<compile_context>
chip_gen: v7x
topology: tpu7x:2x2x1
jax: 0.10.0
libtpu: 0.0.40
codegen_flags: <defaults>
</compile_context>

<pallas_src>
import functools

import jax
import jax.numpy as jnp
from jax.experimental import pallas as pl
from jax.experimental.pallas import tpu as pltpu


# --------------------------------------------------------------------------
# VGG19 feature-extractor architecture (torchvision layer indexing).
# --------------------------------------------------------------------------
VGG19_CFG = [64, 64, 'M', 128, 128, 'M', 256, 256, 256, 256, 'M',
             512, 512, 512, 512, 'M', 512, 512, 512, 512, 'M']

_VMEM_LIMIT = 56 * 1024 * 1024   # safe on v5e/v6e (128 MiB) and v7x (64 MiB)


def build_feature_layers():
    """List matching vgg19.features indices: ('conv',(cin,cout)) | ('relu',None) | ('maxpool',None)."""
    layers = []
    in_c = 3
    for v in VGG19_CFG:
        if v == 'M':
            layers.append(('maxpool', None))
        else:
            layers.append(('conv', (in_c, v)))
            layers.append(('relu', None))
            in_c = v
    return layers


def init_params(key, layers, last_layer):
    """Deterministic He-init weights for every conv layer with index <= last_layer."""
    params = {}
    for i, (kind, meta) in enumerate(layers):
        if i > last_layer:
            break
        if kind == 'conv':
            cin, cout = meta
            key, kw, kb = jax.random.split(key, 3)
            std = (2.0 / (9 * cin)) ** 0.5
            w = jax.random.normal(kw, (3, 3, cin, cout), jnp.float32) * std
            b = jax.random.normal(kb, (1, cout), jnp.float32) * 0.01
            params[i] = (w, b)
    return params


def _pick_tile(n, cap, want_multiple=1):
    """Largest divisor of n that is <= cap, preferring multiples of `want_multiple`."""
    cap = min(cap, n)
    for d in range(cap, 0, -1):
        if n % d == 0 and d % want_multiple == 0:
            return d
    for d in range(cap, 0, -1):
        if n % d == 0:
            return d
    return n


# --------------------------------------------------------------------------
# General 3x3 conv kernel (Cin >= 8): fused bias + ReLU + optional 2x2 maxpool
# --------------------------------------------------------------------------
def _conv3x3_kernel(x_ref, w_ref, b_ref, o_ref, acc_ref, *,
                    TH, W, Wp, apply_relu, apply_pool):
    """One (batch, Cout-tile, row-tile) grid step.

    x_ref  : (1, 1, TH+3, Wp, Cin) bf16  halo'd row tile (Wp = pad(W+2, 8))
    w_ref  : (3, 3, Cin, TC)       bf16
    b_ref  : (1, TC)               f32
    o_ref  : (1, TH, W, TC) or (1, TH//2, W//2, TC)   f32
    acc_ref: (TH*Wp, TC)           f32 VMEM scratch accumulator

    The padded tile is flattened to ((TH+3)*Wp, Cin) so every 3x3 tap is a
    contiguous sublane-offset slice feeding the MXU directly (no per-tap
    reshape / relayout). Columns >= W of each output row are garbage and are
    dropped before the store.
    """
    Cin = x_ref.shape[-1]
    rows = TH * Wp
    x = x_ref[0, 0].reshape((TH + 3) * Wp, Cin)          # Wp % 8 == 0 -> cheap view
    first = True
    for dy in range(3):
        for dx in range(3):
            off = dy * Wp + dx
            tap = x[off:off + rows]                       # contiguous slice
            contrib = jnp.dot(tap, w_ref[dy, dx],
                              preferred_element_type=jnp.float32)
            if first:
                acc_ref[...] = contrib
                first = False
            else:
                acc_ref[...] += contrib

    y = acc_ref[...] + b_ref[...]                         # (TH*Wp, TC) + (1, TC)
    if apply_relu:
        y = jnp.maximum(y, 0.0)
    y = y.reshape(TH, Wp, y.shape[-1])[:, :W, :]          # drop halo/garbage cols
    if apply_pool:
        y = jnp.max(y.reshape(TH // 2, 2, W, y.shape[-1]), axis=1)
        y = jnp.max(y.reshape(TH // 2, W // 2, 2, y.shape[-1]), axis=2)
    o_ref[0] = y.astype(o_ref.dtype)


def conv3x3(x_nhwc, w, b, *, apply_relu, apply_pool):
    N, H, W, Cin = x_nhwc.shape
    Cout = w.shape[-1]
    TC = min(Cout, 128)
    assert Cout % TC == 0
    nco = Cout // TC
    TH = _pick_tile(H, 32, want_multiple=2 if apply_pool else 1)
    if apply_pool:
        assert H % 2 == 0 and W % 2 == 0 and TH % 2 == 0
    nt = H // TH
    Wp = ((W + 2 + 7) // 8) * 8                           # lane/sublane-friendly stride

    # bf16 at the kernel boundary (MXU-native); halo rows materialized per tile.
    # TODO(synk): element-indexed overlapping blocks would avoid this HBM copy.
    xb = x_nhwc.astype(jnp.bfloat16)
    x_pad = jnp.pad(xb, ((0, 0), (1, 2), (1, Wp - W - 1), (0, 0)))
    x_tiles = jnp.stack([x_pad[:, t * TH: t * TH + TH + 3] for t in range(nt)],
                        axis=1)                           # (N, nt, TH+3, Wp, Cin)
    wb = w.astype(jnp.bfloat16)

    out_H = H // 2 if apply_pool else H
    out_W = W // 2 if apply_pool else W
    oTH = TH // 2 if apply_pool else TH

    kernel = functools.partial(_conv3x3_kernel, TH=TH, W=W, Wp=Wp,
                               apply_relu=apply_relu, apply_pool=apply_pool)
    return pl.pallas_call(
        kernel,
        out_shape=jax.ShapeDtypeStruct((N, out_H, out_W, Cout), jnp.float32),
        grid_spec=pltpu.PrefetchScalarGridSpec(
            num_scalar_prefetch=0,
            grid=(N, nco, nt),
            in_specs=[
                pl.BlockSpec((1, 1, TH + 3, Wp, Cin),
                             lambda n, c, t: (n, t, 0, 0, 0)),
                pl.BlockSpec((3, 3, Cin, TC), lambda n, c, t: (0, 0, 0, c)),
                pl.BlockSpec((1, TC), lambda n, c, t: (0, c)),
            ],
            out_specs=pl.BlockSpec((1, oTH, out_W, TC),
                                   lambda n, c, t: (n, t, 0, c)),
            scratch_shapes=[pltpu.VMEM((TH * Wp, TC), jnp.float32)],
        ),
        compiler_params=pltpu.CompilerParams(
            dimension_semantics=("parallel", "parallel", "parallel"),
            vmem_limit_bytes=_VMEM_LIMIT),
    )(x_tiles, wb, b)


# --------------------------------------------------------------------------
# First conv (Cin=3) via im2col: (H*W, 27) @ (27, Cout) dense matmul kernel
# --------------------------------------------------------------------------
def _dense_kernel(x_ref, w_ref, b_ref, o_ref, *, apply_relu):
    """x_ref: (1, TR, K) bf16 patches; w_ref: (K, TC) bf16; b_ref: (1, TC) f32."""
    acc = jnp.dot(x_ref[0], w_ref[...], preferred_element_type=jnp.float32)
    acc = acc + b_ref[...]
    if apply_relu:
        acc = jnp.maximum(acc, 0.0)
    o_ref[0] = acc.astype(o_ref.dtype)


def conv3x3_small_cin(x_nhwc, w, b, *, apply_relu):
    N, H, W, Cin = x_nhwc.shape
    Cout = w.shape[-1]
    K = 9 * Cin
    TC = min(Cout, 128)
    nco = Cout // TC
    R = H * W
    TR = _pick_tile(R, 2048, want_multiple=8)
    nr = R // TR

    xb = x_nhwc.astype(jnp.bfloat16)
    x_pad = jnp.pad(xb, ((0, 0), (1, 1), (1, 1), (0, 0)))
    patches = jnp.concatenate(
        [x_pad[:, dy:dy + H, dx:dx + W, :] for dy in range(3) for dx in range(3)],
        axis=-1).reshape(N, R, K)                         # (N, H*W, 9*Cin)
    w2 = w.reshape(K, Cout).astype(jnp.bfloat16)          # (dy,dx,ci)-major = patch order

    kernel = functools.partial(_dense_kernel, apply_relu=apply_relu)
    out = pl.pallas_call(
        kernel,
        out_shape=jax.ShapeDtypeStruct((N, R, Cout), jnp.float32),
        grid_spec=pltpu.PrefetchScalarGridSpec(
            num_scalar_prefetch=0,
            grid=(N, nco, nr),
            in_specs=[
                pl.BlockSpec((1, TR, K), lambda n, c, r: (n, r, 0)),
                pl.BlockSpec((K, TC), lambda n, c, r: (0, c)),
                pl.BlockSpec((1, TC), lambda n, c, r: (0, c)),
            ],
            out_specs=pl.BlockSpec((1, TR, TC), lambda n, c, r: (n, r, c)),
        ),
        compiler_params=pltpu.CompilerParams(
            dimension_semantics=("parallel", "parallel", "parallel"),
            vmem_limit_bytes=_VMEM_LIMIT),
    )(patches, w2, b)
    return out.reshape(N, H, W, Cout)


# --------------------------------------------------------------------------
# TruncVGG19 forward (= output of vgg19.features[last_layer])
# --------------------------------------------------------------------------
def trunc_vgg19_forward(x_nchw, params, last_layer):
    layers = build_feature_layers()
    assert 0 <= last_layer < len(layers)
    x = jnp.transpose(x_nchw, (0, 2, 3, 1)).astype(jnp.float32)  # NCHW -> NHWC
    i = 0
    while i <= last_layer:
        kind, _ = layers[i]
        if kind == 'conv':
            w, b = params[i]
            relu = (i + 1 <= last_layer) and layers[i + 1][0] == 'relu'
            j = i + 2 if relu else i + 1
            pool = (relu and j <= last_layer and j < len(layers)
                    and layers[j][0] == 'maxpool')
            if x.shape[-1] <= 4 and not pool:
                x = conv3x3_small_cin(x, w, b, apply_relu=relu)
            else:
                x = conv3x3(x, w, b, apply_relu=relu, apply_pool=pool)
            i = j + 1 if pool else j
        elif kind == 'relu':      # unreachable for the VGG19 cfg (always fused)
            x = jnp.maximum(x, 0.0)
            i += 1
        else:                     # standalone maxpool: unreachable for VGG19 cfg
            # TODO(synk): not needed for VGG19 (pool is always fused above);
            # plain-JAX fallback kept only for structural safety.
            x = jax.lax.reduce_window(x, -jnp.inf, jax.lax.max,
                                      (1, 2, 2, 1), (1, 2, 2, 1), 'VALID')
            i += 1
    return jnp.transpose(x, (0, 3, 1, 2))  # back to NCHW like the PyTorch hook output


# --------------------------------------------------------------------------
# Pure-JAX reference (same bf16-matmul / f32-accumulate policy), for checking
# --------------------------------------------------------------------------
def reference_forward(x_nchw, params, last_layer):
    layers = build_feature_layers()
    x = jnp.transpose(x_nchw, (0, 2, 3, 1)).astype(jnp.float32)
    i = 0
    while i <= last_layer:
        kind, _ = layers[i]
        if kind == 'conv':
            w, b = params[i]
            y = jax.lax.conv_general_dilated(
                x.astype(jnp.bfloat16), w.astype(jnp.bfloat16), (1, 1), 'SAME',
                dimension_numbers=('NHWC', 'HWIO', 'NHWC'),
                preferred_element_type=jnp.float32)
            y = y + b.reshape(1, 1, 1, -1)
            if (i + 1 <= last_layer) and layers[i + 1][0] == 'relu':
                y = jnp.maximum(y, 0.0)
                i += 2
            else:
                i += 1
            x = y
        elif kind == 'maxpool':
            x = jax.lax.reduce_window(x, -jnp.inf, jax.lax.max,
                                      (1, 2, 2, 1), (1, 2, 2, 1), 'VALID')
            i += 1
        else:
            x = jnp.maximum(x, 0.0)
            i += 1
    return jnp.transpose(x, (0, 3, 1, 2))


if __name__ == "__main__":
    key = jax.random.PRNGKey(0)
    kx, kp = jax.random.split(key)

    # Small NCHW image batch consistent with the module (3 input channels).
    # last_layer=11 = ReLU after conv3_1 -> exercises the im2col first-conv
    # kernel, two fused conv+relu+pool layers, plain conv+relu, and Cout tiling.
    last_layer = 11
    x = jax.random.normal(kx, (2, 3, 16, 16), jnp.float32)

    layers = build_feature_layers()
    params = init_params(kp, layers, last_layer)

    fwd = jax.jit(lambda xx, pp: trunc_vgg19_forward(xx, pp, last_layer))
    out = jax.block_until_ready(fwd(x, params))
    assert out.shape == (2, 256, 4, 4), out.shape

    ref = jax.block_until_ready(reference_forward(x, params, last_layer))
    err = float(jnp.max(jnp.abs(out - ref)))
    assert jnp.allclose(out, ref, rtol=5e-2, atol=5e-2), f"max abs err = {err}"

    print("KERNEL_OK")
</pallas_src>

<mosaic_0001>
module attributes {stable_mosaic.version = 11 : i64} {
  func.func @_dense_kernel(%arg0: i32, %arg1: i32, %arg2: i32, %arg3: memref<1x256x27xbf16, #tpu.memory_space<vmem>>, %arg4: memref<27x64xbf16, #tpu.memory_space<vmem>>, %arg5: memref<1x64xf32, #tpu.memory_space<vmem>>, %arg6: memref<1x256x64xf32, #tpu.memory_space<vmem>>) attributes {dimension_semantics = [#tpu.dimension_semantics<parallel>, #tpu.dimension_semantics<parallel>, #tpu.dimension_semantics<parallel>], iteration_bounds = array<i64: 2, 1, 1>, scalar_prefetch = 0 : i64, scratch_operands = 0 : i64, tpu.core_type = #tpu.core_type<tc>, window_params = [{transform_indices = @transform_0, window_bounds = array<i64: 1, 256, 27>}, {transform_indices = @transform_1, window_bounds = array<i64: 27, 64>}, {transform_indices = @transform_2, window_bounds = array<i64: 1, 64>}, {transform_indices = @transform_3, window_bounds = array<i64: 1, 256, 64>}]} {
    %c0 = arith.constant 0 : index
    %c0_0 = arith.constant 0 : index
    %c0_1 = arith.constant 0 : index
    %0 = vector.load %arg3[%c0, %c0_0, %c0_1] : memref<1x256x27xbf16, #tpu.memory_space<vmem>>, vector<1x256x27xbf16>
    %1 = vector.shape_cast %0 : vector<1x256x27xbf16> to vector<256x27xbf16>
    %c0_2 = arith.constant 0 : index
    %c0_3 = arith.constant 0 : index
    %2 = vector.load %arg4[%c0_2, %c0_3] : memref<27x64xbf16, #tpu.memory_space<vmem>>, vector<27x64xbf16>
    %cst = arith.constant dense<0.000000e+00> : vector<256x64xf32>
    %3 = tpu.matmul %1, %2, %cst {dimension_numbers = #tpu.dot_dimension_numbers<[1], [0], [0], [1], [0, 0, 1, 1], [], []>} : vector<256x27xbf16>, vector<27x64xbf16>, vector<256x64xf32> -> vector<256x64xf32>
    %c0_4 = arith.constant 0 : index
    %c0_5 = arith.constant 0 : index
    %4 = vector.load %arg5[%c0_4, %c0_5] : memref<1x64xf32, #tpu.memory_space<vmem>>, vector<1x64xf32>
    %5 = vector.broadcast %4 : vector<1x64xf32> to vector<256x64xf32>
    %6 = arith.addf %3, %5 : vector<256x64xf32>
    %cst_6 = arith.constant 0.000000e+00 : f32
    %7 = vector.broadcast %cst_6 : f32 to vector<256x64xf32>
    %8 = arith.maximumf %6, %7 : vector<256x64xf32>
    %c0_7 = arith.constant 0 : index
    %c0_8 = arith.constant 0 : index
    %c0_9 = arith.constant 0 : index
    %9 = vector.load %arg6[%c0_7, %c0_8, %c0_9] : memref<1x256x64xf32, #tpu.memory_space<vmem>>, vector<1x256x64xf32>
    %10 = vector.shape_cast %9 : vector<1x256x64xf32> to vector<256x64xf32>
    %11 = vector.shape_cast %8 : vector<256x64xf32> to vector<1x256x64xf32>
    tpu.vector_store %arg6[%c0_7, %c0_8, %c0_9], %11 {strides = array<i32>} : memref<1x256x64xf32, #tpu.memory_space<vmem>>, vector<1x256x64xf32>,
    return
  }
  func.func @transform_0(%arg0: i32, %arg1: i32, %arg2: i32) -> (i32, i32, i32) {
    %c0_i32 = arith.constant 0 : i32
    %c0_i32_0 = arith.constant 0 : i32
    return %arg0, %arg2, %c0_i32 : i32, i32, i32
  }
  func.func @transform_1(%arg0: i32, %arg1: i32, %arg2: i32) -> (i32, i32) {
    %c0_i32 = arith.constant 0 : i32
    %c0_i32_0 = arith.constant 0 : i32
    return %c0_i32, %arg1 : i32, i32
  }
  func.func @transform_2(%arg0: i32, %arg1: i32, %arg2: i32) -> (i32, i32) {
    %c0_i32 = arith.constant 0 : i32
    %c0_i32_0 = arith.constant 0 : i32
    return %c0_i32, %arg1 : i32, i32
  }
  func.func @transform_3(%arg0: i32, %arg1: i32, %arg2: i32) -> (i32, i32, i32) {
    %c0_i32 = arith.constant 0 : i32
    return %arg0, %arg2, %arg1 : i32, i32, i32
  }
}

module attributes {stable_mosaic.version = 11 : i64} {
  func.func @_conv3x3_kernel(%arg0: i32, %arg1: i32, %arg2: i32, %arg3: memref<1x1x19x24x64xbf16, #tpu.memory_space<vmem>>, %arg4: memref<3x3x64x64xbf16, #tpu.memory_space<vmem>>, %arg5: memref<1x64xf32, #tpu.memory_space<vmem>>, %arg6: memref<1x8x8x64xf32, #tpu.memory_space<vmem>>, %arg7: memref<384x64xf32, #tpu.memory_space<vmem>>) attributes {dimension_semantics = [#tpu.dimension_semantics<parallel>, #tpu.dimension_semantics<parallel>, #tpu.dimension_semantics<parallel>], iteration_bounds = array<i64: 2, 1, 1>, scalar_prefetch = 0 : i64, scratch_operands = 1 : i64, tpu.core_type = #tpu.core_type<tc>, window_params = [{transform_indices = @transform_0, window_bounds = array<i64: 1, 1, 19, 24, 64>}, {transform_indices = @transform_1, window_bounds = array<i64: 3, 3, 64, 64>}, {transform_indices = @transform_2, window_bounds = array<i64: 1, 64>}, {transform_indices = @transform_3, window_bounds = array<i64: 1, 8, 8, 64>}]} {
    %c0 = arith.constant 0 : index
    %c0_0 = arith.constant 0 : index
    %c0_1 = arith.constant 0 : index
    %c0_2 = arith.constant 0 : index
    %c0_3 = arith.constant 0 : index
    %0 = vector.load %arg3[%c0, %c0_0, %c0_1, %c0_2, %c0_3] : memref<1x1x19x24x64xbf16, #tpu.memory_space<vmem>>, vector<1x1x19x24x64xbf16>
    %1 = vector.shape_cast %0 : vector<1x1x19x24x64xbf16> to vector<19x24x64xbf16>
    %2 = vector.shape_cast %1 : vector<19x24x64xbf16> to vector<456x64xbf16>
    %3 = vector.extract_strided_slice %2 {offsets = [0, 0], sizes = [384, 64], strides = [1, 1]} : vector<456x64xbf16> to vector<384x64xbf16>
    %c0_4 = arith.constant 0 : index
    %c0_5 = arith.constant 0 : index
    %c0_6 = arith.constant 0 : index
    %c0_7 = arith.constant 0 : index
    %4 = vector.load %arg4[%c0_4, %c0_5, %c0_6, %c0_7] : memref<3x3x64x64xbf16, #tpu.memory_space<vmem>>, vector<1x1x64x64xbf16>
    %5 = vector.shape_cast %4 : vector<1x1x64x64xbf16> to vector<64x64xbf16>
    %cst = arith.constant dense<0.000000e+00> : vector<384x64xf32>
    %6 = tpu.matmul %3, %5, %cst {dimension_numbers = #tpu.dot_dimension_numbers<[1], [0], [0], [1], [0, 0, 1, 1], [], []>} : vector<384x64xbf16>, vector<64x64xbf16>, vector<384x64xf32> -> vector<384x64xf32>
    %c0_8 = arith.constant 0 : index
    %c0_9 = arith.constant 0 : index
    %7 = vector.load %arg7[%c0_8, %c0_9] : memref<384x64xf32, #tpu.memory_space<vmem>>, vector<384x64xf32>
    tpu.vector_store %arg7[%c0_8, %c0_9], %6 {strides = array<i32>} : memref<384x64xf32, #tpu.memory_space<vmem>>, vector<384x64xf32>,
    %8 = vector.extract_strided_slice %2 {offsets = [1, 0], sizes = [384, 64], strides = [1, 1]} : vector<456x64xbf16> to vector<384x64xbf16>
    %c0_10 = arith.constant 0 : index
    %c1 = arith.constant 1 : index
    %c0_11 = arith.constant 0 : index
    %c0_12 = arith.constant 0 : index
    %9 = vector.load %arg4[%c0_10, %c1, %c0_11, %c0_12] : memref<3x3x64x64xbf16, #tpu.memory_space<vmem>>, vector<1x1x64x64xbf16>
    %10 = vector.shape_cast %9 : vector<1x1x64x64xbf16> to vector<64x64xbf16>
    %cst_13 = arith.constant dense<0.000000e+00> : vector<384x64xf32>
    %11 = tpu.matmul %8, %10, %cst_13 {dimension_numbers = #tpu.dot_dimension_numbers<[1], [0], [0], [1], [0, 0, 1, 1], [], []>} : vector<384x64xbf16>, vector<64x64xbf16>, vector<384x64xf32> -> vector<384x64xf32>
    %c0_14 = arith.constant 0 : index
    %c0_15 = arith.constant 0 : index
    %12 = vector.load %arg7[%c0_14, %c0_15] : memref<384x64xf32, #tpu.memory_space<vmem>>, vector<384x64xf32>
    %13 = arith.addf %12, %11 : vector<384x64xf32>
    %c0_16 = arith.constant 0 : index
    %c0_17 = arith.constant 0 : index
    %14 = vector.load %arg7[%c0_16, %c0_17] : memref<384x64xf32, #tpu.memory_space<vmem>>, vector<384x64xf32>
    tpu.vector_store %arg7[%c0_16, %c0_17], %13 {strides = array<i32>} : memref<384x64xf32, #tpu.memory_space<vmem>>, vector<384x64xf32>,
    %15 = vector.extract_strided_slice %2 {offsets = [2, 0], sizes = [384, 64], strides = [1, 1]} : vector<456x64xbf16> to vector<384x64xbf16>
    %c0_18 = arith.constant 0 : index
    %c2 = arith.constant 2 : index
    %c0_19 = arith.constant 0 : index
    %c0_20 = arith.constant 0 : index
    %16 = vector.load %arg4[%c0_18, %c2, %c0_19, %c0_20] : memref<3x3x64x64xbf16, #tpu.memory_space<vmem>>, vector<1x1x64x64xbf16>
    %17 = vector.shape_cast %16 : vector<1x1x64x64xbf16> to vector<64x64xbf16>
    %cst_21 = arith.constant dense<0.000000e+00> : vector<384x64xf32>
    %18 = tpu.matmul %15, %17, %cst_21 {dimension_numbers = #tpu.dot_dimension_numbers<[1], [0], [0], [1], [0, 0, 1, 1], [], []>} : vector<384x64xbf16>, vector<64x64xbf16>, vector<384x64xf32> -> vector<384x64xf32>
    %c0_22 = arith.constant 0 : index
    %c0_23 = arith.constant 0 : index
    %19 = vector.load %arg7[%c0_22, %c0_23] : memref<384x64xf32, #tpu.memory_space<vmem>>, vector<384x64xf32>
    %20 = arith.addf %19, %18 : vector<384x64xf32>
    %c0_24 = arith.constant 0 : index
    %c0_25 = arith.constant 0 : index
    %21 = vector.load %arg7[%c0_24, %c0_25] : memref<384x64xf32, #tpu.memory_space<vmem>>, vector<384x64xf32>
    tpu.vector_store %arg7[%c0_24, %c0_25], %20 {strides = array<i32>} : memref<384x64xf32, #tpu.memory_space<vmem>>, vector<384x64xf32>,
    %22 = vector.extract_strided_slice %2 {offsets = [24, 0], sizes = [384, 64], strides = [1, 1]} : vector<456x64xbf16> to vector<384x64xbf16>
    %c1_26 = arith.constant 1 : index
    %c0_27 = arith.constant 0 : index
    %c0_28 = arith.constant 0 : index
    %c0_29 = arith.constant 0 : index
    %23 = vector.load %arg4[%c1_26, %c0_27, %c0_28, %c0_29] : memref<3x3x64x64xbf16, #tpu.memory_space<vmem>>, vector<1x1x64x64xbf16>
    %24 = vector.shape_cast %23 : vector<1x1x64x64xbf16> to vector<64x64xbf16>
    %cst_30 = arith.constant dense<0.000000e+00> : vector<384x64xf32>
    %25 = tpu.matmul %22, %24, %cst_30 {dimension_numbers = #tpu.dot_dimension_numbers<[1], [0], [0], [1], [0, 0, 1, 1], [], []>} : vector<384x64xbf16>, vector<64x64xbf16>, vector<384x64xf32> -> vector<384x64xf32>
    %c0_31 = arith.constant 0 : index
    %c0_32 = arith.constant 0 : index
    %26 = vector.load %arg7[%c0_31, %c0_32] : memref<384x64xf32, #tpu.memory_space<vmem>>, vector<384x64xf32>
    %27 = arith.addf %26, %25 : vector<384x64xf32>
    %c0_33 = arith.constant 0 : index
    %c0_34 = arith.constant 0 : index
    %28 = vector.load %arg7[%c0_33, %c0_34] : memref<384x64xf32, #tpu.memory_space<vmem>>, vector<384x64xf32>
    tpu.vector_store %arg7[%c0_33, %c0_34], %27 {strides = array<i32>} : memref<384x64xf32, #tpu.memory_space<vmem>>, vector<384x64xf32>,
    %29 = vector.extract_strided_slice %2 {offsets = [25, 0], sizes = [384, 64], strides = [1, 1]} : vector<456x64xbf16> to vector<384x64xbf16>
    %c1_35 = arith.constant 1 : index
    %c1_36 = arith.constant 1 : index
    %c0_37 = arith.constant 0 : index
    %c0_38 = arith.constant 0 : index
    %30 = vector.load %arg4[%c1_35, %c1_36, %c0_37, %c0_38] : memref<3x3x64x64xbf16, #tpu.memory_space<vmem>>, vector<1x1x64x64xbf16>
    %31 = vector.shape_cast %30 : vector<1x1x64x64xbf16> to vector<64x64xbf16>
    %cst_39 = arith.constant dense<0.000000e+00> : vector<384x64xf32>
    %32 = tpu.matmul %29, %31, %cst_39 {dimension_numbers = #tpu.dot_dimension_numbers<[1], [0], [0], [1], [0, 0, 1, 1], [], []>} : vector<384x64xbf16>, vector<64x64xbf16>, vector<384x64xf32> -> vector<384x64xf32>
    %c0_40 = arith.constant 0 : index
    %c0_41 = arith.constant 0 : index
    %33 = vector.load %arg7[%c0_40, %c0_41] : memref<384x64xf32, #tpu.memory_space<vmem>>, vector<384x64xf32>
    %34 = arith.addf %33, %32 : vector<384x64xf32>
    %c0_42 = arith.constant 0 : index
    %c0_43 = arith.constant 0 : index
    %35 = vector.load %arg7[%c0_42, %c0_43] : memref<384x64xf32, #tpu.memory_space<vmem>>, vector<384x64xf32>
    tpu.vector_store %arg7[%c0_42, %c0_43], %34 {strides = array<i32>} : memref<384x64xf32, #tpu.memory_space<vmem>>, vector<384x64xf32>,
    %36 = vector.extract_strided_slice %2 {offsets = [26, 0], sizes = [384, 64], strides = [1, 1]} : vector<456x64xbf16> to vector<384x64xbf16>
    %c1_44 = arith.constant 1 : index
    %c2_45 = arith.constant 2 : index
    %c0_46 = arith.constant 0 : index
    %c0_47 = arith.constant 0 : index
    %37 = vector.load %arg4[%c1_44, %c2_45, %c0_46, %c0_47] : memref<3x3x64x64xbf16, #tpu.memory_space<vmem>>, vector<1x1x64x64xbf16>
    %38 = vector.shape_cast %37 : vector<1x1x64x64xbf16> to vector<64x64xbf16>
    %cst_48 = arith.constant dense<0.000000e+00> : vector<384x64xf32>
    %39 = tpu.matmul %36, %38, %cst_48 {dimension_numbers = #tpu.dot_dimension_numbers<[1], [0], [0], [1], [0, 0, 1, 1], [], []>} : vector<384x64xbf16>, vector<64x64xbf16>, vector<384x64xf32> -> vector<384x64xf32>
    %c0_49 = arith.constant 0 : index
    %c0_50 = arith.constant 0 : index
    %40 = vector.load %arg7[%c0_49, %c0_50] : memref<384x64xf32, #tpu.memory_space<vmem>>, vector<384x64xf32>
    %41 = arith.addf %40, %39 : vector<384x64xf32>
    %c0_51 = arith.constant 0 : index
    %c0_52 = arith.constant 0 : index
    %42 = vector.load %arg7[%c0_51, %c0_52] : memref<384x64xf32, #tpu.memory_space<vmem>>, vector<384x64xf32>
    tpu.vector_store %arg7[%c0_51, %c0_52], %41 {strides = array<i32>} : memref<384x64xf32, #tpu.memory_space<vmem>>, vector<384x64xf32>,
    %43 = vector.extract_strided_slice %2 {offsets = [48, 0], sizes = [384, 64], strides = [1, 1]} : vector<456x64xbf16> to vector<384x64xbf16>
    %c2_53 = arith.constant 2 : index
    %c0_54 = arith.constant 0 : index
    %c0_55 = arith.constant 0 : index
    %c0_56 = arith.constant 0 : index
    %44 = vector.load %arg4[%c2_53, %c0_54, %c0_55, %c0_56] : memref<3x3x64x64xbf16, #tpu.memory_space<vmem>>, vector<1x1x64x64xbf16>
    %45 = vector.shape_cast %44 : vector<1x1x64x64xbf16> to vector<64x64xbf16>
    %cst_57 = arith.constant dense<0.000000e+00> : vector<384x64xf32>
    %46 = tpu.matmul %43, %45, %cst_57 {dimension_numbers = #tpu.dot_dimension_numbers<[1], [0], [0], [1], [0, 0, 1, 1], [], []>} : vector<384x64xbf16>, vector<64x64xbf16>, vector<384x64xf32> -> vector<384x64xf32>
    %c0_58 = arith.constant 0 : index
    %c0_59 = arith.constant 0 : index
    %47 = vector.load %arg7[%c0_58, %c0_59] : memref<384x64xf32, #tpu.memory_space<vmem>>, vector<384x64xf32>
    %48 = arith.addf %47, %46 : vector<384x64xf32>
    %c0_60 = arith.constant 0 : index
    %c0_61 = arith.constant 0 : index
    %49 = vector.load %arg7[%c0_60, %c0_61] : memref<384x64xf32, #tpu.memory_space<vmem>>, vector<384x64xf32>
    tpu.vector_store %arg7[%c0_60, %c0_61], %48 {strides = array<i32>} : memref<384x64xf32, #tpu.memory_space<vmem>>, vector<384x64xf32>,
    %50 = vector.extract_strided_slice %2 {offsets = [49, 0], sizes = [384, 64], strides = [1, 1]} : vector<456x64xbf16> to vector<384x64xbf16>
    %c2_62 = arith.constant 2 : index
    %c1_63 = arith.constant 1 : index
    %c0_64 = arith.constant 0 : index
    %c0_65 = arith.constant 0 : index
    %51 = vector.load %arg4[%c2_62, %c1_63, %c0_64, %c0_65] : memref<3x3x64x64xbf16, #tpu.memory_space<vmem>>, vector<1x1x64x64xbf16>
    %52 = vector.shape_cast %51 : vector<1x1x64x64xbf16> to vector<64x64xbf16>
    %cst_66 = arith.constant dense<0.000000e+00> : vector<384x64xf32>
    %53 = tpu.matmul %50, %52, %cst_66 {dimension_numbers = #tpu.dot_dimension_numbers<[1], [0], [0], [1], [0, 0, 1, 1], [], []>} : vector<384x64xbf16>, vector<64x64xbf16>, vector<384x64xf32> -> vector<384x64xf32>
    %c0_67 = arith.constant 0 : index
    %c0_68 = arith.constant 0 : index
    %54 = vector.load %arg7[%c0_67, %c0_68] : memref<384x64xf32, #tpu.memory_space<vmem>>, vector<384x64xf32>
    %55 = arith.addf %54, %53 : vector<384x64xf32>
    %c0_69 = arith.constant 0 : index
    %c0_70 = arith.constant 0 : index
    %56 = vector.load %arg7[%c0_69, %c0_70] : memref<384x64xf32, #tpu.memory_space<vmem>>, vector<384x64xf32>
    tpu.vector_store %arg7[%c0_69, %c0_70], %55 {strides = array<i32>} : memref<384x64xf32, #tpu.memory_space<vmem>>, vector<384x64xf32>,
    %57 = vector.extract_strided_slice %2 {offsets = [50, 0], sizes = [384, 64], strides = [1, 1]} : vector<456x64xbf16> to vector<384x64xbf16>
    %c2_71 = arith.constant 2 : index
    %c2_72 = arith.constant 2 : index
    %c0_73 = arith.constant 0 : index
    %c0_74 = arith.constant 0 : index
    %58 = vector.load %arg4[%c2_71, %c2_72, %c0_73, %c0_74] : memref<3x3x64x64xbf16, #tpu.memory_space<vmem>>, vector<1x1x64x64xbf16>
    %59 = vector.shape_cast %58 : vector<1x1x64x64xbf16> to vector<64x64xbf16>
    %cst_75 = arith.constant dense<0.000000e+00> : vector<384x64xf32>
    %60 = tpu.matmul %57, %59, %cst_75 {dimension_numbers = #tpu.dot_dimension_numbers<[1], [0], [0], [1], [0, 0, 1, 1], [], []>} : vector<384x64xbf16>, vector<64x64xbf16>, vector<384x64xf32> -> vector<384x64xf32>
    %c0_76 = arith.constant 0 : index
    %c0_77 = arith.constant 0 : index
    %61 = vector.load %arg7[%c0_76, %c0_77] : memref<384x64xf32, #tpu.memory_space<vmem>>, vector<384x64xf32>
    %62 = arith.addf %61, %60 : vector<384x64xf32>
    %c0_78 = arith.constant 0 : index
    %c0_79 = arith.constant 0 : index
    %63 = vector.load %arg7[%c0_78, %c0_79] : memref<384x64xf32, #tpu.memory_space<vmem>>, vector<384x64xf32>
    tpu.vector_store %arg7[%c0_78, %c0_79], %62 {strides = array<i32>} : memref<384x64xf32, #tpu.memory_space<vmem>>, vector<384x64xf32>,
    %c0_80 = arith.constant 0 : index
    %c0_81 = arith.constant 0 : index
    %64 = vector.load %arg7[%c0_80, %c0_81] : memref<384x64xf32, #tpu.memory_space<vmem>>, vector<384x64xf32>
    %c0_82 = arith.constant 0 : index
    %c0_83 = arith.constant 0 : index
    %65 = vector.load %arg5[%c0_82, %c0_83] : memref<1x64xf32, #tpu.memory_space<vmem>>, vector<1x64xf32>
    %66 = vector.broadcast %65 : vector<1x64xf32> to vector<384x64xf32>
    %67 = arith.addf %64, %66 : vector<384x64xf32>
    %cst_84 = arith.constant 0.000000e+00 : f32
    %68 = vector.broadcast %cst_84 : f32 to vector<384x64xf32>
    %69 = arith.maximumf %67, %68 : vector<384x64xf32>
    %70 = vector.shape_cast %69 : vector<384x64xf32> to vector<16x24x64xf32>
    %71 = vector.extract_strided_slice %70 {offsets = [0, 0, 0], sizes = [16, 16, 64], strides = [1, 1, 1]} : vector<16x24x64xf32> to vector<16x16x64xf32>
    %72 = vector.shape_cast %71 : vector<16x16x64xf32> to vector<8x2x16x64xf32>
    %cst_85 = arith.constant dense<0xFF800000> : vector<8x16x64xf32>
    %73 = vector.multi_reduction <maximumf>, %72, %cst_85 [1] : vector<8x2x16x64xf32> to vector<8x16x64xf32>
    %74 = vector.shape_cast %73 : vector<8x16x64xf32> to vector<8x8x2x64xf32>
    %cst_86 = arith.constant dense<0xFF800000> : vector<8x8x64xf32>
    %75 = vector.multi_reduction <maximumf>, %74, %cst_86 [2] : vector<8x8x2x64xf32> to vector<8x8x64xf32>
    %c0_87 = arith.constant 0 : index
    %c0_88 = arith.constant 0 : index
    %c0_89 = arith.constant 0 : index
    %c0_90 = arith.constant 0 : index
    %76 = vector.load %arg6[%c0_87, %c0_88, %c0_89, %c0_90] : memref<1x8x8x64xf32, #tpu.memory_space<vmem>>, vector<1x8x8x64xf32>
    %77 = vector.shape_cast %76 : vector<1x8x8x64xf32> to vector<8x8x64xf32>
    %78 = vector.shape_cast %75 : vector<8x8x64xf32> to vector<1x8x8x64xf32>
    tpu.vector_store %arg6[%c0_87, %c0_88, %c0_89, %c0_90], %78 {strides = array<i32>} : memref<1x8x8x64xf32, #tpu.memory_space<vmem>>, vector<1x8x8x64xf32>,
    return
  }
  func.func @transform_0(%arg0: i32, %arg1: i32, %arg2: i32) -> (i32, i32, i32, i32, i32) {
    %c0_i32 = arith.constant 0 : i32
    %c0_i32_0 = arith.constant 0 : i32
    %c0_i32_1 = arith.constant 0 : i32
    %c0_i32_2 = arith.constant 0 : i32
    return %arg0, %arg2, %c0_i32, %c0_i32_0, %c0_i32_1 : i32, i32, i32, i32, i32
  }
  func.func @transform_1(%arg0: i32, %arg1: i32, %arg2: i32) -> (i32, i32, i32, i32) {
    %c0_i32 = arith.constant 0 : i32
    %c0_i32_0 = arith.constant 0 : i32
    %c0_i32_1 = arith.constant 0 : i32
    %c0_i32_2 = arith.constant 0 : i32
    return %c0_i32, %c0_i32_0, %c0_i32_1, %arg1 : i32, i32, i32, i32
  }
  func.func @transform_2(%arg0: i32, %arg1: i32, %arg2: i32) -> (i32, i32) {
    %c0_i32 = arith.constant 0 : i32
    %c0_i32_0 = arith.constant 0 : i32
    return %c0_i32, %arg1 : i32, i32
  }
  func.func @transform_3(%arg0: i32, %arg1: i32, %arg2: i32) -> (i32, i32, i32, i32) {
    %c0_i32 = arith.constant 0 : i32
    %c0_i32_0 = arith.constant 0 : i32
    return %arg0, %arg2, %c0_i32, %arg1 : i32, i32, i32, i32
  }
}

module attributes {stable_mosaic.version = 11 : i64} {
  func.func @_conv3x3_kernel(%arg0: i32, %arg1: i32, %arg2: i32, %arg3: memref<1x1x11x16x64xbf16, #tpu.memory_space<vmem>>, %arg4: memref<3x3x64x128xbf16, #tpu.memory_space<vmem>>, %arg5: memref<1x128xf32, #tpu.memory_space<vmem>>, %arg6: memref<1x8x8x128xf32, #tpu.memory_space<vmem>>, %arg7: memref<128x128xf32, #tpu.memory_space<vmem>>) attributes {dimension_semantics = [#tpu.dimension_semantics<parallel>, #tpu.dimension_semantics<parallel>, #tpu.dimension_semantics<parallel>], iteration_bounds = array<i64: 2, 1, 1>, scalar_prefetch = 0 : i64, scratch_operands = 1 : i64, tpu.core_type = #tpu.core_type<tc>, window_params = [{transform_indices = @transform_0, window_bounds = array<i64: 1, 1, 11, 16, 64>}, {transform_indices = @transform_1, window_bounds = array<i64: 3, 3, 64, 128>}, {transform_indices = @transform_2, window_bounds = array<i64: 1, 128>}, {transform_indices = @transform_3, window_bounds = array<i64: 1, 8, 8, 128>}]} {
    %c0 = arith.constant 0 : index
    %c0_0 = arith.constant 0 : index
    %c0_1 = arith.constant 0 : index
    %c0_2 = arith.constant 0 : index
    %c0_3 = arith.constant 0 : index
    %0 = vector.load %arg3[%c0, %c0_0, %c0_1, %c0_2, %c0_3] : memref<1x1x11x16x64xbf16, #tpu.memory_space<vmem>>, vector<1x1x11x16x64xbf16>
    %1 = vector.shape_cast %0 : vector<1x1x11x16x64xbf16> to vector<11x16x64xbf16>
    %2 = vector.shape_cast %1 : vector<11x16x64xbf16> to vector<176x64xbf16>
    %3 = vector.extract_strided_slice %2 {offsets = [0, 0], sizes = [128, 64], strides = [1, 1]} : vector<176x64xbf16> to vector<128x64xbf16>
    %c0_4 = arith.constant 0 : index
    %c0_5 = arith.constant 0 : index
    %c0_6 = arith.constant 0 : index
    %c0_7 = arith.constant 0 : index
    %4 = vector.load %arg4[%c0_4, %c0_5, %c0_6, %c0_7] : memref<3x3x64x128xbf16, #tpu.memory_space<vmem>>, vector<1x1x64x128xbf16>
    %5 = vector.shape_cast %4 : vector<1x1x64x128xbf16> to vector<64x128xbf16>
    %cst = arith.constant dense<0.000000e+00> : vector<128x128xf32>
    %6 = tpu.matmul %3, %5, %cst {dimension_numbers = #tpu.dot_dimension_numbers<[1], [0], [0], [1], [0, 0, 1, 1], [], []>} : vector<128x64xbf16>, vector<64x128xbf16>, vector<128x128xf32> -> vector<128x128xf32>
    %c0_8 = arith.constant 0 : index
    %c0_9 = arith.constant 0 : index
    %7 = vector.load %arg7[%c0_8, %c0_9] : memref<128x128xf32, #tpu.memory_space<vmem>>, vector<128x128xf32>
    tpu.vector_store %arg7[%c0_8, %c0_9], %6 {strides = array<i32>} : memref<128x128xf32, #tpu.memory_space<vmem>>, vector<128x128xf32>,
    %8 = vector.extract_strided_slice %2 {offsets = [1, 0], sizes = [128, 64], strides = [1, 1]} : vector<176x64xbf16> to vector<128x64xbf16>
    %c0_10 = arith.constant 0 : index
    %c1 = arith.constant 1 : index
    %c0_11 = arith.constant 0 : index
    %c0_12 = arith.constant 0 : index
    %9 = vector.load %arg4[%c0_10, %c1, %c0_11, %c0_12] : memref<3x3x64x128xbf16, #tpu.memory_space<vmem>>, vector<1x1x64x128xbf16>
    %10 = vector.shape_cast %9 : vector<1x1x64x128xbf16> to vector<64x128xbf16>
    %cst_13 = arith.constant dense<0.000000e+00> : vector<128x128xf32>
    %11 = tpu.matmul %8, %10, %cst_13 {dimension_numbers = #tpu.dot_dimension_numbers<[1], [0], [0], [1], [0, 0, 1, 1], [], []>} : vector<128x64xbf16>, vector<64x128xbf16>, vector<128x128xf32> -> vector<128x128xf32>
    %c0_14 = arith.constant 0 : index
    %c0_15 = arith.constant 0 : index
    %12 = vector.load %arg7[%c0_14, %c0_15] : memref<128x128xf32, #tpu.memory_space<vmem>>, vector<128x128xf32>
    %13 = arith.addf %12, %11 : vector<128x128xf32>
    %c0_16 = arith.constant 0 : index
    %c0_17 = arith.constant 0 : index
    %14 = vector.load %arg7[%c0_16, %c0_17] : memref<128x128xf32, #tpu.memory_space<vmem>>, vector<128x128xf32>
    tpu.vector_store %arg7[%c0_16, %c0_17], %13 {strides = array<i32>} : memref<128x128xf32, #tpu.memory_space<vmem>>, vector<128x128xf32>,
    %15 = vector.extract_strided_slice %2 {offsets = [2, 0], sizes = [128, 64], strides = [1, 1]} : vector<176x64xbf16> to vector<128x64xbf16>
    %c0_18 = arith.constant 0 : index
    %c2 = arith.constant 2 : index
    %c0_19 = arith.constant 0 : index
    %c0_20 = arith.constant 0 : index
    %16 = vector.load %arg4[%c0_18, %c2, %c0_19, %c0_20] : memref<3x3x64x128xbf16, #tpu.memory_space<vmem>>, vector<1x1x64x128xbf16>
    %17 = vector.shape_cast %16 : vector<1x1x64x128xbf16> to vector<64x128xbf16>
    %cst_21 = arith.constant dense<0.000000e+00> : vector<128x128xf32>
    %18 = tpu.matmul %15, %17, %cst_21 {dimension_numbers = #tpu.dot_dimension_numbers<[1], [0], [0], [1], [0, 0, 1, 1], [], []>} : vector<128x64xbf16>, vector<64x128xbf16>, vector<128x128xf32> -> vector<128x128xf32>
    %c0_22 = arith.constant 0 : index
    %c0_23 = arith.constant 0 : index
    %19 = vector.load %arg7[%c0_22, %c0_23] : memref<128x128xf32, #tpu.memory_space<vmem>>, vector<128x128xf32>
    %20 = arith.addf %19, %18 : vector<128x128xf32>
    %c0_24 = arith.constant 0 : index
    %c0_25 = arith.constant 0 : index
    %21 = vector.load %arg7[%c0_24, %c0_25] : memref<128x128xf32, #tpu.memory_space<vmem>>, vector<128x128xf32>
    tpu.vector_store %arg7[%c0_24, %c0_25], %20 {strides = array<i32>} : memref<128x128xf32, #tpu.memory_space<vmem>>, vector<128x128xf32>,
    %22 = vector.extract_strided_slice %2 {offsets = [16, 0], sizes = [128, 64], strides = [1, 1]} : vector<176x64xbf16> to vector<128x64xbf16>
    %c1_26 = arith.constant 1 : index
    %c0_27 = arith.constant 0 : index
    %c0_28 = arith.constant 0 : index
    %c0_29 = arith.constant 0 : index
    %23 = vector.load %arg4[%c1_26, %c0_27, %c0_28, %c0_29] : memref<3x3x64x128xbf16, #tpu.memory_space<vmem>>, vector<1x1x64x128xbf16>
    %24 = vector.shape_cast %23 : vector<1x1x64x128xbf16> to vector<64x128xbf16>
    %cst_30 = arith.constant dense<0.000000e+00> : vector<128x128xf32>
    %25 = tpu.matmul %22, %24, %cst_30 {dimension_numbers = #tpu.dot_dimension_numbers<[1], [0], [0], [1], [0, 0, 1, 1], [], []>} : vector<128x64xbf16>, vector<64x128xbf16>, vector<128x128xf32> -> vector<128x128xf32>
    %c0_31 = arith.constant 0 : index
    %c0_32 = arith.constant 0 : index
    %26 = vector.load %arg7[%c0_31, %c0_32] : memref<128x128xf32, #tpu.memory_space<vmem>>, vector<128x128xf32>
    %27 = arith.addf %26, %25 : vector<128x128xf32>
    %c0_33 = arith.constant 0 : index
    %c0_34 = arith.constant 0 : index
    %28 = vector.load %arg7[%c0_33, %c0_34] : memref<128x128xf32, #tpu.memory_space<vmem>>, vector<128x128xf32>
    tpu.vector_store %arg7[%c0_33, %c0_34], %27 {strides = array<i32>} : memref<128x128xf32, #tpu.memory_space<vmem>>, vector<128x128xf32>,
    %29 = vector.extract_strided_slice %2 {offsets = [17, 0], sizes = [128, 64], strides = [1, 1]} : vector<176x64xbf16> to vector<128x64xbf16>
    %c1_35 = arith.constant 1 : index
    %c1_36 = arith.constant 1 : index
    %c0_37 = arith.constant 0 : index
    %c0_38 = arith.constant 0 : index
    %30 = vector.load %arg4[%c1_35, %c1_36, %c0_37, %c0_38] : memref<3x3x64x128xbf16, #tpu.memory_space<vmem>>, vector<1x1x64x128xbf16>
    %31 = vector.shape_cast %30 : vector<1x1x64x128xbf16> to vector<64x128xbf16>
    %cst_39 = arith.constant dense<0.000000e+00> : vector<128x128xf32>
    %32 = tpu.matmul %29, %31, %cst_39 {dimension_numbers = #tpu.dot_dimension_numbers<[1], [0], [0], [1], [0, 0, 1, 1], [], []>} : vector<128x64xbf16>, vector<64x128xbf16>, vector<128x128xf32> -> vector<128x128xf32>
    %c0_40 = arith.constant 0 : index
    %c0_41 = arith.constant 0 : index
    %33 = vector.load %arg7[%c0_40, %c0_41] : memref<128x128xf32, #tpu.memory_space<vmem>>, vector<128x128xf32>
    %34 = arith.addf %33, %32 : vector<128x128xf32>
    %c0_42 = arith.constant 0 : index
    %c0_43 = arith.constant 0 : index
    %35 = vector.load %arg7[%c0_42, %c0_43] : memref<128x128xf32, #tpu.memory_space<vmem>>, vector<128x128xf32>
    tpu.vector_store %arg7[%c0_42, %c0_43], %34 {strides = array<i32>} : memref<128x128xf32, #tpu.memory_space<vmem>>, vector<128x128xf32>,
    %36 = vector.extract_strided_slice %2 {offsets = [18, 0], sizes = [128, 64], strides = [1, 1]} : vector<176x64xbf16> to vector<128x64xbf16>
    %c1_44 = arith.constant 1 : index
    %c2_45 = arith.constant 2 : index
    %c0_46 = arith.constant 0 : index
    %c0_47 = arith.constant 0 : index
    %37 = vector.load %arg4[%c1_44, %c2_45, %c0_46, %c0_47] : memref<3x3x64x128xbf16, #tpu.memory_space<vmem>>, vector<1x1x64x128xbf16>
    %38 = vector.shape_cast %37 : vector<1x1x64x128xbf16> to vector<64x128xbf16>
    %cst_48 = arith.constant dense<0.000000e+00> : vector<128x128xf32>
    %39 = tpu.matmul %36, %38, %cst_48 {dimension_numbers = #tpu.dot_dimension_numbers<[1], [0], [0], [1], [0, 0, 1, 1], [], []>} : vector<128x64xbf16>, vector<64x128xbf16>, vector<128x128xf32> -> vector<128x128xf32>
    %c0_49 = arith.constant 0 : index
    %c0_50 = arith.constant 0 : index
    %40 = vector.load %arg7[%c0_49, %c0_50] : memref<128x128xf32, #tpu.memory_space<vmem>>, vector<128x128xf32>
    %41 = arith.addf %40, %39 : vector<128x128xf32>
    %c0_51 = arith.constant 0 : index
    %c0_52 = arith.constant 0 : index
    %42 = vector.load %arg7[%c0_51, %c0_52] : memref<128x128xf32, #tpu.memory_space<vmem>>, vector<128x128xf32>
    tpu.vector_store %arg7[%c0_51, %c0_52], %41 {strides = array<i32>} : memref<128x128xf32, #tpu.memory_space<vmem>>, vector<128x128xf32>,
    %43 = vector.extract_strided_slice %2 {offsets = [32, 0], sizes = [128, 64], strides = [1, 1]} : vector<176x64xbf16> to vector<128x64xbf16>
    %c2_53 = arith.constant 2 : index
    %c0_54 = arith.constant 0 : index
    %c0_55 = arith.constant 0 : index
    %c0_56 = arith.constant 0 : index
    %44 = vector.load %arg4[%c2_53, %c0_54, %c0_55, %c0_56] : memref<3x3x64x128xbf16, #tpu.memory_space<vmem>>, vector<1x1x64x128xbf16>
    %45 = vector.shape_cast %44 : vector<1x1x64x128xbf16> to vector<64x128xbf16>
    %cst_57 = arith.constant dense<0.000000e+00> : vector<128x128xf32>
    %46 = tpu.matmul %43, %45, %cst_57 {dimension_numbers = #tpu.dot_dimension_numbers<[1], [0], [0], [1], [0, 0, 1, 1], [], []>} : vector<128x64xbf16>, vector<64x128xbf16>, vector<128x128xf32> -> vector<128x128xf32>
    %c0_58 = arith.constant 0 : index
    %c0_59 = arith.constant 0 : index
    %47 = vector.load %arg7[%c0_58, %c0_59] : memref<128x128xf32, #tpu.memory_space<vmem>>, vector<128x128xf32>
    %48 = arith.addf %47, %46 : vector<128x128xf32>
    %c0_60 = arith.constant 0 : index
    %c0_61 = arith.constant 0 : index
    %49 = vector.load %arg7[%c0_60, %c0_61] : memref<128x128xf32, #tpu.memory_space<vmem>>, vector<128x128xf32>
    tpu.vector_store %arg7[%c0_60, %c0_61], %48 {strides = array<i32>} : memref<128x128xf32, #tpu.memory_space<vmem>>, vector<128x128xf32>,
    %50 = vector.extract_strided_slice %2 {offsets = [33, 0], sizes = [128, 64], strides = [1, 1]} : vector<176x64xbf16> to vector<128x64xbf16>
    %c2_62 = arith.constant 2 : index
    %c1_63 = arith.constant 1 : index
    %c0_64 = arith.constant 0 : index
    %c0_65 = arith.constant 0 : index
    %51 = vector.load %arg4[%c2_62, %c1_63, %c0_64, %c0_65] : memref<3x3x64x128xbf16, #tpu.memory_space<vmem>>, vector<1x1x64x128xbf16>
    %52 = vector.shape_cast %51 : vector<1x1x64x128xbf16> to vector<64x128xbf16>
    %cst_66 = arith.constant dense<0.000000e+00> : vector<128x128xf32>
    %53 = tpu.matmul %50, %52, %cst_66 {dimension_numbers = #tpu.dot_dimension_numbers<[1], [0], [0], [1], [0, 0, 1, 1], [], []>} : vector<128x64xbf16>, vector<64x128xbf16>, vector<128x128xf32> -> vector<128x128xf32>
    %c0_67 = arith.constant 0 : index
    %c0_68 = arith.constant 0 : index
    %54 = vector.load %arg7[%c0_67, %c0_68] : memref<128x128xf32, #tpu.memory_space<vmem>>, vector<128x128xf32>
    %55 = arith.addf %54, %53 : vector<128x128xf32>
    %c0_69 = arith.constant 0 : index
    %c0_70 = arith.constant 0 : index
    %56 = vector.load %arg7[%c0_69, %c0_70] : memref<128x128xf32, #tpu.memory_space<vmem>>, vector<128x128xf32>
    tpu.vector_store %arg7[%c0_69, %c0_70], %55 {strides = array<i32>} : memref<128x128xf32, #tpu.memory_space<vmem>>, vector<128x128xf32>,
    %57 = vector.extract_strided_slice %2 {offsets = [34, 0], sizes = [128, 64], strides = [1, 1]} : vector<176x64xbf16> to vector<128x64xbf16>
    %c2_71 = arith.constant 2 : index
    %c2_72 = arith.constant 2 : index
    %c0_73 = arith.constant 0 : index
    %c0_74 = arith.constant 0 : index
    %58 = vector.load %arg4[%c2_71, %c2_72, %c0_73, %c0_74] : memref<3x3x64x128xbf16, #tpu.memory_space<vmem>>, vector<1x1x64x128xbf16>
    %59 = vector.shape_cast %58 : vector<1x1x64x128xbf16> to vector<64x128xbf16>
    %cst_75 = arith.constant dense<0.000000e+00> : vector<128x128xf32>
    %60 = tpu.matmul %57, %59, %cst_75 {dimension_numbers = #tpu.dot_dimension_numbers<[1], [0], [0], [1], [0, 0, 1, 1], [], []>} : vector<128x64xbf16>, vector<64x128xbf16>, vector<128x128xf32> -> vector<128x128xf32>
    %c0_76 = arith.constant 0 : index
    %c0_77 = arith.constant 0 : index
    %61 = vector.load %arg7[%c0_76, %c0_77] : memref<128x128xf32, #tpu.memory_space<vmem>>, vector<128x128xf32>
    %62 = arith.addf %61, %60 : vector<128x128xf32>
    %c0_78 = arith.constant 0 : index
    %c0_79 = arith.constant 0 : index
    %63 = vector.load %arg7[%c0_78, %c0_79] : memref<128x128xf32, #tpu.memory_space<vmem>>, vector<128x128xf32>
    tpu.vector_store %arg7[%c0_78, %c0_79], %62 {strides = array<i32>} : memref<128x128xf32, #tpu.memory_space<vmem>>, vector<128x128xf32>,
    %c0_80 = arith.constant 0 : index
    %c0_81 = arith.constant 0 : index
    %64 = vector.load %arg7[%c0_80, %c0_81] : memref<128x128xf32, #tpu.memory_space<vmem>>, vector<128x128xf32>
    %c0_82 = arith.constant 0 : index
    %c0_83 = arith.constant 0 : index
    %65 = vector.load %arg5[%c0_82, %c0_83] : memref<1x128xf32, #tpu.memory_space<vmem>>, vector<1x128xf32>
    %66 = vector.broadcast %65 : vector<1x128xf32> to vector<128x128xf32>
    %67 = arith.addf %64, %66 : vector<128x128xf32>
    %cst_84 = arith.constant 0.000000e+00 : f32
    %68 = vector.broadcast %cst_84 : f32 to vector<128x128xf32>
    %69 = arith.maximumf %67, %68 : vector<128x128xf32>
    %70 = vector.shape_cast %69 : vector<128x128xf32> to vector<8x16x128xf32>
    %71 = vector.extract_strided_slice %70 {offsets = [0, 0, 0], sizes = [8, 8, 128], strides = [1, 1, 1]} : vector<8x16x128xf32> to vector<8x8x128xf32>
    %c0_85 = arith.constant 0 : index
    %c0_86 = arith.constant 0 : index
    %c0_87 = arith.constant 0 : index
    %c0_88 = arith.constant 0 : index
    %72 = vector.load %arg6[%c0_85, %c0_86, %c0_87, %c0_88] : memref<1x8x8x128xf32, #tpu.memory_space<vmem>>, vector<1x8x8x128xf32>
    %73 = vector.shape_cast %72 : vector<1x8x8x128xf32> to vector<8x8x128xf32>
    %74 = vector.shape_cast %71 : vector<8x8x128xf32> to vector<1x8x8x128xf32>
    tpu.vector_store %arg6[%c0_85, %c0_86, %c0_87, %c0_88], %74 {strides = array<i32>} : memref<1x8x8x128xf32, #tpu.memory_space<vmem>>, vector<1x8x8x128xf32>,
    return
  }
  func.func @transform_0(%arg0: i32, %arg1: i32, %arg2: i32) -> (i32, i32, i32, i32, i32) {
    %c0_i32 = arith.constant 0 : i32
    %c0_i32_0 = arith.constant 0 : i32
    %c0_i32_1 = arith.constant 0 : i32
    %c0_i32_2 = arith.constant 0 : i32
    return %arg0, %arg2, %c0_i32, %c0_i32_0, %c0_i32_1 : i32, i32, i32, i32, i32
  }
  func.func @transform_1(%arg0: i32, %arg1: i32, %arg2: i32) -> (i32, i32, i32, i32) {
    %c0_i32 = arith.constant 0 : i32
    %c0_i32_0 = arith.constant 0 : i32
    %c0_i32_1 = arith.constant 0 : i32
    %c0_i32_2 = arith.constant 0 : i32
    return %c0_i32, %c0_i32_0, %c0_i32_1, %arg1 : i32, i32, i32, i32
  }
  func.func @transform_2(%arg0: i32, %arg1: i32, %arg2: i32) -> (i32, i32) {
    %c0_i32 = arith.constant 0 : i32
    %c0_i32_0 = arith.constant 0 : i32
    return %c0_i32, %arg1 : i32, i32
  }
  func.func @transform_3(%arg0: i32, %arg1: i32, %arg2: i32) -> (i32, i32, i32, i32) {
    %c0_i32 = arith.constant 0 : i32
    %c0_i32_0 = arith.constant 0 : i32
    return %arg0, %arg2, %c0_i32, %arg1 : i32, i32, i32, i32
  }
}

module attributes {stable_mosaic.version = 11 : i64} {
  func.func @_conv3x3_kernel(%arg0: i32, %arg1: i32, %arg2: i32, %arg3: memref<1x1x11x16x128xbf16, #tpu.memory_space<vmem>>, %arg4: memref<3x3x128x128xbf16, #tpu.memory_space<vmem>>, %arg5: memref<1x128xf32, #tpu.memory_space<vmem>>, %arg6: memref<1x4x4x128xf32, #tpu.memory_space<vmem>>, %arg7: memref<128x128xf32, #tpu.memory_space<vmem>>) attributes {dimension_semantics = [#tpu.dimension_semantics<parallel>, #tpu.dimension_semantics<parallel>, #tpu.dimension_semantics<parallel>], iteration_bounds = array<i64: 2, 1, 1>, scalar_prefetch = 0 : i64, scratch_operands = 1 : i64, tpu.core_type = #tpu.core_type<tc>, window_params = [{transform_indices = @transform_0, window_bounds = array<i64: 1, 1, 11, 16, 128>}, {transform_indices = @transform_1, window_bounds = array<i64: 3, 3, 128, 128>}, {transform_indices = @transform_2, window_bounds = array<i64: 1, 128>}, {transform_indices = @transform_3, window_bounds = array<i64: 1, 4, 4, 128>}]} {
    %c0 = arith.constant 0 : index
    %c0_0 = arith.constant 0 : index
    %c0_1 = arith.constant 0 : index
    %c0_2 = arith.constant 0 : index
    %c0_3 = arith.constant 0 : index
    %0 = vector.load %arg3[%c0, %c0_0, %c0_1, %c0_2, %c0_3] : memref<1x1x11x16x128xbf16, #tpu.memory_space<vmem>>, vector<1x1x11x16x128xbf16>
    %1 = vector.shape_cast %0 : vector<1x1x11x16x128xbf16> to vector<11x16x128xbf16>
    %2 = vector.shape_cast %1 : vector<11x16x128xbf16> to vector<176x128xbf16>
    %3 = vector.extract_strided_slice %2 {offsets = [0, 0], sizes = [128, 128], strides = [1, 1]} : vector<176x128xbf16> to vector<128x128xbf16>
    %c0_4 = arith.constant 0 : index
    %c0_5 = arith.constant 0 : index
    %c0_6 = arith.constant 0 : index
    %c0_7 = arith.constant 0 : index
    %4 = vector.load %arg4[%c0_4, %c0_5, %c0_6, %c0_7] : memref<3x3x128x128xbf16, #tpu.memory_space<vmem>>, vector<1x1x128x128xbf16>
    %5 = vector.shape_cast %4 : vector<1x1x128x128xbf16> to vector<128x128xbf16>
    %cst = arith.constant dense<0.000000e+00> : vector<128x128xf32>
    %6 = tpu.matmul %3, %5, %cst {dimension_numbers = #tpu.dot_dimension_numbers<[1], [0], [0], [1], [0, 0, 1, 1], [], []>} : vector<128x128xbf16>, vector<128x128xbf16>, vector<128x128xf32> -> vector<128x128xf32>
    %c0_8 = arith.constant 0 : index
    %c0_9 = arith.constant 0 : index
    %7 = vector.load %arg7[%c0_8, %c0_9] : memref<128x128xf32, #tpu.memory_space<vmem>>, vector<128x128xf32>
    tpu.vector_store %arg7[%c0_8, %c0_9], %6 {strides = array<i32>} : memref<128x128xf32, #tpu.memory_space<vmem>>, vector<128x128xf32>,
    %8 = vector.extract_strided_slice %2 {offsets = [1, 0], sizes = [128, 128], strides = [1, 1]} : vector<176x128xbf16> to vector<128x128xbf16>
    %c0_10 = arith.constant 0 : index
    %c1 = arith.constant 1 : index
    %c0_11 = arith.constant 0 : index
    %c0_12 = arith.constant 0 : index
    %9 = vector.load %arg4[%c0_10, %c1, %c0_11, %c0_12] : memref<3x3x128x128xbf16, #tpu.memory_space<vmem>>, vector<1x1x128x128xbf16>
    %10 = vector.shape_cast %9 : vector<1x1x128x128xbf16> to vector<128x128xbf16>
    %cst_13 = arith.constant dense<0.000000e+00> : vector<128x128xf32>
    %11 = tpu.matmul %8, %10, %cst_13 {dimension_numbers = #tpu.dot_dimension_numbers<[1], [0], [0], [1], [0, 0, 1, 1], [], []>} : vector<128x128xbf16>, vector<128x128xbf16>, vector<128x128xf32> -> vector<128x128xf32>
    %c0_14 = arith.constant 0 : index
    %c0_15 = arith.constant 0 : index
    %12 = vector.load %arg7[%c0_14, %c0_15] : memref<128x128xf32, #tpu.memory_space<vmem>>, vector<128x128xf32>
    %13 = arith.addf %12, %11 : vector<128x128xf32>
    %c0_16 = arith.constant 0 : index
    %c0_17 = arith.constant 0 : index
    %14 = vector.load %arg7[%c0_16, %c0_17] : memref<128x128xf32, #tpu.memory_space<vmem>>, vector<128x128xf32>
    tpu.vector_store %arg7[%c0_16, %c0_17], %13 {strides = array<i32>} : memref<128x128xf32, #tpu.memory_space<vmem>>, vector<128x128xf32>,
    %15 = vector.extract_strided_slice %2 {offsets = [2, 0], sizes = [128, 128], strides = [1, 1]} : vector<176x128xbf16> to vector<128x128xbf16>
    %c0_18 = arith.constant 0 : index
    %c2 = arith.constant 2 : index
    %c0_19 = arith.constant 0 : index
    %c0_20 = arith.constant 0 : index
    %16 = vector.load %arg4[%c0_18, %c2, %c0_19, %c0_20] : memref<3x3x128x128xbf16, #tpu.memory_space<vmem>>, vector<1x1x128x128xbf16>
    %17 = vector.shape_cast %16 : vector<1x1x128x128xbf16> to vector<128x128xbf16>
    %cst_21 = arith.constant dense<0.000000e+00> : vector<128x128xf32>
    %18 = tpu.matmul %15, %17, %cst_21 {dimension_numbers = #tpu.dot_dimension_numbers<[1], [0], [0], [1], [0, 0, 1, 1], [], []>} : vector<128x128xbf16>, vector<128x128xbf16>, vector<128x128xf32> -> vector<128x128xf32>
    %c0_22 = arith.constant 0 : index
    %c0_23 = arith.constant 0 : index
    %19 = vector.load %arg7[%c0_22, %c0_23] : memref<128x128xf32, #tpu.memory_space<vmem>>, vector<128x128xf32>
    %20 = arith.addf %19, %18 : vector<128x128xf32>
    %c0_24 = arith.constant 0 : index
    %c0_25 = arith.constant 0 : index
    %21 = vector.load %arg7[%c0_24, %c0_25] : memref<128x128xf32, #tpu.memory_space<vmem>>, vector<128x128xf32>
    tpu.vector_store %arg7[%c0_24, %c0_25], %20 {strides = array<i32>} : memref<128x128xf32, #tpu.memory_space<vmem>>, vector<128x128xf32>,
    %22 = vector.extract_strided_slice %2 {offsets = [16, 0], sizes = [128, 128], strides = [1, 1]} : vector<176x128xbf16> to vector<128x128xbf16>
    %c1_26 = arith.constant 1 : index
    %c0_27 = arith.constant 0 : index
    %c0_28 = arith.constant 0 : index
    %c0_29 = arith.constant 0 : index
    %23 = vector.load %arg4[%c1_26, %c0_27, %c0_28, %c0_29] : memref<3x3x128x128xbf16, #tpu.memory_space<vmem>>, vector<1x1x128x128xbf16>
    %24 = vector.shape_cast %23 : vector<1x1x128x128xbf16> to vector<128x128xbf16>
    %cst_30 = arith.constant dense<0.000000e+00> : vector<128x128xf32>
    %25 = tpu.matmul %22, %24, %cst_30 {dimension_numbers = #tpu.dot_dimension_numbers<[1], [0], [0], [1], [0, 0, 1, 1], [], []>} : vector<128x128xbf16>, vector<128x128xbf16>, vector<128x128xf32> -> vector<128x128xf32>
    %c0_31 = arith.constant 0 : index
    %c0_32 = arith.constant 0 : index
    %26 = vector.load %arg7[%c0_31, %c0_32] : memref<128x128xf32, #tpu.memory_space<vmem>>, vector<128x128xf32>
    %27 = arith.addf %26, %25 : vector<128x128xf32>
    %c0_33 = arith.constant 0 : index
    %c0_34 = arith.constant 0 : index
    %28 = vector.load %arg7[%c0_33, %c0_34] : memref<128x128xf32, #tpu.memory_space<vmem>>, vector<128x128xf32>
    tpu.vector_store %arg7[%c0_33, %c0_34], %27 {strides = array<i32>} : memref<128x128xf32, #tpu.memory_space<vmem>>, vector<128x128xf32>,
    %29 = vector.extract_strided_slice %2 {offsets = [17, 0], sizes = [128, 128], strides = [1, 1]} : vector<176x128xbf16> to vector<128x128xbf16>
    %c1_35 = arith.constant 1 : index
    %c1_36 = arith.constant 1 : index
    %c0_37 = arith.constant 0 : index
    %c0_38 = arith.constant 0 : index
    %30 = vector.load %arg4[%c1_35, %c1_36, %c0_37, %c0_38] : memref<3x3x128x128xbf16, #tpu.memory_space<vmem>>, vector<1x1x128x128xbf16>
    %31 = vector.shape_cast %30 : vector<1x1x128x128xbf16> to vector<128x128xbf16>
    %cst_39 = arith.constant dense<0.000000e+00> : vector<128x128xf32>
    %32 = tpu.matmul %29, %31, %cst_39 {dimension_numbers = #tpu.dot_dimension_numbers<[1], [0], [0], [1], [0, 0, 1, 1], [], []>} : vector<128x128xbf16>, vector<128x128xbf16>, vector<128x128xf32> -> vector<128x128xf32>
    %c0_40 = arith.constant 0 : index
    %c0_41 = arith.constant 0 : index
    %33 = vector.load %arg7[%c0_40, %c0_41] : memref<128x128xf32, #tpu.memory_space<vmem>>, vector<128x128xf32>
    %34 = arith.addf %33, %32 : vector<128x128xf32>
    %c0_42 = arith.constant 0 : index
    %c0_43 = arith.constant 0 : index
    %35 = vector.load %arg7[%c0_42, %c0_43] : memref<128x128xf32, #tpu.memory_space<vmem>>, vector<128x128xf32>
    tpu.vector_store %arg7[%c0_42, %c0_43], %34 {strides = array<i32>} : memref<128x128xf32, #tpu.memory_space<vmem>>, vector<128x128xf32>,
    %36 = vector.extract_strided_slice %2 {offsets = [18, 0], sizes = [128, 128], strides = [1, 1]} : vector<176x128xbf16> to vector<128x128xbf16>
    %c1_44 = arith.constant 1 : index
    %c2_45 = arith.constant 2 : index
    %c0_46 = arith.constant 0 : index
    %c0_47 = arith.constant 0 : index
    %37 = vector.load %arg4[%c1_44, %c2_45, %c0_46, %c0_47] : memref<3x3x128x128xbf16, #tpu.memory_space<vmem>>, vector<1x1x128x128xbf16>
    %38 = vector.shape_cast %37 : vector<1x1x128x128xbf16> to vector<128x128xbf16>
    %cst_48 = arith.constant dense<0.000000e+00> : vector<128x128xf32>
    %39 = tpu.matmul %36, %38, %cst_48 {dimension_numbers = #tpu.dot_dimension_numbers<[1], [0], [0], [1], [0, 0, 1, 1], [], []>} : vector<128x128xbf16>, vector<128x128xbf16>, vector<128x128xf32> -> vector<128x128xf32>
    %c0_49 = arith.constant 0 : index
    %c0_50 = arith.constant 0 : index
    %40 = vector.load %arg7[%c0_49, %c0_50] : memref<128x128xf32, #tpu.memory_space<vmem>>, vector<128x128xf32>
    %41 = arith.addf %40, %39 : vector<128x128xf32>
    %c0_51 = arith.constant 0 : index
    %c0_52 = arith.constant 0 : index
    %42 = vector.load %arg7[%c0_51, %c0_52] : memref<128x128xf32, #tpu.memory_space<vmem>>, vector<128x128xf32>
    tpu.vector_store %arg7[%c0_51, %c0_52], %41 {strides = array<i32>} : memref<128x128xf32, #tpu.memory_space<vmem>>, vector<128x128xf32>,
    %43 = vector.extract_strided_slice %2 {offsets = [32, 0], sizes = [128, 128], strides = [1, 1]} : vector<176x128xbf16> to vector<128x128xbf16>
    %c2_53 = arith.constant 2 : index
    %c0_54 = arith.constant 0 : index
    %c0_55 = arith.constant 0 : index
    %c0_56 = arith.constant 0 : index
    %44 = vector.load %arg4[%c2_53, %c0_54, %c0_55, %c0_56] : memref<3x3x128x128xbf16, #tpu.memory_space<vmem>>, vector<1x1x128x128xbf16>
    %45 = vector.shape_cast %44 : vector<1x1x128x128xbf16> to vector<128x128xbf16>
    %cst_57 = arith.constant dense<0.000000e+00> : vector<128x128xf32>
    %46 = tpu.matmul %43, %45, %cst_57 {dimension_numbers = #tpu.dot_dimension_numbers<[1], [0], [0], [1], [0, 0, 1, 1], [], []>} : vector<128x128xbf16>, vector<128x128xbf16>, vector<128x128xf32> -> vector<128x128xf32>
    %c0_58 = arith.constant 0 : index
    %c0_59 = arith.constant 0 : index
    %47 = vector.load %arg7[%c0_58, %c0_59] : memref<128x128xf32, #tpu.memory_space<vmem>>, vector<128x128xf32>
    %48 = arith.addf %47, %46 : vector<128x128xf32>
    %c0_60 = arith.constant 0 : index
    %c0_61 = arith.constant 0 : index
    %49 = vector.load %arg7[%c0_60, %c0_61] : memref<128x128xf32, #tpu.memory_space<vmem>>, vector<128x128xf32>
    tpu.vector_store %arg7[%c0_60, %c0_61], %48 {strides = array<i32>} : memref<128x128xf32, #tpu.memory_space<vmem>>, vector<128x128xf32>,
    %50 = vector.extract_strided_slice %2 {offsets = [33, 0], sizes = [128, 128], strides = [1, 1]} : vector<176x128xbf16> to vector<128x128xbf16>
    %c2_62 = arith.constant 2 : index
    %c1_63 = arith.constant 1 : index
    %c0_64 = arith.constant 0 : index
    %c0_65 = arith.constant 0 : index
    %51 = vector.load %arg4[%c2_62, %c1_63, %c0_64, %c0_65] : memref<3x3x128x128xbf16, #tpu.memory_space<vmem>>, vector<1x1x128x128xbf16>
    %52 = vector.shape_cast %51 : vector<1x1x128x128xbf16> to vector<128x128xbf16>
    %cst_66 = arith.constant dense<0.000000e+00> : vector<128x128xf32>
    %53 = tpu.matmul %50, %52, %cst_66 {dimension_numbers = #tpu.dot_dimension_numbers<[1], [0], [0], [1], [0, 0, 1, 1], [], []>} : vector<128x128xbf16>, vector<128x128xbf16>, vector<128x128xf32> -> vector<128x128xf32>
    %c0_67 = arith.constant 0 : index
    %c0_68 = arith.constant 0 : index
    %54 = vector.load %arg7[%c0_67, %c0_68] : memref<128x128xf32, #tpu.memory_space<vmem>>, vector<128x128xf32>
    %55 = arith.addf %54, %53 : vector<128x128xf32>
    %c0_69 = arith.constant 0 : index
    %c0_70 = arith.constant 0 : index
    %56 = vector.load %arg7[%c0_69, %c0_70] : memref<128x128xf32, #tpu.memory_space<vmem>>, vector<128x128xf32>
    tpu.vector_store %arg7[%c0_69, %c0_70], %55 {strides = array<i32>} : memref<128x128xf32, #tpu.memory_space<vmem>>, vector<128x128xf32>,
    %57 = vector.extract_strided_slice %2 {offsets = [34, 0], sizes = [128, 128], strides = [1, 1]} : vector<176x128xbf16> to vector<128x128xbf16>
    %c2_71 = arith.constant 2 : index
    %c2_72 = arith.constant 2 : index
    %c0_73 = arith.constant 0 : index
    %c0_74 = arith.constant 0 : index
    %58 = vector.load %arg4[%c2_71, %c2_72, %c0_73, %c0_74] : memref<3x3x128x128xbf16, #tpu.memory_space<vmem>>, vector<1x1x128x128xbf16>
    %59 = vector.shape_cast %58 : vector<1x1x128x128xbf16> to vector<128x128xbf16>
    %cst_75 = arith.constant dense<0.000000e+00> : vector<128x128xf32>
    %60 = tpu.matmul %57, %59, %cst_75 {dimension_numbers = #tpu.dot_dimension_numbers<[1], [0], [0], [1], [0, 0, 1, 1], [], []>} : vector<128x128xbf16>, vector<128x128xbf16>, vector<128x128xf32> -> vector<128x128xf32>
    %c0_76 = arith.constant 0 : index
    %c0_77 = arith.constant 0 : index
    %61 = vector.load %arg7[%c0_76, %c0_77] : memref<128x128xf32, #tpu.memory_space<vmem>>, vector<128x128xf32>
    %62 = arith.addf %61, %60 : vector<128x128xf32>
    %c0_78 = arith.constant 0 : index
    %c0_79 = arith.constant 0 : index
    %63 = vector.load %arg7[%c0_78, %c0_79] : memref<128x128xf32, #tpu.memory_space<vmem>>, vector<128x128xf32>
    tpu.vector_store %arg7[%c0_78, %c0_79], %62 {strides = array<i32>} : memref<128x128xf32, #tpu.memory_space<vmem>>, vector<128x128xf32>,
    %c0_80 = arith.constant 0 : index
    %c0_81 = arith.constant 0 : index
    %64 = vector.load %arg7[%c0_80, %c0_81] : memref<128x128xf32, #tpu.memory_space<vmem>>, vector<128x128xf32>
    %c0_82 = arith.constant 0 : index
    %c0_83 = arith.constant 0 : index
    %65 = vector.load %arg5[%c0_82, %c0_83] : memref<1x128xf32, #tpu.memory_space<vmem>>, vector<1x128xf32>
    %66 = vector.broadcast %65 : vector<1x128xf32> to vector<128x128xf32>
    %67 = arith.addf %64, %66 : vector<128x128xf32>
    %cst_84 = arith.constant 0.000000e+00 : f32
    %68 = vector.broadcast %cst_84 : f32 to vector<128x128xf32>
    %69 = arith.maximumf %67, %68 : vector<128x128xf32>
    %70 = vector.shape_cast %69 : vector<128x128xf32> to vector<8x16x128xf32>
    %71 = vector.extract_strided_slice %70 {offsets = [0, 0, 0], sizes = [8, 8, 128], strides = [1, 1, 1]} : vector<8x16x128xf32> to vector<8x8x128xf32>
    %72 = vector.shape_cast %71 : vector<8x8x128xf32> to vector<4x2x8x128xf32>
    %cst_85 = arith.constant dense<0xFF800000> : vector<4x8x128xf32>
    %73 = vector.multi_reduction <maximumf>, %72, %cst_85 [1] : vector<4x2x8x128xf32> to vector<4x8x128xf32>
    %74 = vector.shape_cast %73 : vector<4x8x128xf32> to vector<4x4x2x128xf32>
    %cst_86 = arith.constant dense<0xFF800000> : vector<4x4x128xf32>
    %75 = vector.multi_reduction <maximumf>, %74, %cst_86 [2] : vector<4x4x2x128xf32> to vector<4x4x128xf32>
    %c0_87 = arith.constant 0 : index
    %c0_88 = arith.constant 0 : index
    %c0_89 = arith.constant 0 : index
    %c0_90 = arith.constant 0 : index
    %76 = vector.load %arg6[%c0_87, %c0_88, %c0_89, %c0_90] : memref<1x4x4x128xf32, #tpu.memory_space<vmem>>, vector<1x4x4x128xf32>
    %77 = vector.shape_cast %76 : vector<1x4x4x128xf32> to vector<4x4x128xf32>
    %78 = vector.shape_cast %75 : vector<4x4x128xf32> to vector<1x4x4x128xf32>
    tpu.vector_store %arg6[%c0_87, %c0_88, %c0_89, %c0_90], %78 {strides = array<i32>} : memref<1x4x4x128xf32, #tpu.memory_space<vmem>>, vector<1x4x4x128xf32>,
    return
  }
  func.func @transform_0(%arg0: i32, %arg1: i32, %arg2: i32) -> (i32, i32, i32, i32, i32) {
    %c0_i32 = arith.constant 0 : i32
    %c0_i32_0 = arith.constant 0 : i32
    %c0_i32_1 = arith.constant 0 : i32
    %c0_i32_2 = arith.constant 0 : i32
    return %arg0, %arg2, %c0_i32, %c0_i32_0, %c0_i32_1 : i32, i32, i32, i32, i32
  }
  func.func @transform_1(%arg0: i32, %arg1: i32, %arg2: i32) -> (i32, i32, i32, i32) {
    %c0_i32 = arith.constant 0 : i32
    %c0_i32_0 = arith.constant 0 : i32
    %c0_i32_1 = arith.constant 0 : i32
    %c0_i32_2 = arith.constant 0 : i32
    return %c0_i32, %c0_i32_0, %c0_i32_1, %arg1 : i32, i32, i32, i32
  }
  func.func @transform_2(%arg0: i32, %arg1: i32, %arg2: i32) -> (i32, i32) {
    %c0_i32 = arith.constant 0 : i32
    %c0_i32_0 = arith.constant 0 : i32
    return %c0_i32, %arg1 : i32, i32
  }
  func.func @transform_3(%arg0: i32, %arg1: i32, %arg2: i32) -> (i32, i32, i32, i32) {
    %c0_i32 = arith.constant 0 : i32
    %c0_i32_0 = arith.constant 0 : i32
    return %arg0, %arg2, %c0_i32, %arg1 : i32, i32, i32, i32
  }
}

module attributes {stable_mosaic.version = 11 : i64} {
  func.func @_conv3x3_kernel(%arg0: i32, %arg1: i32, %arg2: i32, %arg3: memref<1x1x7x8x128xbf16, #tpu.memory_space<vmem>>, %arg4: memref<3x3x128x128xbf16, #tpu.memory_space<vmem>>, %arg5: memref<1x128xf32, #tpu.memory_space<vmem>>, %arg6: memref<1x4x4x128xf32, #tpu.memory_space<vmem>>, %arg7: memref<32x128xf32, #tpu.memory_space<vmem>>) attributes {dimension_semantics = [#tpu.dimension_semantics<parallel>, #tpu.dimension_semantics<parallel>, #tpu.dimension_semantics<parallel>], iteration_bounds = array<i64: 2, 2, 1>, scalar_prefetch = 0 : i64, scratch_operands = 1 : i64, tpu.core_type = #tpu.core_type<tc>, window_params = [{transform_indices = @transform_0, window_bounds = array<i64: 1, 1, 7, 8, 128>}, {transform_indices = @transform_1, window_bounds = array<i64: 3, 3, 128, 128>}, {transform_indices = @transform_2, window_bounds = array<i64: 1, 128>}, {transform_indices = @transform_3, window_bounds = array<i64: 1, 4, 4, 128>}]} {
    %c0 = arith.constant 0 : index
    %c0_0 = arith.constant 0 : index
    %c0_1 = arith.constant 0 : index
    %c0_2 = arith.constant 0 : index
    %c0_3 = arith.constant 0 : index
    %0 = vector.load %arg3[%c0, %c0_0, %c0_1, %c0_2, %c0_3] : memref<1x1x7x8x128xbf16, #tpu.memory_space<vmem>>, vector<1x1x7x8x128xbf16>
    %1 = vector.shape_cast %0 : vector<1x1x7x8x128xbf16> to vector<7x8x128xbf16>
    %2 = vector.shape_cast %1 : vector<7x8x128xbf16> to vector<56x128xbf16>
    %3 = vector.extract_strided_slice %2 {offsets = [0, 0], sizes = [32, 128], strides = [1, 1]} : vector<56x128xbf16> to vector<32x128xbf16>
    %c0_4 = arith.constant 0 : index
    %c0_5 = arith.constant 0 : index
    %c0_6 = arith.constant 0 : index
    %c0_7 = arith.constant 0 : index
    %4 = vector.load %arg4[%c0_4, %c0_5, %c0_6, %c0_7] : memref<3x3x128x128xbf16, #tpu.memory_space<vmem>>, vector<1x1x128x128xbf16>
    %5 = vector.shape_cast %4 : vector<1x1x128x128xbf16> to vector<128x128xbf16>
    %cst = arith.constant dense<0.000000e+00> : vector<32x128xf32>
    %6 = tpu.matmul %3, %5, %cst {dimension_numbers = #tpu.dot_dimension_numbers<[1], [0], [0], [1], [0, 0, 1, 1], [], []>} : vector<32x128xbf16>, vector<128x128xbf16>, vector<32x128xf32> -> vector<32x128xf32>
    %c0_8 = arith.constant 0 : index
    %c0_9 = arith.constant 0 : index
    %7 = vector.load %arg7[%c0_8, %c0_9] : memref<32x128xf32, #tpu.memory_space<vmem>>, vector<32x128xf32>
    tpu.vector_store %arg7[%c0_8, %c0_9], %6 {strides = array<i32>} : memref<32x128xf32, #tpu.memory_space<vmem>>, vector<32x128xf32>,
    %8 = vector.extract_strided_slice %2 {offsets = [1, 0], sizes = [32, 128], strides = [1, 1]} : vector<56x128xbf16> to vector<32x128xbf16>
    %c0_10 = arith.constant 0 : index
    %c1 = arith.constant 1 : index
    %c0_11 = arith.constant 0 : index
    %c0_12 = arith.constant 0 : index
    %9 = vector.load %arg4[%c0_10, %c1, %c0_11, %c0_12] : memref<3x3x128x128xbf16, #tpu.memory_space<vmem>>, vector<1x1x128x128xbf16>
    %10 = vector.shape_cast %9 : vector<1x1x128x128xbf16> to vector<128x128xbf16>
    %cst_13 = arith.constant dense<0.000000e+00> : vector<32x128xf32>
    %11 = tpu.matmul %8, %10, %cst_13 {dimension_numbers = #tpu.dot_dimension_numbers<[1], [0], [0], [1], [0, 0, 1, 1], [], []>} : vector<32x128xbf16>, vector<128x128xbf16>, vector<32x128xf32> -> vector<32x128xf32>
    %c0_14 = arith.constant 0 : index
    %c0_15 = arith.constant 0 : index
    %12 = vector.load %arg7[%c0_14, %c0_15] : memref<32x128xf32, #tpu.memory_space<vmem>>, vector<32x128xf32>
    %13 = arith.addf %12, %11 : vector<32x128xf32>
    %c0_16 = arith.constant 0 : index
    %c0_17 = arith.constant 0 : index
    %14 = vector.load %arg7[%c0_16, %c0_17] : memref<32x128xf32, #tpu.memory_space<vmem>>, vector<32x128xf32>
    tpu.vector_store %arg7[%c0_16, %c0_17], %13 {strides = array<i32>} : memref<32x128xf32, #tpu.memory_space<vmem>>, vector<32x128xf32>,
    %15 = vector.extract_strided_slice %2 {offsets = [2, 0], sizes = [32, 128], strides = [1, 1]} : vector<56x128xbf16> to vector<32x128xbf16>
    %c0_18 = arith.constant 0 : index
    %c2 = arith.constant 2 : index
    %c0_19 = arith.constant 0 : index
    %c0_20 = arith.constant 0 : index
    %16 = vector.load %arg4[%c0_18, %c2, %c0_19, %c0_20] : memref<3x3x128x128xbf16, #tpu.memory_space<vmem>>, vector<1x1x128x128xbf16>
    %17 = vector.shape_cast %16 : vector<1x1x128x128xbf16> to vector<128x128xbf16>
    %cst_21 = arith.constant dense<0.000000e+00> : vector<32x128xf32>
    %18 = tpu.matmul %15, %17, %cst_21 {dimension_numbers = #tpu.dot_dimension_numbers<[1], [0], [0], [1], [0, 0, 1, 1], [], []>} : vector<32x128xbf16>, vector<128x128xbf16>, vector<32x128xf32> -> vector<32x128xf32>
    %c0_22 = arith.constant 0 : index
    %c0_23 = arith.constant 0 : index
    %19 = vector.load %arg7[%c0_22, %c0_23] : memref<32x128xf32, #tpu.memory_space<vmem>>, vector<32x128xf32>
    %20 = arith.addf %19, %18 : vector<32x128xf32>
    %c0_24 = arith.constant 0 : index
    %c0_25 = arith.constant 0 : index
    %21 = vector.load %arg7[%c0_24, %c0_25] : memref<32x128xf32, #tpu.memory_space<vmem>>, vector<32x128xf32>
    tpu.vector_store %arg7[%c0_24, %c0_25], %20 {strides = array<i32>} : memref<32x128xf32, #tpu.memory_space<vmem>>, vector<32x128xf32>,
    %22 = vector.extract_strided_slice %2 {offsets = [8, 0], sizes = [32, 128], strides = [1, 1]} : vector<56x128xbf16> to vector<32x128xbf16>
    %c1_26 = arith.constant 1 : index
    %c0_27 = arith.constant 0 : index
    %c0_28 = arith.constant 0 : index
    %c0_29 = arith.constant 0 : index
    %23 = vector.load %arg4[%c1_26, %c0_27, %c0_28, %c0_29] : memref<3x3x128x128xbf16, #tpu.memory_space<vmem>>, vector<1x1x128x128xbf16>
    %24 = vector.shape_cast %23 : vector<1x1x128x128xbf16> to vector<128x128xbf16>
    %cst_30 = arith.constant dense<0.000000e+00> : vector<32x128xf32>
    %25 = tpu.matmul %22, %24, %cst_30 {dimension_numbers = #tpu.dot_dimension_numbers<[1], [0], [0], [1], [0, 0, 1, 1], [], []>} : vector<32x128xbf16>, vector<128x128xbf16>, vector<32x128xf32> -> vector<32x128xf32>
    %c0_31 = arith.constant 0 : index
    %c0_32 = arith.constant 0 : index
    %26 = vector.load %arg7[%c0_31, %c0_32] : memref<32x128xf32, #tpu.memory_space<vmem>>, vector<32x128xf32>
    %27 = arith.addf %26, %25 : vector<32x128xf32>
    %c0_33 = arith.constant 0 : index
    %c0_34 = arith.constant 0 : index
    %28 = vector.load %arg7[%c0_33, %c0_34] : memref<32x128xf32, #tpu.memory_space<vmem>>, vector<32x128xf32>
    tpu.vector_store %arg7[%c0_33, %c0_34], %27 {strides = array<i32>} : memref<32x128xf32, #tpu.memory_space<vmem>>, vector<32x128xf32>,
    %29 = vector.extract_strided_slice %2 {offsets = [9, 0], sizes = [32, 128], strides = [1, 1]} : vector<56x128xbf16> to vector<32x128xbf16>
    %c1_35 = arith.constant 1 : index
    %c1_36 = arith.constant 1 : index
    %c0_37 = arith.constant 0 : index
    %c0_38 = arith.constant 0 : index
    %30 = vector.load %arg4[%c1_35, %c1_36, %c0_37, %c0_38] : memref<3x3x128x128xbf16, #tpu.memory_space<vmem>>, vector<1x1x128x128xbf16>
    %31 = vector.shape_cast %30 : vector<1x1x128x128xbf16> to vector<128x128xbf16>
    %cst_39 = arith.constant dense<0.000000e+00> : vector<32x128xf32>
    %32 = tpu.matmul %29, %31, %cst_39 {dimension_numbers = #tpu.dot_dimension_numbers<[1], [0], [0], [1], [0, 0, 1, 1], [], []>} : vector<32x128xbf16>, vector<128x128xbf16>, vector<32x128xf32> -> vector<32x128xf32>
    %c0_40 = arith.constant 0 : index
    %c0_41 = arith.constant 0 : index
    %33 = vector.load %arg7[%c0_40, %c0_41] : memref<32x128xf32, #tpu.memory_space<vmem>>, vector<32x128xf32>
    %34 = arith.addf %33, %32 : vector<32x128xf32>
    %c0_42 = arith.constant 0 : index
    %c0_43 = arith.constant 0 : index
    %35 = vector.load %arg7[%c0_42, %c0_43] : memref<32x128xf32, #tpu.memory_space<vmem>>, vector<32x128xf32>
    tpu.vector_store %arg7[%c0_42, %c0_43], %34 {strides = array<i32>} : memref<32x128xf32, #tpu.memory_space<vmem>>, vector<32x128xf32>,
    %36 = vector.extract_strided_slice %2 {offsets = [10, 0], sizes = [32, 128], strides = [1, 1]} : vector<56x128xbf16> to vector<32x128xbf16>
    %c1_44 = arith.constant 1 : index
    %c2_45 = arith.constant 2 : index
    %c0_46 = arith.constant 0 : index
    %c0_47 = arith.constant 0 : index
    %37 = vector.load %arg4[%c1_44, %c2_45, %c0_46, %c0_47] : memref<3x3x128x128xbf16, #tpu.memory_space<vmem>>, vector<1x1x128x128xbf16>
    %38 = vector.shape_cast %37 : vector<1x1x128x128xbf16> to vector<128x128xbf16>
    %cst_48 = arith.constant dense<0.000000e+00> : vector<32x128xf32>
    %39 = tpu.matmul %36, %38, %cst_48 {dimension_numbers = #tpu.dot_dimension_numbers<[1], [0], [0], [1], [0, 0, 1, 1], [], []>} : vector<32x128xbf16>, vector<128x128xbf16>, vector<32x128xf32> -> vector<32x128xf32>
    %c0_49 = arith.constant 0 : index
    %c0_50 = arith.constant 0 : index
    %40 = vector.load %arg7[%c0_49, %c0_50] : memref<32x128xf32, #tpu.memory_space<vmem>>, vector<32x128xf32>
    %41 = arith.addf %40, %39 : vector<32x128xf32>
    %c0_51 = arith.constant 0 : index
    %c0_52 = arith.constant 0 : index
    %42 = vector.load %arg7[%c0_51, %c0_52] : memref<32x128xf32, #tpu.memory_space<vmem>>, vector<32x128xf32>
    tpu.vector_store %arg7[%c0_51, %c0_52], %41 {strides = array<i32>} : memref<32x128xf32, #tpu.memory_space<vmem>>, vector<32x128xf32>,
    %43 = vector.extract_strided_slice %2 {offsets = [16, 0], sizes = [32, 128], strides = [1, 1]} : vector<56x128xbf16> to vector<32x128xbf16>
    %c2_53 = arith.constant 2 : index
    %c0_54 = arith.constant 0 : index
    %c0_55 = arith.constant 0 : index
    %c0_56 = arith.constant 0 : index
    %44 = vector.load %arg4[%c2_53, %c0_54, %c0_55, %c0_56] : memref<3x3x128x128xbf16, #tpu.memory_space<vmem>>, vector<1x1x128x128xbf16>
    %45 = vector.shape_cast %44 : vector<1x1x128x128xbf16> to vector<128x128xbf16>
    %cst_57 = arith.constant dense<0.000000e+00> : vector<32x128xf32>
    %46 = tpu.matmul %43, %45, %cst_57 {dimension_numbers = #tpu.dot_dimension_numbers<[1], [0], [0], [1], [0, 0, 1, 1], [], []>} : vector<32x128xbf16>, vector<128x128xbf16>, vector<32x128xf32> -> vector<32x128xf32>
    %c0_58 = arith.constant 0 : index
    %c0_59 = arith.constant 0 : index
    %47 = vector.load %arg7[%c0_58, %c0_59] : memref<32x128xf32, #tpu.memory_space<vmem>>, vector<32x128xf32>
    %48 = arith.addf %47, %46 : vector<32x128xf32>
    %c0_60 = arith.constant 0 : index
    %c0_61 = arith.constant 0 : index
    %49 = vector.load %arg7[%c0_60, %c0_61] : memref<32x128xf32, #tpu.memory_space<vmem>>, vector<32x128xf32>
    tpu.vector_store %arg7[%c0_60, %c0_61], %48 {strides = array<i32>} : memref<32x128xf32, #tpu.memory_space<vmem>>, vector<32x128xf32>,
    %50 = vector.extract_strided_slice %2 {offsets = [17, 0], sizes = [32, 128], strides = [1, 1]} : vector<56x128xbf16> to vector<32x128xbf16>
    %c2_62 = arith.constant 2 : index
    %c1_63 = arith.constant 1 : index
    %c0_64 = arith.constant 0 : index
    %c0_65 = arith.constant 0 : index
    %51 = vector.load %arg4[%c2_62, %c1_63, %c0_64, %c0_65] : memref<3x3x128x128xbf16, #tpu.memory_space<vmem>>, vector<1x1x128x128xbf16>
    %52 = vector.shape_cast %51 : vector<1x1x128x128xbf16> to vector<128x128xbf16>
    %cst_66 = arith.constant dense<0.000000e+00> : vector<32x128xf32>
    %53 = tpu.matmul %50, %52, %cst_66 {dimension_numbers = #tpu.dot_dimension_numbers<[1], [0], [0], [1], [0, 0, 1, 1], [], []>} : vector<32x128xbf16>, vector<128x128xbf16>, vector<32x128xf32> -> vector<32x128xf32>
    %c0_67 = arith.constant 0 : index
    %c0_68 = arith.constant 0 : index
    %54 = vector.load %arg7[%c0_67, %c0_68] : memref<32x128xf32, #tpu.memory_space<vmem>>, vector<32x128xf32>
    %55 = arith.addf %54, %53 : vector<32x128xf32>
    %c0_69 = arith.constant 0 : index
    %c0_70 = arith.constant 0 : index
    %56 = vector.load %arg7[%c0_69, %c0_70] : memref<32x128xf32, #tpu.memory_space<vmem>>, vector<32x128xf32>
    tpu.vector_store %arg7[%c0_69, %c0_70], %55 {strides = array<i32>} : memref<32x128xf32, #tpu.memory_space<vmem>>, vector<32x128xf32>,
    %57 = vector.extract_strided_slice %2 {offsets = [18, 0], sizes = [32, 128], strides = [1, 1]} : vector<56x128xbf16> to vector<32x128xbf16>
    %c2_71 = arith.constant 2 : index
    %c2_72 = arith.constant 2 : index
    %c0_73 = arith.constant 0 : index
    %c0_74 = arith.constant 0 : index
    %58 = vector.load %arg4[%c2_71, %c2_72, %c0_73, %c0_74] : memref<3x3x128x128xbf16, #tpu.memory_space<vmem>>, vector<1x1x128x128xbf16>
    %59 = vector.shape_cast %58 : vector<1x1x128x128xbf16> to vector<128x128xbf16>
    %cst_75 = arith.constant dense<0.000000e+00> : vector<32x128xf32>
    %60 = tpu.matmul %57, %59, %cst_75 {dimension_numbers = #tpu.dot_dimension_numbers<[1], [0], [0], [1], [0, 0, 1, 1], [], []>} : vector<32x128xbf16>, vector<128x128xbf16>, vector<32x128xf32> -> vector<32x128xf32>
    %c0_76 = arith.constant 0 : index
    %c0_77 = arith.constant 0 : index
    %61 = vector.load %arg7[%c0_76, %c0_77] : memref<32x128xf32, #tpu.memory_space<vmem>>, vector<32x128xf32>
    %62 = arith.addf %61, %60 : vector<32x128xf32>
    %c0_78 = arith.constant 0 : index
    %c0_79 = arith.constant 0 : index
    %63 = vector.load %arg7[%c0_78, %c0_79] : memref<32x128xf32, #tpu.memory_space<vmem>>, vector<32x128xf32>
    tpu.vector_store %arg7[%c0_78, %c0_79], %62 {strides = array<i32>} : memref<32x128xf32, #tpu.memory_space<vmem>>, vector<32x128xf32>,
    %c0_80 = arith.constant 0 : index
    %c0_81 = arith.constant 0 : index
    %64 = vector.load %arg7[%c0_80, %c0_81] : memref<32x128xf32, #tpu.memory_space<vmem>>, vector<32x128xf32>
    %c0_82 = arith.constant 0 : index
    %c0_83 = arith.constant 0 : index
    %65 = vector.load %arg5[%c0_82, %c0_83] : memref<1x128xf32, #tpu.memory_space<vmem>>, vector<1x128xf32>
    %66 = vector.broadcast %65 : vector<1x128xf32> to vector<32x128xf32>
    %67 = arith.addf %64, %66 : vector<32x128xf32>
    %cst_84 = arith.constant 0.000000e+00 : f32
    %68 = vector.broadcast %cst_84 : f32 to vector<32x128xf32>
    %69 = arith.maximumf %67, %68 : vector<32x128xf32>
    %70 = vector.shape_cast %69 : vector<32x128xf32> to vector<4x8x128xf32>
    %71 = vector.extract_strided_slice %70 {offsets = [0, 0, 0], sizes = [4, 4, 128], strides = [1, 1, 1]} : vector<4x8x128xf32> to vector<4x4x128xf32>
    %c0_85 = arith.constant 0 : index
    %c0_86 = arith.constant 0 : index
    %c0_87 = arith.constant 0 : index
    %c0_88 = arith.constant 0 : index
    %72 = vector.load %arg6[%c0_85, %c0_86, %c0_87, %c0_88] : memref<1x4x4x128xf32, #tpu.memory_space<vmem>>, vector<1x4x4x128xf32>
    %73 = vector.shape_cast %72 : vector<1x4x4x128xf32> to vector<4x4x128xf32>
    %74 = vector.shape_cast %71 : vector<4x4x128xf32> to vector<1x4x4x128xf32>
    tpu.vector_store %arg6[%c0_85, %c0_86, %c0_87, %c0_88], %74 {strides = array<i32>} : memref<1x4x4x128xf32, #tpu.memory_space<vmem>>, vector<1x4x4x128xf32>,
    return
  }
  func.func @transform_0(%arg0: i32, %arg1: i32, %arg2: i32) -> (i32, i32, i32, i32, i32) {
    %c0_i32 = arith.constant 0 : i32
    %c0_i32_0 = arith.constant 0 : i32
    %c0_i32_1 = arith.constant 0 : i32
    %c0_i32_2 = arith.constant 0 : i32
    return %arg0, %arg2, %c0_i32, %c0_i32_0, %c0_i32_1 : i32, i32, i32, i32, i32
  }
  func.func @transform_1(%arg0: i32, %arg1: i32, %arg2: i32) -> (i32, i32, i32, i32) {
    %c0_i32 = arith.constant 0 : i32
    %c0_i32_0 = arith.constant 0 : i32
    %c0_i32_1 = arith.constant 0 : i32
    %c0_i32_2 = arith.constant 0 : i32
    return %c0_i32, %c0_i32_0, %c0_i32_1, %arg1 : i32, i32, i32, i32
  }
  func.func @transform_2(%arg0: i32, %arg1: i32, %arg2: i32) -> (i32, i32) {
    %c0_i32 = arith.constant 0 : i32
    %c0_i32_0 = arith.constant 0 : i32
    return %c0_i32, %arg1 : i32, i32
  }
  func.func @transform_3(%arg0: i32, %arg1: i32, %arg2: i32) -> (i32, i32, i32, i32) {
    %c0_i32 = arith.constant 0 : i32
    %c0_i32_0 = arith.constant 0 : i32
    return %arg0, %arg2, %c0_i32, %arg1 : i32, i32, i32, i32
  }
}

</mosaic_0001>

<bundles_post_ra>
// kernel: _lambda_.5
= control target key start
LH: loop header
LB: loop body
LE: loop exit
PB: predicated region body
PF: predicated region fallthrough
CT: control target
= control target key end

     0   :  { %8 = vsyncpa [#allocation3], 0  ;;  %s1049_s12 = smov 0   ;;  %s1051_s13 = smov 0   ;;  %s1269_s0 = inlined_call_operand.vmem [shape: bf16[2,256,27], index: 0, kind: input, shape index: {}]   ;;  %s1270_s1 = inlined_call_operand.vmem [shape: bf16[27,64], index: 1, kind: input, shape index: {}]   ;;  %s1271_s2 = inlined_call_operand.hbm [shape: f32[1,64], index: 2, kind: input, shape index: {}]   ;;  %s1272_s3 = inlined_call_operand.vmem [shape: f32[2,256,64], index: 3, kind: output, shape index: {}]  }
   0x1   :  { %s1053_s14 = smov 0  }
   0x2 LB: > { %s808_s15 = sadd.s32 4294967295, %s1025_s14   ;;  %s33_s16 = sadd.s32 1, %s1021_s13  ;;  %s1025_s14 = sphi %s1053_s14, %s14_s14   ;;  %s1021_s13 = sphi %s1051_s13, %s1282_s13   ;;  %s1017_s12 = sphi %s1049_s12, %s1281_s12  }
   0x3   : > { %p35_p0 = scmp.ge.s32.totalorder %s33_s16, 2  ;;  %p810_p1 = scmp.ge.s32.totalorder %s1025_s14, 1 }
   0x4   : > { %p148_p2 = scmp.lt.s32.totalorder %s1025_s14, 3  ;;  %p1074_p4 = scmp.eq.s32.totalorder %s808_s15, 0 }
   0x5   : > { %s1284_s16 = smov (%p35_p0, %s33_s16), 0  ;;  %s1027_s19 = smov [#allocation2]  }
   0x6   : > { %p1070_p3 = pnand %p810_p1, %p148_p2  ;;  %s170_s20 = sshll.u32 %s1027_s19, 4  ;;  %s171_s20 = int_to_ptr.vmem [resolvable:$true] %s170_s20 }
   0x7   : > { %s1277_s18 = scalar_select %p1074_p4, 1, 0 }
   0x8   : > { %s1276_s17 = scalar_select %p1070_p3, 1, 0 }
   0x9   : > { %p921_p5 = pneg %p1070_p3  ;;  %s971_s24 = scalar_lea.hbm %s1271_s2, 16 }
   0xa   : > { %p972_p7 = scmp.ne.s32.totalorder %s1271_s2, %s971_s24  ;;  %p978_p11 = scmp.lt.u32.totalorder %s971_s24, %s1271_s2 }
   0xb   : > { %p1082_p6 = pnand %p1074_p4, %p921_p5 }
   0xd   : > { %p973_p8 = pneg %p1082_p6 }
   0xf   : > { %p974_p9 = pnand %p973_p8, %p972_p7 }
  0x11   : > { %p975_p10 = pneg %p974_p9 }
  0x13   : > { %p980_p12 = pnand %p978_p11, %p975_p10 }
  0x15   : > { %983 = shalt.err (!%p980_p12)
}
  0x16   : > { %s984_s29 = scalar_lea.vmem %s171_s20, 16  ;;  %s991_s30 = scalar_lea.vmem %s171_s20, 32 }
  0x17   : > { %p985_p13 = scmp.ne.s32.totalorder %s171_s20, %s984_s29  ;;  %p992_p2 = scmp.lt.s32.totalorder %s171_s20, %s171_s20 }
  0x18   : > { %p993_p5 = scmp.lt.s32.totalorder %s991_s30, %s984_s29 }
  0x19   : > { %p987_p0 = pnand %p985_p13, %p973_p8 }
  0x1a   : > { %p994_p4 = por %p993_p5, %p992_p2 }
  0x1b   : > { %p988_p1 = pneg %p987_p0 }
  0x1d   : > { %p995_p3 = pnand %p994_p4, %p988_p1 }
  0x1f   : > { %998 = shalt.err (!%p995_p3)
}
  0x20   : > { %924 = dma.hbm_to_vmem [thread:$0]  (!%p1082_p6), %s1271_s2, 16, %s171_s20, [#allocation3]  }
  0x21   : > { %p1279_p7 = scmp.ne.s32.totalorder %s1276_s17, 0 }
  0x22   : > { %p1280_p9 = scmp.ne.s32.totalorder (!%p1279_p7), %s1277_s18, 0 }
  0x23   : > { %196 = sbr.rel (%p1279_p7) target bundleno = 298 (0x12a), region = 32 }
  0x2a   : > { %1012 = dma.done.wait (%p1280_p9), [#allocation3], 16  }
  0x2b   : > { %1014 = vsyncadd (%p1280_p9), [#allocation3], 4294967280  ;;  %p236_p8 = scmp.lt.s32.totalorder %s1017_s12, 1  ;;  %vm446_vm0 = vcmask 1044480   ;;  %vm447_vm1 = vcmask 1045504   ;;  %v1028_v0 = vmov 65535  }
  0x2c   : > { %v448_v1 = vsel %vm446_vm0, 4294967295, %v1028_v0  ;;  %vm397_vm2 = vcmask 220160   ;;  %v953_v2 = vld [vmem:[%s1270_s1] sm:$0xff]   ;;  %v954_v4 = vld [vmem:[%s1270_s1 + $0x8] sm:$0x3f]   ;;  %vm646_vm3 = vcmask 523264  }
  0x2d   : > { %s1286_s12 = smov (!%p236_p8, %s1017_s12), 1  ;;  %v449_v3 = vsel %vm447_vm1, %v448_v1, 0  ;;  %877 = vmatprep.subr.bf16.mxu0 %v953_v2  ;;  %913 = vmatprep.subr.bf16.mxu1 %v953_v2  ;;  %v1156_v22 = vld [vmem:[#allocation2] ss:$0 sm:$0xff] }
  0x2e   : > { %s857_s6 = sshll.u32 %s1286_s12, 7  ;;  %878 = vmatpush3.bf16.msra.mxu0 %v953_v2  ;;  %915 = vmatpush3.bf16.msra.mxu1 %v953_v2  ;;  %v451_v6 = vand.u32 %v954_v4, %v449_v3  ;;  %s858_s18 = sshll.u32 %s1286_s12, 8 }
  0x2f   : > { %s1116_s9 = scalar_lea.vmem %s1269_s0, %s857_s6  ;;  %s1164_s21 = scalar_lea.vmem %s1272_s3, %s858_s18 }
  0x30   : > { %v955_v5 = vld [vmem:[%s1116_s9] sm:$0xff]   ;;  %v957_v8 = vld [vmem:[%s1116_s9 + $0x8] sm:$0xff]   ;;  %879 = vmatprep.subr.bf16.mxu0 %v451_v6  ;;  %914 = vmatprep.subr.bf16.mxu1 %v451_v6  ;;  %v959_v10 = vld [vmem:[%s1116_s9 + $0x10] sm:$0xff]  }
  0x31   : > { %v956_v7 = vld [vmem:[%s1116_s9 + $0x40] sm:$0xff]   ;;  %881 = vmatprep.mubr.msk.bf16.mxu0 %vm397_vm2, %v955_v5  ;;  %v958_v9 = vld [vmem:[%s1116_s9 + $0x48] sm:$0xff]   ;;  %v960_v11 = vld [vmem:[%s1116_s9 + $0x50] sm:$0xff]  }
  0x32   : > { %897 = vmatprep.mubr.msk.bf16.mxu1 %vm397_vm2, %v956_v7  ;;  %880 = vmatpush3.bf16.msra.mxu0 %v451_v6  ;;  %v961_v12 = vld [vmem:[%s1116_s9 + $0x18] sm:$0xff]   ;;  %v963_v14 = vld [vmem:[%s1116_s9 + $0x20] sm:$0xff]   ;;  %v965_v16 = vld [vmem:[%s1116_s9 + $0x28] sm:$0xff]  }
  0x33   : > { %916 = vmatpush3.bf16.msra.mxu1 %v451_v6  ;;  %v962_v13 = vld [vmem:[%s1116_s9 + $0x58] sm:$0xff]   ;;  %v964_v15 = vld [vmem:[%s1116_s9 + $0x60] sm:$0xff]   ;;  %v966_v17 = vld [vmem:[%s1116_s9 + $0x68] sm:$0xff]  }
  0x34   : > { %v967_v18 = vld [vmem:[%s1116_s9 + $0x30] sm:$0xff]   ;;  %v969_v20 = vld [vmem:[%s1116_s9 + $0x38] sm:$0xff]  }
  0x35   : > { %882 = vmatmul.mubr.msk.bf16.vlgmr.msra.gmra.mrb[0].mxu0 %vm397_vm2, %v957_v8  ;;  %v968_v19 = vld [vmem:[%s1116_s9 + $0x70] sm:$0xff]   ;;  %v970_v21 = vld [vmem:[%s1116_s9 + $0x78] sm:$0xff]  }
  0x36   : > { %898 = vmatmul.mubr.msk.bf16.vlgmr.msra.gmra.mrb[0].mxu1 %vm397_vm2, %v958_v9  ;;  %885 = vmatprep.mubr.msk.bf16.mxu0 %vm397_vm2, %v959_v10 }
  0x37   : > { %901 = vmatprep.mubr.msk.bf16.mxu1 %vm397_vm2, %v960_v11 }
  0x3d   : > { %886 = vmatmul.mubr.msk.bf16.gmra.mrb[4].mxu0 %vm397_vm2, %v961_v12 }
  0x3e   : > { %902 = vmatmul.mubr.msk.bf16.gmra.mrb[4].mxu1 %vm397_vm2, %v962_v13  ;;  %889 = vmatprep.mubr.msk.bf16.mxu0 %vm397_vm2, %v963_v14 }
  0x3f   : > { %905 = vmatprep.mubr.msk.bf16.mxu1 %vm397_vm2, %v964_v15 }
  0x45   : > { %890 = vmatmul.mubr.msk.bf16.gmra.mrb[8].mxu0 %vm397_vm2, %v965_v16 }
  0x46   : > { %906 = vmatmul.mubr.msk.bf16.gmra.mrb[8].mxu1 %vm397_vm2, %v966_v17  ;;  %893 = vmatprep.mubr.msk.bf16.mxu0 %vm397_vm2, %v967_v18 }
  0x47   : > { %909 = vmatprep.mubr.msk.bf16.mxu1 %vm397_vm2, %v968_v19 }
  0x4d   : > { %894 = vmatmul.mubr.msk.bf16.gmra.mrb[12].mxu0 %vm397_vm2, %v969_v20 }
  0x4e   : > { %910 = vmatmul.mubr.msk.bf16.gmra.mrb[12].mxu1 %vm397_vm2, %v970_v21 }
 0x108   : > { %v883_v23 = vpop.f32.mrb[0].mxu0 }
 0x109   : > { %v899_v24 = vpop.f32.mrb[0].mxu1  ;;  %v496_v25 = vadd.f32 %v883_v23, %v1156_v22  ;;  %v487_v27 = vpop.f32.mrb[1].mxu0 }
 0x10a   : > { %v560_v26 = vadd.f32 %v899_v24, %v1156_v22  ;;  %v551_v28 = vpop.f32.mrb[1].mxu1  ;;  %v488_v29 = vadd.f32 %v1156_v22, %v487_v27  ;;  %v884_v31 = vpop.f32.mrb[2].mxu0 }
 0x10b   : > { %v552_v30 = vadd.f32 %v1156_v22, %v551_v28  ;;  %v900_v32 = vpop.f32.mrb[2].mxu1  ;;  %v616_v33 = vmax.f32 %v496_v25, 0.0  ;;  %v499_v35 = vadd.f32 %v884_v31, %v1156_v22  ;;  %v490_v37 = vpop.f32.mrb[3].mxu0 }
 0x10c   : > { %v632_v34 = vmax.f32 %v560_v26, 0.0  ;;  %v563_v36 = vadd.f32 %v900_v32, %v1156_v22  ;;  %v554_v38 = vpop.f32.mrb[3].mxu1  ;;  %v614_v39 = vmax.f32 %v488_v29, 0.0  ;;  %v491_v41 = vadd.f32 %v1156_v22, %v490_v37 }
 0x10d   : > { %v630_v40 = vmax.f32 %v552_v30, 0.0  ;;  %v555_v42 = vadd.f32 %v1156_v22, %v554_v38  ;;  %649 = vst.msk [vmem:[%s1164_s21 + $0x10] sm:$0xff] %vm646_vm3, %v616_v33  ;;  %v617_v43 = vmax.f32 %v499_v35, 0.0 }
 0x10e   : > { %665 = vst.msk [vmem:[%s1164_s21 + $0x90] sm:$0xff] %vm646_vm3, %v632_v34  ;;  %v633_v44 = vmax.f32 %v563_v36, 0.0  ;;  %647 = vst.msk [vmem:[%s1164_s21] sm:$0xff] %vm646_vm3, %v614_v39  ;;  %v615_v45 = vmax.f32 %v491_v41, 0.0 }
 0x10f   : > { %663 = vst.msk [vmem:[%s1164_s21 + $0x80] sm:$0xff] %vm646_vm3, %v630_v40  ;;  %v631_v46 = vmax.f32 %v555_v42, 0.0  ;;  %650 = vst.msk [vmem:[%s1164_s21 + $0x18] sm:$0xff] %vm646_vm3, %v617_v43 }
 0x110   : > { %666 = vst.msk [vmem:[%s1164_s21 + $0x98] sm:$0xff] %vm646_vm3, %v633_v44  ;;  %648 = vst.msk [vmem:[%s1164_s21 + $0x8] sm:$0xff] %vm646_vm3, %v615_v45  ;;  %v887_v47 = vpop.f32.mrb[4].mxu0 }
 0x111   : > { %664 = vst.msk [vmem:[%s1164_s21 + $0x88] sm:$0xff] %vm646_vm3, %v631_v46  ;;  %v903_v48 = vpop.f32.mrb[4].mxu1  ;;  %v512_v49 = vadd.f32 %v887_v47, %v1156_v22  ;;  %v503_v51 = vpop.f32.mrb[5].mxu0 }
 0x112   : > { %v576_v50 = vadd.f32 %v903_v48, %v1156_v22  ;;  %v567_v52 = vpop.f32.mrb[5].mxu1  ;;  %v504_v53 = vadd.f32 %v1156_v22, %v503_v51  ;;  %v888_v55 = vpop.f32.mrb[6].mxu0 }
 0x113   : > { %v568_v54 = vadd.f32 %v1156_v22, %v567_v52  ;;  %v904_v56 = vpop.f32.mrb[6].mxu1  ;;  %v620_v57 = vmax.f32 %v512_v49, 0.0  ;;  %v515_v59 = vadd.f32 %v888_v55, %v1156_v22  ;;  %v506_v61 = vpop.f32.mrb[7].mxu0 }
 0x114   : > { %v636_v58 = vmax.f32 %v576_v50, 0.0  ;;  %v579_v60 = vadd.f32 %v904_v56, %v1156_v22  ;;  %v570_v62 = vpop.f32.mrb[7].mxu1  ;;  %v618_v63 = vmax.f32 %v504_v53, 0.0  ;;  %v507_v1 = vadd.f32 %v1156_v22, %v506_v61 }
 0x115   : > { %v634_v0 = vmax.f32 %v568_v54, 0.0  ;;  %v571_v2 = vadd.f32 %v1156_v22, %v570_v62  ;;  %653 = vst.msk [vmem:[%s1164_s21 + $0x30] sm:$0xff] %vm646_vm3, %v620_v57  ;;  %v621_v3 = vmax.f32 %v515_v59, 0.0 }
 0x116   : > { %669 = vst.msk [vmem:[%s1164_s21 + $0xb0] sm:$0xff] %vm646_vm3, %v636_v58  ;;  %v637_v4 = vmax.f32 %v579_v60, 0.0  ;;  %651 = vst.msk [vmem:[%s1164_s21 + $0x20] sm:$0xff] %vm646_vm3, %v618_v63  ;;  %v619_v5 = vmax.f32 %v507_v1, 0.0 }
 0x117   : > { %667 = vst.msk [vmem:[%s1164_s21 + $0xa0] sm:$0xff] %vm646_vm3, %v634_v0  ;;  %v635_v6 = vmax.f32 %v571_v2, 0.0  ;;  %654 = vst.msk [vmem:[%s1164_s21 + $0x38] sm:$0xff] %vm646_vm3, %v621_v3 }
 0x118   : > { %670 = vst.msk [vmem:[%s1164_s21 + $0xb8] sm:$0xff] %vm646_vm3, %v637_v4  ;;  %652 = vst.msk [vmem:[%s1164_s21 + $0x28] sm:$0xff] %vm646_vm3, %v619_v5  ;;  %v891_v7 = vpop.f32.mrb[8].mxu0 }
 0x119   : > { %668 = vst.msk [vmem:[%s1164_s21 + $0xa8] sm:$0xff] %vm646_vm3, %v635_v6  ;;  %v907_v8 = vpop.f32.mrb[8].mxu1  ;;  %v528_v9 = vadd.f32 %v891_v7, %v1156_v22  ;;  %v519_v11 = vpop.f32.mrb[9].mxu0 }
 0x11a   : > { %v592_v10 = vadd.f32 %v907_v8, %v1156_v22  ;;  %v583_v12 = vpop.f32.mrb[9].mxu1  ;;  %v520_v13 = vadd.f32 %v1156_v22, %v519_v11  ;;  %v892_v15 = vpop.f32.mrb[10].mxu0 }
 0x11b   : > { %v584_v14 = vadd.f32 %v1156_v22, %v583_v12  ;;  %v908_v16 = vpop.f32.mrb[10].mxu1  ;;  %v624_v17 = vmax.f32 %v528_v9, 0.0  ;;  %v531_v19 = vadd.f32 %v892_v15, %v1156_v22  ;;  %v522_v21 = vpop.f32.mrb[11].mxu0 }
 0x11c   : > { %v640_v18 = vmax.f32 %v592_v10, 0.0  ;;  %v595_v20 = vadd.f32 %v908_v16, %v1156_v22  ;;  %v586_v23 = vpop.f32.mrb[11].mxu1  ;;  %v622_v24 = vmax.f32 %v520_v13, 0.0  ;;  %v523_v26 = vadd.f32 %v1156_v22, %v522_v21 }
 0x11d   : > { %v638_v25 = vmax.f32 %v584_v14, 0.0  ;;  %v587_v27 = vadd.f32 %v1156_v22, %v586_v23  ;;  %657 = vst.msk [vmem:[%s1164_s21 + $0x50] sm:$0xff] %vm646_vm3, %v624_v17  ;;  %v625_v28 = vmax.f32 %v531_v19, 0.0 }
 0x11e   : > { %673 = vst.msk [vmem:[%s1164_s21 + $0xd0] sm:$0xff] %vm646_vm3, %v640_v18  ;;  %v641_v29 = vmax.f32 %v595_v20, 0.0  ;;  %655 = vst.msk [vmem:[%s1164_s21 + $0x40] sm:$0xff] %vm646_vm3, %v622_v24  ;;  %v623_v30 = vmax.f32 %v523_v26, 0.0 }
 0x11f   : > { %671 = vst.msk [vmem:[%s1164_s21 + $0xc0] sm:$0xff] %vm646_vm3, %v638_v25  ;;  %v639_v31 = vmax.f32 %v587_v27, 0.0  ;;  %658 = vst.msk [vmem:[%s1164_s21 + $0x58] sm:$0xff] %vm646_vm3, %v625_v28 }
 0x120   : > { %674 = vst.msk [vmem:[%s1164_s21 + $0xd8] sm:$0xff] %vm646_vm3, %v641_v29  ;;  %656 = vst.msk [vmem:[%s1164_s21 + $0x48] sm:$0xff] %vm646_vm3, %v623_v30  ;;  %v895_v32 = vpop.f32.mrb[12].mxu0 }
 0x121   : > { %672 = vst.msk [vmem:[%s1164_s21 + $0xc8] sm:$0xff] %vm646_vm3, %v639_v31  ;;  %v911_v33 = vpop.f32.mrb[12].mxu1  ;;  %v544_v34 = vadd.f32 %v895_v32, %v1156_v22  ;;  %v535_v36 = vpop.f32.mrb[13].mxu0 }
 0x122   : > { %v608_v35 = vadd.f32 %v911_v33, %v1156_v22  ;;  %v599_v37 = vpop.f32.mrb[13].mxu1  ;;  %v536_v38 = vadd.f32 %v1156_v22, %v535_v36  ;;  %v896_v40 = vpop.f32.mrb[14].mxu0 }
 0x123   : > { %v600_v39 = vadd.f32 %v1156_v22, %v599_v37  ;;  %v912_v41 = vpop.f32.mrb[14].mxu1  ;;  %v628_v42 = vmax.f32 %v544_v34, 0.0  ;;  %v547_v44 = vadd.f32 %v896_v40, %v1156_v22  ;;  %v538_v46 = vpop.f32.mrb[15].mxu0 }
 0x124   : > { %v644_v43 = vmax.f32 %v608_v35, 0.0  ;;  %v611_v45 = vadd.f32 %v912_v41, %v1156_v22  ;;  %v602_v47 = vpop.f32.mrb[15].mxu1  ;;  %v626_v48 = vmax.f32 %v536_v38, 0.0  ;;  %v539_v50 = vadd.f32 %v1156_v22, %v538_v46 }
 0x125   : > { %v642_v49 = vmax.f32 %v600_v39, 0.0  ;;  %v603_v51 = vadd.f32 %v1156_v22, %v602_v47  ;;  %661 = vst.msk [vmem:[%s1164_s21 + $0x70] sm:$0xff] %vm646_vm3, %v628_v42  ;;  %v629_v52 = vmax.f32 %v547_v44, 0.0 }
 0x126   : > { %677 = vst.msk [vmem:[%s1164_s21 + $0xf0] sm:$0xff] %vm646_vm3, %v644_v43  ;;  %v645_v53 = vmax.f32 %v611_v45, 0.0  ;;  %659 = vst.msk [vmem:[%s1164_s21 + $0x60] sm:$0xff] %vm646_vm3, %v626_v48  ;;  %v627_v54 = vmax.f32 %v539_v50, 0.0 }
 0x127   : > { %675 = vst.msk [vmem:[%s1164_s21 + $0xe0] sm:$0xff] %vm646_vm3, %v642_v49  ;;  %v643_v55 = vmax.f32 %v603_v51, 0.0  ;;  %662 = vst.msk [vmem:[%s1164_s21 + $0x78] sm:$0xff] %vm646_vm3, %v629_v52 }
 0x128   : > { %678 = vst.msk [vmem:[%s1164_s21 + $0xf8] sm:$0xff] %vm646_vm3, %v645_v53  ;;  %660 = vst.msk [vmem:[%s1164_s21 + $0x68] sm:$0xff] %vm646_vm3, %v627_v54 }
 0x129   : > { %676 = vst.msk [vmem:[%s1164_s21 + $0xe8] sm:$0xff] %vm646_vm3, %v643_v55 }
 0x12a PF: > { %s14_s14 = sadd.s32 1, %s1025_s14   ;;  %s1281_s12 = smov %s1021_s13 }
 0x12b   : > { %p11_p3 = scmp.ge.s32.totalorder %s14_s14, 4   ;;  %s1282_s13 = smov %s1284_s16 }
 0x12d   :  { %13 = sbr.rel (!%p11_p3) target bundleno = 2 (0x2), region = 71 }
 0x134   :  { %715 = vsyncpa [#allocation3], 1 }
 0x135   :  { %717 = vsyncpa [#allocation3 + $0x1], 1 }

// kernel: _lambda_.7
= control target key start
LH: loop header
LB: loop body
LE: loop exit
PB: predicated region body
PF: predicated region fallthrough
CT: control target
= control target key end

     0   :  { %s2932_s12 = smov 0   ;;  %s2934_s13 = smov 0   ;;  %s3376_s0 = inlined_call_operand.vmem [shape: bf16[2,1,11,16,64], index: 0, kind: input, shape index: {}]   ;;  %s3377_s1 = inlined_call_operand.vmem [shape: bf16[3,3,64,128], index: 1, kind: input, shape index: {}]   ;;  %s3378_s2 = inlined_call_operand.vmem [shape: f32[1,128], index: 2, kind: input, shape index: {}]   ;;  %s3379_s3 = inlined_call_operand.vmem [shape: f32[2,8,8,128], index: 3, kind: output, shape index: {}]  }
   0x1   :  { %s2936_s14 = smov 0  }
   0x2 LB: > { %s32_s15 = sadd.s32 1, %s2906_s13  ;;  %p2289_p0 = scmp.ge.s32.totalorder %s2910_s14, 1  ;;  %s2910_s14 = sphi %s2936_s14, %s13_s14   ;;  %s2906_s13 = sphi %s2934_s13, %s3381_s13   ;;  %s2902_s12 = sphi %s2932_s12, %s3380_s12  }
   0x3   : > { %p34_p1 = scmp.ge.s32.totalorder %s32_s15, 2  ;;  %p183_p2 = scmp.lt.s32.totalorder %s2910_s14, 3 }
   0x5   : > { %s3383_s15 = smov (%p34_p1, %s32_s15), 0  ;;  %p184_p3 = pnand %p2289_p0, %p183_p2 }
   0x6   : > { %v2839_v0 = vld [vmem:[%s3377_s1] sm:$0xff] (!%p184_p3)   ;;  %p225_p4 = scmp.lt.s32.totalorder (!%p184_p3), %s2902_s12, 1  ;;  %v2840_v1 = vld [vmem:[%s3377_s1 + $0x8] sm:$0xff] (!%p184_p3)   ;;  %v2841_v2 = vld [vmem:[%s3377_s1 + $0x10] sm:$0xff] (!%p184_p3)   ;;  %vm348_vm0 = vcmask (!%p184_p3), 523264   ;;  %vm761_vm1 = vcmask (!%p184_p3), 1046528  }
   0x7   : > { %187 = sbr.rel (%p184_p3) target bundleno = 382 (0x17e), region = 32  ;;  %2590 = vmatprep.subr.bf16.mxu0 (!%p184_p3), %v2839_v0  ;;  %2806 = vmatprep.subr.bf16.mxu1 (!%p184_p3), %v2839_v0  ;;  %v2842_v3 = vld [vmem:[%s3377_s1 + $0x18] sm:$0xff] (!%p184_p3)   ;;  %v2847_v6 = vld [vmem:[%s3377_s1 + $0x20] sm:$0xff] (!%p184_p3)   ;;  %v2849_v11 = vld [vmem:[%s3377_s1 + $0x28] sm:$0xff] (!%p184_p3)   ;;  %vm498_vm2 = vsmask.f32 (!%p184_p3), 7424 }
   0x8   : > { %2591 = vmatpush3.bf16.msra.mxu0 (!%p184_p3), %v2839_v0  ;;  %2810 = vmatpush3.bf16.msra.mxu1 (!%p184_p3), %v2839_v0  ;;  %v2848_v7 = vld [vmem:[%s3377_s1 + $0x40] sm:$0xff] (!%p184_p3)   ;;  %v2850_v12 = vld [vmem:[%s3377_s1 + $0x48] sm:$0xff] (!%p184_p3)   ;;  %v2855_v18 = vld [vmem:[%s3377_s1 + $0x30] sm:$0xff] (!%p184_p3)  }
   0x9   : > { %2592 = vmatprep.subr.bf16.mxu0 (!%p184_p3), %v2840_v1  ;;  %2807 = vmatprep.subr.bf16.mxu1 (!%p184_p3), %v2840_v1  ;;  %v2856_v19 = vld [vmem:[%s3377_s1 + $0x50] sm:$0xff] (!%p184_p3)   ;;  %v2857_v24 = vld [vmem:[%s3377_s1 + $0x38] sm:$0xff] (!%p184_p3)   ;;  %v2859_v37 = vld [vmem:[%s3377_s1 + $0x60] sm:$0xff] (!%p184_p3)  }
   0xa   : > { %v2858_v29 = vld [vmem:[%s3377_s1 + $0x58] sm:$0xff] (!%p184_p3)   ;;  %v2860_v38 = vld [vmem:[%s3377_s1 + $0x80] sm:$0xff] (!%p184_p3)   ;;  %v2861_v49 = vld [vmem:[%s3377_s1 + $0x68] sm:$0xff] (!%p184_p3)  }
   0xb   : > { %v2862_v54 = vld [vmem:[%s3377_s1 + $0x88] sm:$0xff] (!%p184_p3)   ;;  %v2863_v58 = vld [vmem:[%s3377_s1 + $0x70] sm:$0xff] (!%p184_p3)  }
   0xc   : > { %2593 = vmatpush3.bf16.msra.mxu0 (!%p184_p3), %v2840_v1  ;;  %2811 = vmatpush3.bf16.msra.mxu1 (!%p184_p3), %v2840_v1  ;;  %v2864_v62 = vld [vmem:[%s3377_s1 + $0x90] sm:$0xff] (!%p184_p3)  }
   0xd   : > { %2594 = vmatprep.subr.bf16.mxu0 (!%p184_p3), %v2841_v2  ;;  %2808 = vmatprep.subr.bf16.mxu1 (!%p184_p3), %v2841_v2 }
   0xe   : > { %s3385_s12 = smov (!%p225_p4, %s2902_s12), 1 }
   0xf   : > { %s2814_s22 = smul.u32 88, %s3385_s12  ;;  %s2481_s25 = sshll.u32 %s3385_s12, 6 }
  0x10   : > { %2595 = vmatpush3.bf16.msra.mxu0 %v2841_v2  ;;  %2812 = vmatpush3.bf16.msra.mxu1 %v2841_v2  ;;  %s3349_s29 = scalar_lea.vmem %s3379_s3, %s2481_s25 }
  0x11   : > { %s2968_s27 = scalar_lea.vmem %s3376_s0, %s2814_s22  ;;  %2596 = vmatprep.subr.bf16.mxu0 %v2842_v3  ;;  %2809 = vmatprep.subr.bf16.mxu1 %v2842_v3 }
  0x12   : > { %v2843_v4 = vld [vmem:[%s2968_s27] sm:$0xff]   ;;  %v2984_v8 = vld [vmem:[%s2968_s27 + $0x8] sm:$0xff]   ;;  %v2996_v14 = vld [vmem:[%s2968_s27 + $0x10] sm:$0xff]  }
  0x13   : > { %v2972_v5 = vld [vmem:[%s2968_s27 + $0x20] sm:$0xff]   ;;  %2598 = vmatprep.mubr.msk.bf16.mxu0 %vm348_vm0, %v2843_v4  ;;  %v501_v9 = vshll.u32 %v2843_v4, 16  ;;  %v2987_v10 = vld [vmem:[%s2968_s27 + $0x28] sm:$0xff]   ;;  %v499_v13 = vshrl.u32 %v2843_v4, 16  ;;  %v505_v15 = vshll.u32 %v2984_v8, 16  ;;  %v3000_v16 = vld [vmem:[%s2968_s27 + $0x30] sm:$0xff]  }
  0x14   : > { %2606 = vmatprep.mubr.msk.bf16.mxu1 %vm348_vm0, %v2972_v5  ;;  %2597 = vmatpush3.bf16.msra.mxu0 %v2842_v3  ;;  %v3017_v20 = vld [vmem:[%s2968_s27 + $0x18] sm:$0xff]   ;;  %v509_v25 = vshrl.u32 %v2984_v8, 16  ;;  %v762_v26 = vrot.slane %v2843_v4, 1  ;;  %v763_v27 = vrot.slane %v2984_v8, 1  ;;  %v512_v28 = vshll.u32 %v2996_v14, 16 }
  0x15   : > { %2813 = vmatpush3.bf16.msra.mxu1 %v2842_v3  ;;  %2638 = vmatprep.subr.bf16.mxu0 %v2848_v7  ;;  %v503_v17 = vrot.slane %v501_v9, 1  ;;  %v507_v22 = vrot.slane %v505_v15, 1  ;;  %v3020_v23 = vld [vmem:[%s2968_s27 + $0x38] sm:$0xff]   ;;  %v516_v30 = vshrl.u32 %v2996_v14, 16  ;;  %v519_v31 = vshll.u32 %v3017_v20, 16 }
  0x16   : > { %2614 = vmatprep.subr.bf16.mxu1 %v2847_v6  ;;  %v764_v33 = vsel %vm761_vm1, %v762_v26, %v763_v27  ;;  %v514_v35 = vrot.slane %v512_v28, 1  ;;  %v765_v36 = vrot.slane %v2996_v14, 1  ;;  %v767_v39 = vrot.slane %v3017_v20, 1  ;;  %v272_v50 = vld [vmem:[%s2968_s27 + $0x44] sm:$0xf]  ;;  %v2867_v9 = vld [vmem:[%s3377_s1 + $0x78] sm:$0xff]  }
  0x17   : > { %2599 = vmatmul.mubr.msk.bf16.vlgmr.msra.gmra.mrb[0].mxu0 %vm348_vm0, %v2984_v8  ;;  %v504_v21 = vor.u32 %v503_v17, %v499_v13  ;;  %v511_v34 = vor.u32 %v509_v25, %v507_v22  ;;  %v523_v40 = vshrl.u32 %v3017_v20, 16  ;;  %v521_v42 = vrot.slane %v519_v31, 1  ;;  %v271_v55 = vld [vmem:[%s2968_s27 + $0x40] sm:$0xf]  ;;  %v273_v0 = vld [vmem:[%s2968_s27 + $0x48] sm:$0xf] }
  0x18   : > { %2607 = vmatmul.mubr.msk.bf16.vlgmr.msra.gmra.mrb[0].mxu1 %vm348_vm0, %v2987_v10  ;;  %2639 = vmatpush3.bf16.msra.mxu0 %v2848_v7  ;;  %v518_v41 = vor.u32 %v516_v30, %v514_v35  ;;  %v526_v43 = vshll.u32 %v2972_v5, 16  ;;  %v769_v44 = vrot.slane %v2972_v5, 1  ;;  %v530_v45 = vshrl.u32 %v2972_v5, 16  ;;  %v2870_v31 = vld [vmem:[%s3377_s1 + $0xc0] sm:$0xff]  }
  0x19   : > { %2615 = vmatpush3.bf16.msra.mxu1 %v2847_v6  ;;  %2640 = vmatprep.subr.bf16.mxu0 %v2850_v12  ;;  %v508_v32 = vsel %vm498_vm2, %v504_v21, %v507_v22  ;;  %v533_v46 = vshll.u32 %v2987_v10, 16  ;;  %v3055_v47 = vsel %vm498_vm2, %v511_v34, %v514_v35  ;;  %v3058_v48 = vsel %vm761_vm1, %v763_v27, %v765_v36  ;;  %v2869_v27 = vld [vmem:[%s3377_s1 + $0xa0] sm:$0xff]   ;;  %v274_v34 = vld [vmem:[%s2968_s27 + $0x4c] sm:$0xf] }
  0x1a   : > { %2616 = vmatprep.subr.bf16.mxu1 %v2849_v11  ;;  %2602 = vmatprep.mubr.msk.bf16.mxu0 %vm348_vm0, %v2996_v14  ;;  %v3065_v51 = vsel %vm498_vm2, %v518_v41, %v521_v42  ;;  %v3068_v52 = vsel %vm761_vm1, %v765_v36, %v767_v39  ;;  %v528_v53 = vrot.slane %v526_v43, 1  ;;  %v525_v56 = vor.u32 %v523_v40, %v521_v42 }
  0x1b   : > { %2610 = vmatprep.mubr.msk.bf16.mxu1 %vm348_vm0, %v3000_v16  ;;  %v771_v57 = vrot.slane %v2987_v10, 1  ;;  %v3082_v59 = vcombine.low %v271_v55, %v272_v50  ;;  %v535_v61 = vrot.slane %v533_v46, 1  ;;  %v3092_v63 = vrot.slane %v3020_v23, 1 }
  0x1c   : > { %2641 = vmatpush3.bf16.msra.mxu0 %v2850_v12  ;;  %v532_v60 = vor.u32 %v530_v45, %v528_v53  ;;  %v3097_v2 = vsel %vm761_vm1, %v767_v39, %v769_v44  ;;  %v537_v3 = vshrl.u32 %v2987_v10, 16  ;;  %v540_v4 = vshll.u32 %v3000_v16, 16 }
  0x1d   : > { %2617 = vmatpush3.bf16.msra.mxu1 %v2849_v11  ;;  %2642 = vmatprep.subr.bf16.mxu0 %v2856_v19  ;;  %v1364_v1 = vrot.slane %v3082_v59, 1  ;;  %v3102_v6 = vsel %vm498_vm2, %v525_v56, %v528_v53  ;;  %v544_v7 = vshrl.u32 %v3000_v16, 16  ;;  %v3108_v11 = vcombine.low %v273_v0, %v273_v0 }
  0x1e   : > { %2618 = vmatprep.subr.bf16.mxu1 %v2855_v18  ;;  %v3115_v13 = vsel %vm498_vm2, %v532_v60, %v535_v61  ;;  %v3118_v15 = vsel %vm761_vm1, %v769_v44, %v771_v57  ;;  %v547_v17 = vshll.u32 %v3020_v23, 16  ;;  %v542_v22 = vrot.slane %v540_v4, 1  ;;  %v2887_v44 = vld [vmem:[%s2968_s27 + $0x50] ss:$0 sps:$4 sm:$0xff]   ;;  %v2871_v4 = vld [vmem:[%s3377_s1 + $0xa8] sm:$0xff]  }
  0x1f   : > { %2603 = vmatmul.mubr.msk.bf16.gmra.mrb[4].mxu0 %vm348_vm0, %v3017_v20  ;;  %v3112_v12 = vsel %vm761_vm1, %v3092_v63, %v1364_v1  ;;  %v1366_v21 = vrot.slane %v3108_v11, 1  ;;  %v773_v25 = vrot.slane %v3000_v16, 1  ;;  %v2321_v26 = vcombine.low %v271_v55, %v271_v55 }
  0x20   : > { %2611 = vmatmul.mubr.msk.bf16.gmra.mrb[4].mxu1 %vm348_vm0, %v3020_v23  ;;  %2643 = vmatpush3.bf16.msra.mxu0 %v2856_v19  ;;  %v1168_v19 = vshll.u32 %v3082_v59, 16  ;;  %v549_v30 = vrot.slane %v547_v17, 1  ;;  %v3148_v35 = vcombine.low %v273_v0, %v274_v34  ;;  %v1747_v53 = vshll.u32 %v2887_v44, 16  ;;  %v2878_v17 = vld [vmem:[%s3377_s1 + $0xe0] sm:$0xff]  }
  0x21   : > { %2619 = vmatpush3.bf16.msra.mxu1 %v2855_v18  ;;  %2644 = vmatprep.subr.bf16.mxu0 %v2858_v29  ;;  %v2868_v18 = vld [vmem:[%s3377_s1 + $0x98] sm:$0xff]   ;;  %v3139_v28 = vsel %vm761_vm1, %v1364_v1, %v1366_v21  ;;  %v555_v39 = vshll.u32 %v2321_v26, 16  ;;  %v3162_v41 = vsel %vm761_vm1, %v773_v25, %v3092_v63 }
  0x22   : > { %2620 = vmatprep.subr.bf16.mxu1 %v2857_v24  ;;  %2622 = vmatprep.mubr.msk.bf16.mxu1 %vm348_vm0, %v508_v32  ;;  %v3144_v32 = vrot.slane %v1168_v19, 1  ;;  %v1739_v42 = vshll.u32 %v3148_v35, 16  ;;  %v1935_v43 = vrot.slane %v3148_v35, 1  ;;  %v1743_v46 = vshrl.u32 %v3148_v35, 16 }
  0x23   : > { %2646 = vmatprep.mubr.msk.bf16.mxu0 %vm348_vm0, %v764_v33  ;;  %v1172_v33 = vshrl.u32 %v3082_v59, 16  ;;  %v557_v56 = vrot.slane %v555_v39, 1  ;;  %v1176_v19 = vshll.u32 %v3108_v11, 16 }
  0x24   : > { %2645 = vmatpush3.bf16.msra.mxu0 %v2858_v29  ;;  %v546_v29 = vor.u32 %v544_v7, %v542_v22  ;;  %v3176_v50 = vsel %vm761_vm1, %v1364_v1, %v1935_v43  ;;  %v2872_v7 = vld [vmem:[%s3377_s1 + $0xc8] sm:$0xff]  }
  0x25   : > { %2621 = vmatpush3.bf16.msra.mxu1 %v2857_v24  ;;  %2686 = vmatprep.subr.bf16.mxu0 %v2860_v38  ;;  %v539_v24 = vor.u32 %v537_v3, %v535_v61  ;;  %v3168_v45 = vor.u32 %v1172_v33, %v3144_v32  ;;  %v1749_v61 = vrot.slane %v1747_v53, 1 }
  0x26   : > { %2662 = vmatprep.subr.bf16.mxu1 %v2859_v37  ;;  %v3158_v40 = vsel %vm498_vm2, %v546_v29, %v549_v30 }
  0x27   : > { %2647 = vmatmul.mubr.msk.bf16.vlgmr.msra.gmra.mrb[8].mxu0 %vm348_vm0, %v3058_v48  ;;  %v3151_v36 = vsel %vm498_vm2, %v539_v24, %v542_v22  ;;  %v1178_v22 = vrot.slane %v1176_v19, 1  ;;  %v2880_v24 = vld [vmem:[%s3377_s1 + $0xe8] sm:$0xff]  }
  0x28   : > { %2623 = vmatmul.mubr.msk.bf16.vlgmr.msra.gmra.mrb[8].mxu1 %vm348_vm0, %v3055_v47  ;;  %2687 = vmatpush3.bf16.msra.mxu0 %v2860_v38  ;;  %v551_v38 = vshrl.u32 %v3020_v23, 16 }
  0x29   : > { %2663 = vmatpush3.bf16.msra.mxu1 %v2859_v37  ;;  %2626 = vmatprep.mubr.msk.bf16.mxu1 %vm348_vm0, %v3065_v51  ;;  %v3154_v37 = vsel %vm761_vm1, %v771_v57, %v773_v25  ;;  %v777_v57 = vrot.slane %v2321_v26, 1  ;;  %v1179_v11 = vsel %vm498_vm2, %v3168_v45, %v1178_v22  ;;  %v2881_v25 = vld [vmem:[%s3377_s1 + $0x108] sm:$0xff]  }
  0x2a   : > { %2650 = vmatprep.mubr.msk.bf16.mxu0 %vm348_vm0, %v3068_v52  ;;  %2664 = vmatprep.subr.bf16.mxu1 %v2861_v49  ;;  %v553_v55 = vor.u32 %v551_v38, %v549_v30 }
  0x2b   : > { %2688 = vmatprep.subr.bf16.mxu0 %v2862_v54  ;;  %v778_v3 = vsel %vm761_vm1, %v3092_v63, %v777_v57  ;;  %v2876_v63 = vld [vmem:[%s3377_s1 + $0xb8] sm:$0xff]  }
  0x2c   : > { %2689 = vmatpush3.bf16.msra.mxu0 %v2862_v54  ;;  %v1937_v54 = vrot.slane %v2887_v44, 1  ;;  %v558_v1 = vsel %vm498_vm2, %v553_v55, %v557_v56  ;;  %v1171_v21 = vsel %vm498_vm2, %v553_v55, %v3144_v32 }
  0x2d   : > { %2665 = vmatpush3.bf16.msra.mxu1 %v2861_v49  ;;  %2690 = vmatprep.subr.bf16.mxu0 %v2864_v62  ;;  %v1741_v49 = vrot.slane %v1739_v42, 1 }
  0x2e   : > { %2666 = vmatprep.subr.bf16.mxu1 %v2863_v58 }
  0x2f   : > { %2651 = vmatmul.mubr.msk.bf16.gmra.mrb[12].mxu0 %vm348_vm0, %v3097_v2  ;;  %v1745_v60 = vor.u32 %v1743_v46, %v1741_v49 }
  0x30   : > { %2627 = vmatmul.mubr.msk.bf16.gmra.mrb[12].mxu1 %vm348_vm0, %v3102_v6  ;;  %2654 = vmatprep.mubr.msk.bf16.mxu0 %vm348_vm0, %v3118_v15 }
  0x31   : > { %2630 = vmatprep.mubr.msk.bf16.mxu1 %vm348_vm0, %v3115_v13  ;;  %2667 = vmatpush3.bf16.msra.mxu1 %v2863_v58  ;;  %v3184_v58 = vsel %vm498_vm2, %v3168_v45, %v1741_v49  ;;  %v3190_v0 = vsel %vm498_vm2, %v1745_v60, %v1749_v61 }
  0x32   : > { %2691 = vmatpush3.bf16.msra.mxu0 %v2864_v62  ;;  %2668 = vmatprep.subr.bf16.mxu1 %v2867_v9  ;;  %v3187_v62 = vsel %vm761_vm1, %v1935_v43, %v1937_v54 }
  0x33   : > { %2692 = vmatprep.subr.bf16.mxu0 %v2868_v18 }
  0x35   : > { %2669 = vmatpush3.bf16.msra.mxu1 %v2867_v9  ;;  %v2877_v9 = vld [vmem:[%s3377_s1 + $0xd8] sm:$0xff]  }
  0x36   : > { %2693 = vmatpush3.bf16.msra.mxu0 %v2868_v18  ;;  %2710 = vmatprep.subr.bf16.mxu1 %v2869_v27  ;;  %v2879_v18 = vld [vmem:[%s3377_s1 + $0x100] sm:$0xff]  }
  0x37   : > { %2734 = vmatprep.subr.bf16.mxu0 %v2870_v31  ;;  %2655 = vmatmul.mubr.msk.bf16.gmra.mrb[16].mxu0 %vm348_vm0, %v3154_v37 }
  0x38   : > { %2631 = vmatmul.mubr.msk.bf16.gmra.mrb[16].mxu1 %vm348_vm0, %v3151_v36  ;;  %2658 = vmatprep.mubr.msk.bf16.mxu0 %vm348_vm0, %v3162_v41 }
  0x39   : > { %2634 = vmatprep.mubr.msk.bf16.mxu1 %vm348_vm0, %v3158_v40 }
  0x3f   : > { %2659 = vmatmul.mubr.msk.bf16.gmra.mrb[20].mxu0 %vm348_vm0, %v778_v3 }
  0x40   : > { %2635 = vmatmul.mubr.msk.bf16.gmra.mrb[20].mxu1 %vm348_vm0, %v558_v1  ;;  %2694 = vmatprep.mubr.msk.bf16.mxu0 %vm348_vm0, %v3055_v47  ;;  %v2874_v47 = vld [vmem:[%s3377_s1 + $0xd0] sm:$0xff]  }
  0x41   : > { %2670 = vmatprep.mubr.msk.bf16.mxu1 %vm348_vm0, %v2984_v8  ;;  %v2873_v8 = vld [vmem:[%s3377_s1 + $0xb0] sm:$0xff]  }
  0x47   : > { %2695 = vmatmul.mubr.msk.bf16.vlgmr.msra.gmra.mrb[24].mxu0 %vm348_vm0, %v3065_v51 }
  0x48   : > { %2671 = vmatmul.mubr.msk.bf16.vlgmr.msra.gmra.mrb[24].mxu1 %vm348_vm0, %v2996_v14  ;;  %2735 = vmatpush3.bf16.msra.mxu0 %v2870_v31 }
  0x49   : > { %2711 = vmatpush3.bf16.msra.mxu1 %v2869_v27  ;;  %2674 = vmatprep.mubr.msk.bf16.mxu1 %vm348_vm0, %v3017_v20 }
  0x4a   : > { %2698 = vmatprep.mubr.msk.bf16.mxu0 %vm348_vm0, %v3102_v6  ;;  %2712 = vmatprep.subr.bf16.mxu1 %v2871_v4 }
  0x4b   : > { %2736 = vmatprep.subr.bf16.mxu0 %v2872_v7 }
  0x4c   : > { %2737 = vmatpush3.bf16.msra.mxu0 %v2872_v7 }
  0x4d   : > { %2713 = vmatpush3.bf16.msra.mxu1 %v2871_v4  ;;  %2738 = vmatprep.subr.bf16.mxu0 %v2874_v47 }
  0x4e   : > { %2714 = vmatprep.subr.bf16.mxu1 %v2873_v8 }
  0x4f   : > { %2699 = vmatmul.mubr.msk.bf16.gmra.mrb[28].mxu0 %vm348_vm0, %v3115_v13 }
  0x50   : > { %2675 = vmatmul.mubr.msk.bf16.gmra.mrb[28].mxu1 %vm348_vm0, %v2972_v5  ;;  %2702 = vmatprep.mubr.msk.bf16.mxu0 %vm348_vm0, %v3151_v36 }
  0x51   : > { %2678 = vmatprep.mubr.msk.bf16.mxu1 %vm348_vm0, %v2987_v10  ;;  %2715 = vmatpush3.bf16.msra.mxu1 %v2873_v8 }
  0x52   : > { %2739 = vmatpush3.bf16.msra.mxu0 %v2874_v47  ;;  %2716 = vmatprep.subr.bf16.mxu1 %v2876_v63 }
  0x53   : > { %2740 = vmatprep.subr.bf16.mxu0 %v2877_v9 }
  0x55   : > { %2717 = vmatpush3.bf16.msra.mxu1 %v2876_v63 }
  0x56   : > { %2741 = vmatpush3.bf16.msra.mxu0 %v2877_v9  ;;  %2758 = vmatprep.subr.bf16.mxu1 %v2878_v17 }
  0x57   : > { %2782 = vmatprep.subr.bf16.mxu0 %v2879_v18  ;;  %2703 = vmatmul.mubr.msk.bf16.gmra.mrb[32].mxu0 %vm348_vm0, %v3158_v40 }
  0x58   : > { %2679 = vmatmul.mubr.msk.bf16.gmra.mrb[32].mxu1 %vm348_vm0, %v3000_v16  ;;  %2706 = vmatprep.mubr.msk.bf16.mxu0 %vm348_vm0, %v1171_v21 }
  0x59   : > { %2682 = vmatprep.mubr.msk.bf16.mxu1 %vm348_vm0, %v3020_v23 }
  0x5f   : > { %2707 = vmatmul.mubr.msk.bf16.gmra.mrb[36].mxu0 %vm348_vm0, %v1179_v11 }
  0x60   : > { %2683 = vmatmul.mubr.msk.bf16.gmra.mrb[36].mxu1 %vm348_vm0, %v3082_v59  ;;  %2742 = vmatprep.mubr.msk.bf16.mxu0 %vm348_vm0, %v2996_v14  ;;  %v2882_v14 = vld [vmem:[%s3377_s1 + $0xf0] sm:$0xff]  }
  0x61   : > { %2718 = vmatprep.mubr.msk.bf16.mxu1 %vm348_vm0, %v3058_v48  ;;  %v2883_v48 = vld [vmem:[%s3377_s1 + $0x110] sm:$0xff]  }
  0x67   : > { %2743 = vmatmul.mubr.msk.bf16.vlgmr.msra.gmra.mrb[40].mxu0 %vm348_vm0, %v3017_v20  ;;  %v2885_v20 = vld [vmem:[%s3377_s1 + $0xf8] sm:$0xff]  }
  0x68   : > { %2719 = vmatmul.mubr.msk.bf16.vlgmr.msra.gmra.mrb[40].mxu1 %vm348_vm0, %v3068_v52  ;;  %2783 = vmatpush3.bf16.msra.mxu0 %v2879_v18 }
  0x69   : > { %2759 = vmatpush3.bf16.msra.mxu1 %v2878_v17  ;;  %2722 = vmatprep.mubr.msk.bf16.mxu1 %vm348_vm0, %v3097_v2 }
  0x6a   : > { %2746 = vmatprep.mubr.msk.bf16.mxu0 %vm348_vm0, %v2972_v5  ;;  %2760 = vmatprep.subr.bf16.mxu1 %v2880_v24  ;;  %v2886_v5 = vld [vmem:[%s3377_s1 + $0x118] sm:$0xff]  }
  0x6b   : > { %2784 = vmatprep.subr.bf16.mxu0 %v2881_v25 }
  0x6c   : > { %2785 = vmatpush3.bf16.msra.mxu0 %v2881_v25 }
  0x6d   : > { %2761 = vmatpush3.bf16.msra.mxu1 %v2880_v24  ;;  %2786 = vmatprep.subr.bf16.mxu0 %v2883_v48 }
  0x6e   : > { %2762 = vmatprep.subr.bf16.mxu1 %v2882_v14 }
  0x6f   : > { %2747 = vmatmul.mubr.msk.bf16.gmra.mrb[44].mxu0 %vm348_vm0, %v2987_v10 }
  0x70   : > { %2723 = vmatmul.mubr.msk.bf16.gmra.mrb[44].mxu1 %vm348_vm0, %v3118_v15  ;;  %2750 = vmatprep.mubr.msk.bf16.mxu0 %vm348_vm0, %v3000_v16 }
  0x71   : > { %2726 = vmatprep.mubr.msk.bf16.mxu1 %vm348_vm0, %v3154_v37  ;;  %2763 = vmatpush3.bf16.msra.mxu1 %v2882_v14 }
  0x72   : > { %2787 = vmatpush3.bf16.msra.mxu0 %v2883_v48  ;;  %2764 = vmatprep.subr.bf16.mxu1 %v2885_v20 }
  0x73   : > { %2788 = vmatprep.subr.bf16.mxu0 %v2886_v5 }
  0x75   : > { %2765 = vmatpush3.bf16.msra.mxu1 %v2885_v20 }
  0x76   : > { %2789 = vmatpush3.bf16.msra.mxu0 %v2886_v5 }
  0x77   : > { %2751 = vmatmul.mubr.msk.bf16.gmra.mrb[48].mxu0 %vm348_vm0, %v3020_v23 }
  0x78   : > { %2727 = vmatmul.mubr.msk.bf16.gmra.mrb[48].mxu1 %vm348_vm0, %v3162_v41  ;;  %2754 = vmatprep.mubr.msk.bf16.mxu0 %vm348_vm0, %v3082_v59 }
  0x79   : > { %2730 = vmatprep.mubr.msk.bf16.mxu1 %vm348_vm0, %v3112_v12 }
  0x7f   : > { %2755 = vmatmul.mubr.msk.bf16.gmra.mrb[52].mxu0 %vm348_vm0, %v3148_v35 }
  0x80   : > { %2731 = vmatmul.mubr.msk.bf16.gmra.mrb[52].mxu1 %vm348_vm0, %v3139_v28  ;;  %2790 = vmatprep.mubr.msk.bf16.mxu0 %vm348_vm0, %v3068_v52 }
  0x81   : > { %2766 = vmatprep.mubr.msk.bf16.mxu1 %vm348_vm0, %v3065_v51 }
  0x87   : > { %2791 = vmatmul.mubr.msk.bf16.vlgmr.msra.gmra.mrb[56].mxu0 %vm348_vm0, %v3097_v2 }
  0x88   : > { %2767 = vmatmul.mubr.msk.bf16.vlgmr.msra.gmra.mrb[56].mxu1 %vm348_vm0, %v3102_v6  ;;  %2794 = vmatprep.mubr.msk.bf16.mxu0 %vm348_vm0, %v3118_v15 }
  0x89   : > { %2770 = vmatprep.mubr.msk.bf16.mxu1 %vm348_vm0, %v3115_v13 }
  0x8f   : > { %2795 = vmatmul.mubr.msk.bf16.gmra.mrb[60].mxu0 %vm348_vm0, %v3154_v37 }
  0x90   : > { %2771 = vmatmul.mubr.msk.bf16.gmra.mrb[60].mxu1 %vm348_vm0, %v3151_v36  ;;  %2798 = vmatprep.mubr.msk.bf16.mxu0 %vm348_vm0, %v3162_v41 }
  0x91   : > { %2774 = vmatprep.mubr.msk.bf16.mxu1 %vm348_vm0, %v3158_v40 }
  0x97   : > { %2799 = vmatmul.mubr.msk.bf16.gmra.mrb[64].mxu0 %vm348_vm0, %v3112_v12 }
  0x98   : > { %2775 = vmatmul.mubr.msk.bf16.gmra.mrb[64].mxu1 %vm348_vm0, %v1171_v21  ;;  %2802 = vmatprep.mubr.msk.bf16.mxu0 %vm348_vm0, %v3176_v50 }
  0x99   : > { %2778 = vmatprep.mubr.msk.bf16.mxu1 %vm348_vm0, %v3184_v58 }
  0x9f   : > { %2803 = vmatmul.mubr.msk.bf16.gmra.mrb[68].mxu0 %vm348_vm0, %v3187_v62 }
  0xa0   : > { %2779 = vmatmul.mubr.msk.bf16.gmra.mrb[68].mxu1 %vm348_vm0, %v3190_v0 }
  0xea   : > { %v2600_v10 = vpop.f32.mrb[0].mxu0 }
  0xeb   : > { %v2608_v16 = vpop.f32.mrb[0].mxu1  ;;  %v407_v23 = vpop.f32.mrb[1].mxu0 }
  0xec   : > { %v439_v51 = vpop.f32.mrb[1].mxu1  ;;  %v2601_v52 = vpop.f32.mrb[2].mxu0 }
  0xed   : > { %v2609_v59 = vpop.f32.mrb[2].mxu1  ;;  %v410_v2 = vpop.f32.mrb[3].mxu0 }
  0xee   : > { %v442_v6 = vpop.f32.mrb[3].mxu1 }
  0xf2   : > { %v2604_v12 = vpop.f32.mrb[4].mxu0 }
  0xf3   : > { %v2612_v13 = vpop.f32.mrb[4].mxu1  ;;  %v423_v15 = vpop.f32.mrb[5].mxu0 }
  0xf4   : > { %v455_v26 = vpop.f32.mrb[5].mxu1  ;;  %v2605_v27 = vpop.f32.mrb[6].mxu0 }
  0xf5   : > { %v2613_v28 = vpop.f32.mrb[6].mxu1  ;;  %v426_v29 = vpop.f32.mrb[7].mxu0 }
  0xf6   : > { %v458_v30 = vpop.f32.mrb[7].mxu1 }
  0xfa   : > { %v2648_v32 = vpop.f32.mrb[8].mxu0 }
  0xfb   : > { %v2624_v31 = vpop.f32.mrb[8].mxu1  ;;  %v861_v35 = vpop.f32.mrb[9].mxu0 }
  0xfc   : > { %v722_v33 = vadd.f32 %v2624_v31, %v2600_v10  ;;  %v641_v34 = vpop.f32.mrb[9].mxu1  ;;  %v2649_v38 = vpop.f32.mrb[10].mxu0 }
  0xfd   : > { %v720_v36 = vadd.f32 %v641_v34, %v407_v23  ;;  %v2625_v37 = vpop.f32.mrb[10].mxu1  ;;  %v864_v41 = vpop.f32.mrb[11].mxu0 }
  0xfe   : > { %v942_v39 = vadd.f32 %v2648_v32, %v722_v33  ;;  %v644_v40 = vpop.f32.mrb[11].mxu1 }
  0xff   : > { %v940_v42 = vadd.f32 %v861_v35, %v720_v36 }
 0x102   : > { %v2652_v44 = vpop.f32.mrb[12].mxu0 }
 0x103   : > { %v2628_v43 = vpop.f32.mrb[12].mxu1  ;;  %v877_v49 = vpop.f32.mrb[13].mxu0 }
 0x104   : > { %v726_v45 = vadd.f32 %v2628_v43, %v2604_v12  ;;  %v657_v46 = vpop.f32.mrb[13].mxu1  ;;  %v2653_v54 = vpop.f32.mrb[14].mxu0 }
 0x105   : > { %v724_v50 = vadd.f32 %v657_v46, %v423_v15  ;;  %v2629_v53 = vpop.f32.mrb[14].mxu1  ;;  %v880_v57 = vpop.f32.mrb[15].mxu0 }
 0x106   : > { %v946_v55 = vadd.f32 %v2652_v44, %v726_v45  ;;  %v660_v56 = vpop.f32.mrb[15].mxu1 }
 0x107   : > { %v944_v58 = vadd.f32 %v877_v49, %v724_v50 }
 0x10a   : > { %v2656_v61 = vpop.f32.mrb[16].mxu0 }
 0x10b   : > { %v2632_v60 = vpop.f32.mrb[16].mxu1  ;;  %v893_v1 = vpop.f32.mrb[17].mxu0 }
 0x10c   : > { %v730_v62 = vadd.f32 %v2632_v60, %v2608_v16  ;;  %v673_v0 = vpop.f32.mrb[17].mxu1  ;;  %v2657_v7 = vpop.f32.mrb[18].mxu0 }
 0x10d   : > { %v728_v3 = vadd.f32 %v673_v0, %v439_v51  ;;  %v2633_v4 = vpop.f32.mrb[18].mxu1  ;;  %v896_v63 = vpop.f32.mrb[19].mxu0 }
 0x10e   : > { %v950_v8 = vadd.f32 %v2656_v61, %v730_v62  ;;  %v676_v47 = vpop.f32.mrb[19].mxu1 }
 0x10f   : > { %v948_v9 = vadd.f32 %v893_v1, %v728_v3 }
 0x112   : > { %v2660_v18 = vpop.f32.mrb[20].mxu0 }
 0x113   : > { %v2636_v17 = vpop.f32.mrb[20].mxu1  ;;  %v909_v22 = vpop.f32.mrb[21].mxu0 }
 0x114   : > { %v734_v19 = vadd.f32 %v2636_v17, %v2612_v13  ;;  %v689_v21 = vpop.f32.mrb[21].mxu1  ;;  %v2661_v25 = vpop.f32.mrb[22].mxu0 }
 0x115   : > { %v732_v11 = vadd.f32 %v689_v21, %v455_v26  ;;  %v2637_v24 = vpop.f32.mrb[22].mxu1  ;;  %v912_v20 = vpop.f32.mrb[23].mxu0 }
 0x116   : > { %v954_v14 = vadd.f32 %v2660_v18, %v734_v19  ;;  %v692_v48 = vpop.f32.mrb[23].mxu1 }
 0x117   : > { %v952_v5 = vadd.f32 %v909_v22, %v732_v11 }
 0x11a   : > { %v2696_v16 = vpop.f32.mrb[24].mxu0 }
 0x11b   : > { %v2672_v10 = vpop.f32.mrb[24].mxu1  ;;  %v1244_v52 = vpop.f32.mrb[25].mxu0 }
 0x11c   : > { %v1126_v23 = vadd.f32 %v2672_v10, %v942_v39  ;;  %v1045_v51 = vpop.f32.mrb[25].mxu1  ;;  %v2697_v6 = vpop.f32.mrb[26].mxu0 }
 0x11d   : > { %v1124_v59 = vadd.f32 %v1045_v51, %v940_v42  ;;  %v2673_v2 = vpop.f32.mrb[26].mxu1  ;;  %v1247_v13 = vpop.f32.mrb[27].mxu0 }
 0x11e   : > { %v1325_v12 = vadd.f32 %v2696_v16, %v1126_v23  ;;  %v1048_v15 = vpop.f32.mrb[27].mxu1 }
 0x11f   : > { %v1323_v27 = vadd.f32 %v1244_v52, %v1124_v59 }
 0x122   : > { %v2700_v26 = vpop.f32.mrb[28].mxu0 }
 0x123   : > { %v2676_v28 = vpop.f32.mrb[28].mxu1  ;;  %v1260_v31 = vpop.f32.mrb[29].mxu0 }
 0x124   : > { %v1130_v29 = vadd.f32 %v2676_v28, %v946_v55  ;;  %v1061_v30 = vpop.f32.mrb[29].mxu1  ;;  %v2701_v34 = vpop.f32.mrb[30].mxu0 }
 0x125   : > { %v1128_v32 = vadd.f32 %v1061_v30, %v944_v58  ;;  %v2677_v33 = vpop.f32.mrb[30].mxu1  ;;  %v1263_v37 = vpop.f32.mrb[31].mxu0 }
 0x126   : > { %v1329_v35 = vadd.f32 %v2700_v26, %v1130_v29  ;;  %v1064_v36 = vpop.f32.mrb[31].mxu1 }
 0x127   : > { %v1327_v38 = vadd.f32 %v1260_v31, %v1128_v32 }
 0x12a   : > { %v2704_v40 = vpop.f32.mrb[32].mxu0 }
 0x12b   : > { %v2680_v39 = vpop.f32.mrb[32].mxu1  ;;  %v1276_v43 = vpop.f32.mrb[33].mxu0 }
 0x12c   : > { %v1134_v41 = vadd.f32 %v2680_v39, %v950_v8  ;;  %v1077_v42 = vpop.f32.mrb[33].mxu1  ;;  %v2705_v46 = vpop.f32.mrb[34].mxu0 }
 0x12d   : > { %v1132_v44 = vadd.f32 %v1077_v42, %v948_v9  ;;  %v2681_v45 = vpop.f32.mrb[34].mxu1  ;;  %v1279_v53 = vpop.f32.mrb[35].mxu0 }
 0x12e   : > { %v1333_v49 = vadd.f32 %v2704_v40, %v1134_v41  ;;  %v1080_v50 = vpop.f32.mrb[35].mxu1 }
 0x12f   : > { %v1331_v54 = vadd.f32 %v1276_v43, %v1132_v44 }
 0x132   : > { %v2708_v56 = vpop.f32.mrb[36].mxu0 }
 0x133   : > { %v2684_v55 = vpop.f32.mrb[36].mxu1  ;;  %v1292_v60 = vpop.f32.mrb[37].mxu0 }
 0x134   : > { %v1138_v57 = vadd.f32 %v2684_v55, %v954_v14  ;;  %v1093_v58 = vpop.f32.mrb[37].mxu1  ;;  %v2709_v0 = vpop.f32.mrb[38].mxu0 }
 0x135   : > { %v1136_v61 = vadd.f32 %v1093_v58, %v952_v5  ;;  %v2685_v62 = vpop.f32.mrb[38].mxu1  ;;  %v1295_v4 = vpop.f32.mrb[39].mxu0 }
 0x136   : > { %v1337_v1 = vadd.f32 %v2708_v56, %v1138_v57  ;;  %v1096_v3 = vpop.f32.mrb[39].mxu1  ;;  %v3342_v56 = vld [vmem:[%s3378_s2] ss:$0 sm:$0xff] }
 0x137   : > { %v1335_v7 = vadd.f32 %v1292_v60, %v1136_v61 }
 0x13a   : > { %v2744_v47 = vpop.f32.mrb[40].mxu0 }
 0x13b   : > { %v2720_v8 = vpop.f32.mrb[40].mxu1  ;;  %v1616_v17 = vpop.f32.mrb[41].mxu0 }
 0x13c   : > { %v1513_v63 = vadd.f32 %v2720_v8, %v1325_v12  ;;  %v1432_v9 = vpop.f32.mrb[41].mxu1  ;;  %v2745_v21 = vpop.f32.mrb[42].mxu0 }
 0x13d   : > { %v1511_v18 = vadd.f32 %v1432_v9, %v1323_v27  ;;  %v2721_v19 = vpop.f32.mrb[42].mxu1  ;;  %v1619_v24 = vpop.f32.mrb[43].mxu0 }
 0x13e   : > { %v1697_v22 = vadd.f32 %v2744_v47, %v1513_v63  ;;  %v1435_v11 = vpop.f32.mrb[43].mxu1 }
 0x13f   : > { %v1695_v25 = vadd.f32 %v1616_v17, %v1511_v18 }
 0x142   : > { %v2748_v48 = vpop.f32.mrb[44].mxu0 }
 0x143   : > { %v2724_v14 = vpop.f32.mrb[44].mxu1  ;;  %v1632_v10 = vpop.f32.mrb[45].mxu0 }
 0x144   : > { %v1517_v20 = vadd.f32 %v2724_v14, %v1329_v35  ;;  %v1448_v5 = vpop.f32.mrb[45].mxu1  ;;  %v2749_v51 = vpop.f32.mrb[46].mxu0 }
 0x145   : > { %v1515_v16 = vadd.f32 %v1448_v5, %v1327_v38  ;;  %v2725_v23 = vpop.f32.mrb[46].mxu1  ;;  %v1635_v2 = vpop.f32.mrb[47].mxu0 }
 0x146   : > { %v1701_v52 = vadd.f32 %v2748_v48, %v1517_v20  ;;  %v1451_v59 = vpop.f32.mrb[47].mxu1 }
 0x147   : > { %v1699_v6 = vadd.f32 %v1632_v10, %v1515_v16 }
 0x14a   : > { %v2752_v15 = vpop.f32.mrb[48].mxu0 }
 0x14b   : > { %v2728_v12 = vpop.f32.mrb[48].mxu1  ;;  %v1648_v28 = vpop.f32.mrb[49].mxu0 }
 0x14c   : > { %v1521_v13 = vadd.f32 %v2728_v12, %v1333_v49  ;;  %v1464_v27 = vpop.f32.mrb[49].mxu1  ;;  %v2753_v30 = vpop.f32.mrb[50].mxu0 }
 0x14d   : > { %v1519_v26 = vadd.f32 %v1464_v27, %v1331_v54  ;;  %v2729_v29 = vpop.f32.mrb[50].mxu1  ;;  %v1651_v33 = vpop.f32.mrb[51].mxu0 }
 0x14e   : > { %v1705_v31 = vadd.f32 %v2752_v15, %v1521_v13  ;;  %v1467_v32 = vpop.f32.mrb[51].mxu1 }
 0x14f   : > { %v1703_v34 = vadd.f32 %v1648_v28, %v1519_v26 }
 0x152   : > { %v2756_v36 = vpop.f32.mrb[52].mxu0 }
 0x153   : > { %v2732_v35 = vpop.f32.mrb[52].mxu1  ;;  %v1664_v39 = vpop.f32.mrb[53].mxu0 }
 0x154   : > { %v1525_v37 = vadd.f32 %v2732_v35, %v1337_v1  ;;  %v1480_v38 = vpop.f32.mrb[53].mxu1  ;;  %v2757_v42 = vpop.f32.mrb[54].mxu0 }
 0x155   : > { %v1523_v40 = vadd.f32 %v1480_v38, %v1335_v7  ;;  %v2733_v41 = vpop.f32.mrb[54].mxu1  ;;  %v1667_v45 = vpop.f32.mrb[55].mxu0 }
 0x156   : > { %v1709_v43 = vadd.f32 %v2756_v36, %v1525_v37  ;;  %v1483_v44 = vpop.f32.mrb[55].mxu1 }
 0x157   : > { %v3337_v46 = vadd.f32 %v1664_v39, %v1523_v40 }
 0x15a   : > { %v2792_v50 = vpop.f32.mrb[56].mxu0 }
 0x15b   : > { %v2768_v49 = vpop.f32.mrb[56].mxu1  ;;  %v2003_v55 = vpop.f32.mrb[57].mxu0 }
 0x15c   : > { %v1896_v53 = vadd.f32 %v2768_v49, %v1697_v22  ;;  %v1815_v54 = vpop.f32.mrb[57].mxu1  ;;  %v2793_v60 = vpop.f32.mrb[58].mxu0 }
 0x15d   : > { %v1894_v57 = vadd.f32 %v1815_v54, %v1695_v25  ;;  %v2769_v58 = vpop.f32.mrb[58].mxu1  ;;  %v2006_v0 = vpop.f32.mrb[59].mxu0 }
 0x15e   : > { %v2084_v61 = vadd.f32 %v2792_v50, %v1896_v53  ;;  %v1818_v62 = vpop.f32.mrb[59].mxu1 }
 0x15f   : > { %v2082_v1 = vadd.f32 %v2003_v55, %v1894_v57 }
 0x160   : > { %v2130_v3 = vadd.f32 %v3342_v56, %v2084_v61 }
 0x161   : > { %v2129_v4 = vadd.f32 %v3342_v56, %v2082_v1 }
 0x162   : > { %v2138_v7 = vmax.f32 %v2130_v3, 0.0  ;;  %v2796_v63 = vpop.f32.mrb[60].mxu0 }
 0x163   : > { %v2137_v8 = vmax.f32 %v2129_v4, 0.0  ;;  %v2772_v47 = vpop.f32.mrb[60].mxu1  ;;  %v2019_v18 = vpop.f32.mrb[61].mxu0 }
 0x164   : > { %2146 = vst [vmem:[%s3349_s29 + $0x8] sm:$0xff] %v2138_v7  ;;  %v1900_v9 = vadd.f32 %v2772_v47, %v1701_v52  ;;  %v1831_v17 = vpop.f32.mrb[61].mxu1  ;;  %v2797_v22 = vpop.f32.mrb[62].mxu0 }
 0x165   : > { %2145 = vst [vmem:[%s3349_s29] sm:$0xff] %v2137_v8  ;;  %v1898_v19 = vadd.f32 %v1831_v17, %v1699_v6  ;;  %v2773_v21 = vpop.f32.mrb[62].mxu1  ;;  %v2022_v25 = vpop.f32.mrb[63].mxu0 }
 0x166   : > { %v2088_v11 = vadd.f32 %v2796_v63, %v1900_v9  ;;  %v1834_v24 = vpop.f32.mrb[63].mxu1 }
 0x167   : > { %v2086_v14 = vadd.f32 %v2019_v18, %v1898_v19 }
 0x168   : > { %v2132_v48 = vadd.f32 %v3342_v56, %v2088_v11 }
 0x169   : > { %v2131_v20 = vadd.f32 %v3342_v56, %v2086_v14 }
 0x16a   : > { %v2140_v5 = vmax.f32 %v2132_v48, 0.0  ;;  %v2800_v23 = vpop.f32.mrb[64].mxu0 }
 0x16b   : > { %v2139_v10 = vmax.f32 %v2131_v20, 0.0  ;;  %v2776_v16 = vpop.f32.mrb[64].mxu1  ;;  %v2035_v59 = vpop.f32.mrb[65].mxu0 }
 0x16c   : > { %2148 = vst [vmem:[%s3349_s29 + $0x18] sm:$0xff] %v2140_v5  ;;  %v1904_v51 = vadd.f32 %v2776_v16, %v1705_v31  ;;  %v1847_v52 = vpop.f32.mrb[65].mxu1  ;;  %v2801_v12 = vpop.f32.mrb[66].mxu0 }
 0x16d   : > { %2147 = vst [vmem:[%s3349_s29 + $0x10] sm:$0xff] %v2139_v10  ;;  %v1902_v2 = vadd.f32 %v1847_v52, %v1703_v34  ;;  %v2777_v6 = vpop.f32.mrb[66].mxu1  ;;  %v2038_v27 = vpop.f32.mrb[67].mxu0 }
 0x16e   : > { %v2092_v15 = vadd.f32 %v2800_v23, %v1904_v51  ;;  %v1850_v13 = vpop.f32.mrb[67].mxu1 }
 0x16f   : > { %v2090_v28 = vadd.f32 %v2035_v59, %v1902_v2 }
 0x170   : > { %v2134_v26 = vadd.f32 %v3342_v56, %v2092_v15 }
 0x171   : > { %v2133_v29 = vadd.f32 %v3342_v56, %v2090_v28 }
 0x172   : > { %v2142_v30 = vmax.f32 %v2134_v26, 0.0  ;;  %v2804_v31 = vpop.f32.mrb[68].mxu0 }
 0x173   : > { %v2141_v32 = vmax.f32 %v2133_v29, 0.0  ;;  %v2780_v33 = vpop.f32.mrb[68].mxu1  ;;  %v2051_v36 = vpop.f32.mrb[69].mxu0 }
 0x174   : > { %2150 = vst [vmem:[%s3349_s29 + $0x28] sm:$0xff] %v2142_v30  ;;  %v1908_v35 = vadd.f32 %v2780_v33, %v1709_v43  ;;  %v1863_v34 = vpop.f32.mrb[69].mxu1  ;;  %v2805_v39 = vpop.f32.mrb[70].mxu0 }
 0x175   : > { %2149 = vst [vmem:[%s3349_s29 + $0x20] sm:$0xff] %v2141_v32  ;;  %v1906_v37 = vadd.f32 %v1863_v34, %v3337_v46  ;;  %v2781_v38 = vpop.f32.mrb[70].mxu1  ;;  %v2054_v42 = vpop.f32.mrb[71].mxu0 }
 0x176   : > { %v2096_v40 = vadd.f32 %v2804_v31, %v1908_v35  ;;  %v1866_v41 = vpop.f32.mrb[71].mxu1 }
 0x177   : > { %v2094_v44 = vadd.f32 %v2051_v36, %v1906_v37 }
 0x178   : > { %v2136_v45 = vadd.f32 %v3342_v56, %v2096_v40 }
 0x179   : > { %v2135_v49 = vadd.f32 %v3342_v56, %v2094_v44 }
 0x17a   : > { %v2144_v50 = vmax.f32 %v2136_v45, 0.0 }
 0x17b   : > { %v2143_v53 = vmax.f32 %v2135_v49, 0.0 }
 0x17c   : > { %2152 = vst [vmem:[%s3349_s29 + $0x38] sm:$0xff] %v2144_v50 }
 0x17d   : > { %2151 = vst [vmem:[%s3349_s29 + $0x30] sm:$0xff] %v2143_v53 }
 0x17e PF: > { %s13_s14 = sadd.s32 1, %s2910_s14   ;;  %s3380_s12 = smov %s2906_s13 }
 0x17f   : > { %p10_p5 = scmp.ge.s32.totalorder %s13_s14, 4   ;;  %s3381_s13 = smov %s3383_s15 }
 0x181   :  { %12 = sbr.rel (!%p10_p5) target bundleno = 2 (0x2), region = 76 }

// kernel: _lambda_.8
= control target key start
LH: loop header
LB: loop body
LE: loop exit
PB: predicated region body
PF: predicated region fallthrough
CT: control target
= control target key end

     0   :  { %s3579_s12 = smov 0   ;;  %s3581_s13 = smov 0   ;;  %s4109_s0 = inlined_call_operand.vmem [shape: bf16[2,1,11,16,128], index: 0, kind: input, shape index: {}]   ;;  %s4110_s1 = inlined_call_operand.vmem [shape: bf16[3,3,128,128], index: 1, kind: input, shape index: {}]   ;;  %s4111_s2 = inlined_call_operand.vmem [shape: f32[1,128], index: 2, kind: input, shape index: {}]   ;;  %s4112_s3 = inlined_call_operand.vmem [shape: f32[2,4,4,128], index: 3, kind: output, shape index: {}]  }
   0x1   :  { %s3583_s14 = smov 0  }
   0x2 LB: > { %s32_s15 = sadd.s32 1, %s3552_s13  ;;  %p2754_p0 = scmp.ge.s32.totalorder %s3556_s14, 1  ;;  %s3556_s14 = sphi %s3583_s14, %s13_s14   ;;  %s3552_s13 = sphi %s3581_s13, %s4114_s13   ;;  %s3548_s12 = sphi %s3579_s12, %s4113_s12  }
   0x3   : > { %p34_p1 = scmp.ge.s32.totalorder %s32_s15, 2  ;;  %p183_p2 = scmp.lt.s32.totalorder %s3556_s14, 3 }
   0x5   : > { %s4116_s15 = smov (%p34_p1, %s32_s15), 0  ;;  %p184_p3 = pnand %p2754_p0, %p183_p2 }
   0x6   : > { %v3449_v0 = vld [vmem:[%s4110_s1] sm:$0xff] (!%p184_p3)   ;;  %p225_p4 = scmp.lt.s32.totalorder (!%p184_p3), %s3548_s12, 1  ;;  %v3451_v2 = vld [vmem:[%s4110_s1 + $0x8] sm:$0xff] (!%p184_p3)   ;;  %v3453_v4 = vld [vmem:[%s4110_s1 + $0x10] sm:$0xff] (!%p184_p3)   ;;  %vm521_vm0 = vsmask.f32 (!%p184_p3), 7424 }
   0x7   : > { %187 = sbr.rel (%p184_p3) target bundleno = 435 (0x1b3), region = 32  ;;  %v3450_v1 = vld [vmem:[%s4110_s1 + $0x40] sm:$0xff] (!%p184_p3)   ;;  %3119 = vmatprep.subr.bf16.mxu0 (!%p184_p3), %v3449_v0  ;;  %v3452_v3 = vld [vmem:[%s4110_s1 + $0x48] sm:$0xff] (!%p184_p3)   ;;  %v3454_v5 = vld [vmem:[%s4110_s1 + $0x50] sm:$0xff] (!%p184_p3)   ;;  %vm808_vm1 = vcmask (!%p184_p3), 1046528   ;;  %vm2466_vm2 = vcmask (!%p184_p3), 1041408  }
   0x8   : > { %3151 = vmatprep.subr.bf16.mxu1 (!%p184_p3), %v3450_v1  ;;  %3120 = vmatpush3.bf16.msra.mxu0 (!%p184_p3), %v3449_v0  ;;  %v3455_v6 = vld [vmem:[%s4110_s1 + $0x18] sm:$0xff] (!%p184_p3)   ;;  %v3457_v8 = vld [vmem:[%s4110_s1 + $0x20] sm:$0xff] (!%p184_p3)   ;;  %v3459_v10 = vld [vmem:[%s4110_s1 + $0x28] sm:$0xff] (!%p184_p3)   ;;  %vm2595_vm3 = vcmask (!%p184_p3), 1041409   ;;  %vm2597_vm4 = vcmask (!%p184_p3), 1042434   ;;  %vm2599_vm5 = vcmask (!%p184_p3), 1043459  }
   0x9   : > { %3152 = vmatpush3.bf16.msra.mxu1 (!%p184_p3), %v3450_v1  ;;  %3121 = vmatprep.subr.bf16.mxu0 (!%p184_p3), %v3451_v2  ;;  %v3456_v7 = vld [vmem:[%s4110_s1 + $0x58] sm:$0xff] (!%p184_p3)   ;;  %v3458_v9 = vld [vmem:[%s4110_s1 + $0x60] sm:$0xff] (!%p184_p3)   ;;  %v3460_v11 = vld [vmem:[%s4110_s1 + $0x68] sm:$0xff] (!%p184_p3)  }
   0xa   : > { %3153 = vmatprep.subr.bf16.mxu1 (!%p184_p3), %v3452_v3  ;;  %v3461_v16 = vld [vmem:[%s4110_s1 + $0x30] sm:$0xff] (!%p184_p3)   ;;  %v3463_v23 = vld [vmem:[%s4110_s1 + $0x38] sm:$0xff] (!%p184_p3)   ;;  %v3468_v29 = vld [vmem:[%s4110_s1 + $0x80] sm:$0xff] (!%p184_p3)  }
   0xb   : > { %v3462_v20 = vld [vmem:[%s4110_s1 + $0x70] sm:$0xff] (!%p184_p3)   ;;  %v3464_v28 = vld [vmem:[%s4110_s1 + $0x78] sm:$0xff] (!%p184_p3)   ;;  %v3469_v35 = vld [vmem:[%s4110_s1 + $0xc0] sm:$0xff] (!%p184_p3)  }
   0xc   : > { %3122 = vmatpush3.bf16.msra.mxu0 (!%p184_p3), %v3451_v2  ;;  %v3470_v36 = vld [vmem:[%s4110_s1 + $0x88] sm:$0xff] (!%p184_p3)   ;;  %v3474_v46 = vld [vmem:[%s4110_s1 + $0x90] sm:$0xff] (!%p184_p3)   ;;  %v3476_v52 = vld [vmem:[%s4110_s1 + $0x98] sm:$0xff] (!%p184_p3)  }
   0xd   : > { %3154 = vmatpush3.bf16.msra.mxu1 (!%p184_p3), %v3452_v3  ;;  %3123 = vmatprep.subr.bf16.mxu0 (!%p184_p3), %v3453_v4  ;;  %v3471_v43 = vld [vmem:[%s4110_s1 + $0xc8] sm:$0xff] (!%p184_p3)   ;;  %v3475_v51 = vld [vmem:[%s4110_s1 + $0xd0] sm:$0xff] (!%p184_p3)   ;;  %v3477_v55 = vld [vmem:[%s4110_s1 + $0xd8] sm:$0xff] (!%p184_p3)  }
   0xe   : > { %s4118_s12 = smov (!%p225_p4, %s3548_s12), 1  ;;  %3155 = vmatprep.subr.bf16.mxu1 %v3454_v5  ;;  %v3480_v2 = vld [vmem:[%s4110_s1 + $0xa0] sm:$0xff]  }
   0xf   : > { %s3423_s5 = smul.u32 88, %s4118_s12 }
  0x10   : > { %3124 = vmatpush3.bf16.msra.mxu0 %v3453_v4  ;;  %v3481_v4 = vld [vmem:[%s4110_s1 + $0xe0] sm:$0xff]  }
  0x11   : > { %3156 = vmatpush3.bf16.msra.mxu1 %v3454_v5  ;;  %3125 = vmatprep.subr.bf16.mxu0 %v3455_v6  ;;  %s3633_s16 = scalar_lea.vmem %s4109_s0, %s3423_s5  ;;  %v3482_v5 = vld [vmem:[%s4110_s1 + $0xa8] sm:$0xff]   ;;  %s2974_s5 = sshll.u32 %s4118_s12, 4 }
  0x12   : > { %3157 = vmatprep.subr.bf16.mxu1 %v3456_v7  ;;  %v3642_v12 = vld [vmem:[%s3633_s16] sm:$0xff]   ;;  %v3645_v13 = vld [vmem:[%s3633_s16 + $0x8] sm:$0xff]   ;;  %v3655_v19 = vld [vmem:[%s3633_s16 + $0x10] sm:$0xff]   ;;  %s4066_s8 = scalar_lea.vmem %s4112_s3, %s2974_s5 }
  0x13   : > { %3135 = vmatprep.mubr.bf16.mxu0 %v3642_v12  ;;  %v523_v14 = vshrl.u32 %v3642_v12, 16  ;;  %v525_v15 = vshll.u32 %v3642_v12, 16  ;;  %v530_v17 = vshll.u32 %v3645_v13, 16  ;;  %v534_v24 = vshrl.u32 %v3645_v13, 16  ;;  %v3667_v27 = vld [vmem:[%s3633_s16 + $0x18] sm:$0xff]   ;;  %v3678_v34 = vld [vmem:[%s3633_s16 + $0x20] sm:$0xff]  }
  0x14   : > { %3126 = vmatpush3.bf16.msra.mxu0 %v3455_v6  ;;  %v538_v26 = vshll.u32 %v3655_v19, 16  ;;  %v542_v30 = vshrl.u32 %v3655_v19, 16  ;;  %v546_v31 = vshll.u32 %v3667_v27, 16  ;;  %v3687_v39 = vld [vmem:[%s3633_s16 + $0x28] sm:$0xff]   ;;  %v550_v41 = vshrl.u32 %v3667_v27, 16  ;;  %v3708_v50 = vld [vmem:[%s3633_s16 + $0x30] sm:$0xff]  }
  0x15   : > { %3158 = vmatpush3.bf16.msra.mxu1 %v3456_v7  ;;  %3127 = vmatprep.subr.bf16.mxu0 %v3457_v8  ;;  %v527_v18 = vrot.slane %v525_v15, 1  ;;  %v532_v21 = vrot.slane %v530_v17, 1  ;;  %v554_v42 = vshll.u32 %v3678_v34, 16  ;;  %v562_v44 = vshll.u32 %v3687_v39, 16  ;;  %v3719_v54 = vld [vmem:[%s3633_s16 + $0x38] sm:$0xff]   ;;  %v3487_v17 = vld [vmem:[%s4110_s1 + $0xb0] sm:$0xff]  }
  0x16   : > { %3159 = vmatprep.subr.bf16.mxu1 %v3458_v9  ;;  %v540_v33 = vrot.slane %v538_v26, 1  ;;  %v548_v38 = vrot.slane %v546_v31, 1  ;;  %v558_v47 = vshrl.u32 %v3678_v34, 16  ;;  %v566_v58 = vshrl.u32 %v3687_v39, 16  ;;  %v3730_v60 = vld [vmem:[%s3633_s16 + $0x40] sm:$0xf] }
  0x17   : > { %v528_v22 = vor.u32 %v527_v18, %v523_v14  ;;  %v536_v32 = vor.u32 %v534_v24, %v532_v21  ;;  %v556_v49 = vrot.slane %v554_v42, 1  ;;  %v564_v53 = vrot.slane %v562_v44, 1  ;;  %v3488_v18 = vld [vmem:[%s4110_s1 + $0xf0] sm:$0xff]   ;;  %v3490_v24 = vld [vmem:[%s4110_s1 + $0xf8] sm:$0xff]   ;;  %v3491_v26 = vld [vmem:[%s4110_s1 + $0x100] sm:$0xff]  }
  0x18   : > { %3128 = vmatpush3.bf16.msra.mxu0 %v3457_v8  ;;  %v544_v37 = vor.u32 %v542_v30, %v540_v33  ;;  %v552_v48 = vor.u32 %v550_v41, %v548_v38  ;;  %v570_v59 = vshll.u32 %v3708_v50, 16  ;;  %v574_v62 = vshrl.u32 %v3708_v50, 16  ;;  %v3493_v31 = vld [vmem:[%s4110_s1 + $0x108] sm:$0xff]   ;;  %v3497_v41 = vld [vmem:[%s4110_s1 + $0x118] sm:$0xff]  }
  0x19   : > { %3160 = vmatpush3.bf16.msra.mxu1 %v3458_v9  ;;  %3129 = vmatprep.subr.bf16.mxu0 %v3459_v10  ;;  %v533_v25 = vsel %vm521_vm0, %v528_v22, %v532_v21  ;;  %v3690_v40 = vsel %vm521_vm0, %v536_v32, %v540_v33  ;;  %v560_v56 = vor.u32 %v558_v47, %v556_v49  ;;  %v578_v63 = vshll.u32 %v3719_v54, 16  ;;  %v3494_v32 = vld [vmem:[%s4110_s1 + $0x148] sm:$0xff]   ;;  %v3498_v42 = vld [vmem:[%s4110_s1 + $0x158] sm:$0xff]   ;;  %v3500_v47 = vld [vmem:[%s4110_s1 + $0x160] sm:$0xff]  }
  0x1a   : > { %3161 = vmatprep.subr.bf16.mxu1 %v3460_v11  ;;  %3167 = vmatprep.mubr.bf16.mxu1 %v533_v25  ;;  %v3701_v45 = vsel %vm521_vm0, %v544_v37, %v548_v38  ;;  %v3725_v57 = vsel %vm521_vm0, %v552_v48, %v556_v49  ;;  %v568_v0 = vor.u32 %v566_v58, %v564_v53  ;;  %v572_v1 = vrot.slane %v570_v59, 1  ;;  %v3503_v58 = vld [vmem:[%s4110_s1 + $0x130] sm:$0xff]  }
  0x1b   : > { %v3735_v61 = vsel %vm521_vm0, %v560_v56, %v564_v53  ;;  %v3744_v3 = vcombine.low %v3730_v60, %v3730_v60  ;;  %v580_v7 = vrot.slane %v578_v63, 1  ;;  %v582_v9 = vshrl.u32 %v3719_v54, 16  ;;  %v272_v56 = vld [vmem:[%s3633_s16 + $0x44] sm:$0xf]  ;;  %v3504_v59 = vld [vmem:[%s4110_s1 + $0x170] sm:$0xff]  }
  0x1c   : > { %3130 = vmatpush3.bf16.msra.mxu0 %v3459_v10  ;;  %v576_v6 = vor.u32 %v574_v62, %v572_v1  ;;  %v3755_v8 = vsel %vm521_vm0, %v568_v0, %v572_v1  ;;  %v810_v21 = vrot.slane %v3645_v13, 1  ;;  %v812_v25 = vrot.slane %v3655_v19, 1  ;;  %v3505_v0 = vld [vmem:[%s4110_s1 + $0x138] sm:$0xff]  }
  0x1d   : > { %3162 = vmatpush3.bf16.msra.mxu1 %v3460_v11  ;;  %3131 = vmatprep.subr.bf16.mxu0 %v3461_v16  ;;  %v586_v10 = vshll.u32 %v3744_v3, 16  ;;  %v3483_v11 = vld [vmem:[%s4110_s1 + $0xe8] sm:$0xff]   ;;  %v3767_v15 = vor.u32 %v582_v9, %v580_v7  ;;  %v816_v33 = vrot.slane %v3678_v34, 1  ;;  %v818_v37 = vrot.slane %v3687_v39, 1  ;;  %v3506_v1 = vld [vmem:[%s4110_s1 + $0x178] sm:$0xff]  }
  0x1e   : > { %3163 = vmatprep.subr.bf16.mxu1 %v3462_v20  ;;  %v3765_v14 = vsel %vm521_vm0, %v576_v6, %v580_v7  ;;  %v3799_v30 = vsel %vm808_vm1, %v810_v21, %v812_v25  ;;  %v820_v44 = vrot.slane %v3708_v50, 1  ;;  %v3846_v48 = vrot.slane %v3719_v54, 1  ;;  %v3513_v6 = vld [vmem:[%s4110_s1 + $0x198] sm:$0xff]   ;;  %v3913_v7 = vld [vmem:[%s3633_s16 + $0x48] sm:$0xf] }
  0x1f   : > { %v3874_v62 = vcombine.low %v3730_v60, %v272_v56  ;;  %v3507_v60 = vld [vmem:[%s4110_s1 + $0x180] sm:$0xff]   ;;  %v3514_v9 = vld [vmem:[%s4110_s1 + $0x1d8] sm:$0xff]  }
  0x20   : > { %3132 = vmatpush3.bf16.msra.mxu0 %v3461_v16  ;;  %v588_v16 = vrot.slane %v586_v10, 1  ;;  %v3849_v49 = vsel %vm808_vm1, %v818_v37, %v820_v44  ;;  %v3860_v53 = vsel %vm808_vm1, %v820_v44, %v3846_v48 }
  0x21   : > { %3164 = vmatpush3.bf16.msra.mxu1 %v3462_v20  ;;  %3133 = vmatprep.subr.bf16.mxu0 %v3463_v23  ;;  %v809_v20 = vrot.slane %v3642_v12, 1  ;;  %v1262_v10 = vshll.u32 %v3874_v62, 16 }
  0x22   : > { %3165 = vmatprep.subr.bf16.mxu1 %v3464_v28  ;;  %v589_v22 = vsel %vm521_vm0, %v3767_v15, %v588_v16  ;;  %v3515_v16 = vld [vmem:[%s4110_s1 + $0x1a0] sm:$0xff]  }
  0x23   : > { %v811_v12 = vsel %vm808_vm1, %v809_v20, %v810_v21  ;;  %v3932_v20 = vrot.slane %v3874_v62, 1  ;;  %v1266_v21 = vshrl.u32 %v3874_v62, 16 }
  0x24   : > { %3134 = vmatpush3.bf16.msra.mxu0 %v3463_v23  ;;  %v3489_v23 = vld [vmem:[%s4110_s1 + $0xb8] sm:$0xff]  }
  0x25   : > { %3166 = vmatpush3.bf16.msra.mxu1 %v3464_v28  ;;  %3183 = vmatprep.subr.bf16.mxu0 %v3468_v29  ;;  %v3492_v28 = vld [vmem:[%s4110_s1 + $0x140] sm:$0xff]  }
  0x26   : > { %3215 = vmatprep.subr.bf16.mxu1 %v3469_v35 }
  0x27   : > { %3136 = vmatmul.mubr.bf16.vlgmr.msra.gmra.mrb[0].mxu0 %v3645_v13 }
  0x28   : > { %3168 = vmatmul.mubr.bf16.vlgmr.msra.gmra.mrb[0].mxu1 %v3690_v40  ;;  %3184 = vmatpush3.bf16.msra.mxu0 %v3468_v29  ;;  %v814_v29 = vrot.slane %v3667_v27, 1 }
  0x29   : > { %3216 = vmatpush3.bf16.msra.mxu1 %v3469_v35  ;;  %3185 = vmatprep.subr.bf16.mxu0 %v3470_v36  ;;  %v3495_v35 = vld [vmem:[%s4110_s1 + $0x110] sm:$0xff]  }
  0x2a   : > { %3217 = vmatprep.subr.bf16.mxu1 %v3471_v43  ;;  %3139 = vmatprep.mubr.bf16.mxu0 %v3655_v19  ;;  %v3823_v38 = vsel %vm808_vm1, %v814_v29, %v816_v33 }
  0x2b   : > { %3171 = vmatprep.mubr.bf16.mxu1 %v3701_v45 }
  0x2c   : > { %3186 = vmatpush3.bf16.msra.mxu0 %v3470_v36  ;;  %v3496_v36 = vld [vmem:[%s4110_s1 + $0x150] sm:$0xff]  }
  0x2d   : > { %3218 = vmatpush3.bf16.msra.mxu1 %v3471_v43  ;;  %3187 = vmatprep.subr.bf16.mxu0 %v3474_v46  ;;  %v3833_v43 = vsel %vm808_vm1, %v816_v33, %v818_v37  ;;  %v3523_v33 = vld [vmem:[%s4110_s1 + $0x1b8] sm:$0xff]   ;;  %v3526_v37 = vld [vmem:[%s4110_s1 + $0x208] sm:$0xff]  }
  0x2e   : > { %3219 = vmatprep.subr.bf16.mxu1 %v3475_v51 }
  0x2f   : > { %3140 = vmatmul.mubr.bf16.gmra.mrb[4].mxu0 %v3667_v27 }
  0x30   : > { %3172 = vmatmul.mubr.bf16.gmra.mrb[4].mxu1 %v3725_v57  ;;  %3188 = vmatpush3.bf16.msra.mxu0 %v3474_v46  ;;  %v3499_v46 = vld [vmem:[%s4110_s1 + $0x120] sm:$0xff]  }
  0x31   : > { %3220 = vmatpush3.bf16.msra.mxu1 %v3475_v51  ;;  %3189 = vmatprep.subr.bf16.mxu0 %v3476_v52  ;;  %v3501_v51 = vld [vmem:[%s4110_s1 + $0x128] sm:$0xff]  }
  0x32   : > { %3221 = vmatprep.subr.bf16.mxu1 %v3477_v55  ;;  %3143 = vmatprep.mubr.bf16.mxu0 %v3678_v34 }
  0x33   : > { %3175 = vmatprep.mubr.bf16.mxu1 %v3735_v61 }
  0x34   : > { %3190 = vmatpush3.bf16.msra.mxu0 %v3476_v52  ;;  %v3502_v52 = vld [vmem:[%s4110_s1 + $0x168] sm:$0xff]  }
  0x35   : > { %3222 = vmatpush3.bf16.msra.mxu1 %v3477_v55  ;;  %3191 = vmatprep.subr.bf16.mxu0 %v3480_v2  ;;  %v824_v55 = vrot.slane %v3744_v3, 1  ;;  %v3509_v3 = vld [vmem:[%s4110_s1 + $0x188] sm:$0xff]  }
  0x36   : > { %3223 = vmatprep.subr.bf16.mxu1 %v3481_v4 }
  0x37   : > { %3144 = vmatmul.mubr.bf16.gmra.mrb[8].mxu0 %v3687_v39  ;;  %v825_v63 = vsel %vm808_vm1, %v3846_v48, %v824_v55 }
  0x38   : > { %3176 = vmatmul.mubr.bf16.gmra.mrb[8].mxu1 %v3755_v8  ;;  %3192 = vmatpush3.bf16.msra.mxu0 %v3480_v2  ;;  %v3508_v2 = vld [vmem:[%s4110_s1 + $0x1c0] sm:$0xff]  }
  0x39   : > { %3224 = vmatpush3.bf16.msra.mxu1 %v3481_v4  ;;  %3193 = vmatprep.subr.bf16.mxu0 %v3482_v5  ;;  %v3510_v4 = vld [vmem:[%s4110_s1 + $0x1c8] sm:$0xff]  }
  0x3a   : > { %3225 = vmatprep.subr.bf16.mxu1 %v3483_v11  ;;  %3147 = vmatprep.mubr.bf16.mxu0 %v3708_v50 }
  0x3b   : > { %3179 = vmatprep.mubr.bf16.mxu1 %v3765_v14 }
  0x3c   : > { %3194 = vmatpush3.bf16.msra.mxu0 %v3482_v5  ;;  %v3512_v5 = vld [vmem:[%s4110_s1 + $0x1d0] sm:$0xff]  }
  0x3d   : > { %3226 = vmatpush3.bf16.msra.mxu1 %v3483_v11  ;;  %3195 = vmatprep.subr.bf16.mxu0 %v3487_v17  ;;  %v2864_v11 = vcombine.low %v3913_v7, %v3913_v7 }
  0x3e   : > { %3227 = vmatprep.subr.bf16.mxu1 %v3488_v18 }
  0x3f   : > { %3148 = vmatmul.mubr.bf16.gmra.mrb[12].mxu0 %v3719_v54 }
  0x40   : > { %3180 = vmatmul.mubr.bf16.gmra.mrb[12].mxu1 %v589_v22  ;;  %3196 = vmatpush3.bf16.msra.mxu0 %v3487_v17  ;;  %v3516_v17 = vld [vmem:[%s4110_s1 + $0x1e0] sm:$0xff]   ;;  %v1270_v22 = vshll.u32 %v2864_v11, 16 }
  0x41   : > { %3228 = vmatpush3.bf16.msra.mxu1 %v3488_v18  ;;  %3197 = vmatprep.subr.bf16.mxu0 %v3489_v23  ;;  %v1264_v18 = vrot.slane %v1262_v10, 1 }
  0x42   : > { %3229 = vmatprep.subr.bf16.mxu1 %v3490_v24  ;;  %3199 = vmatprep.mubr.bf16.mxu0 %v811_v12 }
  0x43   : > { %3231 = vmatprep.mubr.bf16.mxu1 %v3645_v13  ;;  %v3809_v13 = vsel %vm808_vm1, %v812_v25, %v814_v29  ;;  %v3944_v12 = vsel %vm521_vm0, %v3767_v15, %v1264_v18  ;;  %v3950_v25 = vsel %vm808_vm1, %v3846_v48, %v3932_v20  ;;  %v1488_v29 = vrot.slane %v2864_v11, 1  ;;  %v3522_v15 = vld [vmem:[%s4110_s1 + $0x1f0] sm:$0xff]   ;;  %v3533_v48 = vld [vmem:[%s4110_s1 + $0x238] sm:$0xff]  }
  0x44   : > { %3198 = vmatpush3.bf16.msra.mxu0 %v3489_v23  ;;  %v3517_v23 = vld [vmem:[%s4110_s1 + $0x1a8] sm:$0xff]  }
  0x45   : > { %3230 = vmatpush3.bf16.msra.mxu1 %v3490_v24  ;;  %3247 = vmatprep.subr.bf16.mxu0 %v3491_v26  ;;  %v3518_v24 = vld [vmem:[%s4110_s1 + $0x1e8] sm:$0xff]  }
  0x46   : > { %3279 = vmatprep.subr.bf16.mxu1 %v3492_v28 }
  0x47   : > { %3200 = vmatmul.mubr.bf16.vlgmr.msra.gmra.mrb[16].mxu0 %v3799_v30 }
  0x48   : > { %3232 = vmatmul.mubr.bf16.vlgmr.msra.gmra.mrb[16].mxu1 %v3655_v19  ;;  %3248 = vmatpush3.bf16.msra.mxu0 %v3491_v26  ;;  %v3952_v26 = vor.u32 %v1266_v21, %v1264_v18 }
  0x49   : > { %3280 = vmatpush3.bf16.msra.mxu1 %v3492_v28  ;;  %3249 = vmatprep.subr.bf16.mxu0 %v3493_v31  ;;  %v1272_v28 = vrot.slane %v1270_v22, 1 }
  0x4a   : > { %3281 = vmatprep.subr.bf16.mxu1 %v3494_v32  ;;  %3203 = vmatprep.mubr.bf16.mxu0 %v3809_v13 }
  0x4b   : > { %3235 = vmatprep.mubr.bf16.mxu1 %v3667_v27 }
  0x4c   : > { %3250 = vmatpush3.bf16.msra.mxu0 %v3493_v31  ;;  %v1273_v31 = vsel %vm521_vm0, %v3952_v26, %v1272_v28 }
  0x4d   : > { %3282 = vmatpush3.bf16.msra.mxu1 %v3494_v32  ;;  %3251 = vmatprep.subr.bf16.mxu0 %v3495_v35  ;;  %v1489_v32 = vsel %vm808_vm1, %v3932_v20, %v1488_v29 }
  0x4e   : > { %3283 = vmatprep.subr.bf16.mxu1 %v3496_v36 }
  0x4f   : > { %3204 = vmatmul.mubr.bf16.gmra.mrb[20].mxu0 %v3823_v38 }
  0x50   : > { %3236 = vmatmul.mubr.bf16.gmra.mrb[20].mxu1 %v3678_v34  ;;  %3252 = vmatpush3.bf16.msra.mxu0 %v3495_v35  ;;  %v3524_v35 = vld [vmem:[%s4110_s1 + $0x1f8] sm:$0xff]  }
  0x51   : > { %3284 = vmatpush3.bf16.msra.mxu1 %v3496_v36  ;;  %3253 = vmatprep.subr.bf16.mxu0 %v3497_v41  ;;  %v3525_v36 = vld [vmem:[%s4110_s1 + $0x200] sm:$0xff]  }
  0x52   : > { %3285 = vmatprep.subr.bf16.mxu1 %v3498_v42  ;;  %3207 = vmatprep.mubr.bf16.mxu0 %v3833_v43 }
  0x53   : > { %3239 = vmatprep.mubr.bf16.mxu1 %v3687_v39 }
  0x54   : > { %3254 = vmatpush3.bf16.msra.mxu0 %v3497_v41  ;;  %v274_v41 = vld [vmem:[%s3633_s16 + $0x4c] sm:$0xf] }
  0x55   : > { %3286 = vmatpush3.bf16.msra.mxu1 %v3498_v42  ;;  %3255 = vmatprep.subr.bf16.mxu0 %v3499_v46 }
  0x56   : > { %3287 = vmatprep.subr.bf16.mxu1 %v3500_v47 }
  0x57   : > { %3208 = vmatmul.mubr.bf16.gmra.mrb[24].mxu0 %v3849_v49 }
  0x58   : > { %3240 = vmatmul.mubr.bf16.gmra.mrb[24].mxu1 %v3708_v50  ;;  %3256 = vmatpush3.bf16.msra.mxu0 %v3499_v46 }
  0x59   : > { %3288 = vmatpush3.bf16.msra.mxu1 %v3500_v47  ;;  %3257 = vmatprep.subr.bf16.mxu0 %v3501_v51  ;;  %v3532_v47 = vld [vmem:[%s4110_s1 + $0x230] sm:$0xff]  }
  0x5a   : > { %3289 = vmatprep.subr.bf16.mxu1 %v3502_v52  ;;  %3211 = vmatprep.mubr.bf16.mxu0 %v3860_v53 }
  0x5b   : > { %3243 = vmatprep.mubr.bf16.mxu1 %v3719_v54 }
  0x5c   : > { %3258 = vmatpush3.bf16.msra.mxu0 %v3501_v51 }
  0x5d   : > { %3290 = vmatpush3.bf16.msra.mxu1 %v3502_v52  ;;  %3259 = vmatprep.subr.bf16.mxu0 %v3503_v58 }
  0x5e   : > { %3291 = vmatprep.subr.bf16.mxu1 %v3504_v59 }
  0x5f   : > { %3212 = vmatmul.mubr.bf16.gmra.mrb[28].mxu0 %v825_v63 }
  0x60   : > { %3244 = vmatmul.mubr.bf16.gmra.mrb[28].mxu1 %v3874_v62  ;;  %3260 = vmatpush3.bf16.msra.mxu0 %v3503_v58 }
  0x61   : > { %3292 = vmatpush3.bf16.msra.mxu1 %v3504_v59  ;;  %3261 = vmatprep.subr.bf16.mxu0 %v3505_v0 }
  0x62   : > { %3293 = vmatprep.subr.bf16.mxu1 %v3506_v1  ;;  %3263 = vmatprep.mubr.bf16.mxu0 %v3690_v40  ;;  %v3511_v40 = vld [vmem:[%s4110_s1 + $0x190] sm:$0xff]  }
  0x63   : > { %3295 = vmatprep.mubr.bf16.mxu1 %v3799_v30  ;;  %v3521_v30 = vld [vmem:[%s4110_s1 + $0x1b0] sm:$0xff]  }
  0x64   : > { %3262 = vmatpush3.bf16.msra.mxu0 %v3505_v0 }
  0x65   : > { %3294 = vmatpush3.bf16.msra.mxu1 %v3506_v1  ;;  %3311 = vmatprep.subr.bf16.mxu0 %v3507_v60 }
  0x66   : > { %3343 = vmatprep.subr.bf16.mxu1 %v3508_v2 }
  0x67   : > { %3264 = vmatmul.mubr.bf16.vlgmr.msra.gmra.mrb[32].mxu0 %v3701_v45 }
  0x68   : > { %3296 = vmatmul.mubr.bf16.vlgmr.msra.gmra.mrb[32].mxu1 %v3809_v13  ;;  %3312 = vmatpush3.bf16.msra.mxu0 %v3507_v60 }
  0x69   : > { %3344 = vmatpush3.bf16.msra.mxu1 %v3508_v2  ;;  %3313 = vmatprep.subr.bf16.mxu0 %v3509_v3 }
  0x6a   : > { %3345 = vmatprep.subr.bf16.mxu1 %v3510_v4  ;;  %3267 = vmatprep.mubr.bf16.mxu0 %v3725_v57 }
  0x6b   : > { %3299 = vmatprep.mubr.bf16.mxu1 %v3823_v38 }
  0x6c   : > { %3314 = vmatpush3.bf16.msra.mxu0 %v3509_v3 }
  0x6d   : > { %3346 = vmatpush3.bf16.msra.mxu1 %v3510_v4  ;;  %3315 = vmatprep.subr.bf16.mxu0 %v3511_v40 }
  0x6e   : > { %3347 = vmatprep.subr.bf16.mxu1 %v3512_v5 }
  0x6f   : > { %3268 = vmatmul.mubr.bf16.gmra.mrb[36].mxu0 %v3735_v61 }
  0x70   : > { %3300 = vmatmul.mubr.bf16.gmra.mrb[36].mxu1 %v3833_v43  ;;  %3316 = vmatpush3.bf16.msra.mxu0 %v3511_v40 }
  0x71   : > { %3348 = vmatpush3.bf16.msra.mxu1 %v3512_v5  ;;  %3317 = vmatprep.subr.bf16.mxu0 %v3513_v6 }
  0x72   : > { %3349 = vmatprep.subr.bf16.mxu1 %v3514_v9  ;;  %3271 = vmatprep.mubr.bf16.mxu0 %v3755_v8 }
  0x73   : > { %3303 = vmatprep.mubr.bf16.mxu1 %v3849_v49 }
  0x74   : > { %3318 = vmatpush3.bf16.msra.mxu0 %v3513_v6 }
  0x75   : > { %3350 = vmatpush3.bf16.msra.mxu1 %v3514_v9  ;;  %3319 = vmatprep.subr.bf16.mxu0 %v3515_v16 }
  0x76   : > { %3351 = vmatprep.subr.bf16.mxu1 %v3516_v17 }
  0x77   : > { %3272 = vmatmul.mubr.bf16.gmra.mrb[40].mxu0 %v3765_v14 }
  0x78   : > { %3304 = vmatmul.mubr.bf16.gmra.mrb[40].mxu1 %v3860_v53  ;;  %3320 = vmatpush3.bf16.msra.mxu0 %v3515_v16 }
  0x79   : > { %3352 = vmatpush3.bf16.msra.mxu1 %v3516_v17  ;;  %3321 = vmatprep.subr.bf16.mxu0 %v3517_v23 }
  0x7a   : > { %3353 = vmatprep.subr.bf16.mxu1 %v3518_v24  ;;  %3275 = vmatprep.mubr.bf16.mxu0 %v3944_v12 }
  0x7b   : > { %3307 = vmatprep.mubr.bf16.mxu1 %v3950_v25 }
  0x7c   : > { %3322 = vmatpush3.bf16.msra.mxu0 %v3517_v23 }
  0x7d   : > { %3354 = vmatpush3.bf16.msra.mxu1 %v3518_v24  ;;  %3323 = vmatprep.subr.bf16.mxu0 %v3521_v30 }
  0x7e   : > { %3355 = vmatprep.subr.bf16.mxu1 %v3522_v15 }
  0x7f   : > { %3276 = vmatmul.mubr.bf16.gmra.mrb[44].mxu0 %v1273_v31 }
  0x80   : > { %3308 = vmatmul.mubr.bf16.gmra.mrb[44].mxu1 %v1489_v32  ;;  %3324 = vmatpush3.bf16.msra.mxu0 %v3521_v30 }
  0x81   : > { %3356 = vmatpush3.bf16.msra.mxu1 %v3522_v15  ;;  %3325 = vmatprep.subr.bf16.mxu0 %v3523_v33 }
  0x82   : > { %3357 = vmatprep.subr.bf16.mxu1 %v3524_v35  ;;  %3327 = vmatprep.mubr.bf16.mxu0 %v3655_v19  ;;  %v3527_v19 = vld [vmem:[%s4110_s1 + $0x210] sm:$0xff]  }
  0x83   : > { %3359 = vmatprep.mubr.bf16.mxu1 %v3701_v45  ;;  %v2913_v45 = vcombine.low %v3913_v7, %v274_v41 }
  0x84   : > { %3326 = vmatpush3.bf16.msra.mxu0 %v3523_v33 }
  0x85   : > { %3358 = vmatpush3.bf16.msra.mxu1 %v3524_v35  ;;  %3375 = vmatprep.subr.bf16.mxu0 %v3525_v36  ;;  %v2144_v51 = vrot.slane %v2913_v45, 1 }
  0x86   : > { %3407 = vmatprep.subr.bf16.mxu1 %v3525_v36 }
  0x87   : > { %3328 = vmatmul.mubr.bf16.vlgmr.msra.gmra.mrb[48].mxu0 %v3667_v27  ;;  %v3528_v27 = vld [vmem:[%s4110_s1 + $0x218] sm:$0xff]   ;;  %v2145_v52 = vsel %vm808_vm1, %v3932_v20, %v2144_v51 }
  0x88   : > { %3360 = vmatmul.mubr.bf16.vlgmr.msra.gmra.mrb[48].mxu1 %v3725_v57  ;;  %3376 = vmatpush3.bf16.msra.mxu0 %v3525_v36  ;;  %v1920_v57 = vshll.u32 %v2913_v45, 16 }
  0x89   : > { %3415 = vmatpush3.bf16.msra.mxu1 %v3525_v36  ;;  %3377 = vmatprep.subr.bf16.mxu0 %v3526_v37 }
  0x8a   : > { %3408 = vmatprep.subr.bf16.mxu1 %v3526_v37  ;;  %3331 = vmatprep.mubr.bf16.mxu0 %v3678_v34  ;;  %v3529_v34 = vld [vmem:[%s4110_s1 + $0x220] sm:$0xff]   ;;  %v1922_v42 = vrot.slane %v1920_v57, 1 }
  0x8b   : > { %3363 = vmatprep.mubr.bf16.mxu1 %v3735_v61  ;;  %v3531_v61 = vld [vmem:[%s3633_s16 + $0x50] ss:$0 sps:$4 sm:$0xff]  }
  0x8c   : > { %3378 = vmatpush3.bf16.msra.mxu0 %v3526_v37  ;;  %v1928_v44 = vshll.u32 %v3531_v61, 16  ;;  %v2146_v55 = vrot.slane %v3531_v61, 1 }
  0x8d   : > { %3416 = vmatpush3.bf16.msra.mxu1 %v3526_v37  ;;  %3379 = vmatprep.subr.bf16.mxu0 %v3527_v19 }
  0x8e   : > { %3409 = vmatprep.subr.bf16.mxu1 %v3527_v19  ;;  %v1930_v46 = vrot.slane %v1928_v44, 1  ;;  %v2147_v56 = vsel %vm808_vm1, %v2144_v51, %v2146_v55 }
  0x8f   : > { %3332 = vmatmul.mubr.bf16.gmra.mrb[52].mxu0 %v3687_v39  ;;  %v3530_v39 = vld [vmem:[%s4110_s1 + $0x228] sm:$0xff]  }
  0x90   : > { %3364 = vmatmul.mubr.bf16.gmra.mrb[52].mxu1 %v3755_v8  ;;  %3380 = vmatpush3.bf16.msra.mxu0 %v3527_v19  ;;  %v1924_v8 = vshrl.u32 %v2913_v45, 16 }
  0x91   : > { %3417 = vmatpush3.bf16.msra.mxu1 %v3527_v19  ;;  %3381 = vmatprep.subr.bf16.mxu0 %v3528_v27 }
  0x92   : > { %3410 = vmatprep.subr.bf16.mxu1 %v3528_v27  ;;  %3335 = vmatprep.mubr.bf16.mxu0 %v3708_v50  ;;  %v1923_v50 = vsel %vm521_vm0, %v3952_v26, %v1922_v42 }
  0x93   : > { %3367 = vmatprep.mubr.bf16.mxu1 %v3765_v14  ;;  %v1926_v14 = vor.u32 %v1924_v8, %v1922_v42 }
  0x94   : > { %3382 = vmatpush3.bf16.msra.mxu0 %v3528_v27 }
  0x95   : > { %3418 = vmatpush3.bf16.msra.mxu1 %v3528_v27  ;;  %3383 = vmatprep.subr.bf16.mxu0 %v3529_v34 }
  0x96   : > { %3411 = vmatprep.subr.bf16.mxu1 %v3529_v34 }
  0x97   : > { %3336 = vmatmul.mubr.bf16.gmra.mrb[56].mxu0 %v3719_v54  ;;  %v1931_v54 = vsel %vm521_vm0, %v1926_v14, %v1930_v46 }
  0x98   : > { %3368 = vmatmul.mubr.bf16.gmra.mrb[56].mxu1 %v3944_v12  ;;  %3384 = vmatpush3.bf16.msra.mxu0 %v3529_v34 }
  0x99   : > { %3419 = vmatpush3.bf16.msra.mxu1 %v3529_v34  ;;  %3385 = vmatprep.subr.bf16.mxu0 %v3530_v39 }
  0x9a   : > { %3412 = vmatprep.subr.bf16.mxu1 %v3530_v39  ;;  %3339 = vmatprep.mubr.bf16.mxu0 %v3874_v62 }
  0x9b   : > { %3371 = vmatprep.mubr.bf16.mxu1 %v1923_v50 }
  0x9c   : > { %3386 = vmatpush3.bf16.msra.mxu0 %v3530_v39 }
  0x9d   : > { %3420 = vmatpush3.bf16.msra.mxu1 %v3530_v39  ;;  %3387 = vmatprep.subr.bf16.mxu0 %v3532_v47 }
  0x9e   : > { %3413 = vmatprep.subr.bf16.mxu1 %v3532_v47 }
  0x9f   : > { %3340 = vmatmul.mubr.bf16.gmra.mrb[60].mxu0 %v2913_v45 }
  0xa0   : > { %3372 = vmatmul.mubr.bf16.gmra.mrb[60].mxu1 %v1931_v54  ;;  %3388 = vmatpush3.bf16.msra.mxu0 %v3532_v47 }
  0xa1   : > { %3421 = vmatpush3.bf16.msra.mxu1 %v3532_v47  ;;  %3389 = vmatprep.subr.bf16.mxu0 %v3533_v48 }
  0xa2   : > { %3414 = vmatprep.subr.bf16.mxu1 %v3533_v48  ;;  %3391 = vmatprep.mubr.bf16.mxu0 %v3809_v13 }
  0xa3   : > { %3399 = vmatprep.mubr.bf16.mxu1 %v3860_v53 }
  0xa4   : > { %3390 = vmatpush3.bf16.msra.mxu0 %v3533_v48 }
  0xa5   : > { %3422 = vmatpush3.bf16.msra.mxu1 %v3533_v48 }
  0xa7   : > { %3392 = vmatmul.mubr.bf16.vlgmr.msra.gmra.mrb[64].mxu0 %v3823_v38 }
  0xa8   : > { %3400 = vmatmul.mubr.bf16.vlgmr.msra.gmra.mrb[64].mxu1 %v3950_v25  ;;  %3395 = vmatprep.mubr.bf16.mxu0 %v3833_v43 }
  0xa9   : > { %3403 = vmatprep.mubr.bf16.mxu1 %v2145_v52 }
  0xaf   : > { %3396 = vmatmul.mubr.bf16.gmra.mrb[68].mxu0 %v3849_v49 }
  0xb0   : > { %3404 = vmatmul.mubr.bf16.gmra.mrb[68].mxu1 %v2147_v56 }
  0xfa   : > { %v3137_v13 = vpop.f32.mrb[0].mxu0 }
  0xfb   : > { %v3169_v53 = vpop.f32.mrb[0].mxu1  ;;  %v422_v58 = vpop.f32.mrb[1].mxu0 }
  0xfc   : > { %v761_v59 = vadd.f32 %v3169_v53, %v3137_v13  ;;  %v680_v62 = vpop.f32.mrb[1].mxu1  ;;  %v3138_v63 = vpop.f32.mrb[2].mxu0 }
  0xfd   : > { %v759_v0 = vadd.f32 %v680_v62, %v422_v58  ;;  %v3170_v1 = vpop.f32.mrb[2].mxu1  ;;  %v425_v38 = vpop.f32.mrb[3].mxu0 }
  0xfe   : > { %v683_v60 = vpop.f32.mrb[3].mxu1 }
 0x102   : > { %v3141_v2 = vpop.f32.mrb[4].mxu0 }
 0x103   : > { %v3173_v3 = vpop.f32.mrb[4].mxu1  ;;  %v438_v43 = vpop.f32.mrb[5].mxu0 }
 0x104   : > { %v765_v4 = vadd.f32 %v3173_v3, %v3141_v2  ;;  %v696_v40 = vpop.f32.mrb[5].mxu1  ;;  %v3142_v5 = vpop.f32.mrb[6].mxu0 }
 0x105   : > { %v763_v6 = vadd.f32 %v696_v40, %v438_v43  ;;  %v3174_v7 = vpop.f32.mrb[6].mxu1  ;;  %v441_v49 = vpop.f32.mrb[7].mxu0 }
 0x106   : > { %v699_v9 = vpop.f32.mrb[7].mxu1 }
 0x10a   : > { %v3145_v10 = vpop.f32.mrb[8].mxu0 }
 0x10b   : > { %v3177_v11 = vpop.f32.mrb[8].mxu1  ;;  %v454_v16 = vpop.f32.mrb[9].mxu0 }
 0x10c   : > { %v769_v17 = vadd.f32 %v3177_v11, %v3145_v10  ;;  %v712_v18 = vpop.f32.mrb[9].mxu1  ;;  %v3146_v20 = vpop.f32.mrb[10].mxu0 }
 0x10d   : > { %v767_v21 = vadd.f32 %v712_v18, %v454_v16  ;;  %v3178_v22 = vpop.f32.mrb[10].mxu1  ;;  %v457_v23 = vpop.f32.mrb[11].mxu0 }
 0x10e   : > { %v715_v24 = vpop.f32.mrb[11].mxu1 }
 0x112   : > { %v3149_v12 = vpop.f32.mrb[12].mxu0 }
 0x113   : > { %v3181_v25 = vpop.f32.mrb[12].mxu1  ;;  %v470_v26 = vpop.f32.mrb[13].mxu0 }
 0x114   : > { %v773_v28 = vadd.f32 %v3181_v25, %v3149_v12  ;;  %v728_v29 = vpop.f32.mrb[13].mxu1  ;;  %v3150_v30 = vpop.f32.mrb[14].mxu0 }
 0x115   : > { %v771_v15 = vadd.f32 %v728_v29, %v470_v26  ;;  %v3182_v31 = vpop.f32.mrb[14].mxu1  ;;  %v473_v32 = vpop.f32.mrb[15].mxu0 }
 0x116   : > { %v731_v33 = vpop.f32.mrb[15].mxu1 }
 0x11a   : > { %v3201_v35 = vpop.f32.mrb[16].mxu0 }
 0x11b   : > { %v997_v36 = vadd.f32 %v3201_v35, %v761_v59  ;;  %v3233_v37 = vpop.f32.mrb[16].mxu1  ;;  %v916_v41 = vpop.f32.mrb[17].mxu0 }
 0x11c   : > { %v995_v19 = vadd.f32 %v916_v41, %v759_v0  ;;  %v1130_v45 = vpop.f32.mrb[17].mxu1  ;;  %v3202_v27 = vpop.f32.mrb[18].mxu0 }
 0x11d   : > { %v1211_v57 = vadd.f32 %v3233_v37, %v997_v36  ;;  %v3234_v34 = vpop.f32.mrb[18].mxu1  ;;  %v919_v61 = vpop.f32.mrb[19].mxu0 }
 0x11e   : > { %v1209_v42 = vadd.f32 %v1130_v45, %v995_v19  ;;  %v1133_v39 = vpop.f32.mrb[19].mxu1 }
 0x122   : > { %v3205_v8 = vpop.f32.mrb[20].mxu0 }
 0x123   : > { %v1001_v44 = vadd.f32 %v3205_v8, %v765_v4  ;;  %v3237_v50 = vpop.f32.mrb[20].mxu1  ;;  %v932_v14 = vpop.f32.mrb[21].mxu0 }
 0x124   : > { %v999_v46 = vadd.f32 %v932_v14, %v763_v6  ;;  %v1146_v47 = vpop.f32.mrb[21].mxu1  ;;  %v3206_v54 = vpop.f32.mrb[22].mxu0 }
 0x125   : > { %v1215_v48 = vadd.f32 %v3237_v50, %v1001_v44  ;;  %v3238_v51 = vpop.f32.mrb[22].mxu1  ;;  %v935_v52 = vpop.f32.mrb[23].mxu0 }
 0x126   : > { %v1213_v55 = vadd.f32 %v1146_v47, %v999_v46  ;;  %v1149_v56 = vpop.f32.mrb[23].mxu1 }
 0x12a   : > { %v3209_v13 = vpop.f32.mrb[24].mxu0 }
 0x12b   : > { %v1005_v53 = vadd.f32 %v3209_v13, %v769_v17  ;;  %v3241_v58 = vpop.f32.mrb[24].mxu1  ;;  %v948_v59 = vpop.f32.mrb[25].mxu0 }
 0x12c   : > { %v1003_v62 = vadd.f32 %v948_v59, %v767_v21  ;;  %v1162_v63 = vpop.f32.mrb[25].mxu1  ;;  %v3210_v0 = vpop.f32.mrb[26].mxu0 }
 0x12d   : > { %v1219_v1 = vadd.f32 %v3241_v58, %v1005_v53  ;;  %v3242_v38 = vpop.f32.mrb[26].mxu1  ;;  %v951_v60 = vpop.f32.mrb[27].mxu0 }
 0x12e   : > { %v1217_v2 = vadd.f32 %v1162_v63, %v1003_v62  ;;  %v1165_v3 = vpop.f32.mrb[27].mxu1 }
 0x132   : > { %v3213_v43 = vpop.f32.mrb[28].mxu0 }
 0x133   : > { %v1009_v4 = vadd.f32 %v3213_v43, %v773_v28  ;;  %v3245_v40 = vpop.f32.mrb[28].mxu1  ;;  %v964_v5 = vpop.f32.mrb[29].mxu0 }
 0x134   : > { %v1007_v6 = vadd.f32 %v964_v5, %v771_v15  ;;  %v1178_v7 = vpop.f32.mrb[29].mxu1  ;;  %v3214_v49 = vpop.f32.mrb[30].mxu0 }
 0x135   : > { %v1223_v9 = vadd.f32 %v3245_v40, %v1009_v4  ;;  %v3246_v10 = vpop.f32.mrb[30].mxu1  ;;  %v967_v11 = vpop.f32.mrb[31].mxu0 }
 0x136   : > { %v1221_v16 = vadd.f32 %v1178_v7, %v1007_v6  ;;  %v1181_v17 = vpop.f32.mrb[31].mxu1 }
 0x13a   : > { %v3265_v18 = vpop.f32.mrb[32].mxu0 }
 0x13b   : > { %v1439_v20 = vadd.f32 %v3265_v18, %v1211_v57  ;;  %v3297_v21 = vpop.f32.mrb[32].mxu1  ;;  %v1358_v22 = vpop.f32.mrb[33].mxu0 }
 0x13c   : > { %v1437_v23 = vadd.f32 %v1358_v22, %v1209_v42  ;;  %v1574_v24 = vpop.f32.mrb[33].mxu1  ;;  %v3266_v12 = vpop.f32.mrb[34].mxu0 }
 0x13d   : > { %v1655_v25 = vadd.f32 %v3297_v21, %v1439_v20  ;;  %v3298_v26 = vpop.f32.mrb[34].mxu1  ;;  %v1361_v28 = vpop.f32.mrb[35].mxu0 }
 0x13e   : > { %v1653_v29 = vadd.f32 %v1574_v24, %v1437_v23  ;;  %v1577_v30 = vpop.f32.mrb[35].mxu1 }
 0x142   : > { %v3269_v15 = vpop.f32.mrb[36].mxu0 }
 0x143   : > { %v1443_v31 = vadd.f32 %v3269_v15, %v1215_v48  ;;  %v3301_v32 = vpop.f32.mrb[36].mxu1  ;;  %v1374_v33 = vpop.f32.mrb[37].mxu0 }
 0x144   : > { %v1441_v35 = vadd.f32 %v1374_v33, %v1213_v55  ;;  %v1590_v36 = vpop.f32.mrb[37].mxu1  ;;  %v3270_v37 = vpop.f32.mrb[38].mxu0 }
 0x145   : > { %v1659_v41 = vadd.f32 %v3301_v32, %v1443_v31  ;;  %v3302_v19 = vpop.f32.mrb[38].mxu1  ;;  %v1377_v45 = vpop.f32.mrb[39].mxu0 }
 0x146   : > { %v1657_v27 = vadd.f32 %v1590_v36, %v1441_v35  ;;  %v1593_v57 = vpop.f32.mrb[39].mxu1 }
 0x14a   : > { %v3273_v34 = vpop.f32.mrb[40].mxu0 }
 0x14b   : > { %v1447_v61 = vadd.f32 %v3273_v34, %v1219_v1  ;;  %v3305_v42 = vpop.f32.mrb[40].mxu1  ;;  %v1390_v39 = vpop.f32.mrb[41].mxu0 }
 0x14c   : > { %v1445_v8 = vadd.f32 %v1390_v39, %v1217_v2  ;;  %v1606_v44 = vpop.f32.mrb[41].mxu1  ;;  %v3274_v50 = vpop.f32.mrb[42].mxu0 }
 0x14d   : > { %v1663_v14 = vadd.f32 %v3305_v42, %v1447_v61  ;;  %v3306_v46 = vpop.f32.mrb[42].mxu1  ;;  %v1393_v47 = vpop.f32.mrb[43].mxu0 }
 0x14e   : > { %v1661_v54 = vadd.f32 %v1606_v44, %v1445_v8  ;;  %v1609_v48 = vpop.f32.mrb[43].mxu1  ;;  %v3558_v46 = vmov 1983009808  }
 0x14f   : > { %v2384_v47 = vunpack.c.l.s4 %v3558_v46 }
 0x152   : > { %v3277_v51 = vpop.f32.mrb[44].mxu0 }
 0x153   : > { %v1451_v52 = vadd.f32 %v3277_v51, %v1223_v9  ;;  %v3309_v55 = vpop.f32.mrb[44].mxu1  ;;  %v1406_v56 = vpop.f32.mrb[45].mxu0  ;;  %v4029_v51 = vld [vmem:[%s4111_s2] ss:$0 sm:$0xff] }
 0x154   : > { %v1449_v13 = vadd.f32 %v1406_v56, %v1221_v16  ;;  %v1622_v53 = vpop.f32.mrb[45].mxu1  ;;  %v3278_v58 = vpop.f32.mrb[46].mxu0 }
 0x155   : > { %v1667_v59 = vadd.f32 %v3309_v55, %v1451_v52  ;;  %v3310_v62 = vpop.f32.mrb[46].mxu1  ;;  %v1409_v63 = vpop.f32.mrb[47].mxu0  ;;  %v2385_v58 = vunpack.c.0.s8 %v2384_v47 }
 0x156   : > { %v1665_v0 = vadd.f32 %v1622_v53, %v1449_v13  ;;  %v1625_v1 = vpop.f32.mrb[47].mxu1 }
 0x15a   : > { %v3329_v38 = vpop.f32.mrb[48].mxu0 }
 0x15b   : > { %v1869_v60 = vadd.f32 %v3329_v38, %v1655_v25  ;;  %v3361_v2 = vpop.f32.mrb[48].mxu1  ;;  %v1788_v3 = vpop.f32.mrb[49].mxu0 }
 0x15c   : > { %v1867_v43 = vadd.f32 %v1788_v3, %v1653_v29  ;;  %v2016_v4 = vpop.f32.mrb[49].mxu1  ;;  %v3330_v40 = vpop.f32.mrb[50].mxu0 }
 0x15d   : > { %v2097_v5 = vadd.f32 %v3361_v2, %v1869_v60  ;;  %v3362_v6 = vpop.f32.mrb[50].mxu1  ;;  %v1791_v7 = vpop.f32.mrb[51].mxu0 }
 0x15e   : > { %v2095_v49 = vadd.f32 %v2016_v4, %v1867_v43  ;;  %v2019_v9 = vpop.f32.mrb[51].mxu1 }
 0x162   : > { %v3333_v10 = vpop.f32.mrb[52].mxu0 }
 0x163   : > { %v1873_v11 = vadd.f32 %v3333_v10, %v1659_v41  ;;  %v3365_v16 = vpop.f32.mrb[52].mxu1  ;;  %v1804_v17 = vpop.f32.mrb[53].mxu0 }
 0x164   : > { %v1871_v18 = vadd.f32 %v1804_v17, %v1657_v27  ;;  %v2032_v20 = vpop.f32.mrb[53].mxu1  ;;  %v3334_v21 = vpop.f32.mrb[54].mxu0 }
 0x165   : > { %v2101_v22 = vadd.f32 %v3365_v16, %v1873_v11  ;;  %v3366_v23 = vpop.f32.mrb[54].mxu1  ;;  %v1807_v24 = vpop.f32.mrb[55].mxu0 }
 0x166   : > { %v4024_v12 = vadd.f32 %v2032_v20, %v1871_v18  ;;  %v2035_v25 = vpop.f32.mrb[55].mxu1 }
 0x16a   : > { %v3337_v26 = vpop.f32.mrb[56].mxu0 }
 0x16b   : > { %v1877_v28 = vadd.f32 %v3337_v26, %v1663_v14  ;;  %v3369_v29 = vpop.f32.mrb[56].mxu1  ;;  %v1820_v30 = vpop.f32.mrb[57].mxu0 }
 0x16c   : > { %v1875_v15 = vadd.f32 %v1820_v30, %v1661_v54  ;;  %v2048_v31 = vpop.f32.mrb[57].mxu1  ;;  %v3338_v32 = vpop.f32.mrb[58].mxu0  ;;  %v2386_v54 = vlaneseq }
 0x16d   : > { %v2105_v33 = vadd.f32 %v3369_v29, %v1877_v28  ;;  %v3370_v35 = vpop.f32.mrb[58].mxu1  ;;  %v1823_v36 = vpop.f32.mrb[59].mxu0 }
 0x16e   : > { %v2103_v37 = vadd.f32 %v2048_v31, %v1875_v15  ;;  %v2051_v41 = vpop.f32.mrb[59].mxu1 }
 0x172   : > { %v3341_v19 = vpop.f32.mrb[60].mxu0 }
 0x173   : > { %v1881_v45 = vadd.f32 %v3341_v19, %v1667_v59  ;;  %v3373_v27 = vpop.f32.mrb[60].mxu1  ;;  %v1836_v57 = vpop.f32.mrb[61].mxu0  ;;  %v2387_v59 = vshrl.u32 %v2386_v54, 7 }
 0x174   : > { %v1879_v34 = vadd.f32 %v1836_v57, %v1665_v0  ;;  %v2064_v61 = vpop.f32.mrb[61].mxu1  ;;  %v3342_v42 = vpop.f32.mrb[62].mxu0 }
 0x175   : > { %v2109_v39 = vadd.f32 %v3373_v27, %v1881_v45  ;;  %v3374_v8 = vpop.f32.mrb[62].mxu1  ;;  %v1839_v44 = vpop.f32.mrb[63].mxu0  ;;  %v4035_v7 = vsub.s32 %v2385_v58, %v2387_v59 }
 0x176   : > { %v2107_v50 = vadd.f32 %v2064_v61, %v1879_v34  ;;  %v2067_v14 = vpop.f32.mrb[63].mxu1 }
 0x17a   : > { %v3393_v48 = vpop.f32.mrb[64].mxu0 }
 0x17b   : > { %v2313_v52 = vadd.f32 %v3393_v48, %v2097_v5  ;;  %v3401_v55 = vpop.f32.mrb[64].mxu1  ;;  %v2232_v56 = vpop.f32.mrb[65].mxu0 }
 0x17c   : > { %v2321_v13 = vadd.f32 %v3401_v55, %v2105_v33  ;;  %v2311_v53 = vadd.f32 %v2232_v56, %v2095_v49  ;;  %v2264_v62 = vpop.f32.mrb[65].mxu1  ;;  %v3394_v63 = vpop.f32.mrb[66].mxu0 }
 0x17d   : > { %v2359_v0 = vadd.f32 %v4029_v51, %v2313_v52  ;;  %v2319_v1 = vadd.f32 %v2264_v62, %v2103_v37  ;;  %v3402_v38 = vpop.f32.mrb[66].mxu1  ;;  %v2235_v60 = vpop.f32.mrb[67].mxu0 }
 0x17e   : > { %v2363_v2 = vadd.f32 %v4029_v51, %v2321_v13  ;;  %v2358_v3 = vadd.f32 %v4029_v51, %v2311_v53  ;;  %v2267_v43 = vpop.f32.mrb[67].mxu1 }
 0x17f   : > { %v2367_v4 = vmax.f32 %v2359_v0, 0.0  ;;  %v2362_v40 = vadd.f32 %v4029_v51, %v2319_v1 }
 0x180   : > { %v2371_v5 = vmax.f32 %v2363_v2, 0.0  ;;  %v2366_v6 = vmax.f32 %v2358_v3, 0.0 }
 0x181   : > { %v2370_v49 = vmax.f32 %v2362_v40, 0.0 }
 0x182   : > { %v2374_v9 = vmax.f32 %v2366_v6, %v2367_v4  ;;  %v3397_v10 = vpop.f32.mrb[68].mxu0 }
 0x183   : > { %v2376_v11 = vmax.f32 %v2370_v49, %v2371_v5  ;;  %v2317_v16 = vadd.f32 %v3397_v10, %v2101_v22  ;;  %v3405_v17 = vpop.f32.mrb[68].mxu1  ;;  %v2248_v18 = vpop.f32.mrb[69].mxu0 }
 0x184   : > { %v2382_v20 = vcombine.high %v2374_v9, %v2374_v9  ;;  %v2389_v21 = vrot.slane %v2374_v9, %v4035_v7  ;;  %v2325_v23 = vadd.f32 %v3405_v17, %v2109_v39  ;;  %v4039_v24 = vadd.f32 %v2248_v18, %v4024_v12  ;;  %v2280_v25 = vpop.f32.mrb[69].mxu1  ;;  %v3398_v26 = vpop.f32.mrb[70].mxu0 }
 0x185   : > { %v2416_v28 = vcombine.high %v2376_v11, %v2376_v11  ;;  %v2423_v29 = vrot.slane %v2376_v11, %v4035_v7  ;;  %v4043_v30 = vadd.f32 %v4029_v51, %v2317_v16  ;;  %v4045_v15 = vadd.f32 %v2280_v25, %v2107_v50  ;;  %v3406_v22 = vpop.f32.mrb[70].mxu1  ;;  %v2251_v31 = vpop.f32.mrb[71].mxu0 }
 0x186   : > { %v2396_v32 = vrot.slane %v2382_v20, %v4035_v7  ;;  %v2397_v33 = vcombine.high %v2389_v21, %v2389_v21  ;;  %v2467_v35 = vsel %vm2466_vm2, %v2389_v21, -inf  ;;  %v4050_v12 = vadd.f32 %v4029_v51, %v2325_v23  ;;  %v2283_v36 = vpop.f32.mrb[71].mxu1 }
 0x187   : > { %v2468_v37 = vrot.slane %v2467_v35, 4  ;;  %v2430_v41 = vrot.slane %v2416_v28, %v4035_v7  ;;  %v2431_v19 = vcombine.high %v2423_v29, %v2423_v29  ;;  %v2523_v45 = vsel %vm2466_vm2, %v2423_v29, -inf }
 0x188   : > { %v2398_v27 = vcombine.high %v2396_v32, %v2396_v32  ;;  %v2474_v57 = vsel %vm2466_vm2, %v2397_v33, -inf  ;;  %v2481_v34 = vsel %vm2466_vm2, %v2396_v32, -inf  ;;  %v2524_v61 = vrot.slane %v2523_v45, 4 }
 0x189   : > { %v2469_v42 = vmax.f32 %v2467_v35, %v2468_v37  ;;  %v2475_v39 = vrot.slane %v2474_v57, 4  ;;  %v2482_v8 = vrot.slane %v2481_v34, 4  ;;  %v2432_v44 = vcombine.high %v2430_v41, %v2430_v41 }
 0x18a   : > { %v2488_v50 = vsel %vm2466_vm2, %v2398_v27, -inf  ;;  %v2525_v14 = vmax.f32 %v2523_v45, %v2524_v61  ;;  %v2530_v46 = vsel %vm2466_vm2, %v2431_v19, -inf  ;;  %v2537_v47 = vsel %vm2466_vm2, %v2430_v41, -inf }
 0x18b   : > { %v2470_v54 = vrot.slane %v2469_v42, 2  ;;  %v2476_v48 = vmax.f32 %v2474_v57, %v2475_v39  ;;  %v2483_v52 = vmax.f32 %v2481_v34, %v2482_v8  ;;  %v2489_v55 = vrot.slane %v2488_v50, 4 }
 0x18c   : > { %v2526_v56 = vrot.slane %v2525_v14, 2  ;;  %v2531_v13 = vrot.slane %v2530_v46, 4  ;;  %v2538_v53 = vrot.slane %v2537_v47, 4  ;;  %v2544_v58 = vsel %vm2466_vm2, %v2432_v44, -inf }
 0x18d   : > { %v2471_v59 = vmax.f32 %v2469_v42, %v2470_v54  ;;  %v2477_v62 = vrot.slane %v2476_v48, 2  ;;  %v2484_v63 = vrot.slane %v2483_v52, 2  ;;  %v2490_v0 = vmax.f32 %v2488_v50, %v2489_v55 }
 0x18e   : > { %v2527_v1 = vmax.f32 %v2525_v14, %v2526_v56  ;;  %v2532_v38 = vmax.f32 %v2530_v46, %v2531_v13  ;;  %v2539_v60 = vmax.f32 %v2537_v47, %v2538_v53  ;;  %v2545_v2 = vrot.slane %v2544_v58, 4 }
 0x18f   : > { %v2472_v3 = vrot.slane %v2471_v59, 1  ;;  %v2478_v43 = vmax.f32 %v2476_v48, %v2477_v62  ;;  %v2485_v4 = vmax.f32 %v2483_v52, %v2484_v63  ;;  %v2491_v40 = vrot.slane %v2490_v0, 2 }
 0x190   : > { %v2528_v5 = vrot.slane %v2527_v1, 1  ;;  %v2533_v6 = vrot.slane %v2532_v38, 2  ;;  %v2540_v49 = vrot.slane %v2539_v60, 2  ;;  %v2546_v9 = vmax.f32 %v2544_v58, %v2545_v2 }
 0x191   : > { %v2473_v10 = vmax.f32 %v2471_v59, %v2472_v3  ;;  %v2479_v11 = vrot.slane %v2478_v43, 1  ;;  %v2486_v16 = vrot.slane %v2485_v4, 1  ;;  %v2492_v17 = vmax.f32 %v2490_v0, %v2491_v40 }
 0x192   : > { %v2529_v18 = vmax.f32 %v2527_v1, %v2528_v5  ;;  %v2534_v20 = vmax.f32 %v2532_v38, %v2533_v6  ;;  %v2541_v21 = vmax.f32 %v2539_v60, %v2540_v49  ;;  %v2547_v23 = vrot.slane %v2546_v9, 2 }
 0x193   : > { %v2480_v25 = vmax.f32 %v2478_v43, %v2479_v11  ;;  %v2487_v26 = vmax.f32 %v2485_v4, %v2486_v16  ;;  %v2493_v28 = vrot.slane %v2492_v17, 1  ;;  %v2369_v29 = vmax.f32 %v4043_v30, 0.0 }
 0x194   : > { %v2535_v22 = vrot.slane %v2534_v20, 1  ;;  %v2542_v31 = vrot.slane %v2541_v21, 1  ;;  %v2548_v32 = vmax.f32 %v2546_v9, %v2547_v23  ;;  %v2373_v33 = vmax.f32 %v4050_v12, 0.0 }
 0x195   : > { %v2494_v35 = vmax.f32 %v2492_v17, %v2493_v28  ;;  %v2596_v36 = vsel %vm2595_vm3, %v2480_v25, %v2473_v10  ;;  %v2360_v37 = vadd.f32 %v4029_v51, %v4039_v24  ;;  %v2364_v30 = vadd.f32 %v4029_v51, %v4045_v15 }
 0x196   : > { %v2598_v41 = vsel %vm2597_vm4, %v2487_v26, %v2596_v36  ;;  %v2536_v19 = vmax.f32 %v2534_v20, %v2535_v22  ;;  %v2543_v12 = vmax.f32 %v2541_v21, %v2542_v31  ;;  %v2549_v45 = vrot.slane %v2548_v32, 1 }
 0x197   : > { %v2600_v27 = vsel %vm2599_vm5, %v2494_v35, %v2598_v41  ;;  %v2368_v57 = vmax.f32 %v2360_v37, 0.0  ;;  %v2372_v34 = vmax.f32 %v2364_v30, 0.0 }
 0x198   : > { %2614 = vst [vmem:[%s4066_s8] sm:$0xf] %v2600_v27  ;;  %v2550_v61 = vmax.f32 %v2548_v32, %v2549_v45  ;;  %v2604_v42 = vsel %vm2595_vm3, %v2536_v19, %v2529_v18 }
 0x199   : > { %v2605_v39 = vsel %vm2597_vm4, %v2543_v12, %v2604_v42  ;;  %v2375_v24 = vmax.f32 %v2368_v57, %v2369_v29  ;;  %v2377_v8 = vmax.f32 %v2372_v34, %v2373_v33 }
 0x19a   : > { %v2606_v44 = vsel %vm2599_vm5, %v2550_v61, %v2605_v39 }
 0x19b   : > { %2616 = vst [vmem:[%s4066_s8 + $0x8] sm:$0xf] %v2606_v44  ;;  %v2399_v51 = vcombine.high %v2375_v24, %v2375_v24  ;;  %v2406_v15 = vrot.slane %v2375_v24, %v4035_v7  ;;  %v2433_v50 = vcombine.high %v2377_v8, %v2377_v8  ;;  %v2440_v14 = vrot.slane %v2377_v8, %v4035_v7 }
 0x19d   : > { %v2413_v46 = vrot.slane %v2399_v51, %v4035_v7  ;;  %v2414_v47 = vcombine.high %v2406_v15, %v2406_v15  ;;  %v2495_v54 = vsel %vm2466_vm2, %v2406_v15, -inf  ;;  %v2447_v48 = vrot.slane %v2433_v50, %v4035_v7 }
 0x19e   : > { %v2496_v52 = vrot.slane %v2495_v54, 4  ;;  %v2448_v55 = vcombine.high %v2440_v14, %v2440_v14  ;;  %v2551_v56 = vsel %vm2466_vm2, %v2440_v14, -inf }
 0x19f   : > { %v2415_v13 = vcombine.high %v2413_v46, %v2413_v46  ;;  %v2502_v53 = vsel %vm2466_vm2, %v2414_v47, -inf  ;;  %v2509_v58 = vsel %vm2466_vm2, %v2413_v46, -inf  ;;  %v2449_v59 = vcombine.high %v2447_v48, %v2447_v48 }
 0x1a0   : > { %v2497_v62 = vmax.f32 %v2495_v54, %v2496_v52  ;;  %v2503_v63 = vrot.slane %v2502_v53, 4  ;;  %v2510_v0 = vrot.slane %v2509_v58, 4  ;;  %v2552_v1 = vrot.slane %v2551_v56, 4 }
 0x1a1   : > { %v2516_v38 = vsel %vm2466_vm2, %v2415_v13, -inf  ;;  %v2558_v60 = vsel %vm2466_vm2, %v2448_v55, -inf  ;;  %v2565_v7 = vsel %vm2466_vm2, %v2447_v48, -inf  ;;  %v2572_v2 = vsel %vm2466_vm2, %v2449_v59, -inf }
 0x1a2   : > { %v2498_v3 = vrot.slane %v2497_v62, 2  ;;  %v2504_v43 = vmax.f32 %v2502_v53, %v2503_v63  ;;  %v2511_v4 = vmax.f32 %v2509_v58, %v2510_v0  ;;  %v2517_v40 = vrot.slane %v2516_v38, 4 }
 0x1a3   : > { %v2553_v5 = vmax.f32 %v2551_v56, %v2552_v1  ;;  %v2559_v6 = vrot.slane %v2558_v60, 4  ;;  %v2566_v49 = vrot.slane %v2565_v7, 4  ;;  %v2573_v9 = vrot.slane %v2572_v2, 4 }
 0x1a4   : > { %v2499_v10 = vmax.f32 %v2497_v62, %v2498_v3  ;;  %v2505_v11 = vrot.slane %v2504_v43, 2  ;;  %v2512_v16 = vrot.slane %v2511_v4, 2  ;;  %v2518_v17 = vmax.f32 %v2516_v38, %v2517_v40 }
 0x1a5   : > { %v2554_v18 = vrot.slane %v2553_v5, 2  ;;  %v2560_v20 = vmax.f32 %v2558_v60, %v2559_v6  ;;  %v2567_v21 = vmax.f32 %v2565_v7, %v2566_v49  ;;  %v2574_v23 = vmax.f32 %v2572_v2, %v2573_v9 }
 0x1a6   : > { %v2500_v25 = vrot.slane %v2499_v10, 1  ;;  %v2506_v26 = vmax.f32 %v2504_v43, %v2505_v11  ;;  %v2513_v28 = vmax.f32 %v2511_v4, %v2512_v16  ;;  %v2519_v29 = vrot.slane %v2518_v17, 2 }
 0x1a7   : > { %v2555_v22 = vmax.f32 %v2553_v5, %v2554_v18  ;;  %v2561_v31 = vrot.slane %v2560_v20, 2  ;;  %v2568_v32 = vrot.slane %v2567_v21, 2  ;;  %v2575_v33 = vrot.slane %v2574_v23, 2 }
 0x1a8   : > { %v2507_v35 = vrot.slane %v2506_v26, 1  ;;  %v2514_v36 = vrot.slane %v2513_v28, 1  ;;  %v2520_v37 = vmax.f32 %v2518_v17, %v2519_v29  ;;  %v2501_v45 = vmax.f32 %v2499_v10, %v2500_v25 }
 0x1a9   : > { %v2556_v30 = vrot.slane %v2555_v22, 1  ;;  %v2562_v41 = vmax.f32 %v2560_v20, %v2561_v31  ;;  %v2569_v19 = vmax.f32 %v2567_v21, %v2568_v32  ;;  %v2576_v12 = vmax.f32 %v2574_v23, %v2575_v33 }
 0x1aa   : > { %v2508_v27 = vmax.f32 %v2506_v26, %v2507_v35  ;;  %v2515_v57 = vmax.f32 %v2513_v28, %v2514_v36  ;;  %v2521_v34 = vrot.slane %v2520_v37, 1 }
 0x1ab   : > { %v2563_v61 = vrot.slane %v2562_v41, 1  ;;  %v2570_v42 = vrot.slane %v2569_v19, 1  ;;  %v2577_v39 = vrot.slane %v2576_v12, 1  ;;  %v2557_v44 = vmax.f32 %v2555_v22, %v2556_v30 }
 0x1ac   : > { %v2522_v24 = vmax.f32 %v2520_v37, %v2521_v34  ;;  %v2601_v8 = vsel %vm2595_vm3, %v2508_v27, %v2501_v45 }
 0x1ad   : > { %v2602_v51 = vsel %vm2597_vm4, %v2515_v57, %v2601_v8  ;;  %v2564_v15 = vmax.f32 %v2562_v41, %v2563_v61  ;;  %v2571_v50 = vmax.f32 %v2569_v19, %v2570_v42  ;;  %v2578_v14 = vmax.f32 %v2576_v12, %v2577_v39 }
 0x1ae   : > { %v2603_v46 = vsel %vm2599_vm5, %v2522_v24, %v2602_v51 }
 0x1af   : > { %2615 = vst [vmem:[%s4066_s8 + $0x4] sm:$0xf] %v2603_v46  ;;  %v2607_v47 = vsel %vm2595_vm3, %v2564_v15, %v2557_v44 }
 0x1b0   : > { %v2608_v54 = vsel %vm2597_vm4, %v2571_v50, %v2607_v47 }
 0x1b1   : > { %v2609_v48 = vsel %vm2599_vm5, %v2578_v14, %v2608_v54 }
 0x1b2   : > { %2617 = vst [vmem:[%s4066_s8 + $0xc] sm:$0xf] %v2609_v48 }
 0x1b3 PF: > { %s13_s14 = sadd.s32 1, %s3556_s14   ;;  %s4113_s12 = smov %s3552_s13 }
 0x1b4   : > { %p10_p5 = scmp.ge.s32.totalorder %s13_s14, 4   ;;  %s4114_s13 = smov %s4116_s15 }
 0x1b6   :  { %12 = sbr.rel (!%p10_p5) target bundleno = 2 (0x2), region = 76 }

// kernel: _lambda_.9
= control target key start
LH: loop header
LB: loop body
LE: loop exit
PB: predicated region body
PF: predicated region fallthrough
CT: control target
= control target key end

     0   :  { %8 = vsyncpa [#allocation5], 0  ;;  %s3725_s0 = inlined_call_operand.vmem [shape: bf16[2,1,7,8,128], index: 0, kind: input, shape index: {}]   ;;  %s3726_s1 = inlined_call_operand.vmem [shape: bf16[3,3,128,256], index: 1, kind: input, shape index: {}]   ;;  %s3727_s2 = inlined_call_operand.vmem [shape: f32[1,256], index: 2, kind: input, shape index: {}]   ;;  %s3728_s3 = inlined_call_operand.hbm [shape: f32[2,4,4,256], index: 3, kind: output, shape index: {}]  }
   0x1   :  { %10 = vsyncpa [#allocation5 + $0x1], 0  ;;  %s3085_s12 = smov 0   ;;  %s3087_s13 = smov 0  }
   0x2   :  { %s3089_s14 = smov 0   ;;  %s3091_s15 = smov 0  }
   0x3   :  { %s3093_s16 = smov 0   ;;  %s3095_s17 = smov 0  }
   0x4   :  { %s3097_s18 = smov 0   ;;  %s3099_s19 = smov 0  }
   0x5   :  { %s3101_s20 = smov 0   ;;  %s3103_s21 = smov 0  }
   0x6 LB: > { %s2252_s22 = sadd.s32 4294967295, %s3059_s21   ;;  %s2253_s23 = sadd.s32 4294967294, %s3059_s21   ;;  %s3059_s21 = sphi %s3103_s21, %s16_s21   ;;  %s3055_s20 = sphi %s3101_s20, %s3740_s20   ;;  %s3051_s19 = sphi %s3099_s19, %s3739_s19   ;;  %s3047_s18 = sphi %s3097_s18, %s3738_s18   ;;  %s3043_s17 = sphi %s3095_s17, %s3737_s17   ;;  %s3039_s16 = sphi %s3093_s16, %s3736_s16   ;;  %s3035_s15 = sphi %s3091_s15, %s3735_s15   ;;  %s3031_s14 = sphi %s3089_s14, %s3734_s14   ;;  %s3027_s13 = sphi %s3087_s13, %s3733_s13   ;;  %s3023_s12 = sphi %s3085_s12, %s3732_s12  }
   0x7   : > { %s31_s24 = sadd.s32 1, %s3051_s19  ;;  %s35_s25 = sadd.s32 1, %s3055_s20 }
   0x8   : > { %p33_p0 = scmp.ge.s32.totalorder %s31_s24, 2  ;;  %s70_s26 = sadd.s32 1, %s3039_s16 }
   0x9   : > { %p77_p1 = scmp.ne.s32.totalorder %s3039_s16, %s3035_s15  ;;  %p78_p2 = scmp.eq.s32.totalorder %s3059_s21, 0 }
   0xa   : > { %s3742_s24 = smov (%p33_p0, %s31_s24), 0  ;;  %s3744_s25 = smov (!%p33_p0, %s35_s25), %s3055_s20 }
   0xb   : > { %s67_s27 = ssub.s32 %s3051_s19, %s3742_s24  ;;  %p3148_p3 = por %p78_p2, %p77_p1 }
   0xc   : > { %p37_p4 = scmp.ge.s32.totalorder %s3744_s25, 2  ;;  %p68_p5 = scmp.eq.s32.totalorder %s67_s27, 0 }
   0xd   : > { %s126_s29 = sadd.s32 1, %s3031_s14  ;;  %p136_p6 = scmp.ne.s32.totalorder %s3031_s14, %s3027_s13 }
   0xe   : > { %s3746_s25 = smov (%p37_p4, %s3744_s25), 0  ;;  %p137_p7 = scmp.eq.s32.totalorder %s2252_s22, 3 }
   0xf   : > { %s3158_s30 = scalar_select %p68_p5, %s3039_s16, %s70_s26  }
  0x10   : > { %s119_s4 = ssub.s32 %s3055_s20, %s3746_s25  ;;  %p142_p8 = scmp.ne.s32.totalorder %s3027_s13, %s3023_s12 }
  0x11   : > { %s123_s5 = sor.u32 %s119_s4, %s67_s27  ;;  %p3164_p10 = por %p137_p7, %p136_p6 }
  0x12   : > { %p124_p9 = scmp.eq.s32.totalorder %s123_s5, 0  ;;  %p143_p11 = scmp.eq.s32.totalorder %s2253_s23, 3 }
  0x13   : > { %p2255_p13 = scmp.ge.s32.totalorder %s3059_s21, 4 }
  0x14   : > { %s3169_s7 = scalar_select %p124_p9, %s3031_s14, %s126_s29  }
  0x15   : > { %p3171_p12 = por %p143_p11, %p142_p8  ;;  %159 = sbr.rel (%p2255_p13) target bundleno = 128 (0x80), region = 16 }
  0x1c   : > { %174 = sbr.rel (!%p3148_p3) target bundleno = 128 (0x80), region = 24  ;;  %s176_s9 = sand.u32 (%p3148_p3), 1, %s3039_s16  }
  0x1d   : > { %s2256_s10 = sshll.u32 (%p3148_p3), %s3051_s19, 2  ;;  %s2776_s11 = smul.u32 (%p3148_p3), 576, %s176_s9 }
  0x1e   : > { %s3183_s23 = scalar_lea.vmem (%p3148_p3), %s3726_s1, %s2256_s10 }
  0x1f   : > { %v196_v0 = vld [vmem:[%s3183_s23] sm:$0xf] (%p3148_p3)  ;;  %v198_v1 = vld [vmem:[%s3183_s23 + $0x8] sm:$0xf] (%p3148_p3)  ;;  %v200_v2 = vld [vmem:[%s3183_s23 + $0x10] sm:$0xf] (%p3148_p3) }
  0x20   : > { %v202_v3 = vld [vmem:[%s3183_s23 + $0x18] sm:$0xf] (%p3148_p3)  ;;  %v204_v4 = vld [vmem:[%s3183_s23 + $0x20] sm:$0xf] (%p3148_p3)  ;;  %s3190_s27 = scalar_lea.vmem (%p3148_p3), [#allocation3], %s2776_s11 }
  0x21   : > { %197 = vst [vmem:[%s3190_s27] sm:$0xf] (%p3148_p3), %v196_v0  ;;  %199 = vst [vmem:[%s3190_s27 + $0x4] sm:$0xf] (%p3148_p3), %v198_v1  ;;  %v206_v5 = vld [vmem:[%s3183_s23 + $0x28] sm:$0xf] (%p3148_p3) }
  0x22   : > { %201 = vst [vmem:[%s3190_s27 + $0x8] sm:$0xf] (%p3148_p3), %v200_v2  ;;  %203 = vst [vmem:[%s3190_s27 + $0xc] sm:$0xf] (%p3148_p3), %v202_v3  ;;  %v208_v6 = vld [vmem:[%s3183_s23 + $0x30] sm:$0xf] (%p3148_p3) }
  0x23   : > { %205 = vst [vmem:[%s3190_s27 + $0x10] sm:$0xf] %v204_v4  ;;  %v210_v7 = vld [vmem:[%s3183_s23 + $0x38] sm:$0xf]  ;;  %207 = vst [vmem:[%s3190_s27 + $0x14] sm:$0xf] %v206_v5 }
  0x24   : > { %209 = vst [vmem:[%s3190_s27 + $0x18] sm:$0xf] %v208_v6  ;;  %211 = vst [vmem:[%s3190_s27 + $0x1c] sm:$0xf] %v210_v7  ;;  %v212_v8 = vld [vmem:[%s3183_s23 + $0x40] sm:$0xf] }
  0x25   : > { %v214_v9 = vld [vmem:[%s3183_s23 + $0x48] sm:$0xf]  ;;  %v216_v10 = vld [vmem:[%s3183_s23 + $0x50] sm:$0xf]  ;;  %213 = vst [vmem:[%s3190_s27 + $0x20] sm:$0xf] %v212_v8 }
  0x26   : > { %215 = vst [vmem:[%s3190_s27 + $0x24] sm:$0xf] %v214_v9  ;;  %217 = vst [vmem:[%s3190_s27 + $0x28] sm:$0xf] %v216_v10  ;;  %v218_v11 = vld [vmem:[%s3183_s23 + $0x58] sm:$0xf] }
  0x27   : > { %v220_v12 = vld [vmem:[%s3183_s23 + $0x60] sm:$0xf]  ;;  %v222_v13 = vld [vmem:[%s3183_s23 + $0x68] sm:$0xf]  ;;  %219 = vst [vmem:[%s3190_s27 + $0x2c] sm:$0xf] %v218_v11 }
  0x28   : > { %221 = vst [vmem:[%s3190_s27 + $0x30] sm:$0xf] %v220_v12  ;;  %223 = vst [vmem:[%s3190_s27 + $0x34] sm:$0xf] %v222_v13  ;;  %v224_v14 = vld [vmem:[%s3183_s23 + $0x70] sm:$0xf] }
  0x29   : > { %v226_v15 = vld [vmem:[%s3183_s23 + $0x78] sm:$0xf]  ;;  %v228_v16 = vld [vmem:[%s3183_s23 + $0x80] sm:$0xf]  ;;  %225 = vst [vmem:[%s3190_s27 + $0x38] sm:$0xf] %v224_v14 }
  0x2a   : > { %227 = vst [vmem:[%s3190_s27 + $0x3c] sm:$0xf] %v226_v15  ;;  %229 = vst [vmem:[%s3190_s27 + $0x40] sm:$0xf] %v228_v16  ;;  %v230_v17 = vld [vmem:[%s3183_s23 + $0x88] sm:$0xf] }
  0x2b   : > { %v232_v18 = vld [vmem:[%s3183_s23 + $0x90] sm:$0xf]  ;;  %v234_v19 = vld [vmem:[%s3183_s23 + $0x98] sm:$0xf]  ;;  %231 = vst [vmem:[%s3190_s27 + $0x44] sm:$0xf] %v230_v17 }
  0x2c   : > { %233 = vst [vmem:[%s3190_s27 + $0x48] sm:$0xf] %v232_v18  ;;  %235 = vst [vmem:[%s3190_s27 + $0x4c] sm:$0xf] %v234_v19  ;;  %v236_v20 = vld [vmem:[%s3183_s23 + $0xa0] sm:$0xf] }
  0x2d   : > { %v238_v21 = vld [vmem:[%s3183_s23 + $0xa8] sm:$0xf]  ;;  %v240_v22 = vld [vmem:[%s3183_s23 + $0xb0] sm:$0xf]  ;;  %237 = vst [vmem:[%s3190_s27 + $0x50] sm:$0xf] %v236_v20 }
  0x2e   : > { %239 = vst [vmem:[%s3190_s27 + $0x54] sm:$0xf] %v238_v21  ;;  %241 = vst [vmem:[%s3190_s27 + $0x58] sm:$0xf] %v240_v22  ;;  %v242_v23 = vld [vmem:[%s3183_s23 + $0xb8] sm:$0xf] }
  0x2f   : > { %v244_v24 = vld [vmem:[%s3183_s23 + $0xc0] sm:$0xf]  ;;  %v246_v25 = vld [vmem:[%s3183_s23 + $0xc8] sm:$0xf]  ;;  %243 = vst [vmem:[%s3190_s27 + $0x5c] sm:$0xf] %v242_v23 }
  0x30   : > { %245 = vst [vmem:[%s3190_s27 + $0x60] sm:$0xf] %v244_v24  ;;  %247 = vst [vmem:[%s3190_s27 + $0x64] sm:$0xf] %v246_v25  ;;  %v248_v26 = vld [vmem:[%s3183_s23 + $0xd0] sm:$0xf] }
  0x31   : > { %v250_v27 = vld [vmem:[%s3183_s23 + $0xd8] sm:$0xf]  ;;  %v252_v28 = vld [vmem:[%s3183_s23 + $0xe0] sm:$0xf]  ;;  %249 = vst [vmem:[%s3190_s27 + $0x68] sm:$0xf] %v248_v26 }
  0x32   : > { %251 = vst [vmem:[%s3190_s27 + $0x6c] sm:$0xf] %v250_v27  ;;  %253 = vst [vmem:[%s3190_s27 + $0x70] sm:$0xf] %v252_v28  ;;  %v254_v29 = vld [vmem:[%s3183_s23 + $0xe8] sm:$0xf] }
  0x33   : > { %v256_v30 = vld [vmem:[%s3183_s23 + $0xf0] sm:$0xf]  ;;  %v258_v31 = vld [vmem:[%s3183_s23 + $0xf8] sm:$0xf]  ;;  %255 = vst [vmem:[%s3190_s27 + $0x74] sm:$0xf] %v254_v29 }
  0x34   : > { %257 = vst [vmem:[%s3190_s27 + $0x78] sm:$0xf] %v256_v30  ;;  %259 = vst [vmem:[%s3190_s27 + $0x7c] sm:$0xf] %v258_v31  ;;  %v260_v32 = vld [vmem:[%s3183_s23 + $0x100] sm:$0xf] }
  0x35   : > { %v262_v33 = vld [vmem:[%s3183_s23 + $0x108] sm:$0xf]  ;;  %v264_v34 = vld [vmem:[%s3183_s23 + $0x110] sm:$0xf]  ;;  %261 = vst [vmem:[%s3190_s27 + $0x80] sm:$0xf] %v260_v32 }
  0x36   : > { %263 = vst [vmem:[%s3190_s27 + $0x84] sm:$0xf] %v262_v33  ;;  %265 = vst [vmem:[%s3190_s27 + $0x88] sm:$0xf] %v264_v34  ;;  %v266_v35 = vld [vmem:[%s3183_s23 + $0x118] sm:$0xf] }
  0x37   : > { %v268_v36 = vld [vmem:[%s3183_s23 + $0x120] sm:$0xf]  ;;  %v270_v37 = vld [vmem:[%s3183_s23 + $0x128] sm:$0xf]  ;;  %267 = vst [vmem:[%s3190_s27 + $0x8c] sm:$0xf] %v266_v35 }
  0x38   : > { %269 = vst [vmem:[%s3190_s27 + $0x90] sm:$0xf] %v268_v36  ;;  %271 = vst [vmem:[%s3190_s27 + $0x94] sm:$0xf] %v270_v37  ;;  %v272_v38 = vld [vmem:[%s3183_s23 + $0x130] sm:$0xf] }
  0x39   : > { %v274_v39 = vld [vmem:[%s3183_s23 + $0x138] sm:$0xf]  ;;  %v276_v40 = vld [vmem:[%s3183_s23 + $0x140] sm:$0xf]  ;;  %273 = vst [vmem:[%s3190_s27 + $0x98] sm:$0xf] %v272_v38 }
  0x3a   : > { %275 = vst [vmem:[%s3190_s27 + $0x9c] sm:$0xf] %v274_v39  ;;  %277 = vst [vmem:[%s3190_s27 + $0xa0] sm:$0xf] %v276_v40  ;;  %v278_v41 = vld [vmem:[%s3183_s23 + $0x148] sm:$0xf] }
  0x3b   : > { %v280_v42 = vld [vmem:[%s3183_s23 + $0x150] sm:$0xf]  ;;  %v282_v43 = vld [vmem:[%s3183_s23 + $0x158] sm:$0xf]  ;;  %279 = vst [vmem:[%s3190_s27 + $0xa4] sm:$0xf] %v278_v41 }
  0x3c   : > { %281 = vst [vmem:[%s3190_s27 + $0xa8] sm:$0xf] %v280_v42  ;;  %283 = vst [vmem:[%s3190_s27 + $0xac] sm:$0xf] %v282_v43  ;;  %v284_v44 = vld [vmem:[%s3183_s23 + $0x160] sm:$0xf] }
  0x3d   : > { %v286_v45 = vld [vmem:[%s3183_s23 + $0x168] sm:$0xf]  ;;  %v288_v46 = vld [vmem:[%s3183_s23 + $0x170] sm:$0xf]  ;;  %285 = vst [vmem:[%s3190_s27 + $0xb0] sm:$0xf] %v284_v44 }
  0x3e   : > { %287 = vst [vmem:[%s3190_s27 + $0xb4] sm:$0xf] %v286_v45  ;;  %289 = vst [vmem:[%s3190_s27 + $0xb8] sm:$0xf] %v288_v46  ;;  %v290_v47 = vld [vmem:[%s3183_s23 + $0x178] sm:$0xf] }
  0x3f   : > { %v292_v48 = vld [vmem:[%s3183_s23 + $0x180] sm:$0xf]  ;;  %v294_v49 = vld [vmem:[%s3183_s23 + $0x188] sm:$0xf]  ;;  %291 = vst [vmem:[%s3190_s27 + $0xbc] sm:$0xf] %v290_v47 }
  0x40   : > { %293 = vst [vmem:[%s3190_s27 + $0xc0] sm:$0xf] %v292_v48  ;;  %295 = vst [vmem:[%s3190_s27 + $0xc4] sm:$0xf] %v294_v49  ;;  %v296_v50 = vld [vmem:[%s3183_s23 + $0x190] sm:$0xf] }
  0x41   : > { %v298_v51 = vld [vmem:[%s3183_s23 + $0x198] sm:$0xf]  ;;  %v300_v52 = vld [vmem:[%s3183_s23 + $0x1a0] sm:$0xf]  ;;  %297 = vst [vmem:[%s3190_s27 + $0xc8] sm:$0xf] %v296_v50 }
  0x42   : > { %299 = vst [vmem:[%s3190_s27 + $0xcc] sm:$0xf] %v298_v51  ;;  %301 = vst [vmem:[%s3190_s27 + $0xd0] sm:$0xf] %v300_v52  ;;  %v302_v53 = vld [vmem:[%s3183_s23 + $0x1a8] sm:$0xf] }
  0x43   : > { %v304_v54 = vld [vmem:[%s3183_s23 + $0x1b0] sm:$0xf]  ;;  %v306_v55 = vld [vmem:[%s3183_s23 + $0x1b8] sm:$0xf]  ;;  %303 = vst [vmem:[%s3190_s27 + $0xd4] sm:$0xf] %v302_v53 }
  0x44   : > { %305 = vst [vmem:[%s3190_s27 + $0xd8] sm:$0xf] %v304_v54  ;;  %307 = vst [vmem:[%s3190_s27 + $0xdc] sm:$0xf] %v306_v55  ;;  %v308_v56 = vld [vmem:[%s3183_s23 + $0x1c0] sm:$0xf] }
  0x45   : > { %v310_v57 = vld [vmem:[%s3183_s23 + $0x1c8] sm:$0xf]  ;;  %v312_v58 = vld [vmem:[%s3183_s23 + $0x1d0] sm:$0xf]  ;;  %309 = vst [vmem:[%s3190_s27 + $0xe0] sm:$0xf] %v308_v56 }
  0x46   : > { %311 = vst [vmem:[%s3190_s27 + $0xe4] sm:$0xf] %v310_v57  ;;  %313 = vst [vmem:[%s3190_s27 + $0xe8] sm:$0xf] %v312_v58  ;;  %v314_v59 = vld [vmem:[%s3183_s23 + $0x1d8] sm:$0xf] }
  0x47   : > { %v316_v60 = vld [vmem:[%s3183_s23 + $0x1e0] sm:$0xf]  ;;  %v318_v61 = vld [vmem:[%s3183_s23 + $0x1e8] sm:$0xf]  ;;  %315 = vst [vmem:[%s3190_s27 + $0xec] sm:$0xf] %v314_v59 }
  0x48   : > { %317 = vst [vmem:[%s3190_s27 + $0xf0] sm:$0xf] %v316_v60  ;;  %319 = vst [vmem:[%s3190_s27 + $0xf4] sm:$0xf] %v318_v61  ;;  %v320_v62 = vld [vmem:[%s3183_s23 + $0x1f0] sm:$0xf] }
  0x49   : > { %v322_v63 = vld [vmem:[%s3183_s23 + $0x1f8] sm:$0xf]  ;;  %v324_v0 = vld [vmem:[%s3183_s23 + $0x200] sm:$0xf]  ;;  %321 = vst [vmem:[%s3190_s27 + $0xf8] sm:$0xf] %v320_v62 }
  0x4a   : > { %323 = vst [vmem:[%s3190_s27 + $0xfc] sm:$0xf] %v322_v63  ;;  %325 = vst [vmem:[%s3190_s27 + $0x100] sm:$0xf] %v324_v0  ;;  %v326_v1 = vld [vmem:[%s3183_s23 + $0x208] sm:$0xf] }
  0x4b   : > { %v328_v2 = vld [vmem:[%s3183_s23 + $0x210] sm:$0xf]  ;;  %v330_v3 = vld [vmem:[%s3183_s23 + $0x218] sm:$0xf]  ;;  %327 = vst [vmem:[%s3190_s27 + $0x104] sm:$0xf] %v326_v1 }
  0x4c   : > { %329 = vst [vmem:[%s3190_s27 + $0x108] sm:$0xf] %v328_v2  ;;  %331 = vst [vmem:[%s3190_s27 + $0x10c] sm:$0xf] %v330_v3  ;;  %v332_v4 = vld [vmem:[%s3183_s23 + $0x220] sm:$0xf] }
  0x4d   : > { %v334_v5 = vld [vmem:[%s3183_s23 + $0x228] sm:$0xf]  ;;  %v336_v6 = vld [vmem:[%s3183_s23 + $0x230] sm:$0xf]  ;;  %333 = vst [vmem:[%s3190_s27 + $0x110] sm:$0xf] %v332_v4 }
  0x4e   : > { %335 = vst [vmem:[%s3190_s27 + $0x114] sm:$0xf] %v334_v5  ;;  %337 = vst [vmem:[%s3190_s27 + $0x118] sm:$0xf] %v336_v6  ;;  %v338_v7 = vld [vmem:[%s3183_s23 + $0x238] sm:$0xf] }
  0x4f   : > { %v340_v8 = vld [vmem:[%s3183_s23 + $0x240] sm:$0xf]  ;;  %v342_v9 = vld [vmem:[%s3183_s23 + $0x248] sm:$0xf]  ;;  %339 = vst [vmem:[%s3190_s27 + $0x11c] sm:$0xf] %v338_v7 }
  0x50   : > { %341 = vst [vmem:[%s3190_s27 + $0x120] sm:$0xf] %v340_v8  ;;  %343 = vst [vmem:[%s3190_s27 + $0x124] sm:$0xf] %v342_v9  ;;  %v344_v10 = vld [vmem:[%s3183_s23 + $0x250] sm:$0xf] }
  0x51   : > { %v346_v11 = vld [vmem:[%s3183_s23 + $0x258] sm:$0xf]  ;;  %v348_v12 = vld [vmem:[%s3183_s23 + $0x260] sm:$0xf]  ;;  %345 = vst [vmem:[%s3190_s27 + $0x128] sm:$0xf] %v344_v10 }
  0x52   : > { %347 = vst [vmem:[%s3190_s27 + $0x12c] sm:$0xf] %v346_v11  ;;  %349 = vst [vmem:[%s3190_s27 + $0x130] sm:$0xf] %v348_v12  ;;  %v350_v13 = vld [vmem:[%s3183_s23 + $0x268] sm:$0xf] }
  0x53   : > { %v352_v14 = vld [vmem:[%s3183_s23 + $0x270] sm:$0xf]  ;;  %v354_v15 = vld [vmem:[%s3183_s23 + $0x278] sm:$0xf]  ;;  %351 = vst [vmem:[%s3190_s27 + $0x134] sm:$0xf] %v350_v13 }
  0x54   : > { %353 = vst [vmem:[%s3190_s27 + $0x138] sm:$0xf] %v352_v14  ;;  %355 = vst [vmem:[%s3190_s27 + $0x13c] sm:$0xf] %v354_v15  ;;  %v356_v16 = vld [vmem:[%s3183_s23 + $0x280] sm:$0xf] }
  0x55   : > { %v358_v17 = vld [vmem:[%s3183_s23 + $0x288] sm:$0xf]  ;;  %v360_v18 = vld [vmem:[%s3183_s23 + $0x290] sm:$0xf]  ;;  %357 = vst [vmem:[%s3190_s27 + $0x140] sm:$0xf] %v356_v16 }
  0x56   : > { %359 = vst [vmem:[%s3190_s27 + $0x144] sm:$0xf] %v358_v17  ;;  %361 = vst [vmem:[%s3190_s27 + $0x148] sm:$0xf] %v360_v18  ;;  %v362_v19 = vld [vmem:[%s3183_s23 + $0x298] sm:$0xf] }
  0x57   : > { %v364_v20 = vld [vmem:[%s3183_s23 + $0x2a0] sm:$0xf]  ;;  %v366_v21 = vld [vmem:[%s3183_s23 + $0x2a8] sm:$0xf]  ;;  %363 = vst [vmem:[%s3190_s27 + $0x14c] sm:$0xf] %v362_v19 }
  0x58   : > { %365 = vst [vmem:[%s3190_s27 + $0x150] sm:$0xf] %v364_v20  ;;  %367 = vst [vmem:[%s3190_s27 + $0x154] sm:$0xf] %v366_v21  ;;  %v368_v22 = vld [vmem:[%s3183_s23 + $0x2b0] sm:$0xf] }
  0x59   : > { %v370_v23 = vld [vmem:[%s3183_s23 + $0x2b8] sm:$0xf]  ;;  %v372_v24 = vld [vmem:[%s3183_s23 + $0x2c0] sm:$0xf]  ;;  %369 = vst [vmem:[%s3190_s27 + $0x158] sm:$0xf] %v368_v22 }
  0x5a   : > { %371 = vst [vmem:[%s3190_s27 + $0x15c] sm:$0xf] %v370_v23  ;;  %373 = vst [vmem:[%s3190_s27 + $0x160] sm:$0xf] %v372_v24  ;;  %v374_v25 = vld [vmem:[%s3183_s23 + $0x2c8] sm:$0xf] }
  0x5b   : > { %v376_v26 = vld [vmem:[%s3183_s23 + $0x2d0] sm:$0xf]  ;;  %v378_v27 = vld [vmem:[%s3183_s23 + $0x2d8] sm:$0xf]  ;;  %375 = vst [vmem:[%s3190_s27 + $0x164] sm:$0xf] %v374_v25 }
  0x5c   : > { %377 = vst [vmem:[%s3190_s27 + $0x168] sm:$0xf] %v376_v26  ;;  %379 = vst [vmem:[%s3190_s27 + $0x16c] sm:$0xf] %v378_v27  ;;  %v380_v28 = vld [vmem:[%s3183_s23 + $0x2e0] sm:$0xf] }
  0x5d   : > { %v382_v29 = vld [vmem:[%s3183_s23 + $0x2e8] sm:$0xf]  ;;  %v384_v30 = vld [vmem:[%s3183_s23 + $0x2f0] sm:$0xf]  ;;  %381 = vst [vmem:[%s3190_s27 + $0x170] sm:$0xf] %v380_v28 }
  0x5e   : > { %383 = vst [vmem:[%s3190_s27 + $0x174] sm:$0xf] %v382_v29  ;;  %385 = vst [vmem:[%s3190_s27 + $0x178] sm:$0xf] %v384_v30  ;;  %v386_v31 = vld [vmem:[%s3183_s23 + $0x2f8] sm:$0xf] }
  0x5f   : > { %v388_v32 = vld [vmem:[%s3183_s23 + $0x300] sm:$0xf]  ;;  %v390_v33 = vld [vmem:[%s3183_s23 + $0x308] sm:$0xf]  ;;  %387 = vst [vmem:[%s3190_s27 + $0x17c] sm:$0xf] %v386_v31 }
  0x60   : > { %389 = vst [vmem:[%s3190_s27 + $0x180] sm:$0xf] %v388_v32  ;;  %391 = vst [vmem:[%s3190_s27 + $0x184] sm:$0xf] %v390_v33  ;;  %v392_v34 = vld [vmem:[%s3183_s23 + $0x310] sm:$0xf] }
  0x61   : > { %v394_v35 = vld [vmem:[%s3183_s23 + $0x318] sm:$0xf]  ;;  %v396_v36 = vld [vmem:[%s3183_s23 + $0x320] sm:$0xf]  ;;  %393 = vst [vmem:[%s3190_s27 + $0x188] sm:$0xf] %v392_v34 }
  0x62   : > { %395 = vst [vmem:[%s3190_s27 + $0x18c] sm:$0xf] %v394_v35  ;;  %397 = vst [vmem:[%s3190_s27 + $0x190] sm:$0xf] %v396_v36  ;;  %v398_v37 = vld [vmem:[%s3183_s23 + $0x328] sm:$0xf] }
  0x63   : > { %v400_v38 = vld [vmem:[%s3183_s23 + $0x330] sm:$0xf]  ;;  %v402_v39 = vld [vmem:[%s3183_s23 + $0x338] sm:$0xf]  ;;  %399 = vst [vmem:[%s3190_s27 + $0x194] sm:$0xf] %v398_v37 }
  0x64   : > { %401 = vst [vmem:[%s3190_s27 + $0x198] sm:$0xf] %v400_v38  ;;  %403 = vst [vmem:[%s3190_s27 + $0x19c] sm:$0xf] %v402_v39  ;;  %v404_v40 = vld [vmem:[%s3183_s23 + $0x340] sm:$0xf] }
  0x65   : > { %v406_v41 = vld [vmem:[%s3183_s23 + $0x348] sm:$0xf]  ;;  %v408_v42 = vld [vmem:[%s3183_s23 + $0x350] sm:$0xf]  ;;  %405 = vst [vmem:[%s3190_s27 + $0x1a0] sm:$0xf] %v404_v40 }
  0x66   : > { %407 = vst [vmem:[%s3190_s27 + $0x1a4] sm:$0xf] %v406_v41  ;;  %409 = vst [vmem:[%s3190_s27 + $0x1a8] sm:$0xf] %v408_v42  ;;  %v410_v43 = vld [vmem:[%s3183_s23 + $0x358] sm:$0xf] }
  0x67   : > { %v412_v44 = vld [vmem:[%s3183_s23 + $0x360] sm:$0xf]  ;;  %v414_v45 = vld [vmem:[%s3183_s23 + $0x368] sm:$0xf]  ;;  %411 = vst [vmem:[%s3190_s27 + $0x1ac] sm:$0xf] %v410_v43 }
  0x68   : > { %413 = vst [vmem:[%s3190_s27 + $0x1b0] sm:$0xf] %v412_v44  ;;  %415 = vst [vmem:[%s3190_s27 + $0x1b4] sm:$0xf] %v414_v45  ;;  %v416_v46 = vld [vmem:[%s3183_s23 + $0x370] sm:$0xf] }
  0x69   : > { %v418_v47 = vld [vmem:[%s3183_s23 + $0x378] sm:$0xf]  ;;  %v420_v48 = vld [vmem:[%s3183_s23 + $0x380] sm:$0xf]  ;;  %417 = vst [vmem:[%s3190_s27 + $0x1b8] sm:$0xf] %v416_v46 }
  0x6a   : > { %419 = vst [vmem:[%s3190_s27 + $0x1bc] sm:$0xf] %v418_v47  ;;  %421 = vst [vmem:[%s3190_s27 + $0x1c0] sm:$0xf] %v420_v48  ;;  %v422_v49 = vld [vmem:[%s3183_s23 + $0x388] sm:$0xf] }
  0x6b   : > { %v424_v50 = vld [vmem:[%s3183_s23 + $0x390] sm:$0xf]  ;;  %v426_v51 = vld [vmem:[%s3183_s23 + $0x398] sm:$0xf]  ;;  %423 = vst [vmem:[%s3190_s27 + $0x1c4] sm:$0xf] %v422_v49 }
  0x6c   : > { %425 = vst [vmem:[%s3190_s27 + $0x1c8] sm:$0xf] %v424_v50  ;;  %427 = vst [vmem:[%s3190_s27 + $0x1cc] sm:$0xf] %v426_v51  ;;  %v428_v52 = vld [vmem:[%s3183_s23 + $0x3a0] sm:$0xf] }
  0x6d   : > { %v430_v53 = vld [vmem:[%s3183_s23 + $0x3a8] sm:$0xf]  ;;  %v432_v54 = vld [vmem:[%s3183_s23 + $0x3b0] sm:$0xf]  ;;  %429 = vst [vmem:[%s3190_s27 + $0x1d0] sm:$0xf] %v428_v52 }
  0x6e   : > { %431 = vst [vmem:[%s3190_s27 + $0x1d4] sm:$0xf] %v430_v53  ;;  %433 = vst [vmem:[%s3190_s27 + $0x1d8] sm:$0xf] %v432_v54  ;;  %v434_v55 = vld [vmem:[%s3183_s23 + $0x3b8] sm:$0xf] }
  0x6f   : > { %v436_v56 = vld [vmem:[%s3183_s23 + $0x3c0] sm:$0xf]  ;;  %v438_v57 = vld [vmem:[%s3183_s23 + $0x3c8] sm:$0xf]  ;;  %435 = vst [vmem:[%s3190_s27 + $0x1dc] sm:$0xf] %v434_v55 }
  0x70   : > { %437 = vst [vmem:[%s3190_s27 + $0x1e0] sm:$0xf] %v436_v56  ;;  %439 = vst [vmem:[%s3190_s27 + $0x1e4] sm:$0xf] %v438_v57  ;;  %v440_v58 = vld [vmem:[%s3183_s23 + $0x3d0] sm:$0xf] }
  0x71   : > { %v442_v59 = vld [vmem:[%s3183_s23 + $0x3d8] sm:$0xf]  ;;  %v444_v60 = vld [vmem:[%s3183_s23 + $0x3e0] sm:$0xf]  ;;  %441 = vst [vmem:[%s3190_s27 + $0x1e8] sm:$0xf] %v440_v58 }
  0x72   : > { %443 = vst [vmem:[%s3190_s27 + $0x1ec] sm:$0xf] %v442_v59  ;;  %445 = vst [vmem:[%s3190_s27 + $0x1f0] sm:$0xf] %v444_v60  ;;  %v446_v61 = vld [vmem:[%s3183_s23 + $0x3e8] sm:$0xf] }
  0x73   : > { %v448_v62 = vld [vmem:[%s3183_s23 + $0x3f0] sm:$0xf]  ;;  %v450_v63 = vld [vmem:[%s3183_s23 + $0x3f8] sm:$0xf]  ;;  %447 = vst [vmem:[%s3190_s27 + $0x1f4] sm:$0xf] %v446_v61 }
  0x74   : > { %449 = vst [vmem:[%s3190_s27 + $0x1f8] sm:$0xf] %v448_v62  ;;  %451 = vst [vmem:[%s3190_s27 + $0x1fc] sm:$0xf] %v450_v63  ;;  %v452_v0 = vld [vmem:[%s3183_s23 + $0x400] sm:$0xf] }
  0x75   : > { %v454_v1 = vld [vmem:[%s3183_s23 + $0x408] sm:$0xf]  ;;  %v456_v2 = vld [vmem:[%s3183_s23 + $0x410] sm:$0xf]  ;;  %453 = vst [vmem:[%s3190_s27 + $0x200] sm:$0xf] %v452_v0 }
  0x76   : > { %455 = vst [vmem:[%s3190_s27 + $0x204] sm:$0xf] %v454_v1  ;;  %457 = vst [vmem:[%s3190_s27 + $0x208] sm:$0xf] %v456_v2  ;;  %v458_v3 = vld [vmem:[%s3183_s23 + $0x418] sm:$0xf] }
  0x77   : > { %v460_v4 = vld [vmem:[%s3183_s23 + $0x420] sm:$0xf]  ;;  %v462_v5 = vld [vmem:[%s3183_s23 + $0x428] sm:$0xf]  ;;  %459 = vst [vmem:[%s3190_s27 + $0x20c] sm:$0xf] %v458_v3 }
  0x78   : > { %461 = vst [vmem:[%s3190_s27 + $0x210] sm:$0xf] %v460_v4  ;;  %463 = vst [vmem:[%s3190_s27 + $0x214] sm:$0xf] %v462_v5  ;;  %v464_v6 = vld [vmem:[%s3183_s23 + $0x430] sm:$0xf] }
  0x79   : > { %v466_v7 = vld [vmem:[%s3183_s23 + $0x438] sm:$0xf]  ;;  %v468_v8 = vld [vmem:[%s3183_s23 + $0x440] sm:$0xf]  ;;  %465 = vst [vmem:[%s3190_s27 + $0x218] sm:$0xf] %v464_v6 }
  0x7a   : > { %467 = vst [vmem:[%s3190_s27 + $0x21c] sm:$0xf] %v466_v7  ;;  %469 = vst [vmem:[%s3190_s27 + $0x220] sm:$0xf] %v468_v8  ;;  %v470_v9 = vld [vmem:[%s3183_s23 + $0x448] sm:$0xf] }
  0x7b   : > { %v472_v10 = vld [vmem:[%s3183_s23 + $0x450] sm:$0xf]  ;;  %v474_v11 = vld [vmem:[%s3183_s23 + $0x458] sm:$0xf]  ;;  %471 = vst [vmem:[%s3190_s27 + $0x224] sm:$0xf] %v470_v9 }
  0x7c   : > { %473 = vst [vmem:[%s3190_s27 + $0x228] sm:$0xf] %v472_v10  ;;  %475 = vst [vmem:[%s3190_s27 + $0x22c] sm:$0xf] %v474_v11  ;;  %v476_v12 = vld [vmem:[%s3183_s23 + $0x460] sm:$0xf] }
  0x7d   : > { %v478_v13 = vld [vmem:[%s3183_s23 + $0x468] sm:$0xf]  ;;  %v480_v14 = vld [vmem:[%s3183_s23 + $0x470] sm:$0xf]  ;;  %477 = vst [vmem:[%s3190_s27 + $0x230] sm:$0xf] %v476_v12 }
  0x7e   : > { %479 = vst [vmem:[%s3190_s27 + $0x234] sm:$0xf] %v478_v13  ;;  %481 = vst [vmem:[%s3190_s27 + $0x238] sm:$0xf] %v480_v14  ;;  %v482_v15 = vld [vmem:[%s3183_s23 + $0x478] sm:$0xf] }
  0x7f   : > { %483 = vst [vmem:[%s3190_s27 + $0x23c] sm:$0xf] %v482_v15 }
  0x80 PF: > { %p2257_p0 = scmp.ge.s32.totalorder %s3059_s21, 1  ;;  %p799_p1 = scmp.lt.s32.totalorder %s3059_s21, 5 }
  0x82   : > { %p800_p2 = pnand %p2257_p0, %p799_p1 }
  0x83   : > { %s806_s28 = sand.u32 (!%p800_p2), 1, %s3035_s15   ;;  %p841_p3 = scmp.lt.s32.totalorder (!%p800_p2), %s3047_s18, 1  ;;  %vm1011_vm0 = vsmask.f32 (!%p800_p2), 7424  ;;  %vm1160_vm1 = vcmask (!%p800_p2), 1046528  }
  0x84   : > { %803 = sbr.rel (%p800_p2) target bundleno = 535 (0x217), region = 69  ;;  %p850_p4 = scmp.lt.s32.totalorder (!%p800_p2), %s3043_s17, 1 }
  0x85   : > { %s2777_s29 = smul.u32 (!%p800_p2), 576, %s806_s28  ;;  %s838_s26 = sand.u32 (!%p800_p2), 1, %s3027_s13  }
  0x86   : > { %s3061_s27 = smov (!%p800_p2), [#allocation4]  }
  0x87   : > { %s3478_s4 = scalar_lea.vmem (!%p800_p2), [#allocation3], %s2777_s29  ;;  %s2470_s29 = sshll.u32 (!%p800_p2), %s3047_s18, 3 }
  0x88   : > { %v2869_v16 = vld [vmem:[%s3478_s4] sm:$0xff] (!%p800_p2)   ;;  %v2871_v18 = vld [vmem:[%s3478_s4 + $0x8] sm:$0xff] (!%p800_p2)   ;;  %v2873_v20 = vld [vmem:[%s3478_s4 + $0x10] sm:$0xff] (!%p800_p2)  }
  0x89   : > { %v2870_v17 = vld [vmem:[%s3478_s4 + $0x100] sm:$0xff] (!%p800_p2)   ;;  %2564 = vmatprep.subr.bf16.mxu1 (!%p800_p2), %v2869_v16  ;;  %v2872_v19 = vld [vmem:[%s3478_s4 + $0x108] sm:$0xff] (!%p800_p2)   ;;  %v2874_v21 = vld [vmem:[%s3478_s4 + $0x110] sm:$0xff] (!%p800_p2)  }
  0x8a   : > { %2644 = vmatprep.subr.bf16.mxu0 (!%p800_p2), %v2870_v17  ;;  %2565 = vmatpush3.bf16.msra.mxu1 (!%p800_p2), %v2869_v16  ;;  %v2875_v22 = vld [vmem:[%s3478_s4 + $0x18] sm:$0xff] (!%p800_p2)   ;;  %v2877_v24 = vld [vmem:[%s3478_s4 + $0x20] sm:$0xff] (!%p800_p2)   ;;  %v2879_v26 = vld [vmem:[%s3478_s4 + $0x28] sm:$0xff] (!%p800_p2)  }
  0x8b   : > { %2645 = vmatpush3.bf16.msra.mxu0 %v2870_v17  ;;  %2566 = vmatprep.subr.bf16.mxu1 %v2871_v18  ;;  %s842_s15 = scalar_select %p841_p3, %s3047_s18, 1  ;;  %v2876_v23 = vld [vmem:[%s3478_s4 + $0x118] sm:$0xff]   ;;  %v2878_v25 = vld [vmem:[%s3478_s4 + $0x120] sm:$0xff]   ;;  %v2880_v27 = vld [vmem:[%s3478_s4 + $0x128] sm:$0xff]  }
  0x8c   : > { %2646 = vmatprep.subr.bf16.mxu0 %v2872_v19  ;;  %v2881_v35 = vld [vmem:[%s3478_s4 + $0x30] sm:$0xff]   ;;  %v2883_v45 = vld [vmem:[%s3478_s4 + $0x38] sm:$0xff]   ;;  %v2888_v53 = vld [vmem:[%s3478_s4 + $0x40] sm:$0xff]   ;;  %s851_s22 = scalar_select %p850_p4, %s3043_s17, 1 }
  0x8d   : > { %s2778_s5 = smul.u32 28, %s842_s15  ;;  %v2882_v40 = vld [vmem:[%s3478_s4 + $0x130] sm:$0xff]   ;;  %v2884_v50 = vld [vmem:[%s3478_s4 + $0x138] sm:$0xff]   ;;  %v2890_v59 = vld [vmem:[%s3478_s4 + $0x140] sm:$0xff]   ;;  %s2133_s15 = sadd.s32 %s3043_s17, %s2470_s29 }
  0x8e   : > { %2567 = vmatpush3.bf16.msra.mxu1 %v2871_v18  ;;  %v2892_v1 = vld [vmem:[%s3478_s4 + $0x48] sm:$0xff]   ;;  %v2894_v6 = vld [vmem:[%s3478_s4 + $0x50] sm:$0xff]   ;;  %v2896_v9 = vld [vmem:[%s3478_s4 + $0x58] sm:$0xff]   ;;  %s852_s28 = scalar_lea.vmem %s3727_s2, %s851_s22  ;;  %s2471_s10 = sshll.u32 %s2133_s15, 6 }
  0x8f   : > { %2647 = vmatpush3.bf16.msra.mxu0 %v2872_v19  ;;  %2568 = vmatprep.subr.bf16.mxu1 %v2873_v20  ;;  %s3495_s11 = scalar_lea.vmem %s3725_s0, %s2778_s5  ;;  %v2893_v3 = vld [vmem:[%s3478_s4 + $0x148] sm:$0xff]   ;;  %v2895_v7 = vld [vmem:[%s3478_s4 + $0x150] sm:$0xff]   ;;  %v2897_v11 = vld [vmem:[%s3478_s4 + $0x158] sm:$0xff]   ;;  %s3667_s22 = scalar_lea.sflag [#allocation5], %s838_s26 }
  0x90   : > { %2648 = vmatprep.subr.bf16.mxu0 %v2874_v21  ;;  %v855_v28 = vld [vmem:[%s3495_s11] sm:$0xf]  ;;  %v856_v29 = vld [vmem:[%s3495_s11 + $0x4] sm:$0xf]  ;;  %v857_v30 = vld [vmem:[%s3495_s11 + $0x8] sm:$0xf] }
  0x91   : > { %v858_v31 = vld [vmem:[%s3495_s11 + $0xc] sm:$0xf]  ;;  %v3503_v32 = vcombine.low %v855_v28, %v856_v29  ;;  %v3505_v33 = vcombine.low %v856_v29, %v857_v30  ;;  %v3508_v34 = vld [vmem:[%s3495_s11 + $0x10] sm:$0xf]  ;;  %v860_v39 = vld [vmem:[%s3495_s11 + $0x14] sm:$0xf] }
  0x92   : > { %2569 = vmatpush3.bf16.msra.mxu1 %v2873_v20  ;;  %v3513_v36 = vcombine.low %v858_v31, %v3508_v34  ;;  %v3520_v43 = vcombine.low %v860_v39, %v860_v39  ;;  %v3523_v44 = vcombine.low %v3508_v34, %v860_v39  ;;  %v3530_v52 = vcombine.low %v857_v30, %v858_v31  ;;  %v2898_v16 = vld [vmem:[%s3478_s4 + $0x60] sm:$0xff]   ;;  %v2900_v20 = vld [vmem:[%s3478_s4 + $0x68] sm:$0xff]  }
  0x93   : > { %2649 = vmatpush3.bf16.msra.mxu0 %v2874_v21  ;;  %2570 = vmatprep.subr.bf16.mxu1 %v2875_v22  ;;  %v1428_v37 = vshrl.u32 %v3505_v33, 16  ;;  %v1430_v38 = vshll.u32 %v3505_v33, 16  ;;  %v1013_v54 = vshrl.u32 %v3503_v32, 16  ;;  %v1015_v55 = vshll.u32 %v3503_v32, 16  ;;  %v2899_v18 = vld [vmem:[%s3478_s4 + $0x160] sm:$0xff]   ;;  %v2901_v21 = vld [vmem:[%s3478_s4 + $0x168] sm:$0xff]  }
  0x94   : > { %2650 = vmatprep.subr.bf16.mxu0 %v2876_v23  ;;  %2580 = vmatprep.mubr.bf16.mxu1 %v3503_v32  ;;  %v1435_v42 = vshll.u32 %v3513_v36, 16  ;;  %v1439_v48 = vshrl.u32 %v3513_v36, 16  ;;  %v1443_v49 = vshll.u32 %v3520_v43, 16  ;;  %v1020_v58 = vshll.u32 %v3530_v52, 16  ;;  %v2906_v29 = vld [vmem:[%s3478_s4 + $0x80] sm:$0xff]   ;;  %v2910_v39 = vld [vmem:[%s3478_s4 + $0x188] sm:$0xff]  }
  0x95   : > { %v1432_v41 = vrot.slane %v1430_v38, 1  ;;  %v1017_v60 = vrot.slane %v1015_v55, 1  ;;  %v1575_v63 = vrot.slane %v3505_v33, 1  ;;  %v1576_v2 = vrot.slane %v3513_v36, 1  ;;  %v2907_v31 = vld [vmem:[%s3478_s4 + $0x180] sm:$0xff]   ;;  %v2909_v38 = vld [vmem:[%s3478_s4 + $0x88] sm:$0xff]  }
  0x96   : > { %2571 = vmatpush3.bf16.msra.mxu1 %v2875_v22  ;;  %v1437_v47 = vrot.slane %v1435_v42, 1  ;;  %v1445_v57 = vrot.slane %v1443_v49, 1  ;;  %v1022_v61 = vrot.slane %v1020_v58, 1  ;;  %v1024_v8 = vshrl.u32 %v3530_v52, 16  ;;  %v2911_v42 = vld [vmem:[%s3478_s4 + $0x90] sm:$0xff]   ;;  %v2913_v49 = vld [vmem:[%s3478_s4 + $0x98] sm:$0xff]  }
  0x97   : > { %2651 = vmatpush3.bf16.msra.mxu0 %v2876_v23  ;;  %2572 = vmatprep.subr.bf16.mxu1 %v2877_v24  ;;  %v1433_v46 = vor.u32 %v1432_v41, %v1428_v37  ;;  %v1018_v62 = vor.u32 %v1017_v60, %v1013_v54  ;;  %v1577_v5 = vsel %vm1160_vm1, %v1575_v63, %v1576_v2  ;;  %v1840_v10 = vshll.u32 %v3523_v44, 16  ;;  %v2902_v23 = vld [vmem:[%s3478_s4 + $0x70] sm:$0xff]   ;;  %v2941_v41 = vld [vmem:[%s3495_s11 + $0x18] ss:$0 sps:$4 sm:$0xff]   ;;  %v2916_v54 = vld [vmem:[%s3478_s4 + $0x1a0] sm:$0xff]   ;;  %s3663_s11 = scalar_lea.hbm %s3728_s3, %s2471_s10 }
  0x98   : > { %2652 = vmatprep.subr.bf16.mxu0 %v2878_v25  ;;  %v1441_v56 = vor.u32 %v1439_v48, %v1437_v47  ;;  %v1026_v12 = vor.u32 %v1024_v8, %v1022_v61  ;;  %v3554_v14 = vrot.slane %v3530_v52, 1  ;;  %v1980_v15 = vrot.slane %v3523_v44, 1  ;;  %v2917_v55 = vld [vmem:[%s3478_s4 + $0xa8] sm:$0xff]   ;;  %v2920_v58 = vld [vmem:[%s3478_s4 + $0x1b0] sm:$0xff]   ;;  %v2922_v60 = vld [vmem:[%s3478_s4 + $0x1b8] sm:$0xff]  }
  0x99   : > { %v1438_v51 = vsel %vm1011_vm0, %v1433_v46, %v1437_v47  ;;  %v1023_v4 = vsel %vm1011_vm0, %v1018_v62, %v1022_v61  ;;  %v1842_v13 = vrot.slane %v1840_v10, 1  ;;  %v3572_v22 = vcombine.low %v3508_v34, %v3508_v34  ;;  %v2923_v62 = vld [vmem:[%s3478_s4 + $0xc0] sm:$0xff]   ;;  %v2935_v8 = vld [vmem:[%s3478_s4 + $0x1e8] sm:$0xff]   ;;  %v2937_v10 = vld [vmem:[%s3478_s4 + $0x1f0] sm:$0xff]  }
  0x9a   : > { %2573 = vmatpush3.bf16.msra.mxu1 %v2877_v24  ;;  %2660 = vmatprep.mubr.bf16.mxu0 %v1438_v51  ;;  %v1446_v0 = vsel %vm1011_vm0, %v1441_v56, %v1445_v57  ;;  %v3566_v19 = vsel %vm1160_vm1, %v3554_v14, %v1980_v15  ;;  %v2903_v24 = vld [vmem:[%s3478_s4 + $0x170] sm:$0xff]   ;;  %v1578_v30 = vrot.slane %v3520_v43, 1  ;;  %v1161_v34 = vrot.slane %v3503_v32, 1  ;;  %v2914_v51 = vld [vmem:[%s3478_s4 + $0x198] sm:$0xff]   ;;  %v2918_v56 = vld [vmem:[%s3478_s4 + $0x1a8] sm:$0xff]  }
  0x9b   : > { %2653 = vmatpush3.bf16.msra.mxu0 %v2878_v25  ;;  %2574 = vmatprep.subr.bf16.mxu1 %v2879_v26  ;;  %v3559_v17 = vsel %vm1011_vm0, %v1026_v12, %v1842_v13  ;;  %v1028_v25 = vshll.u32 %v3572_v22, 16  ;;  %v2912_v43 = vld [vmem:[%s3478_s4 + $0x190] sm:$0xff]   ;;  %v1848_v46 = vshll.u32 %v2941_v41, 16  ;;  %v1982_v47 = vrot.slane %v2941_v41, 1  ;;  %v2924_v63 = vld [vmem:[%s3478_s4 + $0x1c0] sm:$0xff]  }
  0x9c   : > { %2654 = vmatprep.subr.bf16.mxu0 %v2880_v27  ;;  %v1579_v37 = vsel %vm1160_vm1, %v1576_v2, %v1578_v30  ;;  %v1163_v32 = vsel %vm1160_vm1, %v1161_v34, %v3554_v14  ;;  %v2919_v57 = vld [vmem:[%s3478_s4 + $0xb0] sm:$0xff]   ;;  %v1164_v61 = vrot.slane %v3572_v22, 1  ;;  %v2927_v2 = vld [vmem:[%s3478_s4 + $0x1c8] sm:$0xff]  }
  0x9d   : > { %v1030_v28 = vrot.slane %v1028_v25, 1  ;;  %v1850_v48 = vrot.slane %v1848_v46, 1  ;;  %v2468_v25 = vld [vmem:[%s852_s28] ss:$0 sm:$0xff]  ;;  %s2953_s28 = sshll.u32 %s3061_s27, 4  ;;  %s2954_s28 = int_to_ptr.vmem [resolvable:$false] %s2953_s28 }
  0x9e   : > { %2575 = vmatpush3.bf16.msra.mxu1 %v2879_v26  ;;  %v2904_v26 = vld [vmem:[%s3478_s4 + $0x78] sm:$0xff]   ;;  %s2955_s29 = scalar_lea.vmem %s2954_s28, 512 }
  0x9f   : > { %2655 = vmatpush3.bf16.msra.mxu0 %v2880_v27  ;;  %2576 = vmatprep.subr.bf16.mxu1 %v2881_v35  ;;  %v2905_v27 = vld [vmem:[%s3478_s4 + $0x178] sm:$0xff]  }
  0xa0   : > { %2656 = vmatprep.subr.bf16.mxu0 %v2882_v40 }
  0xa2   : > { %2577 = vmatpush3.bf16.msra.mxu1 %v2881_v35  ;;  %v1031_v35 = vsel %vm1011_vm0, %v1026_v12, %v1030_v28  ;;  %v2939_v12 = vld [vmem:[%s3478_s4 + $0x1f8] sm:$0xff]  }
  0xa3   : > { %2657 = vmatpush3.bf16.msra.mxu0 %v2882_v40  ;;  %2578 = vmatprep.subr.bf16.mxu1 %v2883_v45  ;;  %v1844_v40 = vshrl.u32 %v3523_v44, 16 }
  0xa4   : > { %2658 = vmatprep.subr.bf16.mxu0 %v2884_v50 }
  0xa6   : > { %2579 = vmatpush3.bf16.msra.mxu1 %v2883_v45  ;;  %v1846_v45 = vor.u32 %v1844_v40, %v1842_v13  ;;  %v2940_v13 = vld [vmem:[%s3478_s4 + $0x200] sm:$0xff]  }
  0xa7   : > { %2659 = vmatpush3.bf16.msra.mxu0 %v2884_v50  ;;  %2584 = vmatprep.subr.bf16.mxu1 %v2888_v53  ;;  %v3600_v50 = vsel %vm1160_vm1, %v1980_v15, %v1982_v47  ;;  %v2943_v15 = vld [vmem:[%s3478_s4 + $0x210] sm:$0xff]  }
  0xa8   : > { %2664 = vmatprep.subr.bf16.mxu0 %v2890_v59 }
  0xa9   : > { %2581 = vmatmul.mubr.bf16.vlgmr.msra.gmra.mrb[0].mxu1 %v3530_v52 }
  0xaa   : > { %2585 = vmatpush3.bf16.msra.mxu1 %v2888_v53  ;;  %2661 = vmatmul.mubr.bf16.vlgmr.msra.gmra.mrb[0].mxu0 %v1446_v0  ;;  %v3604_v53 = vsel %vm1011_vm0, %v1846_v45, %v1850_v48  ;;  %v1165_v0 = vsel %vm1160_vm1, %v3554_v14, %v1164_v61  ;;  %v2942_v14 = vld [vmem:[%s3478_s4 + $0x208] sm:$0xff]  }
  0xab   : > { %2665 = vmatpush3.bf16.msra.mxu0 %v2890_v59  ;;  %2586 = vmatprep.subr.bf16.mxu1 %v2892_v1  ;;  %v2921_v59 = vld [vmem:[%s3478_s4 + $0xb8] sm:$0xff]  }
  0xac   : > { %2666 = vmatprep.subr.bf16.mxu0 %v2893_v3  ;;  %2600 = vmatprep.mubr.bf16.mxu1 %v1023_v4  ;;  %v2929_v4 = vld [vmem:[%s3478_s4 + $0x1d0] sm:$0xff]  }
  0xad   : > { %2680 = vmatprep.mubr.bf16.mxu0 %v1577_v5  ;;  %v2930_v5 = vld [vmem:[%s3478_s4 + $0xd8] sm:$0xff]  }
  0xae   : > { %2587 = vmatpush3.bf16.msra.mxu1 %v2892_v1  ;;  %v2926_v1 = vld [vmem:[%s3478_s4 + $0xc8] sm:$0xff]  }
  0xaf   : > { %2667 = vmatpush3.bf16.msra.mxu0 %v2893_v3  ;;  %2588 = vmatprep.subr.bf16.mxu1 %v2894_v6  ;;  %v2928_v3 = vld [vmem:[%s3478_s4 + $0xd0] sm:$0xff]  }
  0xb0   : > { %2668 = vmatprep.subr.bf16.mxu0 %v2895_v7 }
  0xb2   : > { %2589 = vmatpush3.bf16.msra.mxu1 %v2894_v6  ;;  %v2931_v6 = vld [vmem:[%s3478_s4 + $0x1d8] sm:$0xff]  }
  0xb3   : > { %2669 = vmatpush3.bf16.msra.mxu0 %v2895_v7  ;;  %2590 = vmatprep.subr.bf16.mxu1 %v2896_v9  ;;  %v2933_v7 = vld [vmem:[%s3478_s4 + $0x1e0] sm:$0xff]  }
  0xb4   : > { %2670 = vmatprep.subr.bf16.mxu0 %v2897_v11 }
  0xb6   : > { %2591 = vmatpush3.bf16.msra.mxu1 %v2896_v9  ;;  %v2936_v9 = vld [vmem:[%s3478_s4 + $0xf0] sm:$0xff]  }
  0xb7   : > { %2671 = vmatpush3.bf16.msra.mxu0 %v2897_v11  ;;  %2592 = vmatprep.subr.bf16.mxu1 %v2898_v16  ;;  %v2938_v11 = vld [vmem:[%s3478_s4 + $0xf8] sm:$0xff]  }
  0xb8   : > { %2672 = vmatprep.subr.bf16.mxu0 %v2899_v18 }
  0xba   : > { %2593 = vmatpush3.bf16.msra.mxu1 %v2898_v16  ;;  %v2944_v16 = vld [vmem:[%s3478_s4 + $0x218] sm:$0xff]  }
  0xbb   : > { %2673 = vmatpush3.bf16.msra.mxu0 %v2899_v18  ;;  %2594 = vmatprep.subr.bf16.mxu1 %v2900_v20  ;;  %v2946_v18 = vld [vmem:[%s3478_s4 + $0x228] sm:$0xff]  }
  0xbc   : > { %2674 = vmatprep.subr.bf16.mxu0 %v2901_v21 }
  0xbe   : > { %2595 = vmatpush3.bf16.msra.mxu1 %v2900_v20 }
  0xbf   : > { %2675 = vmatpush3.bf16.msra.mxu0 %v2901_v21  ;;  %2596 = vmatprep.subr.bf16.mxu1 %v2902_v23 }
  0xc0   : > { %2676 = vmatprep.subr.bf16.mxu0 %v2903_v24 }
  0xc2   : > { %2597 = vmatpush3.bf16.msra.mxu1 %v2902_v23 }
  0xc3   : > { %2677 = vmatpush3.bf16.msra.mxu0 %v2903_v24  ;;  %2598 = vmatprep.subr.bf16.mxu1 %v2904_v26 }
  0xc4   : > { %2678 = vmatprep.subr.bf16.mxu0 %v2905_v27 }
  0xc6   : > { %2599 = vmatpush3.bf16.msra.mxu1 %v2904_v26 }
  0xc7   : > { %2679 = vmatpush3.bf16.msra.mxu0 %v2905_v27  ;;  %2604 = vmatprep.subr.bf16.mxu1 %v2906_v29 }
  0xc8   : > { %2684 = vmatprep.subr.bf16.mxu0 %v2907_v31 }
  0xc9   : > { %2601 = vmatmul.mubr.bf16.vlgmr.msra.gmra.mrb[0].mxu1 %v1031_v35 }
  0xca   : > { %2605 = vmatpush3.bf16.msra.mxu1 %v2906_v29  ;;  %2681 = vmatmul.mubr.bf16.vlgmr.msra.gmra.mrb[0].mxu0 %v1579_v37 }
  0xcb   : > { %2685 = vmatpush3.bf16.msra.mxu0 %v2907_v31  ;;  %2606 = vmatprep.subr.bf16.mxu1 %v2909_v38 }
  0xcc   : > { %2686 = vmatprep.subr.bf16.mxu0 %v2910_v39  ;;  %2620 = vmatprep.mubr.bf16.mxu1 %v1163_v32 }
  0xcd   : > { %2700 = vmatprep.mubr.bf16.mxu0 %v3530_v52  ;;  %v2915_v52 = vld [vmem:[%s3478_s4 + $0xa0] sm:$0xff]  }
  0xce   : > { %2607 = vmatpush3.bf16.msra.mxu1 %v2909_v38 }
  0xcf   : > { %2687 = vmatpush3.bf16.msra.mxu0 %v2910_v39  ;;  %2608 = vmatprep.subr.bf16.mxu1 %v2911_v42 }
  0xd0   : > { %2688 = vmatprep.subr.bf16.mxu0 %v2912_v43 }
  0xd2   : > { %2609 = vmatpush3.bf16.msra.mxu1 %v2911_v42 }
  0xd3   : > { %2689 = vmatpush3.bf16.msra.mxu0 %v2912_v43  ;;  %2610 = vmatprep.subr.bf16.mxu1 %v2913_v49 }
  0xd4   : > { %2690 = vmatprep.subr.bf16.mxu0 %v2914_v51 }
  0xd6   : > { %2611 = vmatpush3.bf16.msra.mxu1 %v2913_v49 }
  0xd7   : > { %2691 = vmatpush3.bf16.msra.mxu0 %v2914_v51  ;;  %2612 = vmatprep.subr.bf16.mxu1 %v2915_v52 }
  0xd8   : > { %2692 = vmatprep.subr.bf16.mxu0 %v2916_v54 }
  0xda   : > { %2613 = vmatpush3.bf16.msra.mxu1 %v2915_v52 }
  0xdb   : > { %2693 = vmatpush3.bf16.msra.mxu0 %v2916_v54  ;;  %2614 = vmatprep.subr.bf16.mxu1 %v2917_v55 }
  0xdc   : > { %2694 = vmatprep.subr.bf16.mxu0 %v2918_v56 }
  0xde   : > { %2615 = vmatpush3.bf16.msra.mxu1 %v2917_v55 }
  0xdf   : > { %2695 = vmatpush3.bf16.msra.mxu0 %v2918_v56  ;;  %2616 = vmatprep.subr.bf16.mxu1 %v2919_v57 }
  0xe0   : > { %2696 = vmatprep.subr.bf16.mxu0 %v2920_v58 }
  0xe2   : > { %2617 = vmatpush3.bf16.msra.mxu1 %v2919_v57 }
  0xe3   : > { %2697 = vmatpush3.bf16.msra.mxu0 %v2920_v58  ;;  %2618 = vmatprep.subr.bf16.mxu1 %v2921_v59 }
  0xe4   : > { %2698 = vmatprep.subr.bf16.mxu0 %v2922_v60 }
  0xe6   : > { %2619 = vmatpush3.bf16.msra.mxu1 %v2921_v59 }
  0xe7   : > { %2699 = vmatpush3.bf16.msra.mxu0 %v2922_v60  ;;  %2624 = vmatprep.subr.bf16.mxu1 %v2923_v62 }
  0xe8   : > { %2704 = vmatprep.subr.bf16.mxu0 %v2924_v63 }
  0xe9   : > { %2621 = vmatmul.mubr.bf16.vlgmr.msra.gmra.mrb[0].mxu1 %v1165_v0 }
  0xea   : > { %2625 = vmatpush3.bf16.msra.mxu1 %v2923_v62  ;;  %2701 = vmatmul.mubr.bf16.vlgmr.msra.gmra.mrb[0].mxu0 %v3523_v44  ;;  %v2932_v44 = vld [vmem:[%s3478_s4 + $0xe0] sm:$0xff]  }
  0xeb   : > { %2705 = vmatpush3.bf16.msra.mxu0 %v2924_v63  ;;  %2626 = vmatprep.subr.bf16.mxu1 %v2926_v1 }
  0xec   : > { %2706 = vmatprep.subr.bf16.mxu0 %v2927_v2  ;;  %2640 = vmatprep.mubr.bf16.mxu1 %v3505_v33  ;;  %v2934_v33 = vld [vmem:[%s3478_s4 + $0xe8] sm:$0xff]  }
  0xed   : > { %2720 = vmatprep.mubr.bf16.mxu0 %v3559_v17  ;;  %v2945_v17 = vld [vmem:[%s3478_s4 + $0x220] sm:$0xff]  }
  0xee   : > { %2627 = vmatpush3.bf16.msra.mxu1 %v2926_v1 }
  0xef   : > { %2707 = vmatpush3.bf16.msra.mxu0 %v2927_v2  ;;  %2628 = vmatprep.subr.bf16.mxu1 %v2928_v3 }
  0xf0   : > { %2708 = vmatprep.subr.bf16.mxu0 %v2929_v4 }
  0xf2   : > { %2629 = vmatpush3.bf16.msra.mxu1 %v2928_v3 }
  0xf3   : > { %2709 = vmatpush3.bf16.msra.mxu0 %v2929_v4  ;;  %2630 = vmatprep.subr.bf16.mxu1 %v2930_v5 }
  0xf4   : > { %2710 = vmatprep.subr.bf16.mxu0 %v2931_v6 }
  0xf6   : > { %2631 = vmatpush3.bf16.msra.mxu1 %v2930_v5 }
  0xf7   : > { %2711 = vmatpush3.bf16.msra.mxu0 %v2931_v6  ;;  %2632 = vmatprep.subr.bf16.mxu1 %v2932_v44 }
  0xf8   : > { %2712 = vmatprep.subr.bf16.mxu0 %v2933_v7 }
  0xfa   : > { %2633 = vmatpush3.bf16.msra.mxu1 %v2932_v44 }
  0xfb   : > { %2713 = vmatpush3.bf16.msra.mxu0 %v2933_v7  ;;  %2634 = vmatprep.subr.bf16.mxu1 %v2934_v33 }
  0xfc   : > { %2714 = vmatprep.subr.bf16.mxu0 %v2935_v8 }
  0xfe   : > { %2635 = vmatpush3.bf16.msra.mxu1 %v2934_v33 }
  0xff   : > { %2715 = vmatpush3.bf16.msra.mxu0 %v2935_v8  ;;  %2636 = vmatprep.subr.bf16.mxu1 %v2936_v9 }
 0x100   : > { %2716 = vmatprep.subr.bf16.mxu0 %v2937_v10 }
 0x102   : > { %2637 = vmatpush3.bf16.msra.mxu1 %v2936_v9 }
 0x103   : > { %2717 = vmatpush3.bf16.msra.mxu0 %v2937_v10  ;;  %2638 = vmatprep.subr.bf16.mxu1 %v2938_v11 }
 0x104   : > { %2718 = vmatprep.subr.bf16.mxu0 %v2939_v12 }
 0x106   : > { %2639 = vmatpush3.bf16.msra.mxu1 %v2938_v11 }
 0x107   : > { %2719 = vmatpush3.bf16.msra.mxu0 %v2939_v12 }
 0x108   : > { %2724 = vmatprep.subr.bf16.mxu0 %v2940_v13 }
 0x109   : > { %2641 = vmatmul.mubr.bf16.vlgmr.msra.gmra.mrb[0].mxu1 %v3513_v36  ;;  %v2947_v36 = vld [vmem:[%s3478_s4 + $0x230] sm:$0xff]  }
 0x10a   : > { %2721 = vmatmul.mubr.bf16.vlgmr.msra.gmra.mrb[0].mxu0 %v3604_v53 }
 0x10b   : > { %2725 = vmatpush3.bf16.msra.mxu0 %v2940_v13  ;;  %2740 = vmatprep.mubr.bf16.mxu0 %v3566_v19  ;;  %v2948_v19 = vld [vmem:[%s3478_s4 + $0x238] sm:$0xff]   ;;  %s2258_s4 = sshll.u32 %s838_s26, 4 }
 0x10c   : > { %2726 = vmatprep.subr.bf16.mxu0 %v2942_v14  ;;  %s840_s5 = scalar_lea.vmem [#allocation4], %s2258_s4 }
 0x10d   : > { %s2136_s9 = sshll.u32 %s840_s5, 4  ;;  %s3658_s9 = int_to_ptr.vmem [resolvable:$true] %s2136_s9 }
 0x10e   : > { %s2949_s23 = scalar_lea.vmem %s3658_s9, 256  ;;  %p2956_p8 = scmp.lt.s32.totalorder %s3658_s9, %s2954_s28 }
 0x10f   : > { %2727 = vmatpush3.bf16.msra.mxu0 %v2942_v14  ;;  %p2950_p5 = scmp.ne.s32.totalorder %s3658_s9, %s2949_s23  ;;  %p2957_p9 = scmp.lt.s32.totalorder %s2955_s29, %s2949_s23 }
 0x110   : > { %2728 = vmatprep.subr.bf16.mxu0 %v2943_v15 }
 0x111   : > { %p2951_p6 = pnand %p2950_p5, %p3164_p10  ;;  %p2958_p11 = por %p2957_p9, %p2956_p8 }
 0x113   : > { %2729 = vmatpush3.bf16.msra.mxu0 %v2943_v15  ;;  %p2952_p7 = pneg %p2951_p6 }
 0x114   : > { %2730 = vmatprep.subr.bf16.mxu0 %v2944_v16 }
 0x115   : > { %p2959_p13 = pnand %p2958_p11, %p2952_p7 }
 0x117   : > { %2731 = vmatpush3.bf16.msra.mxu0 %v2944_v16 }
 0x118   : > { %2732 = vmatprep.subr.bf16.mxu0 %v2945_v17 }
 0x11b   : > { %2733 = vmatpush3.bf16.msra.mxu0 %v2945_v17 }
 0x11c   : > { %2734 = vmatprep.subr.bf16.mxu0 %v2946_v18 }
 0x11f   : > { %2735 = vmatpush3.bf16.msra.mxu0 %v2946_v18 }
 0x120   : > { %2736 = vmatprep.subr.bf16.mxu0 %v2947_v36 }
 0x123   : > { %2737 = vmatpush3.bf16.msra.mxu0 %v2947_v36 }
 0x124   : > { %2738 = vmatprep.subr.bf16.mxu0 %v2948_v19 }
 0x127   : > { %2739 = vmatpush3.bf16.msra.mxu0 %v2948_v19 }
 0x12a   : > { %2741 = vmatmul.mubr.bf16.vlgmr.msra.gmra.mrb[0].mxu0 %v3600_v50 }
 0x1dc   : > { %v2642_v20 = vpop.f32.mrb[0].mxu1 }
 0x1dd   : > { %v1380_v21 = vpop.f32.mrb[1].mxu1 }
 0x1de   : > { %v2643_v22 = vpop.f32.mrb[2].mxu1 }
 0x1df   : > { %v1383_v23 = vpop.f32.mrb[3].mxu1 }
 0x1fd   : > { %v2742_v24 = vpop.f32.mrb[0].mxu0 }
 0x1fe   : > { %v2744_v26 = vadd.f32 %v2742_v24, %v2642_v20  ;;  %v2068_v27 = vpop.f32.mrb[1].mxu0 }
 0x1ff   : > { %v2745_v28 = vadd.f32 %v2068_v27, %v1380_v21  ;;  %v2743_v29 = vpop.f32.mrb[2].mxu0 }
 0x200   : > { %v2108_v30 = vadd.f32 %v2744_v26, %v2468_v25  ;;  %v2746_v31 = vadd.f32 %v2743_v29, %v2643_v22  ;;  %v2071_v34 = vpop.f32.mrb[3].mxu0 }
 0x201   : > { %v2106_v35 = vadd.f32 %v2745_v28, %v2468_v25  ;;  %v2747_v37 = vadd.f32 %v2071_v34, %v1383_v23 }
 0x202   : > { %v2112_v38 = vmax.f32 %v2108_v30, 0.0  ;;  %v2109_v39 = vadd.f32 %v2746_v31, %v2468_v25 }
 0x203   : > { %v2110_v40 = vmax.f32 %v2106_v35, 0.0  ;;  %v2107_v32 = vadd.f32 %v2747_v37, %v2468_v25 }
 0x204   : > { %2116 = vst [vmem:[%s840_s5 + $0x8] sm:$0xf] %v2112_v38  ;;  %v2113_v41 = vmax.f32 %v2109_v39, 0.0 }
 0x205   : > { %2114 = vst [vmem:[%s840_s5] sm:$0xf] %v2110_v40  ;;  %v2111_v42 = vmax.f32 %v2107_v32, 0.0 }
 0x206   : > { %2117 = vst [vmem:[%s840_s5 + $0xc] sm:$0xf] %v2113_v41 }
 0x207   : > { %2115 = vst [vmem:[%s840_s5 + $0x4] sm:$0xf] %v2111_v42 }
 0x208   : > { %2962 = shalt.err (!%p2959_p13)
}
 0x209   : > { %s2963_s26 = scalar_lea.hbm %s3663_s11, 256  ;;  %s2967_s5 = scalar_lea.hbm %s3728_s3, 1024 }
 0x20a   : > { %p2964_p0 = scmp.ne.s32.totalorder %s3663_s11, %s2963_s26  ;;  %p2968_p3 = scmp.lt.u32.totalorder %s3663_s11, %s3728_s3 }
 0x20b   : > { %p2969_p4 = scmp.lt.u32.totalorder %s2967_s5, %s2963_s26  ;;  %p2971_p6 = scmp.lt.u32.totalorder %s2963_s26, %s3663_s11 }
 0x20c   : > { %p2965_p1 = pnand %p2964_p0, %p3164_p10 }
 0x20d   : > { %p2970_p5 = por %p2969_p4, %p2968_p3 }
 0x20e   : > { %p2966_p2 = pneg %p2965_p1 }
 0x20f   : > { %p2972_p7 = por %p2971_p6, %p2970_p5 }
 0x211   : > { %p2973_p8 = pnand %p2972_p7, %p2966_p2 }
 0x213   : > { %2976 = shalt.err (!%p2973_p8)
}
 0x214   : > { %s3062_s18 = smov 64   ;;  %s3063_s23 = smov 128  }
 0x215   : > { %s3064_s27 = smov 4  }
 0x216   : > { %2779 = dma.vmem_to_hbm [thread:$0]  (%p3164_p10), %s3658_s9, 256, %s3663_s11, %s3667_s22, %s3062_s18, %s3063_s23, %s3064_s27  }
 0x217 PF: > { %p2785_p9 = scmp.ge.s32.totalorder %s3059_s21, 2  ;;  %s2151_s28 = sand.u32 1, %s3023_s12  }
 0x218   : > { %s2152_s29 = scalar_lea.sflag [#allocation5], %s2151_s28 }
 0x219   : > { %p2782_p11 = pnand %p2785_p9, %p3171_p12 }
 0x21b   : > { %3018 = dma.done.wait (!%p2782_p11), %s2152_s29, 256  }
 0x21c   : > { %3020 = vsyncadd (!%p2782_p11), %s2152_s29, 4294967040  ;;  %s16_s21 = sadd.s32 1, %s3059_s21   ;;  %s3732_s12 = smov %s3027_s13 }
 0x21d   : > { %p13_p13 = scmp.ge.s32.totalorder %s16_s21, 6   ;;  %s3733_s13 = smov %s3031_s14 }
 0x21e   : > { %s3734_s14 = smov %s3169_s7  ;;  %s3735_s15 = smov %s3039_s16 }
 0x21f   : > { %s3736_s16 = smov %s3158_s30  ;;  %s3737_s17 = smov %s3051_s19 }
 0x220   : > { %s3738_s18 = smov %s3055_s20  ;;  %s3739_s19 = smov %s3742_s24 }
 0x221   : > { %s3740_s20 = smov %s3746_s25  ;;  %15 = sbr.rel (!%p13_p13) target bundleno = 6 (0x6), region = 127 }
 0x228   :  { %2157 = vsyncpa [#allocation5], 1 }
 0x229   :  { %2159 = vsyncpa [#allocation5 + $0x1], 1 }

// kernel: _lambda_.6
= control target key start
LH: loop header
LB: loop body
LE: loop exit
PB: predicated region body
PF: predicated region fallthrough
CT: control target
= control target key end

     0   :  { %s7477_s12 = smov 0   ;;  %s7479_s13 = smov 0   ;;  %s9704_s0 = inlined_call_operand.vmem [shape: bf16[2,1,19,24,64], index: 0, kind: input, shape index: {}]   ;;  %s9705_s1 = inlined_call_operand.vmem [shape: bf16[3,3,64,64], index: 1, kind: input, shape index: {}]   ;;  %s9706_s2 = inlined_call_operand.vmem [shape: f32[1,64], index: 2, kind: input, shape index: {}]   ;;  %s9707_s3 = inlined_call_operand.vmem [shape: f32[2,8,8,64], index: 3, kind: output, shape index: {}]  }
   0x1   :  { %s7481_s14 = smov 0  }
   0x2 LB: > { %s32_s15 = sadd.s32 1, %s7450_s13  ;;  %p6170_p0 = scmp.ge.s32.totalorder %s7454_s14, 1  ;;  %s7454_s14 = sphi %s7481_s14, %s13_s14   ;;  %s7450_s13 = sphi %s7479_s13, %s9908_s13   ;;  %s7446_s12 = sphi %s7477_s12, %s9907_s12  }
   0x3   : > { %p34_p1 = scmp.ge.s32.totalorder %s32_s15, 2  ;;  %p183_p2 = scmp.lt.s32.totalorder %s7454_s14, 3 }
   0x5   : > { %s9910_s15 = smov (%p34_p1, %s32_s15), 0  ;;  %p184_p3 = pnand %p6170_p0, %p183_p2 }
   0x7   : > { %187 = sbr.rel (%p184_p3) target bundleno = 808 (0x328), region = 32 }
   0xe   : > { %v7338_v0 = vld [vmem:[%s9705_s1] sm:$0xff]   ;;  %p225_p4 = scmp.lt.s32.totalorder %s7446_s12, 1  ;;  %v7339_v1 = vld [vmem:[%s9705_s1 + $0x8] sm:$0xff]   ;;  %v7340_v2 = vld [vmem:[%s9705_s1 + $0x10] sm:$0xff]   ;;  %vm462_vm0 = vcmask 523264   ;;  %vm1467_vm1 = vcmask 1046528  }
   0xf   : > { %7304 = vmatprep.subr.bf16.mxu1 %v7338_v0  ;;  %6800 = vmatprep.subr.bf16.mxu0 %v7338_v0  ;;  %v7341_v5 = vld [vmem:[%s9705_s1 + $0x18] sm:$0xff]   ;;  %v7344_v10 = vld [vmem:[%s9705_s1 + $0x20] sm:$0xff]   ;;  %v7350_v23 = vld [vmem:[%s9705_s1 + $0x28] sm:$0xff]   ;;  %vm820_vm2 = vsmask.f32 7424  ;;  %vm5442_vm3 = vcmask 517120  }
  0x10   : > { %s9912_s12 = smov (!%p225_p4, %s7446_s12), 1  ;;  %7308 = vmatpush3.bf16.msra.mxu1 %v7338_v0  ;;  %6801 = vmatpush3.bf16.msra.mxu0 %v7338_v0  ;;  %v7349_v11 = vld [vmem:[%s9705_s1 + $0x40] sm:$0xff]   ;;  %v7356_v25 = vld [vmem:[%s9705_s1 + $0x48] sm:$0xff]   ;;  %v7361_v33 = vld [vmem:[%s9705_s1 + $0x30] sm:$0xff]   ;;  %vm5955_vm4 = vcmask 1041409   ;;  %vm5957_vm5 = vcmask 1042434  }
  0x11   : > { %7305 = vmatprep.subr.bf16.mxu1 %v7339_v1  ;;  %6802 = vmatprep.subr.bf16.mxu0 %v7339_v1  ;;  %s7312_s22 = smul.u32 228, %s9912_s12  ;;  %v7366_v36 = vld [vmem:[%s9705_s1 + $0x50] sm:$0xff]   ;;  %v7367_v41 = vld [vmem:[%s9705_s1 + $0x38] sm:$0xff]   ;;  %v7641_v50 = vld [vmem:[%s9705_s1 + $0x60] sm:$0xff]   ;;  %vm5959_vm6 = vcmask 1043459   ;;  %vm5961_vm7 = vcmask 1044484  }
  0x12   : > { %v7372_v42 = vld [vmem:[%s9705_s1 + $0x58] sm:$0xff]   ;;  %v7654_v53 = vld [vmem:[%s9705_s1 + $0x80] sm:$0xff]   ;;  %vm5963_vm8 = vcmask 1045509   ;;  %vm5965_vm9 = vcmask 1046534   ;;  %vm5967_vm10 = vcmask 1047559   ;;  %s6547_s27 = sshll.u32 %s9912_s12, 6 }
  0x13   : > { %s7510_s25 = scalar_lea.vmem %s9704_s0, %s7312_s22  ;;  %s9205_s12 = scalar_lea.vmem %s9707_s3, %s6547_s27 }
  0x14   : > { %7309 = vmatpush3.bf16.msra.mxu1 %v7339_v1  ;;  %6803 = vmatpush3.bf16.msra.mxu0 %v7339_v1  ;;  %v279_v3 = vld [vmem:[%s7510_s25 + $0x60] sm:$0xf]  ;;  %v280_v4 = vld [vmem:[%s7510_s25 + $0x64] sm:$0xf]  ;;  %v281_v8 = vld [vmem:[%s7510_s25 + $0x68] sm:$0xf] }
  0x15   : > { %7306 = vmatprep.subr.bf16.mxu1 %v7340_v2  ;;  %v7517_v6 = vcombine.low %v279_v3, %v280_v4  ;;  %6804 = vmatprep.subr.bf16.mxu0 %v7340_v2  ;;  %v7520_v7 = vld [vmem:[%s7510_s25] sm:$0xff]   ;;  %v282_v9 = vld [vmem:[%s7510_s25 + $0x6c] sm:$0xf]  ;;  %v283_v12 = vld [vmem:[%s7510_s25 + $0x70] sm:$0xf] }
  0x16   : > { %v257_v13 = vld [vmem:[%s7510_s25 + $0x8] sm:$0xf]  ;;  %v258_v14 = vld [vmem:[%s7510_s25 + $0xc] sm:$0xf]  ;;  %v284_v15 = vld [vmem:[%s7510_s25 + $0x74] sm:$0xf]  ;;  %6808 = vmatprep.mubr.msk.bf16.mxu0 %vm462_vm0, %v7520_v7  ;;  %v7542_v19 = vcombine.low %v281_v8, %v282_v9 }
  0x17   : > { %6832 = vmatprep.mubr.msk.bf16.mxu1 %vm462_vm0, %v7517_v6  ;;  %v260_v16 = vld [vmem:[%s7510_s25 + $0x14] sm:$0xf]  ;;  %v261_v17 = vld [vmem:[%s7510_s25 + $0x18] sm:$0xf]  ;;  %v7544_v20 = vcombine.low %v257_v13, %v258_v14  ;;  %v259_v21 = vld [vmem:[%s7510_s25 + $0x10] sm:$0xf]  ;;  %v7547_v22 = vcombine.low %v283_v12, %v284_v15 }
  0x18   : > { %7310 = vmatpush3.bf16.msra.mxu1 %v7340_v2  ;;  %6805 = vmatpush3.bf16.msra.mxu0 %v7340_v2  ;;  %v7540_v18 = vcombine.low %v260_v16, %v261_v17  ;;  %v7552_v24 = vcombine.low %v259_v21, %v260_v16  ;;  %v7562_v26 = vld [vmem:[%s7510_s25 + $0x78] sm:$0xf]  ;;  %v286_v27 = vld [vmem:[%s7510_s25 + $0x7c] sm:$0xf]  ;;  %v287_v29 = vld [vmem:[%s7510_s25 + $0x80] sm:$0xf]  ;;  %v7614_v43 = vcombine.low %v258_v14, %v259_v21 }
  0x19   : > { %7307 = vmatprep.subr.bf16.mxu1 %v7341_v5  ;;  %6806 = vmatprep.subr.bf16.mxu0 %v7341_v5  ;;  %v7568_v28 = vld [vmem:[%s7510_s25 + $0x1c] sm:$0xf]  ;;  %v288_v30 = vld [vmem:[%s7510_s25 + $0x84] sm:$0xf]  ;;  %v7573_v31 = vld [vmem:[%s7510_s25 + $0x20] sm:$0xf]  ;;  %v7584_v34 = vcombine.low %v7562_v26, %v286_v27 }
  0x1a   : > { %v7576_v32 = vld [vmem:[%s7510_s25 + $0x24] sm:$0xf]  ;;  %v7587_v35 = vcombine.low %v261_v17, %v7568_v28  ;;  %v7592_v37 = vcombine.low %v287_v29, %v288_v30  ;;  %v7599_v39 = vld [vmem:[%s7510_s25 + $0x88] sm:$0xf]  ;;  %v7602_v40 = vld [vmem:[%s7510_s25 + $0x8c] sm:$0xf] }
  0x1b   : > { %v7596_v38 = vcombine.low %v7573_v31, %v7576_v32  ;;  %9764 = vst [vmem:[#allocation3_spill] sm:$0xff] %v7602_v40  ;;  %v7621_v44 = vld [vmem:[%s7510_s25 + $0x90] sm:$0xf]  ;;  %v7624_v45 = vld [vmem:[%s7510_s25 + $0x28] sm:$0xf]  ;;  %v7645_v51 = vcombine.low %v7599_v39, %v7602_v40  ;;  %v823_v4 = vshll.u32 %v7520_v7, 16 }
  0x1c   : > { %7311 = vmatpush3.bf16.msra.mxu1 %v7341_v5  ;;  %6807 = vmatpush3.bf16.msra.mxu0 %v7341_v5  ;;  %v7627_v46 = vld [vmem:[%s7510_s25 + $0x2c] sm:$0xf]  ;;  %v7630_v47 = vld [vmem:[%s7510_s25 + $0x94] sm:$0xf]  ;;  %v7633_v48 = vld [vmem:[%s7510_s25 + $0x30] sm:$0xf] }
  0x1d   : > { %6856 = vmatprep.subr.bf16.mxu1 %v7344_v10  ;;  %6912 = vmatprep.subr.bf16.mxu0 %v7349_v11  ;;  %9765 = vst [vmem:[#allocation4_spill] sm:$0xff] %v7630_v47  ;;  %v7636_v49 = vld [vmem:[%s7510_s25 + $0x34] sm:$0xf]  ;;  %v7649_v52 = vcombine.low %v7624_v45, %v7627_v46  ;;  %v7658_v54 = vcombine.low %v7621_v44, %v7630_v47  ;;  %v7665_v56 = vld [vmem:[%s7510_s25 + $0x98] sm:$0xf]  ;;  %v827_v27 = vshll.u32 %v7544_v20, 16 }
  0x1e   : > { %v7662_v55 = vcombine.low %v7633_v48, %v7636_v49  ;;  %9766 = vst [vmem:[#allocation5_spill] sm:$0xff] %v7665_v56  ;;  %v7668_v57 = vld [vmem:[%s7510_s25 + $0x9c] sm:$0xf]  ;;  %v7677_v58 = vld [vmem:[%s7510_s25 + $0xa0] sm:$0xf] }
  0x1f   : > { %6833 = vmatmul.mubr.msk.bf16.vlgmr.msra.gmra.mrb[0].mxu1 %vm462_vm0, %v7542_v19  ;;  %6809 = vmatmul.mubr.msk.bf16.vlgmr.msra.gmra.mrb[0].mxu0 %vm462_vm0, %v7544_v20  ;;  %9767 = vst [vmem:[#allocation6_spill] sm:$0xff] %v7668_v57  ;;  %9768 = vst [vmem:[#allocation7_spill] sm:$0xff] %v7677_v58  ;;  %v7680_v59 = vld [vmem:[%s7510_s25 + $0xa4] sm:$0xf]  ;;  %v7683_v60 = vld [vmem:[%s7510_s25 + $0x38] sm:$0xf]  ;;  %v7700_v0 = vcombine.low %v7665_v56, %v7668_v57 }
  0x20   : > { %6857 = vmatpush3.bf16.msra.mxu1 %v7344_v10  ;;  %6836 = vmatprep.mubr.msk.bf16.mxu1 %vm462_vm0, %v7547_v22  ;;  %9769 = vst [vmem:[#allocation8_spill] sm:$0xff] %v7680_v59  ;;  %v7690_v61 = vld [vmem:[%s7510_s25 + $0x3c] sm:$0xf]  ;;  %v7693_v62 = vld [vmem:[%s7510_s25 + $0x40] sm:$0xf]  ;;  %v7708_v2 = vcombine.low %v7677_v58, %v7680_v59  ;;  %v834_v59 = vshll.u32 %v7552_v24, 16 }
  0x21   : > { %6913 = vmatpush3.bf16.msra.mxu0 %v7349_v11  ;;  %6858 = vmatprep.subr.bf16.mxu1 %v7350_v23  ;;  %v7696_v63 = vld [vmem:[%s7510_s25 + $0x44] sm:$0xf]  ;;  %v7704_v1 = vcombine.low %v7683_v60, %v7690_v61  ;;  %v7716_v5 = vld [vmem:[%s7510_s25 + $0xa8] sm:$0xf]  ;;  %v7719_v8 = vld [vmem:[%s7510_s25 + $0xac] sm:$0xf] }
  0x22   : > { %6812 = vmatprep.mubr.msk.bf16.mxu0 %vm462_vm0, %v7552_v24  ;;  %6914 = vmatprep.subr.bf16.mxu0 %v7356_v25  ;;  %v7712_v3 = vcombine.low %v7693_v62, %v7696_v63  ;;  %9770 = vst [vmem:[#allocation9_spill] sm:$0xff] %v7716_v5  ;;  %9771 = vst [vmem:[#allocation10_spill] sm:$0xff] %v7719_v8  ;;  %v7726_v9 = vld [vmem:[%s7510_s25 + $0xb0] sm:$0xf]  ;;  %v7729_v10 = vld [vmem:[%s7510_s25 + $0xb4] sm:$0xf]  ;;  %v7749_v15 = vcombine.low %v7716_v5, %v7719_v8 }
  0x23   : > { %9772 = vst [vmem:[#allocation11_spill] sm:$0xff] %v7726_v9  ;;  %9773 = vst [vmem:[#allocation12_spill] sm:$0xff] %v7729_v10  ;;  %v7732_v11 = vld [vmem:[%s7510_s25 + $0x48] sm:$0xf]  ;;  %v7739_v12 = vld [vmem:[%s7510_s25 + $0x4c] sm:$0xf]  ;;  %v7757_v17 = vcombine.low %v7726_v9, %v7729_v10 }
  0x24   : > { %6859 = vmatpush3.bf16.msra.mxu1 %v7350_v23  ;;  %v7742_v13 = vld [vmem:[%s7510_s25 + $0x50] sm:$0xf]  ;;  %v7745_v14 = vld [vmem:[%s7510_s25 + $0x54] sm:$0xf]  ;;  %v7753_v16 = vcombine.low %v7732_v11, %v7739_v12  ;;  %v821_v23 = vshrl.u32 %v7520_v7, 16  ;;  %v1469_v10 = vrot.slane %v7544_v20, 1 }
  0x25   : > { %6915 = vmatpush3.bf16.msra.mxu0 %v7356_v25  ;;  %6860 = vmatprep.subr.bf16.mxu1 %v7361_v33  ;;  %9774 = vst [vmem:[#allocation13_spill] sm:$0xff] %v7757_v17  ;;  %v7761_v21 = vcombine.low %v7742_v13, %v7745_v14  ;;  %v825_v25 = vrot.slane %v823_v4, 1  ;;  %v7766_v29 = vld [vmem:[%s7510_s25 + $0xb8] sm:$0xf]  ;;  %v7773_v30 = vld [vmem:[%s7510_s25 + $0xbc] sm:$0xf] }
  0x26   : > { %6916 = vmatprep.subr.bf16.mxu0 %v7366_v36  ;;  %9775 = vst [vmem:[#allocation14_spill] sm:$0xff] %v7766_v29  ;;  %9776 = vst [vmem:[#allocation15_spill] sm:$0xff] %v7773_v30  ;;  %v1468_v4 = vrot.slane %v7520_v7, 1  ;;  %v7789_v8 = vcombine.low %v7766_v29, %v7773_v30  ;;  %v831_v5 = vshrl.u32 %v7544_v20, 16  ;;  %v841_v7 = vshll.u32 %v7587_v35, 16 }
  0x27   : > { %6837 = vmatmul.mubr.msk.bf16.gmra.mrb[4].mxu1 %vm462_vm0, %v7584_v34  ;;  %6813 = vmatmul.mubr.msk.bf16.gmra.mrb[4].mxu0 %vm462_vm0, %v7587_v35  ;;  %v836_v30 = vrot.slane %v834_v59, 1  ;;  %v1471_v20 = vrot.slane %v7552_v24, 1  ;;  %v1473_v58 = vrot.slane %v7587_v35, 1  ;;  %v845_v56 = vshrl.u32 %v7587_v35, 16 }
  0x28   : > { %6840 = vmatprep.mubr.msk.bf16.mxu1 %vm462_vm0, %v7592_v37  ;;  %6816 = vmatprep.mubr.msk.bf16.mxu0 %vm462_vm0, %v7596_v38  ;;  %9777 = vst [vmem:[#allocation16_spill] sm:$0xff] %v7789_v8  ;;  %v843_v57 = vrot.slane %v841_v7, 1 }
  0x29   : > { %6861 = vmatpush3.bf16.msra.mxu1 %v7361_v33  ;;  %6917 = vmatpush3.bf16.msra.mxu0 %v7366_v36  ;;  %v7776_v33 = vld [vmem:[%s7510_s25 + $0x58] sm:$0xf]  ;;  %v7783_v36 = vld [vmem:[%s7510_s25 + $0x5c] sm:$0xf]  ;;  %v1472_v40 = vsel %vm1467_vm1, %v1469_v10, %v1471_v20 }
  0x2a   : > { %6862 = vmatprep.subr.bf16.mxu1 %v7367_v41  ;;  %6918 = vmatprep.subr.bf16.mxu0 %v7372_v42  ;;  %v7793_v9 = vcombine.low %v7776_v33, %v7783_v36 }
  0x2d   : > { %6863 = vmatpush3.bf16.msra.mxu1 %v7367_v41  ;;  %6919 = vmatpush3.bf16.msra.mxu0 %v7372_v42  ;;  %v826_v41 = vor.u32 %v825_v25, %v821_v23  ;;  %v829_v42 = vrot.slane %v827_v27, 1  ;;  %v838_v25 = vshrl.u32 %v7552_v24, 16  ;;  %v1470_v27 = vsel %vm1467_vm1, %v1468_v4, %v1469_v10 }
  0x2e   : > { %6968 = vmatprep.subr.bf16.mxu1 %v7641_v50  ;;  %7024 = vmatprep.subr.bf16.mxu0 %v7654_v53  ;;  %v848_v4 = vshll.u32 %v7596_v38, 16  ;;  %v1474_v24 = vsel %vm1467_vm1, %v1471_v20, %v1473_v58  ;;  %v847_v10 = vor.u32 %v845_v56, %v843_v57  ;;  %v1477_v20 = vrot.slane %v7649_v52, 1 }
  0x2f   : > { %6841 = vmatmul.mubr.msk.bf16.gmra.mrb[8].mxu1 %vm462_vm0, %v7645_v51  ;;  %6817 = vmatmul.mubr.msk.bf16.gmra.mrb[8].mxu0 %vm462_vm0, %v7649_v52  ;;  %v830_v23 = vsel %vm820_vm2, %v826_v41, %v829_v42  ;;  %v833_v29 = vor.u32 %v831_v5, %v829_v42  ;;  %v840_v41 = vor.u32 %v838_v25, %v836_v30  ;;  %v852_v5 = vshrl.u32 %v7596_v38, 16 }
  0x30   : > { %6844 = vmatprep.mubr.msk.bf16.mxu1 %vm462_vm0, %v7658_v54  ;;  %6820 = vmatprep.mubr.msk.bf16.mxu0 %vm462_vm0, %v7662_v55  ;;  %v855_v42 = vshll.u32 %v7649_v52, 16  ;;  %v1475_v25 = vrot.slane %v7596_v38, 1  ;;  %v862_v56 = vshll.u32 %v7662_v55, 16 }
  0x31   : > { %v837_v47 = vsel %vm820_vm2, %v833_v29, %v836_v30  ;;  %v844_v59 = vsel %vm820_vm2, %v840_v41, %v843_v57  ;;  %v7378_v29 = vld [vmem:[%s9705_s1 + $0x88] sm:$0xff]   ;;  %v850_v30 = vrot.slane %v848_v4, 1  ;;  %v866_v4 = vshrl.u32 %v7662_v55, 16 }
  0x32   : > { %v7847_v41 = vsel %vm1467_vm1, %v1473_v58, %v1475_v25  ;;  %v7863_v58 = vcombine.low %v7627_v46, %v7633_v48  ;;  %v7881_v46 = vcombine.low %v7690_v61, %v7693_v62  ;;  %v7896_v61 = vld [vmem:[%s9705_s1 + $0xa0] sm:$0xff]  }
  0x33   : > { %v854_v7 = vor.u32 %v852_v5, %v850_v30  ;;  %v7844_v57 = vsel %vm820_vm2, %v847_v10, %v850_v30  ;;  %9779 = vst [vmem:[#allocation18_spill] sm:$0xff] %v7847_v41  ;;  %v7859_v5 = vsel %vm1467_vm1, %v1475_v25, %v1477_v20  ;;  %v7891_v30 = vcombine.low %v7696_v63, %v7732_v11  ;;  %v7901_v62 = vld [vmem:[%s9705_s1 + $0xc0] sm:$0xff]  }
  0x34   : > { %9778 = vst [vmem:[#allocation17_spill] sm:$0xff] %v7844_v57  ;;  %9781 = vst [vmem:[#allocation20_spill] sm:$0xff] %v7859_v5  ;;  %v876_v10 = vshll.u32 %v7712_v3, 16  ;;  %v7906_v25 = vcombine.low %v7739_v12, %v7742_v13  ;;  %v873_v11 = vshrl.u32 %v7704_v1, 16  ;;  %v883_v12 = vshll.u32 %v7753_v16, 16 }
  0x37   : > { %6845 = vmatmul.mubr.msk.bf16.gmra.mrb[12].mxu1 %vm462_vm0, %v7700_v0  ;;  %6821 = vmatmul.mubr.msk.bf16.gmra.mrb[12].mxu0 %vm462_vm0, %v7704_v1 }
  0x38   : > { %6848 = vmatprep.mubr.msk.bf16.mxu1 %vm462_vm0, %v7708_v2  ;;  %6824 = vmatprep.mubr.msk.bf16.mxu0 %vm462_vm0, %v7712_v3 }
  0x3f   : > { %6849 = vmatmul.mubr.msk.bf16.gmra.mrb[16].mxu1 %vm462_vm0, %v7749_v15  ;;  %6825 = vmatmul.mubr.msk.bf16.gmra.mrb[16].mxu0 %vm462_vm0, %v7753_v16 }
  0x40   : > { %6852 = vmatprep.mubr.msk.bf16.mxu1 %vm462_vm0, %v7757_v17  ;;  %6828 = vmatprep.mubr.msk.bf16.mxu0 %vm462_vm0, %v7761_v21 }
  0x47   : > { %6853 = vmatmul.mubr.msk.bf16.gmra.mrb[20].mxu1 %vm462_vm0, %v7789_v8  ;;  %6829 = vmatmul.mubr.msk.bf16.gmra.mrb[20].mxu0 %vm462_vm0, %v7793_v9 }
  0x48   : > { %6864 = vmatprep.mubr.msk.bf16.mxu1 %vm462_vm0, %v830_v23  ;;  %6920 = vmatprep.mubr.msk.bf16.mxu0 %vm462_vm0, %v1470_v27  ;;  %v7377_v23 = vld [vmem:[%s9705_s1 + $0x68] sm:$0xff]   ;;  %v857_v27 = vrot.slane %v855_v42, 1  ;;  %v7873_v42 = vcombine.low %v7636_v49, %v7683_v60  ;;  %v1479_v49 = vrot.slane %v7662_v55, 1 }
  0x4f   : > { %6865 = vmatmul.mubr.msk.bf16.vlgmr.msra.gmra.mrb[24].mxu1 %vm462_vm0, %v837_v47  ;;  %6921 = vmatmul.mubr.msk.bf16.vlgmr.msra.gmra.mrb[24].mxu0 %vm462_vm0, %v1472_v40  ;;  %v7379_v47 = vld [vmem:[%s9705_s1 + $0x70] sm:$0xff]  }
  0x50   : > { %6969 = vmatpush3.bf16.msra.mxu1 %v7641_v50  ;;  %6868 = vmatprep.mubr.msk.bf16.mxu1 %vm462_vm0, %v844_v59  ;;  %v7380_v40 = vld [vmem:[%s9705_s1 + $0x90] sm:$0xff]   ;;  %v7839_v50 = vcombine.low %v7568_v28, %v7573_v31  ;;  %v7852_v59 = vcombine.low %v7576_v32, %v7624_v45  ;;  %v7855_v28 = vsel %vm820_vm2, %v854_v7, %v857_v27  ;;  %v869_v31 = vshll.u32 %v7704_v1, 16  ;;  %v7381_v32 = vld [vmem:[%s9705_s1 + $0x78] sm:$0xff]  }
  0x51   : > { %7025 = vmatpush3.bf16.msra.mxu0 %v7654_v53  ;;  %6924 = vmatprep.mubr.msk.bf16.mxu0 %vm462_vm0, %v1474_v24  ;;  %v859_v53 = vshrl.u32 %v7649_v52, 16  ;;  %9780 = vst [vmem:[#allocation19_spill] sm:$0xff] %v7855_v28  ;;  %v7382_v45 = vld [vmem:[%s9705_s1 + $0x98] sm:$0xff]   ;;  %v864_v24 = vrot.slane %v862_v56, 1  ;;  %v7913_v7 = vsel %vm1467_vm1, %v1477_v20, %v1479_v49  ;;  %v1483_v20 = vrot.slane %v7712_v3, 1 }
  0x52   : > { %6970 = vmatprep.subr.bf16.mxu1 %v7377_v23  ;;  %7026 = vmatprep.subr.bf16.mxu0 %v7378_v29  ;;  %9783 = vst [vmem:[#allocation22_spill] sm:$0xff] %v7913_v7  ;;  %v885_v56 = vrot.slane %v883_v12, 1 }
  0x53   : > { %v861_v48 = vor.u32 %v859_v53, %v857_v27  ;;  %v868_v60 = vor.u32 %v866_v4, %v864_v24  ;;  %v7917_v27 = vcombine.low %v7745_v14, %v7776_v33  ;;  %v878_v14 = vrot.slane %v876_v10, 1 }
  0x54   : > { %6971 = vmatpush3.bf16.msra.mxu1 %v7377_v23  ;;  %v871_v23 = vrot.slane %v869_v31, 1  ;;  %v1485_v4 = vrot.slane %v7753_v16, 1  ;;  %v890_v31 = vshll.u32 %v7761_v21, 16 }
  0x55   : > { %7027 = vmatpush3.bf16.msra.mxu0 %v7378_v29  ;;  %6972 = vmatprep.subr.bf16.mxu1 %v7379_v47  ;;  %v1481_v29 = vrot.slane %v7704_v1, 1  ;;  %v7909_v63 = vsel %vm820_vm2, %v861_v48, %v864_v24 }
  0x56   : > { %7028 = vmatprep.subr.bf16.mxu0 %v7380_v40  ;;  %9782 = vst [vmem:[#allocation21_spill] sm:$0xff] %v7909_v63  ;;  %v875_v33 = vor.u32 %v873_v11, %v871_v23  ;;  %v892_v10 = vrot.slane %v890_v31, 1  ;;  %v1487_v11 = vrot.slane %v7761_v21, 1 }
  0x57   : > { %6869 = vmatmul.mubr.msk.bf16.gmra.mrb[28].mxu1 %vm462_vm0, %v7844_v57  ;;  %6925 = vmatmul.mubr.msk.bf16.gmra.mrb[28].mxu0 %vm462_vm0, %v7847_v41  ;;  %v7925_v13 = vsel %vm1467_vm1, %v1479_v49, %v1481_v29  ;;  %v7945_v24 = vsel %vm1467_vm1, %v1481_v29, %v1483_v20  ;;  %v894_v49 = vshrl.u32 %v7761_v21, 16 }
  0x58   : > { %6872 = vmatprep.mubr.msk.bf16.mxu1 %vm462_vm0, %v7855_v28  ;;  %6928 = vmatprep.mubr.msk.bf16.mxu0 %vm462_vm0, %v7859_v5  ;;  %9785 = vst [vmem:[#allocation24_spill] sm:$0xff] %v7925_v13  ;;  %9787 = vst [vmem:[#allocation26_spill] sm:$0xff] %v7945_v24  ;;  %v7971_v31 = vsel %vm1467_vm1, %v1485_v4, %v1487_v11 }
  0x59   : > { %6973 = vmatpush3.bf16.msra.mxu1 %v7379_v47  ;;  %7029 = vmatpush3.bf16.msra.mxu0 %v7380_v40  ;;  %v7920_v47 = vsel %vm820_vm2, %v868_v60, %v871_v23  ;;  %v880_v40 = vshrl.u32 %v7712_v3, 16  ;;  %v897_v60 = vshll.u32 %v7793_v9, 16  ;;  %v7953_v23 = vsel %vm1467_vm1, %v1483_v20, %v1485_v4  ;;  %9791 = vst [vmem:[#allocation30_spill] sm:$0xff] %v7971_v31 }
  0x5a   : > { %6974 = vmatprep.subr.bf16.mxu1 %v7381_v32  ;;  %7030 = vmatprep.subr.bf16.mxu0 %v7382_v45  ;;  %9784 = vst [vmem:[#allocation23_spill] sm:$0xff] %v7920_v47  ;;  %9789 = vst [vmem:[#allocation28_spill] sm:$0xff] %v7953_v23 }
  0x5b   : > { %v882_v53 = vor.u32 %v880_v40, %v878_v14  ;;  %v896_v40 = vor.u32 %v894_v49, %v892_v10  ;;  %v899_v12 = vrot.slane %v897_v60, 1  ;;  %v911_v49 = vshll.u32 %v7542_v19, 16 }
  0x5d   : > { %6975 = vmatpush3.bf16.msra.mxu1 %v7381_v32  ;;  %7031 = vmatpush3.bf16.msra.mxu0 %v7382_v45  ;;  %v7941_v32 = vsel %vm820_vm2, %v875_v33, %v878_v14  ;;  %v887_v45 = vshrl.u32 %v7753_v16, 16  ;;  %v7948_v48 = vsel %vm820_vm2, %v882_v53, %v885_v56  ;;  %v1489_v14 = vrot.slane %v7793_v9, 1 }
  0x5e   : > { %7080 = vmatprep.subr.bf16.mxu1 %v7896_v61  ;;  %7136 = vmatprep.subr.bf16.mxu0 %v7901_v62  ;;  %9786 = vst [vmem:[#allocation25_spill] sm:$0xff] %v7941_v32  ;;  %9788 = vst [vmem:[#allocation27_spill] sm:$0xff] %v7948_v48  ;;  %v904_v33 = vshll.u32 %v7517_v6, 16  ;;  %v901_v53 = vshrl.u32 %v7793_v9, 16 }
  0x5f   : > { %6873 = vmatmul.mubr.msk.bf16.gmra.mrb[32].mxu1 %vm462_vm0, %v7909_v63  ;;  %6929 = vmatmul.mubr.msk.bf16.gmra.mrb[32].mxu0 %vm462_vm0, %v7913_v7  ;;  %v889_v29 = vor.u32 %v887_v45, %v885_v56  ;;  %v7974_v56 = vsel %vm820_vm2, %v896_v40, %v899_v12  ;;  %v908_v45 = vshrl.u32 %v7517_v6, 16  ;;  %v7979_v60 = vsel %vm1467_vm1, %v1487_v11, %v1489_v14 }
  0x60   : > { %6876 = vmatprep.mubr.msk.bf16.mxu1 %vm462_vm0, %v7920_v47  ;;  %6932 = vmatprep.mubr.msk.bf16.mxu0 %vm462_vm0, %v7925_v13  ;;  %9792 = vst [vmem:[#allocation31_spill] sm:$0xff] %v7974_v56  ;;  %9793 = vst [vmem:[#allocation32_spill] sm:$0xff] %v7979_v60  ;;  %v903_v4 = vor.u32 %v901_v53, %v899_v12  ;;  %v1493_v11 = vrot.slane %v7542_v19, 1  ;;  %v922_v53 = vshrl.u32 %v7547_v22, 16  ;;  %v2509_v13 = vshll.u32 %v7839_v50, 16 }
  0x61   : > { %v7967_v20 = vsel %vm820_vm2, %v889_v29, %v892_v10  ;;  %v906_v10 = vrot.slane %v904_v33, 1  ;;  %v1491_v29 = vrot.slane %v7517_v6, 1 }
  0x62   : > { %9790 = vst [vmem:[#allocation29_spill] sm:$0xff] %v7967_v20 }
  0x63   : > { %v910_v40 = vor.u32 %v908_v45, %v906_v10  ;;  %v7993_v33 = vsel %vm820_vm2, %v903_v4, %v906_v10  ;;  %v925_v45 = vshll.u32 %v7584_v34, 16  ;;  %v1495_v4 = vrot.slane %v7547_v22, 1 }
  0x64   : > { %9794 = vst [vmem:[#allocation33_spill] sm:$0xff] %v7993_v33 }
  0x67   : > { %6877 = vmatmul.mubr.msk.bf16.gmra.mrb[36].mxu1 %vm462_vm0, %v7941_v32  ;;  %6933 = vmatmul.mubr.msk.bf16.gmra.mrb[36].mxu0 %vm462_vm0, %v7945_v24  ;;  %v2502_v32 = vshll.u32 %v7540_v18, 16 }
  0x68   : > { %6880 = vmatprep.mubr.msk.bf16.mxu1 %vm462_vm0, %v7948_v48  ;;  %6936 = vmatprep.mubr.msk.bf16.mxu0 %vm462_vm0, %v7953_v23  ;;  %v913_v23 = vrot.slane %v911_v49, 1  ;;  %v918_v48 = vshll.u32 %v7547_v22, 16  ;;  %v8005_v49 = vsel %vm1467_vm1, %v1491_v29, %v1493_v11 }
  0x69   : > { %9797 = vst [vmem:[#allocation36_spill] sm:$0xff] %v8005_v49 }
  0x6a   : > { %v8000_v12 = vsel %vm820_vm2, %v910_v40, %v913_v23  ;;  %v920_v10 = vrot.slane %v918_v48, 1 }
  0x6b   : > { %9796 = vst [vmem:[#allocation35_spill] sm:$0xff] %v8000_v12 }
  0x6c   : > { %v924_v40 = vor.u32 %v922_v53, %v920_v10  ;;  %v939_v53 = vshll.u32 %v7645_v51, 16 }
  0x6f   : > { %6881 = vmatmul.mubr.msk.bf16.gmra.mrb[40].mxu1 %vm462_vm0, %v7967_v20  ;;  %6937 = vmatmul.mubr.msk.bf16.gmra.mrb[40].mxu0 %vm462_vm0, %v7971_v31  ;;  %v915_v31 = vshrl.u32 %v7542_v19, 16  ;;  %v7997_v20 = vsel %vm1467_vm1, %v1489_v14, %v1491_v29  ;;  %v1497_v29 = vrot.slane %v7584_v34, 1 }
  0x70   : > { %6884 = vmatprep.mubr.msk.bf16.mxu1 %vm462_vm0, %v7974_v56  ;;  %6940 = vmatprep.mubr.msk.bf16.mxu0 %vm462_vm0, %v7979_v60  ;;  %9795 = vst [vmem:[#allocation34_spill] sm:$0xff] %v7997_v20  ;;  %v927_v60 = vrot.slane %v925_v45, 1  ;;  %v932_v56 = vshll.u32 %v7592_v37, 16 }
  0x71   : > { %v917_v14 = vor.u32 %v915_v31, %v913_v23  ;;  %v936_v31 = vshrl.u32 %v7592_v37, 16  ;;  %v8031_v45 = vsel %vm1467_vm1, %v1495_v4, %v1497_v29 }
  0x72   : > { %v8026_v23 = vsel %vm820_vm2, %v924_v40, %v927_v60  ;;  %9801 = vst [vmem:[#allocation40_spill] sm:$0xff] %v8031_v45 }
  0x73   : > { %v8019_v48 = vsel %vm820_vm2, %v917_v14, %v920_v10  ;;  %9800 = vst [vmem:[#allocation39_spill] sm:$0xff] %v8026_v23  ;;  %v934_v10 = vrot.slane %v932_v56, 1  ;;  %v1499_v14 = vrot.slane %v7592_v37, 1 }
  0x74   : > { %9798 = vst [vmem:[#allocation37_spill] sm:$0xff] %v8019_v48 }
  0x75   : > { %v938_v40 = vor.u32 %v936_v31, %v934_v10  ;;  %v953_v31 = vshll.u32 %v7700_v0, 16 }
  0x77   : > { %6885 = vmatmul.mubr.msk.bf16.gmra.mrb[44].mxu1 %vm462_vm0, %v7993_v33  ;;  %6941 = vmatmul.mubr.msk.bf16.gmra.mrb[44].mxu0 %vm462_vm0, %v7997_v20  ;;  %v929_v20 = vshrl.u32 %v7584_v34, 16  ;;  %v8023_v33 = vsel %vm1467_vm1, %v1493_v11, %v1495_v4  ;;  %v1501_v4 = vrot.slane %v7645_v51, 1 }
  0x78   : > { %6888 = vmatprep.mubr.msk.bf16.mxu1 %vm462_vm0, %v8000_v12  ;;  %6944 = vmatprep.mubr.msk.bf16.mxu0 %vm462_vm0, %v8005_v49  ;;  %9799 = vst [vmem:[#allocation38_spill] sm:$0xff] %v8023_v33  ;;  %v941_v49 = vrot.slane %v939_v53, 1  ;;  %v946_v12 = vshll.u32 %v7658_v54, 16 }
  0x79   : > { %v931_v11 = vor.u32 %v929_v20, %v927_v60  ;;  %v950_v60 = vshrl.u32 %v7658_v54, 16  ;;  %v8057_v53 = vsel %vm1467_vm1, %v1499_v14, %v1501_v4 }
  0x7a   : > { %v8052_v20 = vsel %vm820_vm2, %v938_v40, %v941_v49  ;;  %9805 = vst [vmem:[#allocation44_spill] sm:$0xff] %v8057_v53 }
  0x7b   : > { %v8045_v56 = vsel %vm820_vm2, %v931_v11, %v934_v10  ;;  %9804 = vst [vmem:[#allocation43_spill] sm:$0xff] %v8052_v20  ;;  %v948_v10 = vrot.slane %v946_v12, 1  ;;  %v1503_v11 = vrot.slane %v7658_v54, 1 }
  0x7c   : > { %9802 = vst [vmem:[#allocation41_spill] sm:$0xff] %v8045_v56 }
  0x7d   : > { %v952_v40 = vor.u32 %v950_v60, %v948_v10  ;;  %v967_v60 = vshll.u32 %v7749_v15, 16 }
  0x7f   : > { %6889 = vmatmul.mubr.msk.bf16.gmra.mrb[48].mxu1 %vm462_vm0, %v8019_v48  ;;  %6945 = vmatmul.mubr.msk.bf16.gmra.mrb[48].mxu0 %vm462_vm0, %v8023_v33  ;;  %v943_v33 = vshrl.u32 %v7645_v51, 16  ;;  %v8049_v48 = vsel %vm1467_vm1, %v1497_v29, %v1499_v14  ;;  %v1505_v14 = vrot.slane %v7700_v0, 1 }
  0x80   : > { %6892 = vmatprep.mubr.msk.bf16.mxu1 %vm462_vm0, %v8026_v23  ;;  %6948 = vmatprep.mubr.msk.bf16.mxu0 %vm462_vm0, %v8031_v45  ;;  %9803 = vst [vmem:[#allocation42_spill] sm:$0xff] %v8049_v48  ;;  %v955_v45 = vrot.slane %v953_v31, 1  ;;  %v960_v23 = vshll.u32 %v7708_v2, 16 }
  0x81   : > { %v945_v29 = vor.u32 %v943_v33, %v941_v49  ;;  %v964_v49 = vshrl.u32 %v7708_v2, 16  ;;  %v8083_v31 = vsel %vm1467_vm1, %v1503_v11, %v1505_v14 }
  0x82   : > { %v8078_v33 = vsel %vm820_vm2, %v952_v40, %v955_v45  ;;  %9809 = vst [vmem:[#allocation48_spill] sm:$0xff] %v8083_v31 }
  0x83   : > { %v8071_v12 = vsel %vm820_vm2, %v945_v29, %v948_v10  ;;  %9808 = vst [vmem:[#allocation47_spill] sm:$0xff] %v8078_v33  ;;  %v962_v10 = vrot.slane %v960_v23, 1  ;;  %v1507_v29 = vrot.slane %v7708_v2, 1  ;;  %v971_v23 = vshrl.u32 %v7749_v15, 16 }
  0x84   : > { %9806 = vst [vmem:[#allocation45_spill] sm:$0xff] %v8071_v12 }
  0x85   : > { %v966_v40 = vor.u32 %v964_v49, %v962_v10 }
  0x87   : > { %6893 = vmatmul.mubr.msk.bf16.gmra.mrb[52].mxu1 %vm462_vm0, %v8045_v56  ;;  %6949 = vmatmul.mubr.msk.bf16.gmra.mrb[52].mxu0 %vm462_vm0, %v8049_v48  ;;  %v957_v48 = vshrl.u32 %v7700_v0, 16  ;;  %v8075_v56 = vsel %vm1467_vm1, %v1501_v4, %v1503_v11  ;;  %v969_v11 = vrot.slane %v967_v60, 1  ;;  %v8112_v60 = vld [vmem:[%s7510_s25 + $0xc0] sm:$0xf] }
  0x88   : > { %6896 = vmatprep.mubr.msk.bf16.mxu1 %vm462_vm0, %v8052_v20  ;;  %6952 = vmatprep.mubr.msk.bf16.mxu0 %vm462_vm0, %v8057_v53  ;;  %9807 = vst [vmem:[#allocation46_spill] sm:$0xff] %v8075_v56  ;;  %v1509_v53 = vrot.slane %v7749_v15, 1  ;;  %v8101_v20 = vsel %vm1467_vm1, %v1505_v14, %v1507_v29 }
  0x89   : > { %v959_v4 = vor.u32 %v957_v48, %v955_v45  ;;  %9811 = vst [vmem:[#allocation50_spill] sm:$0xff] %v8101_v20  ;;  %v978_v48 = vshrl.u32 %v7757_v17, 16  ;;  %v981_v45 = vshll.u32 %v7789_v8, 16 }
  0x8a   : > { %v8109_v49 = vsel %vm1467_vm1, %v1507_v29, %v1509_v53  ;;  %v6234_v29 = vcombine.low %v8112_v60, %v8112_v60 }
  0x8b   : > { %9813 = vst [vmem:[#allocation52_spill] sm:$0xff] %v8109_v49 }
  0x8f   : > { %6897 = vmatmul.mubr.msk.bf16.gmra.mrb[56].mxu1 %vm462_vm0, %v8071_v12  ;;  %6953 = vmatmul.mubr.msk.bf16.gmra.mrb[56].mxu0 %vm462_vm0, %v8075_v56  ;;  %v974_v12 = vshll.u32 %v7757_v17, 16  ;;  %v8098_v56 = vsel %vm820_vm2, %v959_v4, %v962_v10  ;;  %v973_v10 = vor.u32 %v971_v23, %v969_v11  ;;  %v983_v4 = vrot.slane %v981_v45, 1 }
  0x90   : > { %6900 = vmatprep.mubr.msk.bf16.mxu1 %vm462_vm0, %v8078_v33  ;;  %6956 = vmatprep.mubr.msk.bf16.mxu0 %vm462_vm0, %v8083_v31  ;;  %9810 = vst [vmem:[#allocation49_spill] sm:$0xff] %v8098_v56  ;;  %v8106_v31 = vsel %vm820_vm2, %v966_v40, %v969_v11  ;;  %v8126_v40 = vrot.slane %v7789_v8, 1  ;;  %v2498_v11 = vshll.u32 %v7614_v43, 16  ;;  %v985_v23 = vshrl.u32 %v7789_v8, 16 }
  0x91   : > { %9812 = vst [vmem:[#allocation51_spill] sm:$0xff] %v8106_v31  ;;  %v976_v33 = vrot.slane %v974_v12, 1  ;;  %v1511_v12 = vrot.slane %v7757_v17, 1  ;;  %v989_v45 = vshll.u32 %v6234_v29, 16  ;;  %v8384_v17 = vld [vmem:[%s7510_s25 + $0xcc] sm:$0xf] }
  0x92   : > { %9814 = vst [vmem:[#allocation53_spill] sm:$0xff] %v8126_v40  ;;  %v2500_v24 = vrot.slane %v2498_v11, 1 }
  0x93   : > { %v980_v14 = vor.u32 %v978_v48, %v976_v33 }
  0x95   : > { %v8134_v48 = vsel %vm820_vm2, %v980_v14, %v983_v4 }
  0x96   : > { %9816 = vst [vmem:[#allocation55_spill] sm:$0xff] %v8134_v48 }
  0x97   : > { %6901 = vmatmul.mubr.msk.bf16.gmra.mrb[60].mxu1 %vm462_vm0, %v8098_v56  ;;  %6957 = vmatmul.mubr.msk.bf16.gmra.mrb[60].mxu0 %vm462_vm0, %v8101_v20  ;;  %v8131_v20 = vsel %vm820_vm2, %v973_v10, %v976_v33  ;;  %v2496_v56 = vshrl.u32 %v7614_v43, 16  ;;  %v991_v33 = vrot.slane %v989_v45, 1  ;;  %v1515_v10 = vrot.slane %v6234_v29, 1 }
  0x98   : > { %6904 = vmatprep.mubr.msk.bf16.mxu1 %vm462_vm0, %v8106_v31  ;;  %6960 = vmatprep.mubr.msk.bf16.mxu0 %vm462_vm0, %v8109_v49  ;;  %9815 = vst [vmem:[#allocation54_spill] sm:$0xff] %v8131_v20  ;;  %v8137_v49 = vsel %vm1467_vm1, %v1509_v53, %v1511_v12  ;;  %v8141_v31 = vsel %vm1467_vm1, %v1511_v12, %v8126_v40  ;;  %v2504_v12 = vrot.slane %v2502_v32, 1  ;;  %v2516_v45 = vshll.u32 %v7852_v59, 16 }
  0x99   : > { %9817 = vst [vmem:[#allocation56_spill] sm:$0xff] %v8137_v49  ;;  %9818 = vst [vmem:[#allocation57_spill] sm:$0xff] %v8141_v31  ;;  %v8151_v53 = vor.u32 %v985_v23, %v983_v4  ;;  %v2501_v14 = vor.u32 %v2500_v24, %v2496_v56  ;;  %v2513_v23 = vshrl.u32 %v7839_v50, 16  ;;  %v2511_v24 = vrot.slane %v2509_v13, 1  ;;  %v7396_v13 = vld [vmem:[%s9705_s1 + $0xc8] sm:$0xff]  }
  0x9a   : > { %v2518_v29 = vrot.slane %v2516_v45, 1 }
  0x9b   : > { %9819 = vst [vmem:[#allocation58_spill] sm:$0xff] %v8151_v53  ;;  %v992_v11 = vsel %vm820_vm2, %v8151_v53, %v991_v33  ;;  %v2505_v4 = vsel %vm820_vm2, %v2501_v14, %v2504_v12  ;;  %v2515_v56 = vor.u32 %v2513_v23, %v2511_v24  ;;  %v2523_v33 = vshll.u32 %v7863_v58, 16 }
  0x9c   : > { %v2520_v14 = vshrl.u32 %v7852_v59, 16 }
  0x9f   : > { %6905 = vmatmul.mubr.msk.bf16.gmra.mrb[64].mxu1 %vm462_vm0, %v8131_v20  ;;  %6961 = vmatmul.mubr.msk.bf16.gmra.mrb[64].mxu0 %vm462_vm0, %v8137_v49  ;;  %v1516_v20 = vsel %vm1467_vm1, %v8126_v40, %v1515_v10  ;;  %v2506_v49 = vshrl.u32 %v7540_v18, 16 }
  0xa0   : > { %6908 = vmatprep.mubr.msk.bf16.mxu1 %vm462_vm0, %v8134_v48  ;;  %6964 = vmatprep.mubr.msk.bf16.mxu0 %vm462_vm0, %v8141_v31  ;;  %v2527_v31 = vshrl.u32 %v7863_v58, 16 }
  0xa1   : > { %v2508_v32 = vor.u32 %v2506_v49, %v2504_v12  ;;  %v7393_v49 = vld [vmem:[%s9705_s1 + $0xa8] sm:$0xff]   ;;  %v2525_v12 = vrot.slane %v2523_v33, 1  ;;  %v2544_v33 = vshll.u32 %v7891_v30, 16 }
  0xa3   : > { %v2512_v10 = vsel %vm820_vm2, %v2508_v32, %v2511_v24  ;;  %v2529_v23 = vor.u32 %v2527_v31, %v2525_v12  ;;  %v7401_v32 = vld [vmem:[%s9705_s1 + $0xb0] sm:$0xff]   ;;  %v2537_v24 = vshll.u32 %v7881_v46, 16 }
  0xa7   : > { %6909 = vmatmul.mubr.msk.bf16.gmra.mrb[68].mxu1 %vm462_vm0, %v992_v11  ;;  %6965 = vmatmul.mubr.msk.bf16.gmra.mrb[68].mxu0 %vm462_vm0, %v1516_v20  ;;  %v2530_v11 = vshll.u32 %v7873_v42, 16  ;;  %v2519_v20 = vsel %vm820_vm2, %v2515_v56, %v2518_v29 }
  0xa8   : > { %6976 = vmatprep.mubr.msk.bf16.mxu1 %vm462_vm0, %v7614_v43  ;;  %7032 = vmatprep.mubr.msk.bf16.mxu0 %vm462_vm0, %v2505_v4  ;;  %v2522_v4 = vor.u32 %v2520_v14, %v2518_v29  ;;  %v2541_v29 = vshrl.u32 %v7881_v46, 16  ;;  %v7408_v14 = vld [vmem:[%s9705_s1 + $0xd8] sm:$0xff]  }
  0xa9   : > { %v2532_v45 = vrot.slane %v2530_v11, 1  ;;  %v2539_v11 = vrot.slane %v2537_v24, 1  ;;  %v2555_v24 = vshrl.u32 %v7906_v25, 16 }
  0xaa   : > { %v2526_v56 = vsel %vm820_vm2, %v2522_v4, %v2525_v12  ;;  %v8216_v12 = vld [vmem:[%s9705_s1 + $0xe0] sm:$0xff]  }
  0xab   : > { %v2533_v31 = vsel %vm820_vm2, %v2529_v23, %v2532_v45  ;;  %v8221_v4 = vld [vmem:[%s9705_s1 + $0x100] sm:$0xff]   ;;  %v2551_v23 = vshll.u32 %v7906_v25, 16 }
  0xaf   : > { %6977 = vmatmul.mubr.msk.bf16.vlgmr.msra.gmra.mrb[72].mxu1 %vm462_vm0, %v7540_v18  ;;  %7033 = vmatmul.mubr.msk.bf16.vlgmr.msra.gmra.mrb[72].mxu0 %vm462_vm0, %v2512_v10  ;;  %v7407_v10 = vld [vmem:[%s9705_s1 + $0xb8] sm:$0xff]  }
  0xb0   : > { %7081 = vmatpush3.bf16.msra.mxu1 %v7896_v61  ;;  %6980 = vmatprep.mubr.msk.bf16.mxu1 %vm462_vm0, %v7839_v50  ;;  %v7404_v61 = vld [vmem:[%s9705_s1 + $0xd0] sm:$0xff]  }
  0xb1   : > { %7137 = vmatpush3.bf16.msra.mxu0 %v7901_v62  ;;  %7036 = vmatprep.mubr.msk.bf16.mxu0 %vm462_vm0, %v2519_v20  ;;  %v2534_v62 = vshrl.u32 %v7873_v42, 16 }
  0xb2   : > { %7082 = vmatprep.subr.bf16.mxu1 %v7393_v49  ;;  %7138 = vmatprep.subr.bf16.mxu0 %v7396_v13 }
  0xb3   : > { %v2536_v20 = vor.u32 %v2534_v62, %v2532_v45  ;;  %v2553_v62 = vrot.slane %v2551_v23, 1 }
  0xb4   : > { %7083 = vmatpush3.bf16.msra.mxu1 %v7393_v49  ;;  %v2543_v49 = vor.u32 %v2541_v29, %v2539_v11 }
  0xb5   : > { %7139 = vmatpush3.bf16.msra.mxu0 %v7396_v13  ;;  %7084 = vmatprep.subr.bf16.mxu1 %v7401_v32  ;;  %v2546_v13 = vrot.slane %v2544_v33, 1  ;;  %v2540_v45 = vsel %vm820_vm2, %v2536_v20, %v2539_v11  ;;  %v7422_v11 = vld [vmem:[%s7510_s25 + $0x64] sm:$0xf]  ;;  %v7423_v20 = vld [vmem:[%s7510_s25 + $0x68] sm:$0xf] }
  0xb6   : > { %7140 = vmatprep.subr.bf16.mxu0 %v7404_v61 }
  0xb7   : > { %6981 = vmatmul.mubr.msk.bf16.gmra.mrb[76].mxu1 %vm462_vm0, %v7852_v59  ;;  %7037 = vmatmul.mubr.msk.bf16.gmra.mrb[76].mxu0 %vm462_vm0, %v2526_v56  ;;  %v2558_v56 = vshll.u32 %v7917_v27, 16 }
  0xb8   : > { %6984 = vmatprep.mubr.msk.bf16.mxu1 %vm462_vm0, %v7863_v58  ;;  %7040 = vmatprep.mubr.msk.bf16.mxu0 %vm462_vm0, %v2533_v31  ;;  %v7421_v31 = vld [vmem:[%s7510_s25 + $0x60] sm:$0xf] }
  0xb9   : > { %7085 = vmatpush3.bf16.msra.mxu1 %v7401_v32  ;;  %7141 = vmatpush3.bf16.msra.mxu0 %v7404_v61  ;;  %v2548_v32 = vshrl.u32 %v7891_v30, 16  ;;  %v2547_v61 = vsel %vm820_vm2, %v2543_v49, %v2546_v13  ;;  %v8236_v29 = vcombine.low %v7783_v36, %v7421_v31  ;;  %v8243_v49 = vcombine.low %v7422_v11, %v7423_v20  ;;  %v7426_v20 = vld [vmem:[%s7510_s25 + $0x74] sm:$0xf] }
  0xba   : > { %7086 = vmatprep.subr.bf16.mxu1 %v7407_v10  ;;  %7142 = vmatprep.subr.bf16.mxu0 %v7408_v14  ;;  %v2562_v36 = vshrl.u32 %v7917_v27, 16  ;;  %v8263_v48 = vcombine.low %v7426_v20, %v7562_v26 }
  0xbb   : > { %v2550_v33 = vor.u32 %v2548_v32, %v2546_v13  ;;  %v2565_v23 = vshll.u32 %v8236_v29, 16  ;;  %v2572_v13 = vshll.u32 %v8243_v49, 16 }
  0xbd   : > { %7087 = vmatpush3.bf16.msra.mxu1 %v7407_v10  ;;  %7143 = vmatpush3.bf16.msra.mxu0 %v7408_v14  ;;  %v2557_v10 = vor.u32 %v2555_v24, %v2553_v62  ;;  %v2560_v14 = vrot.slane %v2558_v56, 1  ;;  %v2567_v32 = vrot.slane %v2565_v23, 1  ;;  %v7424_v24 = vld [vmem:[%s7510_s25 + $0x6c] sm:$0xf]  ;;  %v7425_v56 = vld [vmem:[%s7510_s25 + $0x70] sm:$0xf] }
  0xbe   : > { %7192 = vmatprep.subr.bf16.mxu1 %v8216_v12  ;;  %7248 = vmatprep.subr.bf16.mxu0 %v8221_v4  ;;  %v8256_v11 = vcombine.low %v7424_v24, %v7425_v56  ;;  %v2576_v24 = vshrl.u32 %v8243_v49, 16 }
  0xbf   : > { %6985 = vmatmul.mubr.msk.bf16.gmra.mrb[80].mxu1 %vm462_vm0, %v7873_v42  ;;  %7041 = vmatmul.mubr.msk.bf16.gmra.mrb[80].mxu0 %vm462_vm0, %v2540_v45  ;;  %v2554_v45 = vsel %vm820_vm2, %v2550_v33, %v2553_v62  ;;  %v2561_v31 = vsel %vm820_vm2, %v2557_v10, %v2560_v14  ;;  %v2564_v62 = vor.u32 %v2562_v36, %v2560_v14  ;;  %v2574_v10 = vrot.slane %v2572_v13, 1  ;;  %v7427_v14 = vld [vmem:[%s7510_s25 + $0x7c] sm:$0xf]  ;;  %v7428_v36 = vld [vmem:[%s7510_s25 + $0x80] sm:$0xf] }
  0xc0   : > { %6988 = vmatprep.mubr.msk.bf16.mxu1 %vm462_vm0, %v7881_v46  ;;  %7044 = vmatprep.mubr.msk.bf16.mxu0 %vm462_vm0, %v2547_v61  ;;  %v2569_v61 = vshrl.u32 %v8236_v29, 16  ;;  %v2579_v23 = vshll.u32 %v8256_v11, 16  ;;  %v2583_v40 = vshrl.u32 %v8256_v11, 16 }
  0xc1   : > { %v2578_v13 = vor.u32 %v2576_v24, %v2574_v10 }
  0xc2   : > { %v2571_v33 = vor.u32 %v2569_v61, %v2567_v32  ;;  %v2581_v26 = vrot.slane %v2579_v23, 1  ;;  %v8276_v61 = vcombine.low %v7427_v14, %v7428_v36 }
  0xc4   : > { %v2575_v56 = vsel %vm820_vm2, %v2571_v33, %v2574_v10  ;;  %v7429_v33 = vld [vmem:[%s7510_s25 + $0x84] sm:$0xf]  ;;  %v2593_v53 = vshll.u32 %v8276_v61, 16  ;;  %v2582_v23 = vsel %vm820_vm2, %v2578_v13, %v2581_v26  ;;  %v2597_v36 = vshrl.u32 %v8276_v61, 16  ;;  %v9822_v13 = vld [vmem:[#allocation4_spill] sm:$0xff] }
  0xc5   : > { %v8283_v20 = vcombine.low %v7429_v33, %v7599_v39  ;;  %v9820_v39 = vld [vmem:[#allocation3_spill] sm:$0xff] }
  0xc6   : > { %v8296_v10 = vcombine.low %v9820_v39, %v7621_v44 }
  0xc7   : > { %6989 = vmatmul.mubr.msk.bf16.gmra.mrb[84].mxu1 %vm462_vm0, %v7891_v30  ;;  %7045 = vmatmul.mubr.msk.bf16.gmra.mrb[84].mxu0 %vm462_vm0, %v2554_v45  ;;  %v2568_v45 = vsel %vm820_vm2, %v2564_v62, %v2567_v32  ;;  %v2585_v32 = vor.u32 %v2583_v40, %v2581_v26  ;;  %v2600_v47 = vshll.u32 %v8283_v20, 16  ;;  %v2595_v40 = vrot.slane %v2593_v53, 1  ;;  %v9821_v26 = vld [vmem:[#allocation5_spill] sm:$0xff] }
  0xc8   : > { %6992 = vmatprep.mubr.msk.bf16.mxu1 %vm462_vm0, %v7906_v25  ;;  %7048 = vmatprep.mubr.msk.bf16.mxu0 %vm462_vm0, %v2561_v31  ;;  %v2586_v31 = vshll.u32 %v8263_v48, 16  ;;  %v2607_v33 = vshll.u32 %v8296_v10, 16  ;;  %v2611_v39 = vshrl.u32 %v8296_v10, 16 }
  0xca   : > { %v2588_v62 = vrot.slane %v2586_v31, 1  ;;  %v2602_v31 = vrot.slane %v2600_v47, 1  ;;  %v2609_v47 = vrot.slane %v2607_v33, 1 }
  0xcc   : > { %v2589_v14 = vsel %vm820_vm2, %v2585_v32, %v2588_v62  ;;  %v8303_v32 = vcombine.low %v9822_v13, %v9821_v26  ;;  %v9826_v26 = vld [vmem:[#allocation8_spill] sm:$0xff] }
  0xce   : > { %v2614_v7 = vshll.u32 %v8303_v32, 16 }
  0xcf   : > { %6993 = vmatmul.mubr.msk.bf16.gmra.mrb[88].mxu1 %vm462_vm0, %v7917_v27  ;;  %7049 = vmatmul.mubr.msk.bf16.gmra.mrb[88].mxu0 %vm462_vm0, %v2568_v45  ;;  %v2590_v45 = vshrl.u32 %v8263_v48, 16 }
  0xd0   : > { %6996 = vmatprep.mubr.msk.bf16.mxu1 %vm462_vm0, %v8236_v29  ;;  %7052 = vmatprep.mubr.msk.bf16.mxu0 %vm462_vm0, %v2575_v56  ;;  %v2599_v56 = vor.u32 %v2597_v36, %v2595_v40 }
  0xd1   : > { %v2592_v24 = vor.u32 %v2590_v45, %v2588_v62  ;;  %v9823_v62 = vld [vmem:[#allocation7_spill] sm:$0xff]  ;;  %v9824_v45 = vld [vmem:[#allocation6_spill] sm:$0xff] }
  0xd2   : > { %v2603_v44 = vsel %vm820_vm2, %v2599_v56, %v2602_v31  ;;  %v9825_v56 = vld [vmem:[#allocation9_spill] sm:$0xff] }
  0xd3   : > { %v2596_v53 = vsel %vm820_vm2, %v2592_v24, %v2595_v40  ;;  %v2613_v40 = vor.u32 %v2611_v39, %v2609_v47  ;;  %v2616_v24 = vrot.slane %v2614_v7, 1  ;;  %v8323_v13 = vcombine.low %v9826_v26, %v9825_v56  ;;  %v9830_v56 = vld [vmem:[#allocation12_spill] sm:$0xff] }
  0xd5   : > { %v2628_v5 = vshll.u32 %v8323_v13, 16  ;;  %v2632_v28 = vshrl.u32 %v8323_v13, 16 }
  0xd7   : > { %6997 = vmatmul.mubr.msk.bf16.gmra.mrb[92].mxu1 %vm462_vm0, %v8243_v49  ;;  %7053 = vmatmul.mubr.msk.bf16.gmra.mrb[92].mxu0 %vm462_vm0, %v2582_v23  ;;  %v2604_v23 = vshrl.u32 %v8283_v20, 16 }
  0xd8   : > { %7000 = vmatprep.mubr.msk.bf16.mxu1 %vm462_vm0, %v8256_v11  ;;  %7056 = vmatprep.mubr.msk.bf16.mxu0 %vm462_vm0, %v2589_v14  ;;  %v8316_v14 = vcombine.low %v9824_v45, %v9823_v62  ;;  %v2617_v62 = vsel %vm820_vm2, %v2613_v40, %v2616_v24  ;;  %v9829_v40 = vld [vmem:[#allocation14_spill] sm:$0xff] }
  0xd9   : > { %v2606_v36 = vor.u32 %v2604_v23, %v2602_v31  ;;  %v9827_v31 = vld [vmem:[#allocation11_spill] sm:$0xff]  ;;  %v9828_v23 = vld [vmem:[#allocation10_spill] sm:$0xff]  ;;  %v8343_v26 = vcombine.low %v9830_v56, %v9829_v40 }
  0xda   : > { %v2621_v63 = vshll.u32 %v8316_v14, 16  ;;  %v2625_v45 = vshrl.u32 %v8316_v14, 16 }
  0xdb   : > { %v2610_v33 = vsel %vm820_vm2, %v2606_v36, %v2609_v47  ;;  %v2630_v36 = vrot.slane %v2628_v5, 1  ;;  %v2642_v41 = vshll.u32 %v8343_v26, 16 }
  0xdc   : > { %v2623_v7 = vrot.slane %v2621_v63, 1 }
  0xde   : > { %v2627_v47 = vor.u32 %v2625_v45, %v2623_v7 }
  0xdf   : > { %7001 = vmatmul.mubr.msk.bf16.gmra.mrb[96].mxu1 %vm462_vm0, %v8263_v48  ;;  %7057 = vmatmul.mubr.msk.bf16.gmra.mrb[96].mxu0 %vm462_vm0, %v2596_v53  ;;  %v2618_v53 = vshrl.u32 %v8303_v32, 16 }
  0xe0   : > { %7004 = vmatprep.mubr.msk.bf16.mxu1 %vm462_vm0, %v8276_v61  ;;  %7060 = vmatprep.mubr.msk.bf16.mxu0 %vm462_vm0, %v2603_v44  ;;  %v8336_v44 = vcombine.low %v9828_v23, %v9827_v31  ;;  %v2631_v31 = vsel %vm820_vm2, %v2627_v47, %v2630_v36  ;;  %v2644_v47 = vrot.slane %v2642_v41, 1 }
  0xe1   : > { %v2620_v39 = vor.u32 %v2618_v53, %v2616_v24  ;;  %v8355_v24 = vld [vmem:[%s7510_s25 + $0xc8] sm:$0xf]  ;;  %v9831_v53 = vld [vmem:[#allocation15_spill] sm:$0xff] }
  0xe2   : > { %v2639_v23 = vshrl.u32 %v8336_v44, 16  ;;  %v8362_v45 = vcombine.low %v9831_v53, %v8112_v60 }
  0xe3   : > { %v2624_v63 = vsel %vm820_vm2, %v2620_v39, %v2623_v7  ;;  %v2634_v7 = vor.u32 %v2632_v28, %v2630_v36 }
  0xe4   : > { %v2649_v53 = vshll.u32 %v8362_v45, 16  ;;  %v2653_v8 = vshrl.u32 %v8362_v45, 16 }
  0xe7   : > { %7005 = vmatmul.mubr.msk.bf16.gmra.mrb[100].mxu1 %vm462_vm0, %v8283_v20  ;;  %7061 = vmatmul.mubr.msk.bf16.gmra.mrb[100].mxu0 %vm462_vm0, %v2610_v33  ;;  %v2635_v33 = vshll.u32 %v8336_v44, 16 }
  0xe8   : > { %7008 = vmatprep.mubr.msk.bf16.mxu1 %vm462_vm0, %v8296_v10  ;;  %7064 = vmatprep.mubr.msk.bf16.mxu0 %vm462_vm0, %v2617_v62  ;;  %v8352_v62 = vld [vmem:[%s7510_s25 + $0xc4] sm:$0xf] }
  0xe9   : > { %v2637_v5 = vrot.slane %v2635_v33, 1  ;;  %v8369_v40 = vcombine.low %v8352_v62, %v8355_v24 }
  0xeb   : > { %v2641_v39 = vor.u32 %v2639_v23, %v2637_v5  ;;  %v2638_v36 = vsel %vm820_vm2, %v2634_v7, %v2637_v5  ;;  %v2651_v5 = vrot.slane %v2649_v53, 1 }
  0xef   : > { %7009 = vmatmul.mubr.msk.bf16.gmra.mrb[104].mxu1 %vm462_vm0, %v8303_v32  ;;  %7065 = vmatmul.mubr.msk.bf16.gmra.mrb[104].mxu0 %vm462_vm0, %v2624_v63 }
  0xf0   : > { %7012 = vmatprep.mubr.msk.bf16.mxu1 %vm462_vm0, %v8316_v14  ;;  %7068 = vmatprep.mubr.msk.bf16.mxu0 %vm462_vm0, %v2631_v31  ;;  %v2646_v31 = vshrl.u32 %v8343_v26, 16 }
  0xf2   : > { %v6834_v56 = vpop.f32.mrb[0].mxu1  ;;  %v6810_v57 = vpop.f32.mrb[0].mxu0  ;;  %v2648_v7 = vor.u32 %v2646_v31, %v2644_v47 }
  0xf3   : > { %786 = vst.msk [vmem:[#allocation2 + $0xd0] sm:$0xff] %vm462_vm0, %v6834_v56  ;;  %v665_v33 = vpop.f32.mrb[1].mxu1  ;;  %762 = vst.msk [vmem:[#allocation2 + $0x10] sm:$0xff] %vm462_vm0, %v6810_v57  ;;  %v569_v63 = vpop.f32.mrb[1].mxu0  ;;  %v2645_v56 = vsel %vm820_vm2, %v2641_v39, %v2644_v47  ;;  %v8396_v39 = vcombine.low %v8384_v17, %v8384_v17 }
  0xf4   : > { %784 = vst.msk [vmem:[#allocation2 + $0xc0] sm:$0xff] %vm462_vm0, %v665_v33  ;;  %v6835_v28 = vpop.f32.mrb[2].mxu1  ;;  %760 = vst.msk [vmem:[#allocation2] sm:$0xff] %vm462_vm0, %v569_v63  ;;  %v6811_v41 = vpop.f32.mrb[2].mxu0  ;;  %v2656_v33 = vshll.u32 %v8369_v40, 16  ;;  %v2655_v63 = vor.u32 %v2653_v8, %v2651_v5  ;;  %v2652_v31 = vsel %vm820_vm2, %v2648_v7, %v2651_v5 }
  0xf5   : > { %787 = vst.msk [vmem:[#allocation2 + $0xd8] sm:$0xff] %vm462_vm0, %v6835_v28  ;;  %v668_v23 = vpop.f32.mrb[3].mxu1  ;;  %763 = vst.msk [vmem:[#allocation2 + $0x18] sm:$0xff] %vm462_vm0, %v6811_v41  ;;  %v572_v57 = vpop.f32.mrb[3].mxu0  ;;  %v2664_v8 = vshll.u32 %v8396_v39, 16 }
  0xf6   : > { %785 = vst.msk [vmem:[#allocation2 + $0xc8] sm:$0xff] %vm462_vm0, %v668_v23  ;;  %761 = vst.msk [vmem:[#allocation2 + $0x8] sm:$0xff] %vm462_vm0, %v572_v57  ;;  %v2658_v28 = vrot.slane %v2656_v33, 1 }
  0xf7   : > { %7013 = vmatmul.mubr.msk.bf16.gmra.mrb[108].mxu1 %vm462_vm0, %v8323_v13  ;;  %7069 = vmatmul.mubr.msk.bf16.gmra.mrb[108].mxu0 %vm462_vm0, %v2638_v36  ;;  %v2666_v7 = vrot.slane %v2664_v8, 1  ;;  %v3145_v8 = vrot.slane %v7839_v50, 1 }
  0xf8   : > { %7016 = vmatprep.mubr.msk.bf16.mxu1 %vm462_vm0, %v8336_v44  ;;  %7072 = vmatprep.mubr.msk.bf16.mxu0 %vm462_vm0, %v2645_v56  ;;  %v2660_v56 = vshrl.u32 %v8369_v40, 16 }
  0xfa   : > { %v6838_v41 = vpop.f32.mrb[4].mxu1  ;;  %v6814_v23 = vpop.f32.mrb[4].mxu0  ;;  %v2662_v5 = vor.u32 %v2660_v56, %v2658_v28 }
  0xfb   : > { %790 = vst.msk [vmem:[#allocation2 + $0xf0] sm:$0xff] %vm462_vm0, %v6838_v41  ;;  %v681_v57 = vpop.f32.mrb[5].mxu1  ;;  %766 = vst.msk [vmem:[#allocation2 + $0x30] sm:$0xff] %vm462_vm0, %v6814_v23  ;;  %v585_v53 = vpop.f32.mrb[5].mxu0  ;;  %v2659_v23 = vsel %vm820_vm2, %v2655_v63, %v2658_v28  ;;  %v3143_v63 = vrot.slane %v7540_v18, 1 }
  0xfc   : > { %788 = vst.msk [vmem:[#allocation2 + $0xe0] sm:$0xff] %vm462_vm0, %v681_v57  ;;  %v6839_v36 = vpop.f32.mrb[6].mxu1  ;;  %764 = vst.msk [vmem:[#allocation2 + $0x20] sm:$0xff] %vm462_vm0, %v585_v53  ;;  %v6815_v47 = vpop.f32.mrb[6].mxu0  ;;  %v3142_v57 = vrot.slane %v7614_v43, 1  ;;  %v2667_v28 = vsel %vm820_vm2, %v2662_v5, %v2666_v7 }
  0xfd   : > { %791 = vst.msk [vmem:[#allocation2 + $0xf8] sm:$0xff] %vm462_vm0, %v6839_v36  ;;  %v684_v33 = vpop.f32.mrb[7].mxu1  ;;  %767 = vst.msk [vmem:[#allocation2 + $0x38] sm:$0xff] %vm462_vm0, %v6815_v47  ;;  %v588_v41 = vpop.f32.mrb[7].mxu0 }
  0xfe   : > { %789 = vst.msk [vmem:[#allocation2 + $0xe8] sm:$0xff] %vm462_vm0, %v684_v33  ;;  %765 = vst.msk [vmem:[#allocation2 + $0x28] sm:$0xff] %vm462_vm0, %v588_v41  ;;  %v3144_v56 = vsel %vm1467_vm1, %v3142_v57, %v3143_v63 }
  0xff   : > { %7017 = vmatmul.mubr.msk.bf16.gmra.mrb[112].mxu1 %vm462_vm0, %v8343_v26  ;;  %7073 = vmatmul.mubr.msk.bf16.gmra.mrb[112].mxu0 %vm462_vm0, %v2652_v31 }
 0x100   : > { %7020 = vmatprep.mubr.msk.bf16.mxu1 %vm462_vm0, %v8362_v45  ;;  %7076 = vmatprep.mubr.msk.bf16.mxu0 %vm462_vm0, %v2659_v23  ;;  %v3147_v23 = vrot.slane %v7852_v59, 1 }
 0x102   : > { %v6842_v53 = vpop.f32.mrb[8].mxu1  ;;  %v6818_v36 = vpop.f32.mrb[8].mxu0 }
 0x103   : > { %794 = vst.msk [vmem:[#allocation2 + $0x110] sm:$0xff] %vm462_vm0, %v6842_v53  ;;  %v697_v47 = vpop.f32.mrb[9].mxu1  ;;  %770 = vst.msk [vmem:[#allocation2 + $0x50] sm:$0xff] %vm462_vm0, %v6818_v36  ;;  %v601_v33 = vpop.f32.mrb[9].mxu0 }
 0x104   : > { %792 = vst.msk [vmem:[#allocation2 + $0x100] sm:$0xff] %vm462_vm0, %v697_v47  ;;  %v6843_v31 = vpop.f32.mrb[10].mxu1  ;;  %768 = vst.msk [vmem:[#allocation2 + $0x40] sm:$0xff] %vm462_vm0, %v601_v33  ;;  %v6819_v41 = vpop.f32.mrb[10].mxu0  ;;  %v3146_v47 = vsel %vm1467_vm1, %v3143_v63, %v3145_v8  ;;  %v3148_v33 = vsel %vm1467_vm1, %v3145_v8, %v3147_v23  ;;  %v7414_v63 = vld [vmem:[%s9705_s1 + $0x108] sm:$0xff]  }
 0x105   : > { %795 = vst.msk [vmem:[#allocation2 + $0x118] sm:$0xff] %vm462_vm0, %v6843_v31  ;;  %v700_v43 = vpop.f32.mrb[11].mxu1  ;;  %771 = vst.msk [vmem:[#allocation2 + $0x58] sm:$0xff] %vm462_vm0, %v6819_v41  ;;  %v604_v18 = vpop.f32.mrb[11].mxu0  ;;  %v7413_v31 = vld [vmem:[%s9705_s1 + $0xe8] sm:$0xff]   ;;  %v3149_v41 = vrot.slane %v7863_v58, 1 }
 0x106   : > { %793 = vst.msk [vmem:[#allocation2 + $0x108] sm:$0xff] %vm462_vm0, %v700_v43  ;;  %769 = vst.msk [vmem:[#allocation2 + $0x48] sm:$0xff] %vm462_vm0, %v604_v18  ;;  %v7415_v43 = vld [vmem:[%s9705_s1 + $0xf0] sm:$0xff]  }
 0x107   : > { %7021 = vmatmul.mubr.msk.bf16.gmra.mrb[116].mxu1 %vm462_vm0, %v8369_v40  ;;  %7077 = vmatmul.mubr.msk.bf16.gmra.mrb[116].mxu0 %vm462_vm0, %v2667_v28  ;;  %v3151_v28 = vrot.slane %v7873_v42, 1 }
 0x108   : > { %7088 = vmatprep.mubr.msk.bf16.mxu1 %vm462_vm0, %v3144_v56  ;;  %7144 = vmatprep.mubr.msk.bf16.mxu0 %vm462_vm0, %v7587_v35 }
 0x10a   : > { %v6846_v5 = vpop.f32.mrb[12].mxu1  ;;  %v6822_v7 = vpop.f32.mrb[12].mxu0 }
 0x10b   : > { %798 = vst.msk [vmem:[#allocation2 + $0x130] sm:$0xff] %vm462_vm0, %v6846_v5  ;;  %v713_v57 = vpop.f32.mrb[13].mxu1  ;;  %774 = vst.msk [vmem:[#allocation2 + $0x70] sm:$0xff] %vm462_vm0, %v6822_v7  ;;  %v617_v53 = vpop.f32.mrb[13].mxu0  ;;  %v3152_v7 = vsel %vm1467_vm1, %v3149_v41, %v3151_v28 }
 0x10c   : > { %796 = vst.msk [vmem:[#allocation2 + $0x120] sm:$0xff] %vm462_vm0, %v713_v57  ;;  %v6847_v36 = vpop.f32.mrb[14].mxu1  ;;  %772 = vst.msk [vmem:[#allocation2 + $0x60] sm:$0xff] %vm462_vm0, %v617_v53  ;;  %v6823_v50 = vpop.f32.mrb[14].mxu0  ;;  %v7418_v57 = vld [vmem:[%s9705_s1 + $0x118] sm:$0xff]   ;;  %v3153_v53 = vrot.slane %v7881_v46, 1 }
 0x10d   : > { %799 = vst.msk [vmem:[#allocation2 + $0x138] sm:$0xff] %vm462_vm0, %v6847_v36  ;;  %v716_v35 = vpop.f32.mrb[15].mxu1  ;;  %775 = vst.msk [vmem:[#allocation2 + $0x78] sm:$0xff] %vm462_vm0, %v6823_v50  ;;  %v620_v59 = vpop.f32.mrb[15].mxu0  ;;  %v3155_v36 = vrot.slane %v7891_v30, 1 }
 0x10e   : > { %797 = vst.msk [vmem:[#allocation2 + $0x128] sm:$0xff] %vm462_vm0, %v716_v35  ;;  %773 = vst.msk [vmem:[#allocation2 + $0x68] sm:$0xff] %vm462_vm0, %v620_v59  ;;  %v3154_v59 = vsel %vm1467_vm1, %v3151_v28, %v3153_v53 }
 0x10f   : > { %7089 = vmatmul.mubr.msk.bf16.vlgmr.msra.gmra.mrb[120].mxu1 %vm462_vm0, %v3146_v47  ;;  %7145 = vmatmul.mubr.msk.bf16.vlgmr.msra.gmra.mrb[120].mxu0 %vm462_vm0, %v7596_v38  ;;  %v7416_v38 = vld [vmem:[%s9705_s1 + $0x110] sm:$0xff]  }
 0x110   : > { %7193 = vmatpush3.bf16.msra.mxu1 %v8216_v12  ;;  %7092 = vmatprep.mubr.msk.bf16.mxu1 %vm462_vm0, %v3148_v33  ;;  %v3150_v12 = vsel %vm1467_vm1, %v3147_v23, %v3149_v41  ;;  %v7417_v23 = vld [vmem:[%s9705_s1 + $0xf8] sm:$0xff]   ;;  %v3159_v41 = vrot.slane %v7917_v27, 1 }
 0x111   : > { %7249 = vmatpush3.bf16.msra.mxu0 %v8221_v4  ;;  %7148 = vmatprep.mubr.msk.bf16.mxu0 %vm462_vm0, %v7649_v52 }
 0x112   : > { %v6850_v18 = vpop.f32.mrb[16].mxu1  ;;  %v6826_v56 = vpop.f32.mrb[16].mxu0  ;;  %7194 = vmatprep.subr.bf16.mxu1 %v7413_v31  ;;  %7250 = vmatprep.subr.bf16.mxu0 %v7414_v63 }
 0x113   : > { %802 = vst.msk [vmem:[#allocation2 + $0x150] sm:$0xff] %vm462_vm0, %v6850_v18  ;;  %v729_v58 = vpop.f32.mrb[17].mxu1  ;;  %778 = vst.msk [vmem:[#allocation2 + $0x90] sm:$0xff] %vm462_vm0, %v6826_v56  ;;  %v633_v42 = vpop.f32.mrb[17].mxu0 }
 0x114   : > { %800 = vst.msk [vmem:[#allocation2 + $0x140] sm:$0xff] %vm462_vm0, %v729_v58  ;;  %v6851_v52 = vpop.f32.mrb[18].mxu1  ;;  %776 = vst.msk [vmem:[#allocation2 + $0x80] sm:$0xff] %vm462_vm0, %v633_v42  ;;  %v6827_v4 = vpop.f32.mrb[18].mxu0  ;;  %7195 = vmatpush3.bf16.msra.mxu1 %v7413_v31  ;;  %v3156_v31 = vsel %vm1467_vm1, %v3153_v53, %v3155_v36  ;;  %v1314_v58 = vld [vmem:[#allocation2] sm:$0xff]  ;;  %v3163_v53 = vrot.slane %v8243_v49, 1 }
 0x115   : > { %803 = vst.msk [vmem:[#allocation2 + $0x158] sm:$0xff] %vm462_vm0, %v6851_v52  ;;  %v732_v8 = vpop.f32.mrb[19].mxu1  ;;  %779 = vst.msk [vmem:[#allocation2 + $0x98] sm:$0xff] %vm462_vm0, %v6827_v4  ;;  %v636_v5 = vpop.f32.mrb[19].mxu0  ;;  %7251 = vmatpush3.bf16.msra.mxu0 %v7414_v63  ;;  %7196 = vmatprep.subr.bf16.mxu1 %v7415_v43  ;;  %v3157_v63 = vrot.slane %v7906_v25, 1  ;;  %v1317_v4 = vld [vmem:[#allocation2 + $0x18] sm:$0xff] }
 0x116   : > { %801 = vst.msk [vmem:[#allocation2 + $0x148] sm:$0xff] %vm462_vm0, %v732_v8  ;;  %777 = vst.msk [vmem:[#allocation2 + $0x88] sm:$0xff] %vm462_vm0, %v636_v5  ;;  %7252 = vmatprep.subr.bf16.mxu0 %v7416_v38 }
 0x117   : > { %7093 = vmatmul.mubr.msk.bf16.gmra.mrb[124].mxu1 %vm462_vm0, %v3150_v12  ;;  %7149 = vmatmul.mubr.msk.bf16.gmra.mrb[124].mxu0 %vm462_vm0, %v7662_v55  ;;  %v3160_v27 = vsel %vm1467_vm1, %v3157_v63, %v3159_v41 }
 0x118   : > { %7096 = vmatprep.mubr.msk.bf16.mxu1 %vm462_vm0, %v3152_v7  ;;  %7152 = vmatprep.mubr.msk.bf16.mxu0 %vm462_vm0, %v7704_v1 }
 0x119   : > { %7197 = vmatpush3.bf16.msra.mxu1 %v7415_v43  ;;  %7253 = vmatpush3.bf16.msra.mxu0 %v7416_v38  ;;  %v1316_v43 = vld [vmem:[#allocation2 + $0x10] sm:$0xff] }
 0x11a   : > { %v6854_v47 = vpop.f32.mrb[20].mxu1  ;;  %v6830_v50 = vpop.f32.mrb[20].mxu0  ;;  %7198 = vmatprep.subr.bf16.mxu1 %v7417_v23  ;;  %7254 = vmatprep.subr.bf16.mxu0 %v7418_v57 }
 0x11b   : > { %806 = vst.msk [vmem:[#allocation2 + $0x170] sm:$0xff] %vm462_vm0, %v6854_v47  ;;  %v745_v35 = vpop.f32.mrb[21].mxu1  ;;  %782 = vst.msk [vmem:[#allocation2 + $0xb0] sm:$0xff] %vm462_vm0, %v6830_v50  ;;  %v649_v55 = vpop.f32.mrb[21].mxu0  ;;  %v1320_v47 = vld [vmem:[#allocation2 + $0x30] sm:$0xff] }
 0x11c   : > { %804 = vst.msk [vmem:[#allocation2 + $0x160] sm:$0xff] %vm462_vm0, %v745_v35  ;;  %v6855_v46 = vpop.f32.mrb[22].mxu1  ;;  %780 = vst.msk [vmem:[#allocation2 + $0xa0] sm:$0xff] %vm462_vm0, %v649_v55  ;;  %v6831_v1 = vpop.f32.mrb[22].mxu0 }
 0x11d   : > { %807 = vst.msk [vmem:[#allocation2 + $0x178] sm:$0xff] %vm462_vm0, %v6855_v46  ;;  %v748_v30 = vpop.f32.mrb[23].mxu1  ;;  %783 = vst.msk [vmem:[#allocation2 + $0xb8] sm:$0xff] %vm462_vm0, %v6831_v1  ;;  %v652_v33 = vpop.f32.mrb[23].mxu0  ;;  %7199 = vmatpush3.bf16.msra.mxu1 %v7417_v23  ;;  %7255 = vmatpush3.bf16.msra.mxu0 %v7418_v57  ;;  %v3161_v57 = vrot.slane %v8236_v29, 1  ;;  %v1318_v46 = vld [vmem:[#allocation2 + $0x20] sm:$0xff] }
 0x11e   : > { %805 = vst.msk [vmem:[#allocation2 + $0x168] sm:$0xff] %vm462_vm0, %v748_v30  ;;  %781 = vst.msk [vmem:[#allocation2 + $0xa8] sm:$0xff] %vm462_vm0, %v652_v33  ;;  %v1321_v33 = vld [vmem:[#allocation2 + $0x38] sm:$0xff] }
 0x11f   : > { %7097 = vmatmul.mubr.msk.bf16.gmra.mrb[128].mxu1 %vm462_vm0, %v3154_v59  ;;  %7153 = vmatmul.mubr.msk.bf16.gmra.mrb[128].mxu0 %vm462_vm0, %v7712_v3  ;;  %v3158_v3 = vsel %vm1467_vm1, %v3155_v36, %v3157_v63 }
 0x120   : > { %7100 = vmatprep.mubr.msk.bf16.mxu1 %vm462_vm0, %v3156_v31  ;;  %7156 = vmatprep.mubr.msk.bf16.mxu0 %vm462_vm0, %v7753_v16  ;;  %v1315_v16 = vld [vmem:[#allocation2 + $0x8] sm:$0xff]  ;;  %v3162_v31 = vsel %vm1467_vm1, %v3159_v41, %v3161_v57 }
 0x122   : > { %v6866_v28 = vpop.f32.mrb[24].mxu1  ;;  %v6922_v18 = vpop.f32.mrb[24].mxu0 }
 0x123   : > { %v1364_v56 = vadd.f32 %v6866_v28, %v1316_v43  ;;  %v1123_v38 = vpop.f32.mrb[25].mxu1  ;;  %v1647_v42 = vpop.f32.mrb[25].mxu0  ;;  %v1319_v43 = vld [vmem:[#allocation2 + $0x28] sm:$0xff] }
 0x124   : > { %v1362_v52 = vadd.f32 %v1314_v58, %v1123_v38  ;;  %v6867_v12 = vpop.f32.mrb[26].mxu1  ;;  %v6923_v8 = vpop.f32.mrb[26].mxu0  ;;  %v3164_v38 = vsel %vm1467_vm1, %v3161_v57, %v3163_v53 }
 0x125   : > { %1412 = vst.msk [vmem:[#allocation2 + $0x10] sm:$0xff] %vm462_vm0, %v1364_v56  ;;  %v1365_v25 = vadd.f32 %v6867_v12, %v1317_v4  ;;  %v1126_v5 = vpop.f32.mrb[27].mxu1  ;;  %v1650_v7 = vpop.f32.mrb[27].mxu0 }
 0x126   : > { %1410 = vst.msk [vmem:[#allocation2] sm:$0xff] %vm462_vm0, %v1362_v52  ;;  %v1363_v23 = vadd.f32 %v1315_v16, %v1126_v5 }
 0x127   : > { %1413 = vst.msk [vmem:[#allocation2 + $0x18] sm:$0xff] %vm462_vm0, %v1365_v25  ;;  %7101 = vmatmul.mubr.msk.bf16.gmra.mrb[132].mxu1 %vm462_vm0, %v3158_v3  ;;  %7157 = vmatmul.mubr.msk.bf16.gmra.mrb[132].mxu0 %vm462_vm0, %v7761_v21  ;;  %v3167_v3 = vrot.slane %v8263_v48, 1 }
 0x128   : > { %1411 = vst.msk [vmem:[#allocation2 + $0x8] sm:$0xff] %vm462_vm0, %v1363_v23  ;;  %7104 = vmatprep.mubr.msk.bf16.mxu1 %vm462_vm0, %v3160_v27  ;;  %7160 = vmatprep.mubr.msk.bf16.mxu0 %vm462_vm0, %v7793_v9  ;;  %v1322_v27 = vld [vmem:[#allocation2 + $0x40] sm:$0xff] }
 0x12a   : > { %v6870_v36 = vpop.f32.mrb[28].mxu1  ;;  %v6926_v50 = vpop.f32.mrb[28].mxu0 }
 0x12b   : > { %v1368_v35 = vadd.f32 %v6870_v36, %v1320_v47  ;;  %v1139_v55 = vpop.f32.mrb[29].mxu1  ;;  %v1663_v59 = vpop.f32.mrb[29].mxu0  ;;  %v1325_v36 = vld [vmem:[#allocation2 + $0x58] sm:$0xff] }
 0x12c   : > { %v1840_v1 = vld [vmem:[#allocation2 + $0x10] sm:$0xff]  ;;  %v1366_v21 = vadd.f32 %v1318_v46, %v1139_v55  ;;  %v6871_v30 = vpop.f32.mrb[30].mxu1  ;;  %v6927_v63 = vpop.f32.mrb[30].mxu0 }
 0x12d   : > { %1416 = vst.msk [vmem:[#allocation2 + $0x30] sm:$0xff] %vm462_vm0, %v1368_v35  ;;  %v1888_v29 = vadd.f32 %v6922_v18, %v1840_v1  ;;  %v1838_v9 = vld [vmem:[#allocation2] sm:$0xff]  ;;  %v1369_v28 = vadd.f32 %v6871_v30, %v1321_v33  ;;  %v1142_v49 = vpop.f32.mrb[31].mxu1  ;;  %v1666_v56 = vpop.f32.mrb[31].mxu0  ;;  %v1323_v1 = vld [vmem:[#allocation2 + $0x48] sm:$0xff] }
 0x12e   : > { %1414 = vst.msk [vmem:[#allocation2 + $0x20] sm:$0xff] %vm462_vm0, %v1366_v21  ;;  %v1886_v58 = vadd.f32 %v1838_v9, %v1647_v42  ;;  %v1841_v52 = vld [vmem:[#allocation2 + $0x18] sm:$0xff]  ;;  %v1367_v12 = vadd.f32 %v1319_v43, %v1142_v49  ;;  %v3165_v42 = vrot.slane %v8256_v11, 1  ;;  %v1328_v49 = vld [vmem:[#allocation2 + $0x70] sm:$0xff] }
 0x12f   : > { %1936 = vst.msk [vmem:[#allocation2 + $0x10] sm:$0xff] %vm462_vm0, %v1888_v29  ;;  %1417 = vst.msk [vmem:[#allocation2 + $0x38] sm:$0xff] %vm462_vm0, %v1369_v28  ;;  %v1889_v41 = vadd.f32 %v6923_v8, %v1841_v52  ;;  %v1839_v4 = vld [vmem:[#allocation2 + $0x8] sm:$0xff]  ;;  %7105 = vmatmul.mubr.msk.bf16.gmra.mrb[136].mxu1 %vm462_vm0, %v3162_v31  ;;  %7161 = vmatmul.mubr.msk.bf16.gmra.mrb[136].mxu0 %vm462_vm0, %v7517_v6  ;;  %v1324_v6 = vld [vmem:[#allocation2 + $0x50] sm:$0xff] }
 0x130   : > { %1934 = vst.msk [vmem:[#allocation2] sm:$0xff] %vm462_vm0, %v1886_v58  ;;  %1415 = vst.msk [vmem:[#allocation2 + $0x28] sm:$0xff] %vm462_vm0, %v1367_v12  ;;  %v1887_v18 = vadd.f32 %v1839_v4, %v1650_v7  ;;  %7108 = vmatprep.mubr.msk.bf16.mxu1 %vm462_vm0, %v3164_v38  ;;  %7164 = vmatprep.mubr.msk.bf16.mxu0 %vm462_vm0, %v7542_v19  ;;  %v3166_v19 = vsel %vm1467_vm1, %v3163_v53, %v3165_v42  ;;  %v1326_v38 = vld [vmem:[#allocation2 + $0x60] sm:$0xff]  ;;  %v1329_v4 = vld [vmem:[#allocation2 + $0x78] sm:$0xff] }
 0x131   : > { %1937 = vst.msk [vmem:[#allocation2 + $0x18] sm:$0xff] %vm462_vm0, %v1889_v41  ;;  %v3168_v30 = vsel %vm1467_vm1, %v3165_v42, %v3167_v3  ;;  %v8554_v53 = vcombine.low %v8112_v60, %v8352_v62  ;;  %v3169_v60 = vrot.slane %v8276_v61, 1  ;;  %v8569_v62 = vcombine.low %v8355_v24, %v8384_v17 }
 0x132   : > { %1935 = vst.msk [vmem:[#allocation2 + $0x8] sm:$0xff] %vm462_vm0, %v1887_v18  ;;  %v6874_v8 = vpop.f32.mrb[32].mxu1  ;;  %v6930_v25 = vpop.f32.mrb[32].mxu0 }
 0x133   : > { %v1372_v5 = vadd.f32 %v6874_v8, %v1324_v6  ;;  %v1155_v16 = vpop.f32.mrb[33].mxu1  ;;  %v8542_v7 = vpop.f32.mrb[33].mxu0  ;;  %v3170_v18 = vsel %vm1467_vm1, %v3167_v3, %v3169_v60 }
 0x134   : > { %v1844_v23 = vld [vmem:[#allocation2 + $0x30] sm:$0xff]  ;;  %v1370_v57 = vadd.f32 %v1322_v27, %v1155_v16  ;;  %v6875_v11 = vpop.f32.mrb[34].mxu1  ;;  %v8545_v47 = vpop.f32.mrb[34].mxu0 }
 0x135   : > { %1420 = vst.msk [vmem:[#allocation2 + $0x50] sm:$0xff] %vm462_vm0, %v1372_v5  ;;  %v1892_v48 = vadd.f32 %v6926_v50, %v1844_v23  ;;  %v1842_v35 = vld [vmem:[#allocation2 + $0x20] sm:$0xff]  ;;  %v1373_v55 = vadd.f32 %v6875_v11, %v1325_v36  ;;  %v1158_v46 = vpop.f32.mrb[35].mxu1  ;;  %v8548_v21 = vpop.f32.mrb[35].mxu0 }
 0x136   : > { %1418 = vst.msk [vmem:[#allocation2 + $0x40] sm:$0xff] %vm462_vm0, %v1370_v57  ;;  %v1890_v33 = vadd.f32 %v1842_v35, %v1663_v59  ;;  %v1845_v31 = vld [vmem:[#allocation2 + $0x38] sm:$0xff]  ;;  %v1371_v29 = vadd.f32 %v1323_v1, %v1158_v46  ;;  %v1327_v57 = vld [vmem:[#allocation2 + $0x68] sm:$0xff]  ;;  %v8596_v35 = vld [vmem:[%s7510_s25 + $0xd0] sm:$0xff]   ;;  %v3173_v1 = vrot.slane %v8296_v10, 1  ;;  %v4526_v10 = vrot.slane %v8554_v53, 1 }
 0x137   : > { %1940 = vst.msk [vmem:[#allocation2 + $0x30] sm:$0xff] %vm462_vm0, %v1892_v48  ;;  %1421 = vst.msk [vmem:[#allocation2 + $0x58] sm:$0xff] %vm462_vm0, %v1373_v55  ;;  %v1893_v50 = vadd.f32 %v6927_v63, %v1845_v31  ;;  %v1843_v9 = vld [vmem:[#allocation2 + $0x28] sm:$0xff]  ;;  %7109 = vmatmul.mubr.msk.bf16.gmra.mrb[140].mxu1 %vm462_vm0, %v3166_v19  ;;  %7165 = vmatmul.mubr.msk.bf16.gmra.mrb[140].mxu0 %vm462_vm0, %v7547_v22  ;;  %v4086_v63 = vshll.u32 %v8554_v53, 16  ;;  %v3171_v22 = vrot.slane %v8283_v20, 1  ;;  %v1332_v31 = vld [vmem:[#allocation2 + $0x90] sm:$0xff] }
 0x138   : > { %1938 = vst.msk [vmem:[#allocation2 + $0x20] sm:$0xff] %vm462_vm0, %v1890_v33  ;;  %1419 = vst.msk [vmem:[#allocation2 + $0x48] sm:$0xff] %vm462_vm0, %v1371_v29  ;;  %v1891_v59 = vadd.f32 %v1843_v9, %v1666_v56  ;;  %7112 = vmatprep.mubr.msk.bf16.mxu1 %vm462_vm0, %v3168_v30  ;;  %7168 = vmatprep.mubr.msk.bf16.mxu0 %vm462_vm0, %v7584_v34  ;;  %v4090_v34 = vshrl.u32 %v8554_v53, 16  ;;  %v4093_v56 = vshll.u32 %v8569_v62, 16  ;;  %v3175_v30 = vrot.slane %v8303_v32, 1 }
 0x139   : > { %1941 = vst.msk [vmem:[#allocation2 + $0x38] sm:$0xff] %vm462_vm0, %v1893_v50  ;;  %v8577_v61 = vrot.slane %v4086_v63, 1  ;;  %v3172_v36 = vsel %vm1467_vm1, %v3169_v60, %v3171_v22  ;;  %v4528_v63 = vrot.slane %v8569_v62, 1 }
 0x13a   : > { %1939 = vst.msk [vmem:[#allocation2 + $0x28] sm:$0xff] %vm462_vm0, %v1891_v59  ;;  %v6878_v28 = vpop.f32.mrb[36].mxu1  ;;  %v8575_v43 = vpop.f32.mrb[36].mxu0  ;;  %v4095_v6 = vrot.slane %v4093_v56, 1  ;;  %v1330_v59 = vld [vmem:[#allocation2 + $0x80] sm:$0xff]  ;;  %v1333_v56 = vld [vmem:[#allocation2 + $0x98] sm:$0xff] }
 0x13b   : > { %v1376_v17 = vadd.f32 %v6878_v28, %v1328_v49  ;;  %v1171_v24 = vpop.f32.mrb[37].mxu1  ;;  %v8581_v58 = vpop.f32.mrb[37].mxu0  ;;  %v4092_v8 = vor.u32 %v4090_v34, %v8577_v61  ;;  %v8638_v20 = vsel %vm1467_vm1, %v4526_v10, %v4528_v63 }
 0x13c   : > { %v1848_v52 = vld [vmem:[#allocation2 + $0x50] sm:$0xff]  ;;  %v1374_v12 = vadd.f32 %v1326_v38, %v1171_v24  ;;  %v6879_v41 = vpop.f32.mrb[38].mxu1  ;;  %v8584_v42 = vpop.f32.mrb[38].mxu0  ;;  %v3176_v38 = vsel %vm1467_vm1, %v3173_v1, %v3175_v30 }
 0x13d   : > { %1424 = vst.msk [vmem:[#allocation2 + $0x70] sm:$0xff] %vm462_vm0, %v1376_v17  ;;  %v1896_v5 = vadd.f32 %v6930_v25, %v1848_v52  ;;  %v1846_v16 = vld [vmem:[#allocation2 + $0x40] sm:$0xff]  ;;  %v1377_v27 = vadd.f32 %v6879_v41, %v1329_v4  ;;  %v1174_v23 = vpop.f32.mrb[39].mxu1  ;;  %v8588_v11 = vpop.f32.mrb[39].mxu0  ;;  %v8599_v25 = vsel %vm820_vm2, %v4092_v8, %v4095_v6  ;;  %v3174_v17 = vsel %vm1467_vm1, %v3171_v22, %v3173_v1  ;;  %v1337_v1 = vld [vmem:[#allocation2 + $0xb8] sm:$0xff] }
 0x13e   : > { %1422 = vst.msk [vmem:[#allocation2 + $0x60] sm:$0xff] %vm462_vm0, %v1374_v12  ;;  %v1894_v3 = vadd.f32 %v1846_v16, %v8542_v7  ;;  %v1849_v19 = vld [vmem:[#allocation2 + $0x58] sm:$0xff]  ;;  %v1375_v48 = vadd.f32 %v1327_v57, %v1174_v23  ;;  %v3177_v23 = vrot.slane %v8316_v14, 1  ;;  %v1336_v57 = vld [vmem:[#allocation2 + $0xb0] sm:$0xff] }
 0x13f   : > { %1944 = vst.msk [vmem:[#allocation2 + $0x50] sm:$0xff] %vm462_vm0, %v1896_v5  ;;  %1425 = vst.msk [vmem:[#allocation2 + $0x78] sm:$0xff] %vm462_vm0, %v1377_v27  ;;  %v1897_v55 = vadd.f32 %v8545_v47, %v1849_v19  ;;  %v1847_v46 = vld [vmem:[#allocation2 + $0x48] sm:$0xff]  ;;  %7113 = vmatmul.mubr.msk.bf16.gmra.mrb[144].mxu1 %vm462_vm0, %v3170_v18  ;;  %7169 = vmatmul.mubr.msk.bf16.gmra.mrb[144].mxu0 %vm462_vm0, %v7592_v37  ;;  %v4100_v47 = vshll.u32 %v8596_v35, 16  ;;  %v4097_v37 = vshrl.u32 %v8569_v62, 16 }
 0x140   : > { %1942 = vst.msk [vmem:[#allocation2 + $0x40] sm:$0xff] %vm462_vm0, %v1894_v3  ;;  %1423 = vst.msk [vmem:[#allocation2 + $0x68] sm:$0xff] %vm462_vm0, %v1375_v48  ;;  %v1895_v7 = vadd.f32 %v1847_v46, %v8548_v21  ;;  %7116 = vmatprep.mubr.msk.bf16.mxu1 %vm462_vm0, %v3172_v36  ;;  %7172 = vmatprep.mubr.msk.bf16.mxu0 %vm462_vm0, %v7645_v51  ;;  %v1331_v18 = vld [vmem:[#allocation2 + $0x88] sm:$0xff]  ;;  %v4530_v3 = vrot.slane %v8596_v35, 1  ;;  %v1334_v48 = vld [vmem:[#allocation2 + $0xa0] sm:$0xff] }
 0x141   : > { %1945 = vst.msk [vmem:[#allocation2 + $0x58] sm:$0xff] %vm462_vm0, %v1897_v55  ;;  %v8619_v29 = vrot.slane %v4100_v47, 1  ;;  %v4099_v51 = vor.u32 %v4097_v37, %v4095_v6 }
 0x142   : > { %1943 = vst.msk [vmem:[#allocation2 + $0x48] sm:$0xff] %vm462_vm0, %v1895_v7  ;;  %v6882_v33 = vpop.f32.mrb[40].mxu1  ;;  %v6938_v21 = vpop.f32.mrb[40].mxu0  ;;  %v8665_v47 = vsel %vm1467_vm1, %v4528_v63, %v4530_v3 }
 0x143   : > { %v1380_v50 = vadd.f32 %v6882_v33, %v1332_v31  ;;  %v1187_v9 = vpop.f32.mrb[41].mxu1  ;;  %v1711_v60 = vpop.f32.mrb[41].mxu0  ;;  %v8633_v6 = vsel %vm820_vm2, %v4099_v51, %v8619_v29 }
 0x144   : > { %v1852_v28 = vld [vmem:[#allocation2 + $0x70] sm:$0xff]  ;;  %v1378_v49 = vadd.f32 %v1330_v59, %v1187_v9  ;;  %v6883_v34 = vpop.f32.mrb[42].mxu1  ;;  %v6939_v24 = vpop.f32.mrb[42].mxu0  ;;  %v1335_v9 = vld [vmem:[#allocation2 + $0xa8] sm:$0xff] }
 0x145   : > { %1428 = vst.msk [vmem:[#allocation2 + $0x90] sm:$0xff] %vm462_vm0, %v1380_v50  ;;  %v1900_v52 = vadd.f32 %v8575_v43, %v1852_v28  ;;  %v1850_v12 = vld [vmem:[#allocation2 + $0x60] sm:$0xff]  ;;  %v1381_v41 = vadd.f32 %v6883_v34, %v1333_v56  ;;  %v1190_v4 = vpop.f32.mrb[43].mxu1  ;;  %v1714_v8 = vpop.f32.mrb[43].mxu0  ;;  %v3183_v34 = vrot.slane %v8343_v26, 1 }
 0x146   : > { %1426 = vst.msk [vmem:[#allocation2 + $0x80] sm:$0xff] %vm462_vm0, %v1378_v49  ;;  %v1898_v22 = vadd.f32 %v1850_v12, %v8581_v58  ;;  %v1853_v5 = vld [vmem:[#allocation2 + $0x78] sm:$0xff]  ;;  %v1379_v43 = vadd.f32 %v1331_v18, %v1190_v4 }
 0x147   : > { %1948 = vst.msk [vmem:[#allocation2 + $0x70] sm:$0xff] %vm462_vm0, %v1900_v52  ;;  %1429 = vst.msk [vmem:[#allocation2 + $0x98] sm:$0xff] %vm462_vm0, %v1381_v41  ;;  %v1901_v16 = vadd.f32 %v8584_v42, %v1853_v5  ;;  %v1851_v27 = vld [vmem:[#allocation2 + $0x68] sm:$0xff]  ;;  %7117 = vmatmul.mubr.msk.bf16.gmra.mrb[148].mxu1 %vm462_vm0, %v3174_v17  ;;  %7173 = vmatmul.mubr.msk.bf16.gmra.mrb[148].mxu0 %vm462_vm0, %v7658_v54  ;;  %v3179_v42 = vrot.slane %v8323_v13, 1  ;;  %v1338_v52 = vld [vmem:[#allocation2 + $0xc0] sm:$0xff] }
 0x148   : > { %1946 = vst.msk [vmem:[#allocation2 + $0x60] sm:$0xff] %vm462_vm0, %v1898_v22  ;;  %1427 = vst.msk [vmem:[#allocation2 + $0x88] sm:$0xff] %vm462_vm0, %v1379_v43  ;;  %v1899_v58 = vadd.f32 %v1851_v27, %v8588_v11  ;;  %7120 = vmatprep.mubr.msk.bf16.mxu1 %vm462_vm0, %v3176_v38  ;;  %7176 = vmatprep.mubr.msk.bf16.mxu0 %vm462_vm0, %v7700_v0  ;;  %v3178_v0 = vsel %vm1467_vm1, %v3175_v30, %v3177_v23 }
 0x149   : > { %1949 = vst.msk [vmem:[#allocation2 + $0x78] sm:$0xff] %vm462_vm0, %v1901_v16  ;;  %v3180_v51 = vsel %vm1467_vm1, %v3177_v23, %v3179_v42  ;;  %v1339_v16 = vld [vmem:[#allocation2 + $0xc8] sm:$0xff] }
 0x14a   : > { %1947 = vst.msk [vmem:[#allocation2 + $0x68] sm:$0xff] %vm462_vm0, %v1899_v58  ;;  %v6886_v54 = vpop.f32.mrb[44].mxu1  ;;  %v6942_v36 = vpop.f32.mrb[44].mxu0 }
 0x14b   : > { %v1384_v19 = vadd.f32 %v6886_v54, %v1336_v57  ;;  %v1203_v11 = vpop.f32.mrb[45].mxu1  ;;  %v1727_v55 = vpop.f32.mrb[45].mxu0 }
 0x14c   : > { %v1856_v46 = vld [vmem:[#allocation2 + $0x90] sm:$0xff]  ;;  %v1382_v14 = vadd.f32 %v1334_v48, %v1203_v11  ;;  %v6887_v7 = vpop.f32.mrb[46].mxu1  ;;  %v6943_v13 = vpop.f32.mrb[46].mxu0  ;;  %v3185_v48 = vrot.slane %v8362_v45, 1  ;;  %v1345_v45 = vld [vmem:[#allocation2 + $0xf8] sm:$0xff] }
 0x14d   : > { %1432 = vst.msk [vmem:[#allocation2 + $0xb0] sm:$0xff] %vm462_vm0, %v1384_v19  ;;  %v1904_v37 = vadd.f32 %v6938_v21, %v1856_v46  ;;  %v1854_v33 = vld [vmem:[#allocation2 + $0x80] sm:$0xff]  ;;  %v1385_v31 = vadd.f32 %v6887_v7, %v1337_v1  ;;  %v1206_v50 = vpop.f32.mrb[47].mxu1  ;;  %v1730_v59 = vpop.f32.mrb[47].mxu0  ;;  %v3187_v46 = vrot.slane %v8369_v40, 1  ;;  %v1344_v7 = vld [vmem:[#allocation2 + $0xf0] sm:$0xff] }
 0x14e   : > { %1430 = vst.msk [vmem:[#allocation2 + $0xa0] sm:$0xff] %vm462_vm0, %v1382_v14  ;;  %v1902_v32 = vadd.f32 %v1854_v33, %v1711_v60  ;;  %v1857_v30 = vld [vmem:[#allocation2 + $0x98] sm:$0xff]  ;;  %v1383_v28 = vadd.f32 %v1335_v9, %v1206_v50  ;;  %v3181_v60 = vrot.slane %v8336_v44, 1 }
 0x14f   : > { %1952 = vst.msk [vmem:[#allocation2 + $0x90] sm:$0xff] %vm462_vm0, %v1904_v37  ;;  %1433 = vst.msk [vmem:[#allocation2 + $0xb8] sm:$0xff] %vm462_vm0, %v1385_v31  ;;  %v1905_v63 = vadd.f32 %v6939_v24, %v1857_v30  ;;  %v1855_v49 = vld [vmem:[#allocation2 + $0x88] sm:$0xff]  ;;  %7121 = vmatmul.mubr.msk.bf16.gmra.mrb[152].mxu1 %vm462_vm0, %v3178_v0  ;;  %7177 = vmatmul.mubr.msk.bf16.gmra.mrb[152].mxu0 %vm462_vm0, %v7708_v2  ;;  %v1340_v2 = vld [vmem:[#allocation2 + $0xd0] sm:$0xff] }
 0x150   : > { %1950 = vst.msk [vmem:[#allocation2 + $0x80] sm:$0xff] %vm462_vm0, %v1902_v32  ;;  %1431 = vst.msk [vmem:[#allocation2 + $0xa8] sm:$0xff] %vm462_vm0, %v1383_v28  ;;  %v1903_v21 = vadd.f32 %v1855_v49, %v1714_v8  ;;  %7124 = vmatprep.mubr.msk.bf16.mxu1 %vm462_vm0, %v3180_v51  ;;  %7180 = vmatprep.mubr.msk.bf16.mxu0 %vm462_vm0, %v7749_v15  ;;  %v1341_v44 = vld [vmem:[#allocation2 + $0xd8] sm:$0xff]  ;;  %v3182_v8 = vsel %vm1467_vm1, %v3179_v42, %v3181_v60  ;;  %v1342_v37 = vld [vmem:[#allocation2 + $0xe0] sm:$0xff] }
 0x151   : > { %1953 = vst.msk [vmem:[#allocation2 + $0x98] sm:$0xff] %vm462_vm0, %v1905_v63  ;;  %v3184_v58 = vsel %vm1467_vm1, %v3181_v60, %v3183_v34  ;;  %v1343_v63 = vld [vmem:[#allocation2 + $0xe8] sm:$0xff] }
 0x152   : > { %1951 = vst.msk [vmem:[#allocation2 + $0x88] sm:$0xff] %vm462_vm0, %v1903_v21  ;;  %v6890_v56 = vpop.f32.mrb[48].mxu1  ;;  %v6946_v17 = vpop.f32.mrb[48].mxu0  ;;  %v3188_v21 = vsel %vm1467_vm1, %v3185_v48, %v3187_v46 }
 0x153   : > { %v1388_v24 = vadd.f32 %v6890_v56, %v1340_v2  ;;  %v1219_v38 = vpop.f32.mrb[49].mxu1  ;;  %v1743_v12 = vpop.f32.mrb[49].mxu0 }
 0x154   : > { %v1860_v41 = vld [vmem:[#allocation2 + $0xb0] sm:$0xff]  ;;  %v1386_v4 = vadd.f32 %v1338_v52, %v1219_v38  ;;  %v6891_v18 = vpop.f32.mrb[50].mxu1  ;;  %v6947_v15 = vpop.f32.mrb[50].mxu0  ;;  %v3189_v38 = vrot.slane %v8396_v39, 1 }
 0x155   : > { %1436 = vst.msk [vmem:[#allocation2 + $0xd0] sm:$0xff] %vm462_vm0, %v1388_v24  ;;  %v1908_v22 = vadd.f32 %v6942_v36, %v1860_v41  ;;  %v1858_v26 = vld [vmem:[#allocation2 + $0xa0] sm:$0xff]  ;;  %v1389_v5 = vadd.f32 %v6891_v18, %v1341_v44  ;;  %v1222_v43 = vpop.f32.mrb[51].mxu1  ;;  %v1746_v27 = vpop.f32.mrb[51].mxu0  ;;  %v9832_v36 = vld [vmem:[#allocation13_spill] sm:$0xff] }
 0x156   : > { %1434 = vst.msk [vmem:[#allocation2 + $0xc0] sm:$0xff] %vm462_vm0, %v1386_v4  ;;  %v1906_v23 = vadd.f32 %v1858_v26, %v1727_v55  ;;  %v1861_v54 = vld [vmem:[#allocation2 + $0xb8] sm:$0xff]  ;;  %v1387_v57 = vadd.f32 %v1339_v16, %v1222_v43  ;;  %v9833_v55 = vld [vmem:[#allocation16_spill] sm:$0xff]  ;;  %v1346_v44 = vld [vmem:[#allocation2 + $0x100] sm:$0xff]  ;;  %v3190_v39 = vsel %vm1467_vm1, %v3187_v46, %v3189_v38 }
 0x157   : > { %1956 = vst.msk [vmem:[#allocation2 + $0xb0] sm:$0xff] %vm462_vm0, %v1908_v22  ;;  %1437 = vst.msk [vmem:[#allocation2 + $0xd8] sm:$0xff] %vm462_vm0, %v1389_v5  ;;  %v1909_v42 = vadd.f32 %v6943_v13, %v1861_v54  ;;  %v1859_v19 = vld [vmem:[#allocation2 + $0xa8] sm:$0xff]  ;;  %7125 = vmatmul.mubr.msk.bf16.gmra.mrb[156].mxu1 %vm462_vm0, %v3182_v8  ;;  %7181 = vmatmul.mubr.msk.bf16.gmra.mrb[156].mxu0 %vm462_vm0, %v9832_v36  ;;  %v1349_v5 = vld [vmem:[#allocation2 + $0x118] sm:$0xff] }
 0x158   : > { %1954 = vst.msk [vmem:[#allocation2 + $0xa0] sm:$0xff] %vm462_vm0, %v1906_v23  ;;  %1435 = vst.msk [vmem:[#allocation2 + $0xc8] sm:$0xff] %vm462_vm0, %v1387_v57  ;;  %v1907_v11 = vadd.f32 %v1859_v19, %v1730_v59  ;;  %7128 = vmatprep.mubr.msk.bf16.mxu1 %vm462_vm0, %v3184_v58  ;;  %7184 = vmatprep.mubr.msk.bf16.mxu0 %vm462_vm0, %v9833_v55  ;;  %v3186_v59 = vsel %vm1467_vm1, %v3183_v34, %v3185_v48  ;;  %v1347_v23 = vld [vmem:[#allocation2 + $0x108] sm:$0xff]  ;;  %v9834_v55 = vld [vmem:[#allocation17_spill] sm:$0xff] }
 0x159   : > { %1957 = vst.msk [vmem:[#allocation2 + $0xb8] sm:$0xff] %vm462_vm0, %v1909_v42  ;;  %v9835_v46 = vld [vmem:[#allocation18_spill] sm:$0xff]  ;;  %v9838_v38 = vld [vmem:[#allocation21_spill] sm:$0xff] }
 0x15a   : > { %1955 = vst.msk [vmem:[#allocation2 + $0xa8] sm:$0xff] %vm462_vm0, %v1907_v11  ;;  %v6894_v14 = vpop.f32.mrb[52].mxu1  ;;  %v6950_v1 = vpop.f32.mrb[52].mxu0 }
 0x15b   : > { %v1392_v0 = vadd.f32 %v6894_v14, %v1344_v7  ;;  %v1235_v13 = vpop.f32.mrb[53].mxu1  ;;  %v1759_v33 = vpop.f32.mrb[53].mxu0  ;;  %v1352_v7 = vld [vmem:[#allocation2 + $0x130] sm:$0xff] }
 0x15c   : > { %v1864_v31 = vld [vmem:[#allocation2 + $0xd0] sm:$0xff]  ;;  %v1390_v50 = vadd.f32 %v1342_v37, %v1235_v13  ;;  %v6895_v9 = vpop.f32.mrb[54].mxu1  ;;  %v6951_v51 = vpop.f32.mrb[54].mxu0  ;;  %v1350_v37 = vld [vmem:[#allocation2 + $0x120] sm:$0xff] }
 0x15d   : > { %1440 = vst.msk [vmem:[#allocation2 + $0xf0] sm:$0xff] %vm462_vm0, %v1392_v0  ;;  %v1912_v32 = vadd.f32 %v6946_v17, %v1864_v31  ;;  %v1862_v40 = vld [vmem:[#allocation2 + $0xc0] sm:$0xff]  ;;  %v1393_v30 = vadd.f32 %v6895_v9, %v1345_v45  ;;  %v1238_v28 = vpop.f32.mrb[55].mxu1  ;;  %v1762_v49 = vpop.f32.mrb[55].mxu0  ;;  %v1353_v45 = vld [vmem:[#allocation2 + $0x138] sm:$0xff] }
 0x15e   : > { %1438 = vst.msk [vmem:[#allocation2 + $0xe0] sm:$0xff] %vm462_vm0, %v1390_v50  ;;  %v1910_v60 = vadd.f32 %v1862_v40, %v1743_v12  ;;  %v1865_v56 = vld [vmem:[#allocation2 + $0xd8] sm:$0xff]  ;;  %v1391_v2 = vadd.f32 %v1343_v63, %v1238_v28  ;;  %v1348_v12 = vld [vmem:[#allocation2 + $0x110] sm:$0xff]  ;;  %v1351_v28 = vld [vmem:[#allocation2 + $0x128] sm:$0xff] }
 0x15f   : > { %1960 = vst.msk [vmem:[#allocation2 + $0xd0] sm:$0xff] %vm462_vm0, %v1912_v32  ;;  %1441 = vst.msk [vmem:[#allocation2 + $0xf8] sm:$0xff] %vm462_vm0, %v1393_v30  ;;  %v1913_v34 = vadd.f32 %v6947_v15, %v1865_v56  ;;  %v1863_v24 = vld [vmem:[#allocation2 + $0xc8] sm:$0xff]  ;;  %7129 = vmatmul.mubr.msk.bf16.gmra.mrb[160].mxu1 %vm462_vm0, %v3186_v59  ;;  %7185 = vmatmul.mubr.msk.bf16.gmra.mrb[160].mxu0 %vm462_vm0, %v8554_v53 }
 0x160   : > { %1958 = vst.msk [vmem:[#allocation2 + $0xc0] sm:$0xff] %vm462_vm0, %v1910_v60  ;;  %1439 = vst.msk [vmem:[#allocation2 + $0xe8] sm:$0xff] %vm462_vm0, %v1391_v2  ;;  %v1911_v17 = vadd.f32 %v1863_v24, %v1746_v27  ;;  %7132 = vmatprep.mubr.msk.bf16.mxu1 %vm462_vm0, %v3188_v21  ;;  %7188 = vmatprep.mubr.msk.bf16.mxu0 %vm462_vm0, %v8569_v62  ;;  %v9837_v24 = vld [vmem:[#allocation20_spill] sm:$0xff] }
 0x161   : > { %1961 = vst.msk [vmem:[#allocation2 + $0xd8] sm:$0xff] %vm462_vm0, %v1913_v34  ;;  %v9836_v34 = vld [vmem:[#allocation19_spill] sm:$0xff] }
 0x162   : > { %1959 = vst.msk [vmem:[#allocation2 + $0xc8] sm:$0xff] %vm462_vm0, %v1911_v17  ;;  %v6898_v52 = vpop.f32.mrb[56].mxu1  ;;  %v6954_v41 = vpop.f32.mrb[56].mxu0 }
 0x163   : > { %v1396_v4 = vadd.f32 %v6898_v52, %v1348_v12  ;;  %v1251_v18 = vpop.f32.mrb[57].mxu1  ;;  %v1775_v8 = vpop.f32.mrb[57].mxu0  ;;  %v9839_v52 = vld [vmem:[#allocation22_spill] sm:$0xff] }
 0x164   : > { %v1868_v15 = vld [vmem:[#allocation2 + $0xf0] sm:$0xff]  ;;  %v1394_v22 = vadd.f32 %v1346_v44, %v1251_v18  ;;  %v6899_v26 = vpop.f32.mrb[58].mxu1  ;;  %v6955_v43 = vpop.f32.mrb[58].mxu0 }
 0x165   : > { %1444 = vst.msk [vmem:[#allocation2 + $0x110] sm:$0xff] %vm462_vm0, %v1396_v4  ;;  %v1916_v62 = vadd.f32 %v6950_v1, %v1868_v15  ;;  %v1866_v16 = vld [vmem:[#allocation2 + $0xe0] sm:$0xff]  ;;  %v1397_v27 = vadd.f32 %v6899_v26, %v1349_v5  ;;  %v1254_v58 = vpop.f32.mrb[59].mxu1  ;;  %v1778_v54 = vpop.f32.mrb[59].mxu0 }
 0x166   : > { %1442 = vst.msk [vmem:[#allocation2 + $0x100] sm:$0xff] %vm462_vm0, %v1394_v22  ;;  %v1914_v57 = vadd.f32 %v1866_v16, %v1759_v33  ;;  %v1869_v42 = vld [vmem:[#allocation2 + $0xf8] sm:$0xff]  ;;  %v1395_v19 = vadd.f32 %v1347_v23, %v1254_v58  ;;  %v1355_v23 = vld [vmem:[#allocation2 + $0x148] sm:$0xff] }
 0x167   : > { %1964 = vst.msk [vmem:[#allocation2 + $0xf0] sm:$0xff] %vm462_vm0, %v1916_v62  ;;  %1445 = vst.msk [vmem:[#allocation2 + $0x118] sm:$0xff] %vm462_vm0, %v1397_v27  ;;  %v1917_v36 = vadd.f32 %v6951_v51, %v1869_v42  ;;  %v1867_v11 = vld [vmem:[#allocation2 + $0xe8] sm:$0xff]  ;;  %7133 = vmatmul.mubr.msk.bf16.gmra.mrb[164].mxu1 %vm462_vm0, %v3190_v39  ;;  %7189 = vmatmul.mubr.msk.bf16.gmra.mrb[164].mxu0 %vm462_vm0, %v8596_v35  ;;  %v1357_v39 = vld [vmem:[#allocation2 + $0x158] sm:$0xff] }
 0x168   : > { %1962 = vst.msk [vmem:[#allocation2 + $0xe0] sm:$0xff] %vm462_vm0, %v1914_v57  ;;  %1443 = vst.msk [vmem:[#allocation2 + $0x108] sm:$0xff] %vm462_vm0, %v1395_v19  ;;  %v1915_v48 = vadd.f32 %v1867_v11, %v1762_v49  ;;  %7200 = vmatprep.mubr.msk.bf16.mxu1 %vm462_vm0, %v9834_v55  ;;  %7256 = vmatprep.mubr.msk.bf16.mxu0 %vm462_vm0, %v9835_v46  ;;  %v9841_v55 = vld [vmem:[#allocation24_spill] sm:$0xff] }
 0x169   : > { %1965 = vst.msk [vmem:[#allocation2 + $0xf8] sm:$0xff] %vm462_vm0, %v1917_v36 }
 0x16a   : > { %1963 = vst.msk [vmem:[#allocation2 + $0xe8] sm:$0xff] %vm462_vm0, %v1915_v48  ;;  %v6902_v14 = vpop.f32.mrb[60].mxu1  ;;  %v6958_v1 = vpop.f32.mrb[60].mxu0  ;;  %v9840_v48 = vld [vmem:[#allocation23_spill] sm:$0xff] }
 0x16b   : > { %v1400_v0 = vadd.f32 %v6902_v14, %v1352_v7  ;;  %v1267_v13 = vpop.f32.mrb[61].mxu1  ;;  %v1791_v33 = vpop.f32.mrb[61].mxu0  ;;  %v9842_v14 = vld [vmem:[#allocation25_spill] sm:$0xff]  ;;  %v9843_v7 = vld [vmem:[#allocation26_spill] sm:$0xff] }
 0x16c   : > { %v1872_v31 = vld [vmem:[#allocation2 + $0x110] sm:$0xff]  ;;  %v1398_v50 = vadd.f32 %v1350_v37, %v1267_v13  ;;  %v6903_v9 = vpop.f32.mrb[62].mxu1  ;;  %v6959_v59 = vpop.f32.mrb[62].mxu0 }
 0x16d   : > { %1448 = vst.msk [vmem:[#allocation2 + $0x130] sm:$0xff] %vm462_vm0, %v1400_v0  ;;  %v1920_v51 = vadd.f32 %v6954_v41, %v1872_v31  ;;  %v1870_v32 = vld [vmem:[#allocation2 + $0x100] sm:$0xff]  ;;  %v1401_v40 = vadd.f32 %v6903_v9, %v1353_v45  ;;  %v1270_v30 = vpop.f32.mrb[63].mxu1  ;;  %v1794_v63 = vpop.f32.mrb[63].mxu0  ;;  %v1356_v41 = vld [vmem:[#allocation2 + $0x150] sm:$0xff] }
 0x16e   : > { %1446 = vst.msk [vmem:[#allocation2 + $0x120] sm:$0xff] %vm462_vm0, %v1398_v50  ;;  %v1918_v49 = vadd.f32 %v1870_v32, %v1775_v8  ;;  %v1873_v21 = vld [vmem:[#allocation2 + $0x118] sm:$0xff]  ;;  %v1399_v60 = vadd.f32 %v1351_v28, %v1270_v30  ;;  %v1354_v8 = vld [vmem:[#allocation2 + $0x140] sm:$0xff]  ;;  %v1360_v0 = vld [vmem:[#allocation2 + $0x170] sm:$0xff] }
 0x16f   : > { %1968 = vst.msk [vmem:[#allocation2 + $0x110] sm:$0xff] %vm462_vm0, %v1920_v51  ;;  %1449 = vst.msk [vmem:[#allocation2 + $0x138] sm:$0xff] %vm462_vm0, %v1401_v40  ;;  %v1921_v56 = vadd.f32 %v6955_v43, %v1873_v21  ;;  %v1871_v2 = vld [vmem:[#allocation2 + $0x108] sm:$0xff]  ;;  %7201 = vmatmul.mubr.msk.bf16.vlgmr.msra.gmra.mrb[168].mxu1 %vm462_vm0, %v9836_v34  ;;  %7257 = vmatmul.mubr.msk.bf16.vlgmr.msra.gmra.mrb[168].mxu0 %vm462_vm0, %v9837_v24  ;;  %v1358_v31 = vld [vmem:[#allocation2 + $0x160] sm:$0xff] }
 0x170   : > { %1966 = vst.msk [vmem:[#allocation2 + $0x100] sm:$0xff] %vm462_vm0, %v1918_v49  ;;  %1447 = vst.msk [vmem:[#allocation2 + $0x128] sm:$0xff] %vm462_vm0, %v1399_v60  ;;  %v1919_v17 = vadd.f32 %v1871_v2, %v1778_v54  ;;  %7204 = vmatprep.mubr.msk.bf16.mxu1 %vm462_vm0, %v9838_v38  ;;  %7260 = vmatprep.mubr.msk.bf16.mxu0 %vm462_vm0, %v9839_v52  ;;  %v1361_v51 = vld [vmem:[#allocation2 + $0x178] sm:$0xff]  ;;  %v1359_v49 = vld [vmem:[#allocation2 + $0x168] sm:$0xff] }
 0x171   : > { %1969 = vst.msk [vmem:[#allocation2 + $0x118] sm:$0xff] %vm462_vm0, %v1921_v56  ;;  %v9845_v38 = vld [vmem:[#allocation28_spill] sm:$0xff] }
 0x172   : > { %1967 = vst.msk [vmem:[#allocation2 + $0x108] sm:$0xff] %vm462_vm0, %v1919_v17  ;;  %v6906_v12 = vpop.f32.mrb[64].mxu1  ;;  %v6962_v4 = vpop.f32.mrb[64].mxu0  ;;  %v9844_v17 = vld [vmem:[#allocation27_spill] sm:$0xff] }
 0x173   : > { %v1404_v18 = vadd.f32 %v6906_v12, %v1356_v41  ;;  %v1283_v44 = vpop.f32.mrb[65].mxu1  ;;  %v1807_v15 = vpop.f32.mrb[65].mxu0  ;;  %v9846_v12 = vld [vmem:[#allocation29_spill] sm:$0xff]  ;;  %v9847_v41 = vld [vmem:[#allocation30_spill] sm:$0xff] }
 0x174   : > { %v1876_v22 = vld [vmem:[#allocation2 + $0x130] sm:$0xff]  ;;  %v1402_v26 = vadd.f32 %v1354_v8, %v1283_v44  ;;  %v6907_v5 = vpop.f32.mrb[66].mxu1  ;;  %v6963_v43 = vpop.f32.mrb[66].mxu0 }
 0x175   : > { %1452 = vst.msk [vmem:[#allocation2 + $0x150] sm:$0xff] %vm462_vm0, %v1404_v18  ;;  %v1924_v62 = vadd.f32 %v6958_v1, %v1876_v22  ;;  %v1874_v16 = vld [vmem:[#allocation2 + $0x120] sm:$0xff]  ;;  %v1405_v27 = vadd.f32 %v6907_v5, %v1357_v39  ;;  %v1286_v58 = vpop.f32.mrb[67].mxu1  ;;  %v1810_v54 = vpop.f32.mrb[67].mxu0  ;;  %v2342_v18 = vld [vmem:[#allocation2 + $0x10] sm:$0xff] }
 0x176   : > { %1450 = vst.msk [vmem:[#allocation2 + $0x140] sm:$0xff] %vm462_vm0, %v1402_v26  ;;  %v1922_v57 = vadd.f32 %v1874_v16, %v1791_v33  ;;  %v1877_v42 = vld [vmem:[#allocation2 + $0x138] sm:$0xff]  ;;  %v1403_v19 = vadd.f32 %v1355_v23, %v1286_v58  ;;  %v2340_v22 = vld [vmem:[#allocation2] sm:$0xff] }
 0x177   : > { %1972 = vst.msk [vmem:[#allocation2 + $0x130] sm:$0xff] %vm462_vm0, %v1924_v62  ;;  %1453 = vst.msk [vmem:[#allocation2 + $0x158] sm:$0xff] %vm462_vm0, %v1405_v27  ;;  %v1925_v36 = vadd.f32 %v6959_v59, %v1877_v42  ;;  %v1875_v11 = vld [vmem:[#allocation2 + $0x128] sm:$0xff]  ;;  %7205 = vmatmul.mubr.msk.bf16.gmra.mrb[172].mxu1 %vm462_vm0, %v9840_v48  ;;  %7261 = vmatmul.mubr.msk.bf16.gmra.mrb[172].mxu0 %vm462_vm0, %v9841_v55  ;;  %v2343_v62 = vld [vmem:[#allocation2 + $0x18] sm:$0xff] }
 0x178   : > { %1970 = vst.msk [vmem:[#allocation2 + $0x120] sm:$0xff] %vm462_vm0, %v1922_v57  ;;  %1451 = vst.msk [vmem:[#allocation2 + $0x148] sm:$0xff] %vm462_vm0, %v1403_v19  ;;  %v1923_v46 = vadd.f32 %v1875_v11, %v1794_v63  ;;  %7208 = vmatprep.mubr.msk.bf16.mxu1 %vm462_vm0, %v9842_v14  ;;  %7264 = vmatprep.mubr.msk.bf16.mxu0 %vm462_vm0, %v9843_v7  ;;  %v2341_v57 = vld [vmem:[#allocation2 + $0x8] sm:$0xff] }
 0x179   : > { %1973 = vst.msk [vmem:[#allocation2 + $0x138] sm:$0xff] %vm462_vm0, %v1925_v36  ;;  %v9849_v14 = vld [vmem:[#allocation32_spill] sm:$0xff] }
 0x17a   : > { %1971 = vst.msk [vmem:[#allocation2 + $0x128] sm:$0xff] %vm462_vm0, %v1923_v46  ;;  %v6910_v1 = vpop.f32.mrb[68].mxu1  ;;  %v6966_v13 = vpop.f32.mrb[68].mxu0  ;;  %v9848_v46 = vld [vmem:[#allocation31_spill] sm:$0xff] }
 0x17b   : > { %v1408_v37 = vadd.f32 %v6910_v1, %v1360_v0  ;;  %v1299_v33 = vpop.f32.mrb[69].mxu1  ;;  %v1823_v50 = vpop.f32.mrb[69].mxu0  ;;  %v9850_v1 = vld [vmem:[#allocation33_spill] sm:$0xff]  ;;  %v9851_v0 = vld [vmem:[#allocation34_spill] sm:$0xff] }
 0x17c   : > { %v1880_v9 = vld [vmem:[#allocation2 + $0x150] sm:$0xff]  ;;  %v1406_v45 = vadd.f32 %v1358_v31, %v1299_v33  ;;  %v6911_v59 = vpop.f32.mrb[70].mxu1  ;;  %v6967_v32 = vpop.f32.mrb[70].mxu0 }
 0x17d   : > { %1456 = vst.msk [vmem:[#allocation2 + $0x170] sm:$0xff] %vm462_vm0, %v1408_v37  ;;  %v1928_v40 = vadd.f32 %v6962_v4, %v1880_v9  ;;  %v1878_v30 = vld [vmem:[#allocation2 + $0x140] sm:$0xff]  ;;  %v1409_v28 = vadd.f32 %v6911_v59, %v1361_v51  ;;  %v1302_v63 = vpop.f32.mrb[71].mxu1  ;;  %v1826_v21 = vpop.f32.mrb[71].mxu0  ;;  %v2346_v37 = vld [vmem:[#allocation2 + $0x30] sm:$0xff] }
 0x17e   : > { %1454 = vst.msk [vmem:[#allocation2 + $0x160] sm:$0xff] %vm462_vm0, %v1406_v45  ;;  %v1926_v60 = vadd.f32 %v1878_v30, %v1807_v15  ;;  %v1881_v56 = vld [vmem:[#allocation2 + $0x158] sm:$0xff]  ;;  %v1407_v2 = vadd.f32 %v1359_v49, %v1302_v63  ;;  %v2344_v9 = vld [vmem:[#allocation2 + $0x20] sm:$0xff] }
 0x17f   : > { %1976 = vst.msk [vmem:[#allocation2 + $0x150] sm:$0xff] %vm462_vm0, %v1928_v40  ;;  %1457 = vst.msk [vmem:[#allocation2 + $0x178] sm:$0xff] %vm462_vm0, %v1409_v28  ;;  %v1929_v34 = vadd.f32 %v6963_v43, %v1881_v56  ;;  %v1879_v24 = vld [vmem:[#allocation2 + $0x148] sm:$0xff]  ;;  %7209 = vmatmul.mubr.msk.bf16.gmra.mrb[176].mxu1 %vm462_vm0, %v9844_v17  ;;  %7265 = vmatmul.mubr.msk.bf16.gmra.mrb[176].mxu0 %vm462_vm0, %v9845_v38  ;;  %v2347_v40 = vld [vmem:[#allocation2 + $0x38] sm:$0xff] }
 0x180   : > { %1974 = vst.msk [vmem:[#allocation2 + $0x140] sm:$0xff] %vm462_vm0, %v1926_v60  ;;  %1455 = vst.msk [vmem:[#allocation2 + $0x168] sm:$0xff] %vm462_vm0, %v1407_v2  ;;  %v1927_v52 = vadd.f32 %v1879_v24, %v1810_v54  ;;  %7212 = vmatprep.mubr.msk.bf16.mxu1 %vm462_vm0, %v9846_v12  ;;  %7268 = vmatprep.mubr.msk.bf16.mxu0 %vm462_vm0, %v9847_v41  ;;  %v2345_v60 = vld [vmem:[#allocation2 + $0x28] sm:$0xff] }
 0x181   : > { %1977 = vst.msk [vmem:[#allocation2 + $0x158] sm:$0xff] %vm462_vm0, %v1929_v34  ;;  %v9853_v12 = vld [vmem:[#allocation36_spill] sm:$0xff] }
 0x182   : > { %1975 = vst.msk [vmem:[#allocation2 + $0x148] sm:$0xff] %vm462_vm0, %v1927_v52  ;;  %v6978_v4 = vpop.f32.mrb[72].mxu1  ;;  %v7034_v44 = vpop.f32.mrb[72].mxu0  ;;  %v9852_v52 = vld [vmem:[#allocation35_spill] sm:$0xff] }
 0x183   : > { %v2390_v8 = vadd.f32 %v6978_v4, %v2342_v18  ;;  %v2149_v15 = vpop.f32.mrb[73].mxu1  ;;  %v2798_v26 = vpop.f32.mrb[73].mxu0  ;;  %v9854_v4 = vld [vmem:[#allocation37_spill] sm:$0xff]  ;;  %v9855_v18 = vld [vmem:[#allocation38_spill] sm:$0xff] }
 0x184   : > { %v1884_v5 = vld [vmem:[#allocation2 + $0x170] sm:$0xff]  ;;  %v2388_v39 = vadd.f32 %v2340_v22, %v2149_v15  ;;  %v6979_v43 = vpop.f32.mrb[74].mxu1  ;;  %v7035_v16 = vpop.f32.mrb[74].mxu0 }
 0x185   : > { %v1932_v27 = vadd.f32 %v6966_v13, %v1884_v5  ;;  %2438 = vst.msk [vmem:[#allocation2 + $0x10] sm:$0xff] %vm462_vm0, %v2390_v8  ;;  %v1882_v58 = vld [vmem:[#allocation2 + $0x160] sm:$0xff]  ;;  %v2391_v23 = vadd.f32 %v6979_v43, %v2343_v62  ;;  %v2152_v54 = vpop.f32.mrb[75].mxu1  ;;  %v2801_v42 = vpop.f32.mrb[75].mxu0  ;;  %v2350_v8 = vld [vmem:[#allocation2 + $0x50] sm:$0xff] }
 0x186   : > { %v1930_v19 = vadd.f32 %v1882_v58, %v1823_v50  ;;  %2436 = vst.msk [vmem:[#allocation2] sm:$0xff] %vm462_vm0, %v2388_v39  ;;  %v1885_v36 = vld [vmem:[#allocation2 + $0x178] sm:$0xff]  ;;  %v2389_v11 = vadd.f32 %v2341_v57, %v2152_v54  ;;  %v2348_v5 = vld [vmem:[#allocation2 + $0x40] sm:$0xff] }
 0x187   : > { %1980 = vst.msk [vmem:[#allocation2 + $0x170] sm:$0xff] %vm462_vm0, %v1932_v27  ;;  %v1933_v48 = vadd.f32 %v6967_v32, %v1885_v36  ;;  %2439 = vst.msk [vmem:[#allocation2 + $0x18] sm:$0xff] %vm462_vm0, %v2391_v23  ;;  %v1883_v55 = vld [vmem:[#allocation2 + $0x168] sm:$0xff]  ;;  %7213 = vmatmul.mubr.msk.bf16.gmra.mrb[180].mxu1 %vm462_vm0, %v9848_v46  ;;  %7269 = vmatmul.mubr.msk.bf16.gmra.mrb[180].mxu0 %vm462_vm0, %v9849_v14  ;;  %v2351_v27 = vld [vmem:[#allocation2 + $0x58] sm:$0xff] }
 0x188   : > { %1978 = vst.msk [vmem:[#allocation2 + $0x160] sm:$0xff] %vm462_vm0, %v1930_v19  ;;  %v1931_v7 = vadd.f32 %v1883_v55, %v1826_v21  ;;  %2437 = vst.msk [vmem:[#allocation2 + $0x8] sm:$0xff] %vm462_vm0, %v2389_v11  ;;  %7216 = vmatprep.mubr.msk.bf16.mxu1 %vm462_vm0, %v9850_v1  ;;  %7272 = vmatprep.mubr.msk.bf16.mxu0 %vm462_vm0, %v9851_v0  ;;  %v2349_v19 = vld [vmem:[#allocation2 + $0x48] sm:$0xff] }
 0x189   : > { %1981 = vst.msk [vmem:[#allocation2 + $0x178] sm:$0xff] %vm462_vm0, %v1933_v48  ;;  %v9857_v1 = vld [vmem:[#allocation40_spill] sm:$0xff] }
 0x18a   : > { %1979 = vst.msk [vmem:[#allocation2 + $0x168] sm:$0xff] %vm462_vm0, %v1931_v7  ;;  %v6982_v13 = vpop.f32.mrb[76].mxu1  ;;  %v7038_v33 = vpop.f32.mrb[76].mxu0  ;;  %v9856_v7 = vld [vmem:[#allocation39_spill] sm:$0xff] }
 0x18b   : > { %v2394_v31 = vadd.f32 %v6982_v13, %v2346_v37  ;;  %v2165_v50 = vpop.f32.mrb[77].mxu1  ;;  %v2814_v45 = vpop.f32.mrb[77].mxu0  ;;  %v9858_v13 = vld [vmem:[#allocation41_spill] sm:$0xff]  ;;  %v9859_v37 = vld [vmem:[#allocation42_spill] sm:$0xff] }
 0x18c   : > { %v2991_v59 = vld [vmem:[#allocation2 + $0x10] sm:$0xff]  ;;  %v2392_v51 = vadd.f32 %v2344_v9, %v2165_v50  ;;  %v6983_v32 = vpop.f32.mrb[78].mxu1  ;;  %v7039_v30 = vpop.f32.mrb[78].mxu0 }
 0x18d   : > { %2442 = vst.msk [vmem:[#allocation2 + $0x30] sm:$0xff] %vm462_vm0, %v2394_v31  ;;  %v3039_v28 = vadd.f32 %v7034_v44, %v2991_v59  ;;  %v2989_v63 = vld [vmem:[#allocation2] sm:$0xff]  ;;  %v2395_v49 = vadd.f32 %v6983_v32, %v2347_v40  ;;  %v2168_v21 = vpop.f32.mrb[79].mxu1  ;;  %v2817_v56 = vpop.f32.mrb[79].mxu0  ;;  %v2354_v31 = vld [vmem:[#allocation2 + $0x70] sm:$0xff] }
 0x18e   : > { %2440 = vst.msk [vmem:[#allocation2 + $0x20] sm:$0xff] %vm462_vm0, %v2392_v51  ;;  %v3037_v2 = vadd.f32 %v2989_v63, %v2798_v26  ;;  %v2992_v34 = vld [vmem:[#allocation2 + $0x18] sm:$0xff]  ;;  %v2393_v24 = vadd.f32 %v2345_v60, %v2168_v21  ;;  %v2352_v59 = vld [vmem:[#allocation2 + $0x60] sm:$0xff] }
 0x18f   : > { %3087 = vst.msk [vmem:[#allocation2 + $0x10] sm:$0xff] %vm462_vm0, %v3039_v28  ;;  %2443 = vst.msk [vmem:[#allocation2 + $0x38] sm:$0xff] %vm462_vm0, %v2395_v49  ;;  %v3040_v17 = vadd.f32 %v7035_v16, %v2992_v34  ;;  %v2990_v38 = vld [vmem:[#allocation2 + $0x8] sm:$0xff]  ;;  %7217 = vmatmul.mubr.msk.bf16.gmra.mrb[184].mxu1 %vm462_vm0, %v9852_v52  ;;  %7273 = vmatmul.mubr.msk.bf16.gmra.mrb[184].mxu0 %vm462_vm0, %v9853_v12  ;;  %v2355_v28 = vld [vmem:[#allocation2 + $0x78] sm:$0xff] }
 0x190   : > { %3085 = vst.msk [vmem:[#allocation2] sm:$0xff] %vm462_vm0, %v3037_v2  ;;  %2441 = vst.msk [vmem:[#allocation2 + $0x28] sm:$0xff] %vm462_vm0, %v2393_v24  ;;  %v3038_v41 = vadd.f32 %v2990_v38, %v2801_v42  ;;  %7220 = vmatprep.mubr.msk.bf16.mxu1 %vm462_vm0, %v9854_v4  ;;  %7276 = vmatprep.mubr.msk.bf16.mxu0 %vm462_vm0, %v9855_v18  ;;  %v2353_v2 = vld [vmem:[#allocation2 + $0x68] sm:$0xff] }
 0x191   : > { %3088 = vst.msk [vmem:[#allocation2 + $0x18] sm:$0xff] %vm462_vm0, %v3040_v17  ;;  %v9861_v4 = vld [vmem:[#allocation44_spill] sm:$0xff] }
 0x192   : > { %3086 = vst.msk [vmem:[#allocation2 + $0x8] sm:$0xff] %vm462_vm0, %v3038_v41  ;;  %v6986_v44 = vpop.f32.mrb[80].mxu1  ;;  %v7042_v15 = vpop.f32.mrb[80].mxu0  ;;  %v9860_v41 = vld [vmem:[#allocation43_spill] sm:$0xff] }
 0x193   : > { %v2398_v22 = vadd.f32 %v6986_v44, %v2350_v8  ;;  %v2181_v26 = vpop.f32.mrb[81].mxu1  ;;  %v2830_v39 = vpop.f32.mrb[81].mxu0  ;;  %v9862_v44 = vld [vmem:[#allocation45_spill] sm:$0xff]  ;;  %v9863_v8 = vld [vmem:[#allocation46_spill] sm:$0xff] }
 0x194   : > { %v2995_v43 = vld [vmem:[#allocation2 + $0x30] sm:$0xff]  ;;  %v2396_v62 = vadd.f32 %v2348_v5, %v2181_v26  ;;  %v6987_v16 = vpop.f32.mrb[82].mxu1  ;;  %v7043_v58 = vpop.f32.mrb[82].mxu0 }
 0x195   : > { %2446 = vst.msk [vmem:[#allocation2 + $0x50] sm:$0xff] %vm462_vm0, %v2398_v22  ;;  %v3043_v23 = vadd.f32 %v7038_v33, %v2995_v43  ;;  %v2993_v54 = vld [vmem:[#allocation2 + $0x20] sm:$0xff]  ;;  %v2399_v57 = vadd.f32 %v6987_v16, %v2351_v27  ;;  %v2184_v42 = vpop.f32.mrb[83].mxu1  ;;  %v2833_v36 = vpop.f32.mrb[83].mxu0  ;;  %v2358_v22 = vld [vmem:[#allocation2 + $0x90] sm:$0xff] }
 0x196   : > { %2444 = vst.msk [vmem:[#allocation2 + $0x40] sm:$0xff] %vm462_vm0, %v2396_v62  ;;  %v3041_v11 = vadd.f32 %v2993_v54, %v2814_v45  ;;  %v2996_v48 = vld [vmem:[#allocation2 + $0x38] sm:$0xff]  ;;  %v2397_v55 = vadd.f32 %v2349_v19, %v2184_v42  ;;  %v2356_v43 = vld [vmem:[#allocation2 + $0x80] sm:$0xff] }
 0x197   : > { %3091 = vst.msk [vmem:[#allocation2 + $0x30] sm:$0xff] %vm462_vm0, %v3043_v23  ;;  %2447 = vst.msk [vmem:[#allocation2 + $0x58] sm:$0xff] %vm462_vm0, %v2399_v57  ;;  %v3044_v46 = vadd.f32 %v7039_v30, %v2996_v48  ;;  %v2994_v14 = vld [vmem:[#allocation2 + $0x28] sm:$0xff]  ;;  %7221 = vmatmul.mubr.msk.bf16.gmra.mrb[188].mxu1 %vm462_vm0, %v9856_v7  ;;  %7277 = vmatmul.mubr.msk.bf16.gmra.mrb[188].mxu0 %vm462_vm0, %v9857_v1  ;;  %v2359_v23 = vld [vmem:[#allocation2 + $0x98] sm:$0xff] }
 0x198   : > { %3089 = vst.msk [vmem:[#allocation2 + $0x20] sm:$0xff] %vm462_vm0, %v3041_v11  ;;  %2445 = vst.msk [vmem:[#allocation2 + $0x48] sm:$0xff] %vm462_vm0, %v2397_v55  ;;  %v3042_v0 = vadd.f32 %v2994_v14, %v2817_v56  ;;  %7224 = vmatprep.mubr.msk.bf16.mxu1 %vm462_vm0, %v9858_v13  ;;  %7280 = vmatprep.mubr.msk.bf16.mxu0 %vm462_vm0, %v9859_v37  ;;  %v2357_v11 = vld [vmem:[#allocation2 + $0x88] sm:$0xff] }
 0x199   : > { %3092 = vst.msk [vmem:[#allocation2 + $0x38] sm:$0xff] %vm462_vm0, %v3044_v46  ;;  %v9865_v13 = vld [vmem:[#allocation48_spill] sm:$0xff] }
 0x19a   : > { %3090 = vst.msk [vmem:[#allocation2 + $0x28] sm:$0xff] %vm462_vm0, %v3042_v0  ;;  %v6990_v33 = vpop.f32.mrb[84].mxu1  ;;  %v7046_v50 = vpop.f32.mrb[84].mxu0  ;;  %v9864_v0 = vld [vmem:[#allocation47_spill] sm:$0xff] }
 0x19b   : > { %v2402_v9 = vadd.f32 %v6990_v33, %v2354_v31  ;;  %v2197_v45 = vpop.f32.mrb[85].mxu1  ;;  %v2846_v51 = vpop.f32.mrb[85].mxu0  ;;  %v9866_v33 = vld [vmem:[#allocation49_spill] sm:$0xff]  ;;  %v9867_v31 = vld [vmem:[#allocation50_spill] sm:$0xff] }
 0x19c   : > { %v2999_v32 = vld [vmem:[#allocation2 + $0x50] sm:$0xff]  ;;  %v2400_v40 = vadd.f32 %v2352_v59, %v2197_v45  ;;  %v6991_v30 = vpop.f32.mrb[86].mxu1  ;;  %v7047_v63 = vpop.f32.mrb[86].mxu0 }
 0x19d   : > { %2450 = vst.msk [vmem:[#allocation2 + $0x70] sm:$0xff] %vm462_vm0, %v2402_v9  ;;  %v3047_v49 = vadd.f32 %v7042_v15, %v2999_v32  ;;  %v2997_v21 = vld [vmem:[#allocation2 + $0x40] sm:$0xff]  ;;  %v2403_v60 = vadd.f32 %v6991_v30, %v2355_v28  ;;  %v2200_v56 = vpop.f32.mrb[87].mxu1  ;;  %v2849_v34 = vpop.f32.mrb[87].mxu0  ;;  %v2362_v9 = vld [vmem:[#allocation2 + $0xb0] sm:$0xff] }
 0x19e   : > { %2448 = vst.msk [vmem:[#allocation2 + $0x60] sm:$0xff] %vm462_vm0, %v2400_v40  ;;  %v3045_v24 = vadd.f32 %v2997_v21, %v2830_v39  ;;  %v3000_v17 = vld [vmem:[#allocation2 + $0x58] sm:$0xff]  ;;  %v2401_v38 = vadd.f32 %v2353_v2, %v2200_v56  ;;  %v2360_v32 = vld [vmem:[#allocation2 + $0xa0] sm:$0xff] }
 0x19f   : > { %3095 = vst.msk [vmem:[#allocation2 + $0x50] sm:$0xff] %vm462_vm0, %v3047_v49  ;;  %2451 = vst.msk [vmem:[#allocation2 + $0x78] sm:$0xff] %vm462_vm0, %v2403_v60  ;;  %v3048_v52 = vadd.f32 %v7043_v58, %v3000_v17  ;;  %v2998_v12 = vld [vmem:[#allocation2 + $0x48] sm:$0xff]  ;;  %7225 = vmatmul.mubr.msk.bf16.gmra.mrb[192].mxu1 %vm462_vm0, %v9860_v41  ;;  %7281 = vmatmul.mubr.msk.bf16.gmra.mrb[192].mxu0 %vm462_vm0, %v9861_v4  ;;  %v2363_v49 = vld [vmem:[#allocation2 + $0xb8] sm:$0xff] }
 0x1a0   : > { %3093 = vst.msk [vmem:[#allocation2 + $0x40] sm:$0xff] %vm462_vm0, %v3045_v24  ;;  %2449 = vst.msk [vmem:[#allocation2 + $0x68] sm:$0xff] %vm462_vm0, %v2401_v38  ;;  %v3046_v18 = vadd.f32 %v2998_v12, %v2833_v36  ;;  %7228 = vmatprep.mubr.msk.bf16.mxu1 %vm462_vm0, %v9862_v44  ;;  %7284 = vmatprep.mubr.msk.bf16.mxu0 %vm462_vm0, %v9863_v8  ;;  %v2361_v24 = vld [vmem:[#allocation2 + $0xa8] sm:$0xff] }
 0x1a1   : > { %3096 = vst.msk [vmem:[#allocation2 + $0x58] sm:$0xff] %vm462_vm0, %v3048_v52  ;;  %v9869_v44 = vld [vmem:[#allocation52_spill] sm:$0xff] }
 0x1a2   : > { %3094 = vst.msk [vmem:[#allocation2 + $0x48] sm:$0xff] %vm462_vm0, %v3046_v18  ;;  %v6994_v15 = vpop.f32.mrb[88].mxu1  ;;  %v7050_v26 = vpop.f32.mrb[88].mxu0  ;;  %v9868_v18 = vld [vmem:[#allocation51_spill] sm:$0xff] }
 0x1a3   : > { %v2406_v5 = vadd.f32 %v6994_v15, %v2358_v22  ;;  %v2213_v39 = vpop.f32.mrb[89].mxu1  ;;  %v2862_v62 = vpop.f32.mrb[89].mxu0  ;;  %v9870_v15 = vld [vmem:[#allocation54_spill] sm:$0xff]  ;;  %v9871_v22 = vld [vmem:[#allocation56_spill] sm:$0xff] }
 0x1a4   : > { %v3003_v16 = vld [vmem:[#allocation2 + $0x70] sm:$0xff]  ;;  %v2404_v27 = vadd.f32 %v2356_v43, %v2213_v39  ;;  %v6995_v58 = vpop.f32.mrb[90].mxu1  ;;  %v7051_v54 = vpop.f32.mrb[90].mxu0 }
 0x1a5   : > { %2454 = vst.msk [vmem:[#allocation2 + $0x90] sm:$0xff] %vm462_vm0, %v2406_v5  ;;  %v3051_v57 = vadd.f32 %v7046_v50, %v3003_v16  ;;  %v3001_v42 = vld [vmem:[#allocation2 + $0x60] sm:$0xff]  ;;  %v2407_v19 = vadd.f32 %v6995_v58, %v2359_v23  ;;  %v2216_v36 = vpop.f32.mrb[91].mxu1  ;;  %v2865_v48 = vpop.f32.mrb[91].mxu0  ;;  %v2366_v5 = vld [vmem:[#allocation2 + $0xd0] sm:$0xff] }
 0x1a6   : > { %2452 = vst.msk [vmem:[#allocation2 + $0x80] sm:$0xff] %vm462_vm0, %v2404_v27  ;;  %v3049_v55 = vadd.f32 %v3001_v42, %v2846_v51  ;;  %v3004_v46 = vld [vmem:[#allocation2 + $0x78] sm:$0xff]  ;;  %v2405_v14 = vadd.f32 %v2357_v11, %v2216_v36  ;;  %v2364_v16 = vld [vmem:[#allocation2 + $0xc0] sm:$0xff] }
 0x1a7   : > { %3099 = vst.msk [vmem:[#allocation2 + $0x70] sm:$0xff] %vm462_vm0, %v3051_v57  ;;  %2455 = vst.msk [vmem:[#allocation2 + $0x98] sm:$0xff] %vm462_vm0, %v2407_v19  ;;  %v3052_v7 = vadd.f32 %v7047_v63, %v3004_v46  ;;  %v3002_v1 = vld [vmem:[#allocation2 + $0x68] sm:$0xff]  ;;  %7229 = vmatmul.mubr.msk.bf16.gmra.mrb[196].mxu1 %vm462_vm0, %v9864_v0  ;;  %7285 = vmatmul.mubr.msk.bf16.gmra.mrb[196].mxu0 %vm462_vm0, %v9865_v13  ;;  %v2367_v57 = vld [vmem:[#allocation2 + $0xd8] sm:$0xff] }
 0x1a8   : > { %3097 = vst.msk [vmem:[#allocation2 + $0x60] sm:$0xff] %vm462_vm0, %v3049_v55  ;;  %2453 = vst.msk [vmem:[#allocation2 + $0x88] sm:$0xff] %vm462_vm0, %v2405_v14  ;;  %v3050_v37 = vadd.f32 %v3002_v1, %v2849_v34  ;;  %7232 = vmatprep.mubr.msk.bf16.mxu1 %vm462_vm0, %v9866_v33  ;;  %7288 = vmatprep.mubr.msk.bf16.mxu0 %vm462_vm0, %v9867_v31  ;;  %v2365_v55 = vld [vmem:[#allocation2 + $0xc8] sm:$0xff]  ;;  %v9872_v14 = vld [vmem:[#allocation58_spill] sm:$0xff] }
 0x1a9   : > { %3100 = vst.msk [vmem:[#allocation2 + $0x78] sm:$0xff] %vm462_vm0, %v3052_v7  ;;  %v4089_v7 = vsel %vm820_vm2, %v9872_v14, %v8577_v61  ;;  %v9873_v1 = vld [vmem:[#allocation53_spill] sm:$0xff] }
 0x1aa   : > { %3098 = vst.msk [vmem:[#allocation2 + $0x68] sm:$0xff] %vm462_vm0, %v3050_v37  ;;  %v6998_v50 = vpop.f32.mrb[92].mxu1  ;;  %v7054_v45 = vpop.f32.mrb[92].mxu0  ;;  %v4527_v0 = vsel %vm1467_vm1, %v9873_v1, %v4526_v10  ;;  %v9875_v61 = vld [vmem:[#allocation57_spill] sm:$0xff]  ;;  %v7420_v10 = vld [vmem:[%s7510_s25 + $0xd8] ss:$0 sps:$4 sm:$0xff]  }
 0x1ab   : > { %v2410_v59 = vadd.f32 %v6998_v50, %v2362_v9  ;;  %v2229_v51 = vpop.f32.mrb[93].mxu1  ;;  %v2878_v40 = vpop.f32.mrb[93].mxu0  ;;  %v9874_v9 = vld [vmem:[#allocation55_spill] sm:$0xff] }
 0x1ac   : > { %v3007_v30 = vld [vmem:[#allocation2 + $0x90] sm:$0xff]  ;;  %v2408_v28 = vadd.f32 %v2360_v32, %v2229_v51  ;;  %v6999_v63 = vpop.f32.mrb[94].mxu1  ;;  %v7055_v21 = vpop.f32.mrb[94].mxu0 }
 0x1ad   : > { %2458 = vst.msk [vmem:[#allocation2 + $0xb0] sm:$0xff] %vm462_vm0, %v2410_v59  ;;  %v3055_v60 = vadd.f32 %v7050_v26, %v3007_v30  ;;  %v3005_v56 = vld [vmem:[#allocation2 + $0x80] sm:$0xff]  ;;  %v2411_v2 = vadd.f32 %v6999_v63, %v2363_v49  ;;  %v2232_v34 = vpop.f32.mrb[95].mxu1  ;;  %v2881_v17 = vpop.f32.mrb[95].mxu0  ;;  %v2370_v59 = vld [vmem:[#allocation2 + $0xf0] sm:$0xff] }
 0x1ae   : > { %2456 = vst.msk [vmem:[#allocation2 + $0xa0] sm:$0xff] %vm462_vm0, %v2408_v28  ;;  %v3053_v38 = vadd.f32 %v3005_v56, %v2862_v62  ;;  %v3008_v52 = vld [vmem:[#allocation2 + $0x98] sm:$0xff]  ;;  %v2409_v12 = vadd.f32 %v2361_v24, %v2232_v34  ;;  %v2368_v30 = vld [vmem:[#allocation2 + $0xe0] sm:$0xff]  ;;  %v4108_v24 = vshll.u32 %v7420_v10, 16 }
 0x1af   : > { %3103 = vst.msk [vmem:[#allocation2 + $0x90] sm:$0xff] %vm462_vm0, %v3055_v60  ;;  %2459 = vst.msk [vmem:[#allocation2 + $0xb8] sm:$0xff] %vm462_vm0, %v2411_v2  ;;  %v3056_v41 = vadd.f32 %v7051_v54, %v3008_v52  ;;  %v3006_v4 = vld [vmem:[#allocation2 + $0x88] sm:$0xff]  ;;  %7233 = vmatmul.mubr.msk.bf16.gmra.mrb[200].mxu1 %vm462_vm0, %v9868_v18  ;;  %7289 = vmatmul.mubr.msk.bf16.gmra.mrb[200].mxu0 %vm462_vm0, %v9869_v44  ;;  %v2371_v60 = vld [vmem:[#allocation2 + $0xf8] sm:$0xff] }
 0x1b0   : > { %3101 = vst.msk [vmem:[#allocation2 + $0x80] sm:$0xff] %vm462_vm0, %v3053_v38  ;;  %2457 = vst.msk [vmem:[#allocation2 + $0xa8] sm:$0xff] %vm462_vm0, %v2409_v12  ;;  %v3054_v8 = vadd.f32 %v3006_v4, %v2865_v48  ;;  %7236 = vmatprep.mubr.msk.bf16.mxu1 %vm462_vm0, %v9870_v15  ;;  %7292 = vmatprep.mubr.msk.bf16.mxu0 %vm462_vm0, %v9871_v22  ;;  %v7430_v2 = vld [vmem:[%s7510_s25 + $0xd0] sm:$0xff]  }
 0x1b1   : > { %3104 = vst.msk [vmem:[#allocation2 + $0x98] sm:$0xff] %vm462_vm0, %v3056_v41  ;;  %v4104_v34 = vshrl.u32 %v7430_v2, 16  ;;  %v2369_v41 = vld [vmem:[#allocation2 + $0xe8] sm:$0xff] }
 0x1b2   : > { %3102 = vst.msk [vmem:[#allocation2 + $0x88] sm:$0xff] %vm462_vm0, %v3054_v8  ;;  %v7002_v26 = vpop.f32.mrb[96].mxu1  ;;  %v7058_v39 = vpop.f32.mrb[96].mxu0 }
 0x1b3   : > { %v2414_v43 = vadd.f32 %v7002_v26, %v2366_v5  ;;  %v2245_v62 = vpop.f32.mrb[97].mxu1  ;;  %v2894_v27 = vpop.f32.mrb[97].mxu0  ;;  %v4106_v5 = vor.u32 %v4104_v34, %v8619_v29  ;;  %v2375_v29 = vld [vmem:[#allocation2 + $0x118] sm:$0xff] }
 0x1b4   : > { %v3011_v58 = vld [vmem:[#allocation2 + $0xb0] sm:$0xff]  ;;  %v2412_v23 = vadd.f32 %v2364_v16, %v2245_v62  ;;  %v7003_v54 = vpop.f32.mrb[98].mxu1  ;;  %v7059_v42 = vpop.f32.mrb[98].mxu0 }
 0x1b5   : > { %2462 = vst.msk [vmem:[#allocation2 + $0xd0] sm:$0xff] %vm462_vm0, %v2414_v43  ;;  %v3059_v19 = vadd.f32 %v7054_v45, %v3011_v58  ;;  %v3009_v36 = vld [vmem:[#allocation2 + $0xa0] sm:$0xff]  ;;  %v2415_v11 = vadd.f32 %v7003_v54, %v2367_v57  ;;  %v2248_v48 = vpop.f32.mrb[99].mxu1  ;;  %v2897_v46 = vpop.f32.mrb[99].mxu0  ;;  %v4532_v43 = vrot.slane %v7420_v10, 1 }
 0x1b6   : > { %2460 = vst.msk [vmem:[#allocation2 + $0xc0] sm:$0xff] %vm462_vm0, %v2412_v23  ;;  %v3057_v13 = vadd.f32 %v3009_v36, %v2878_v40  ;;  %v3012_v37 = vld [vmem:[#allocation2 + $0xb8] sm:$0xff]  ;;  %v2413_v33 = vadd.f32 %v2365_v55, %v2248_v48  ;;  %v2372_v58 = vld [vmem:[#allocation2 + $0x100] sm:$0xff] }
 0x1b7   : > { %3107 = vst.msk [vmem:[#allocation2 + $0xb0] sm:$0xff] %vm462_vm0, %v3059_v19  ;;  %2463 = vst.msk [vmem:[#allocation2 + $0xd8] sm:$0xff] %vm462_vm0, %v2415_v11  ;;  %v3060_v31 = vadd.f32 %v7055_v21, %v3012_v37  ;;  %v3010_v50 = vld [vmem:[#allocation2 + $0xa8] sm:$0xff]  ;;  %7237 = vmatmul.mubr.msk.bf16.gmra.mrb[204].mxu1 %vm462_vm0, %v9874_v9  ;;  %7293 = vmatmul.mubr.msk.bf16.gmra.mrb[204].mxu0 %vm462_vm0, %v9875_v61  ;;  %v2376_v61 = vld [vmem:[#allocation2 + $0x120] sm:$0xff] }
 0x1b8   : > { %3105 = vst.msk [vmem:[#allocation2 + $0xa0] sm:$0xff] %vm462_vm0, %v3057_v13  ;;  %2461 = vst.msk [vmem:[#allocation2 + $0xc8] sm:$0xff] %vm462_vm0, %v2413_v33  ;;  %v3058_v53 = vadd.f32 %v3010_v50, %v2881_v17  ;;  %7240 = vmatprep.mubr.msk.bf16.mxu1 %vm462_vm0, %v4089_v7  ;;  %7296 = vmatprep.mubr.msk.bf16.mxu0 %vm462_vm0, %v4527_v0  ;;  %v2378_v33 = vld [vmem:[#allocation2 + $0x130] sm:$0xff] }
 0x1b9   : > { %3108 = vst.msk [vmem:[#allocation2 + $0xb8] sm:$0xff] %vm462_vm0, %v3060_v31 }
 0x1ba   : > { %3106 = vst.msk [vmem:[#allocation2 + $0xa8] sm:$0xff] %vm462_vm0, %v3058_v53  ;;  %v7006_v45 = vpop.f32.mrb[100].mxu1  ;;  %v7062_v51 = vpop.f32.mrb[100].mxu0 }
 0x1bb   : > { %v2418_v32 = vadd.f32 %v7006_v45, %v2370_v59  ;;  %v2261_v40 = vpop.f32.mrb[101].mxu1  ;;  %v2910_v28 = vpop.f32.mrb[101].mxu0 }
 0x1bc   : > { %v3015_v63 = vld [vmem:[#allocation2 + $0xd0] sm:$0xff]  ;;  %v2416_v49 = vadd.f32 %v2368_v30, %v2261_v40  ;;  %v7007_v21 = vpop.f32.mrb[102].mxu1  ;;  %v7063_v56 = vpop.f32.mrb[102].mxu0 }
 0x1bd   : > { %2466 = vst.msk [vmem:[#allocation2 + $0xf0] sm:$0xff] %vm462_vm0, %v2418_v32  ;;  %v3063_v17 = vadd.f32 %v7058_v39, %v3015_v63  ;;  %v3013_v38 = vld [vmem:[#allocation2 + $0xc0] sm:$0xff]  ;;  %v2419_v52 = vadd.f32 %v7007_v21, %v2371_v60  ;;  %v2264_v12 = vpop.f32.mrb[103].mxu1  ;;  %v2913_v4 = vpop.f32.mrb[103].mxu0  ;;  %v4110_v39 = vrot.slane %v4108_v24, 1 }
 0x1be   : > { %2464 = vst.msk [vmem:[#allocation2 + $0xe0] sm:$0xff] %vm462_vm0, %v2416_v49  ;;  %v3061_v18 = vadd.f32 %v3013_v38, %v2894_v27  ;;  %v3016_v44 = vld [vmem:[#allocation2 + $0xd8] sm:$0xff]  ;;  %v2417_v8 = vadd.f32 %v2369_v41, %v2264_v12  ;;  %v2377_v49 = vld [vmem:[#allocation2 + $0x128] sm:$0xff] }
 0x1bf   : > { %3111 = vst.msk [vmem:[#allocation2 + $0xd0] sm:$0xff] %vm462_vm0, %v3063_v17  ;;  %2467 = vst.msk [vmem:[#allocation2 + $0xf8] sm:$0xff] %vm462_vm0, %v2419_v52  ;;  %v3064_v15 = vadd.f32 %v7059_v42, %v3016_v44  ;;  %v3014_v22 = vld [vmem:[#allocation2 + $0xc8] sm:$0xff]  ;;  %7241 = vmatmul.mubr.msk.bf16.gmra.mrb[208].mxu1 %vm462_vm0, %v8599_v25  ;;  %7297 = vmatmul.mubr.msk.bf16.gmra.mrb[208].mxu0 %vm462_vm0, %v8638_v20  ;;  %v2374_v20 = vld [vmem:[#allocation2 + $0x110] sm:$0xff]  ;;  %v4111_v42 = vsel %vm820_vm2, %v4106_v5, %v4110_v39 }
 0x1c0   : > { %3109 = vst.msk [vmem:[#allocation2 + $0xc0] sm:$0xff] %vm462_vm0, %v3061_v18  ;;  %2465 = vst.msk [vmem:[#allocation2 + $0xe8] sm:$0xff] %vm462_vm0, %v2417_v8  ;;  %v3062_v26 = vadd.f32 %v3014_v22, %v2897_v46  ;;  %7244 = vmatprep.mubr.msk.bf16.mxu1 %vm462_vm0, %v8633_v6  ;;  %7300 = vmatprep.mubr.msk.bf16.mxu0 %vm462_vm0, %v8665_v47  ;;  %v4533_v47 = vsel %vm1467_vm1, %v4530_v3, %v4532_v43  ;;  %v2373_v46 = vld [vmem:[#allocation2 + $0x108] sm:$0xff]  ;;  %v2382_v52 = vld [vmem:[#allocation2 + $0x150] sm:$0xff] }
 0x1c1   : > { %3112 = vst.msk [vmem:[#allocation2 + $0xd8] sm:$0xff] %vm462_vm0, %v3064_v15  ;;  %v2380_v18 = vld [vmem:[#allocation2 + $0x140] sm:$0xff] }
 0x1c2   : > { %3110 = vst.msk [vmem:[#allocation2 + $0xc8] sm:$0xff] %vm462_vm0, %v3062_v26  ;;  %v7010_v25 = vpop.f32.mrb[104].mxu1  ;;  %v7066_v62 = vpop.f32.mrb[104].mxu0  ;;  %v2383_v26 = vld [vmem:[#allocation2 + $0x158] sm:$0xff] }
 0x1c3   : > { %v2422_v16 = vadd.f32 %v7010_v25, %v2374_v20  ;;  %v2277_v27 = vpop.f32.mrb[105].mxu1  ;;  %v2926_v23 = vpop.f32.mrb[105].mxu0 }
 0x1c4   : > { %v3019_v54 = vld [vmem:[#allocation2 + $0xf0] sm:$0xff]  ;;  %v2420_v6 = vadd.f32 %v2372_v58, %v2277_v27  ;;  %v7011_v57 = vpop.f32.mrb[106].mxu1  ;;  %v7067_v19 = vpop.f32.mrb[106].mxu0 }
 0x1c5   : > { %2470 = vst.msk [vmem:[#allocation2 + $0x110] sm:$0xff] %vm462_vm0, %v2422_v16  ;;  %v3067_v36 = vadd.f32 %v7062_v51, %v3019_v54  ;;  %v3017_v11 = vld [vmem:[#allocation2 + $0xe0] sm:$0xff]  ;;  %v2423_v48 = vadd.f32 %v7011_v57, %v2375_v29  ;;  %v2280_v55 = vpop.f32.mrb[107].mxu1  ;;  %v2929_v14 = vpop.f32.mrb[107].mxu0  ;;  %v2379_v51 = vld [vmem:[#allocation2 + $0x138] sm:$0xff] }
 0x1c6   : > { %2468 = vst.msk [vmem:[#allocation2 + $0x100] sm:$0xff] %vm462_vm0, %v2420_v6  ;;  %v3065_v7 = vadd.f32 %v3017_v11, %v2910_v28  ;;  %v3020_v1 = vld [vmem:[#allocation2 + $0xf8] sm:$0xff]  ;;  %v2421_v0 = vadd.f32 %v2373_v46, %v2280_v55  ;;  %v2384_v11 = vld [vmem:[#allocation2 + $0x160] sm:$0xff] }
 0x1c7   : > { %3115 = vst.msk [vmem:[#allocation2 + $0xf0] sm:$0xff] %vm462_vm0, %v3067_v36  ;;  %2471 = vst.msk [vmem:[#allocation2 + $0x118] sm:$0xff] %vm462_vm0, %v2423_v48  ;;  %v3068_v35 = vadd.f32 %v7063_v56, %v3020_v1  ;;  %v3018_v13 = vld [vmem:[#allocation2 + $0xe8] sm:$0xff]  ;;  %7245 = vmatmul.mubr.msk.bf16.gmra.mrb[212].mxu1 %vm462_vm0, %v4111_v42  ;;  %7301 = vmatmul.mubr.msk.bf16.gmra.mrb[212].mxu0 %vm462_vm0, %v4533_v47  ;;  %v2386_v42 = vld [vmem:[#allocation2 + $0x170] sm:$0xff] }
 0x1c8   : > { %3113 = vst.msk [vmem:[#allocation2 + $0xe0] sm:$0xff] %vm462_vm0, %v3065_v7  ;;  %2469 = vst.msk [vmem:[#allocation2 + $0x108] sm:$0xff] %vm462_vm0, %v2421_v0  ;;  %v3066_v3 = vadd.f32 %v3018_v13, %v2913_v4  ;;  %v2387_v7 = vld [vmem:[#allocation2 + $0x178] sm:$0xff] }
 0x1c9   : > { %3116 = vst.msk [vmem:[#allocation2 + $0xf8] sm:$0xff] %vm462_vm0, %v3068_v35 }
 0x1ca   : > { %3114 = vst.msk [vmem:[#allocation2 + $0xe8] sm:$0xff] %vm462_vm0, %v3066_v3  ;;  %v7014_v37 = vpop.f32.mrb[108].mxu1  ;;  %v7070_v31 = vpop.f32.mrb[108].mxu0 }
 0x1cb   : > { %v2426_v50 = vadd.f32 %v7014_v37, %v2378_v33  ;;  %v2293_v9 = vpop.f32.mrb[109].mxu1  ;;  %v2942_v53 = vpop.f32.mrb[109].mxu0  ;;  %v2385_v37 = vld [vmem:[#allocation2 + $0x168] sm:$0xff] }
 0x1cc   : > { %v3023_v10 = vld [vmem:[#allocation2 + $0x110] sm:$0xff]  ;;  %v2424_v45 = vadd.f32 %v2376_v61, %v2293_v9  ;;  %v7015_v59 = vpop.f32.mrb[110].mxu1  ;;  %v7071_v32 = vpop.f32.mrb[110].mxu0 }
 0x1cd   : > { %2474 = vst.msk [vmem:[#allocation2 + $0x130] sm:$0xff] %vm462_vm0, %v2426_v50  ;;  %v3071_v40 = vadd.f32 %v7066_v62, %v3023_v10  ;;  %v3021_v30 = vld [vmem:[#allocation2 + $0x100] sm:$0xff]  ;;  %v2427_v28 = vadd.f32 %v7015_v59, %v2379_v51  ;;  %v2296_v63 = vpop.f32.mrb[111].mxu1  ;;  %v2945_v21 = vpop.f32.mrb[111].mxu0  ;;  %v2381_v62 = vld [vmem:[#allocation2 + $0x148] sm:$0xff]  ;;  %v3514_v59 = vld [vmem:[#allocation2 + $0x10] sm:$0xff] }
 0x1ce   : > { %2472 = vst.msk [vmem:[#allocation2 + $0x120] sm:$0xff] %vm462_vm0, %v2424_v45  ;;  %v3069_v60 = vadd.f32 %v3021_v30, %v2926_v23  ;;  %v3024_v56 = vld [vmem:[#allocation2 + $0x118] sm:$0xff]  ;;  %v2425_v2 = vadd.f32 %v2377_v49, %v2296_v63  ;;  %v3512_v30 = vld [vmem:[#allocation2] sm:$0xff] }
 0x1cf   : > { %3119 = vst.msk [vmem:[#allocation2 + $0x110] sm:$0xff] %vm462_vm0, %v3071_v40  ;;  %2475 = vst.msk [vmem:[#allocation2 + $0x138] sm:$0xff] %vm462_vm0, %v2427_v28  ;;  %v3072_v34 = vadd.f32 %v7067_v19, %v3024_v56  ;;  %v3022_v24 = vld [vmem:[#allocation2 + $0x108] sm:$0xff] }
 0x1d0   : > { %3117 = vst.msk [vmem:[#allocation2 + $0x100] sm:$0xff] %vm462_vm0, %v3069_v60  ;;  %2473 = vst.msk [vmem:[#allocation2 + $0x128] sm:$0xff] %vm462_vm0, %v2425_v2  ;;  %v3070_v17 = vadd.f32 %v3022_v24, %v2929_v14  ;;  %v3515_v60 = vld [vmem:[#allocation2 + $0x18] sm:$0xff] }
 0x1d1   : > { %3120 = vst.msk [vmem:[#allocation2 + $0x118] sm:$0xff] %vm462_vm0, %v3072_v34 }
 0x1d2   : > { %3118 = vst.msk [vmem:[#allocation2 + $0x108] sm:$0xff] %vm462_vm0, %v3070_v17  ;;  %v7018_v38 = vpop.f32.mrb[112].mxu1  ;;  %v7074_v12 = vpop.f32.mrb[112].mxu0 }
 0x1d3   : > { %v2430_v41 = vadd.f32 %v7018_v38, %v2382_v52  ;;  %v2309_v4 = vpop.f32.mrb[113].mxu1  ;;  %v2958_v44 = vpop.f32.mrb[113].mxu0  ;;  %v3513_v38 = vld [vmem:[#allocation2 + $0x8] sm:$0xff] }
 0x1d4   : > { %v3027_v8 = vld [vmem:[#allocation2 + $0x130] sm:$0xff]  ;;  %v2428_v15 = vadd.f32 %v2380_v18, %v2309_v4  ;;  %v7019_v22 = vpop.f32.mrb[114].mxu1  ;;  %v7075_v5 = vpop.f32.mrb[114].mxu0 }
 0x1d5   : > { %2478 = vst.msk [vmem:[#allocation2 + $0x150] sm:$0xff] %vm462_vm0, %v2430_v41  ;;  %v3075_v39 = vadd.f32 %v7070_v31, %v3027_v8  ;;  %v3025_v43 = vld [vmem:[#allocation2 + $0x120] sm:$0xff]  ;;  %v2431_v25 = vadd.f32 %v7019_v22, %v2383_v26  ;;  %v2312_v20 = vpop.f32.mrb[115].mxu1  ;;  %v2961_v16 = vpop.f32.mrb[115].mxu0  ;;  %v3518_v22 = vld [vmem:[#allocation2 + $0x30] sm:$0xff] }
 0x1d6   : > { %2476 = vst.msk [vmem:[#allocation2 + $0x140] sm:$0xff] %vm462_vm0, %v2428_v15  ;;  %v3073_v27 = vadd.f32 %v3025_v43, %v2942_v53  ;;  %v3028_v58 = vld [vmem:[#allocation2 + $0x138] sm:$0xff]  ;;  %v2429_v23 = vadd.f32 %v2381_v62, %v2312_v20  ;;  %v3516_v43 = vld [vmem:[#allocation2 + $0x20] sm:$0xff] }
 0x1d7   : > { %3123 = vst.msk [vmem:[#allocation2 + $0x130] sm:$0xff] %vm462_vm0, %v3075_v39  ;;  %2479 = vst.msk [vmem:[#allocation2 + $0x158] sm:$0xff] %vm462_vm0, %v2431_v25  ;;  %v3076_v54 = vadd.f32 %v7071_v32, %v3028_v58  ;;  %v3026_v6 = vld [vmem:[#allocation2 + $0x128] sm:$0xff] }
 0x1d8   : > { %3121 = vst.msk [vmem:[#allocation2 + $0x120] sm:$0xff] %vm462_vm0, %v3073_v27  ;;  %2477 = vst.msk [vmem:[#allocation2 + $0x148] sm:$0xff] %vm462_vm0, %v2429_v23  ;;  %v3074_v57 = vadd.f32 %v3026_v6, %v2945_v21  ;;  %v3519_v27 = vld [vmem:[#allocation2 + $0x38] sm:$0xff] }
 0x1d9   : > { %3124 = vst.msk [vmem:[#allocation2 + $0x138] sm:$0xff] %vm462_vm0, %v3076_v54 }
 0x1da   : > { %3122 = vst.msk [vmem:[#allocation2 + $0x128] sm:$0xff] %vm462_vm0, %v3074_v57  ;;  %v7022_v29 = vpop.f32.mrb[116].mxu1  ;;  %v7078_v19 = vpop.f32.mrb[116].mxu0 }
 0x1db   : > { %v2434_v47 = vadd.f32 %v7022_v29, %v2386_v42  ;;  %v2325_v36 = vpop.f32.mrb[117].mxu1  ;;  %v2974_v48 = vpop.f32.mrb[117].mxu0  ;;  %v3517_v29 = vld [vmem:[#allocation2 + $0x28] sm:$0xff] }
 0x1dc   : > { %v3031_v55 = vld [vmem:[#allocation2 + $0x150] sm:$0xff]  ;;  %v2432_v46 = vadd.f32 %v2384_v11, %v2325_v36  ;;  %v7023_v14 = vpop.f32.mrb[118].mxu1  ;;  %v7079_v1 = vpop.f32.mrb[118].mxu0 }
 0x1dd   : > { %2482 = vst.msk [vmem:[#allocation2 + $0x170] sm:$0xff] %vm462_vm0, %v2434_v47  ;;  %v3079_v0 = vadd.f32 %v7074_v12, %v3031_v55  ;;  %v3029_v35 = vld [vmem:[#allocation2 + $0x140] sm:$0xff]  ;;  %v2435_v13 = vadd.f32 %v7023_v14, %v2387_v7  ;;  %v2328_v3 = vpop.f32.mrb[119].mxu1  ;;  %v2977_v33 = vpop.f32.mrb[119].mxu0  ;;  %v3522_v14 = vld [vmem:[#allocation2 + $0x50] sm:$0xff] }
 0x1de   : > { %2480 = vst.msk [vmem:[#allocation2 + $0x160] sm:$0xff] %vm462_vm0, %v2432_v46  ;;  %v3077_v31 = vadd.f32 %v3029_v35, %v2958_v44  ;;  %v3032_v50 = vld [vmem:[#allocation2 + $0x158] sm:$0xff]  ;;  %v2433_v9 = vadd.f32 %v2385_v37, %v2328_v3  ;;  %v3520_v35 = vld [vmem:[#allocation2 + $0x40] sm:$0xff] }
 0x1df   : > { %3127 = vst.msk [vmem:[#allocation2 + $0x150] sm:$0xff] %vm462_vm0, %v3079_v0  ;;  %2483 = vst.msk [vmem:[#allocation2 + $0x178] sm:$0xff] %vm462_vm0, %v2435_v13  ;;  %v3080_v61 = vadd.f32 %v7075_v5, %v3032_v50  ;;  %v3030_v53 = vld [vmem:[#allocation2 + $0x148] sm:$0xff] }
 0x1e0   : > { %3125 = vst.msk [vmem:[#allocation2 + $0x140] sm:$0xff] %vm462_vm0, %v3077_v31  ;;  %2481 = vst.msk [vmem:[#allocation2 + $0x168] sm:$0xff] %vm462_vm0, %v2433_v9  ;;  %v3078_v10 = vadd.f32 %v3030_v53, %v2961_v16  ;;  %v3523_v31 = vld [vmem:[#allocation2 + $0x58] sm:$0xff] }
 0x1e1   : > { %3128 = vst.msk [vmem:[#allocation2 + $0x158] sm:$0xff] %vm462_vm0, %v3080_v61 }
 0x1e2   : > { %3126 = vst.msk [vmem:[#allocation2 + $0x148] sm:$0xff] %vm462_vm0, %v3078_v10  ;;  %v7090_v45 = vpop.f32.mrb[120].mxu1  ;;  %v7146_v51 = vpop.f32.mrb[120].mxu0 }
 0x1e3   : > { %v3562_v32 = vadd.f32 %v7090_v45, %v3514_v59  ;;  %v3321_v40 = vpop.f32.mrb[121].mxu1  ;;  %v3739_v28 = vpop.f32.mrb[121].mxu0  ;;  %v3521_v45 = vld [vmem:[#allocation2 + $0x48] sm:$0xff] }
 0x1e4   : > { %v3035_v63 = vld [vmem:[#allocation2 + $0x170] sm:$0xff]  ;;  %v3560_v49 = vadd.f32 %v3512_v30, %v3321_v40  ;;  %v7091_v21 = vpop.f32.mrb[122].mxu1  ;;  %v7147_v56 = vpop.f32.mrb[122].mxu0 }
 0x1e5   : > { %v3083_v2 = vadd.f32 %v7078_v19, %v3035_v63  ;;  %3610 = vst.msk [vmem:[#allocation2 + $0x10] sm:$0xff] %vm462_vm0, %v3562_v32  ;;  %v3033_v34 = vld [vmem:[#allocation2 + $0x160] sm:$0xff]  ;;  %v3563_v24 = vadd.f32 %v7091_v21, %v3515_v60  ;;  %v3324_v17 = vpop.f32.mrb[123].mxu1  ;;  %v3742_v52 = vpop.f32.mrb[123].mxu0  ;;  %v3526_v21 = vld [vmem:[#allocation2 + $0x70] sm:$0xff] }
 0x1e6   : > { %v3081_v12 = vadd.f32 %v3033_v34, %v2974_v48  ;;  %3608 = vst.msk [vmem:[#allocation2] sm:$0xff] %vm462_vm0, %v3560_v49  ;;  %v3036_v41 = vld [vmem:[#allocation2 + $0x178] sm:$0xff]  ;;  %v3561_v4 = vadd.f32 %v3513_v38, %v3324_v17  ;;  %v3524_v34 = vld [vmem:[#allocation2 + $0x60] sm:$0xff] }
 0x1e7   : > { %3131 = vst.msk [vmem:[#allocation2 + $0x170] sm:$0xff] %vm462_vm0, %v3083_v2  ;;  %v3084_v18 = vadd.f32 %v7079_v1, %v3036_v41  ;;  %3611 = vst.msk [vmem:[#allocation2 + $0x18] sm:$0xff] %vm462_vm0, %v3563_v24  ;;  %v3034_v44 = vld [vmem:[#allocation2 + $0x168] sm:$0xff] }
 0x1e8   : > { %3129 = vst.msk [vmem:[#allocation2 + $0x160] sm:$0xff] %vm462_vm0, %v3081_v12  ;;  %v3082_v8 = vadd.f32 %v3034_v44, %v2977_v33  ;;  %3609 = vst.msk [vmem:[#allocation2 + $0x8] sm:$0xff] %vm462_vm0, %v3561_v4  ;;  %v3527_v12 = vld [vmem:[#allocation2 + $0x78] sm:$0xff] }
 0x1e9   : > { %3132 = vst.msk [vmem:[#allocation2 + $0x178] sm:$0xff] %vm462_vm0, %v3084_v18 }
 0x1ea   : > { %3130 = vst.msk [vmem:[#allocation2 + $0x168] sm:$0xff] %vm462_vm0, %v3082_v8  ;;  %v7094_v15 = vpop.f32.mrb[124].mxu1  ;;  %v7150_v26 = vpop.f32.mrb[124].mxu0 }
 0x1eb   : > { %v3566_v5 = vadd.f32 %v7094_v15, %v3518_v22  ;;  %v3337_v39 = vpop.f32.mrb[125].mxu1  ;;  %v3755_v25 = vpop.f32.mrb[125].mxu0  ;;  %v3525_v15 = vld [vmem:[#allocation2 + $0x68] sm:$0xff] }
 0x1ec   : > { %v3932_v20 = vld [vmem:[#allocation2 + $0x10] sm:$0xff]  ;;  %v3564_v62 = vadd.f32 %v3516_v43, %v3337_v39  ;;  %v7095_v16 = vpop.f32.mrb[126].mxu1  ;;  %v7151_v58 = vpop.f32.mrb[126].mxu0 }
 0x1ed   : > { %3614 = vst.msk [vmem:[#allocation2 + $0x30] sm:$0xff] %vm462_vm0, %v3566_v5  ;;  %v3980_v23 = vadd.f32 %v7146_v51, %v3932_v20  ;;  %v3930_v54 = vld [vmem:[#allocation2] sm:$0xff]  ;;  %v3567_v6 = vadd.f32 %v7095_v16, %v3519_v27  ;;  %v3340_v57 = vpop.f32.mrb[127].mxu1  ;;  %v3758_v42 = vpop.f32.mrb[127].mxu0  ;;  %v3530_v16 = vld [vmem:[#allocation2 + $0x90] sm:$0xff] }
 0x1ee   : > { %3612 = vst.msk [vmem:[#allocation2 + $0x20] sm:$0xff] %vm462_vm0, %v3564_v62  ;;  %v3978_v19 = vadd.f32 %v3930_v54, %v3739_v28  ;;  %v3933_v47 = vld [vmem:[#allocation2 + $0x18] sm:$0xff]  ;;  %v3565_v36 = vadd.f32 %v3517_v29, %v3340_v57  ;;  %v3528_v54 = vld [vmem:[#allocation2 + $0x80] sm:$0xff] }
 0x1ef   : > { %4028 = vst.msk [vmem:[#allocation2 + $0x10] sm:$0xff] %vm462_vm0, %v3980_v23  ;;  %3615 = vst.msk [vmem:[#allocation2 + $0x38] sm:$0xff] %vm462_vm0, %v3567_v6  ;;  %v3981_v11 = vadd.f32 %v7147_v56, %v3933_v47  ;;  %v3931_v48 = vld [vmem:[#allocation2 + $0x8] sm:$0xff] }
 0x1f0   : > { %4026 = vst.msk [vmem:[#allocation2] sm:$0xff] %vm462_vm0, %v3978_v19  ;;  %3613 = vst.msk [vmem:[#allocation2 + $0x28] sm:$0xff] %vm462_vm0, %v3565_v36  ;;  %v3979_v55 = vadd.f32 %v3931_v48, %v3742_v52  ;;  %v3531_v19 = vld [vmem:[#allocation2 + $0x98] sm:$0xff] }
 0x1f1   : > { %4029 = vst.msk [vmem:[#allocation2 + $0x18] sm:$0xff] %vm462_vm0, %v3981_v11 }
 0x1f2   : > { %4027 = vst.msk [vmem:[#allocation2 + $0x8] sm:$0xff] %vm462_vm0, %v3979_v55  ;;  %v7098_v46 = vpop.f32.mrb[128].mxu1  ;;  %v7154_v7 = vpop.f32.mrb[128].mxu0 }
 0x1f3   : > { %v3570_v1 = vadd.f32 %v7098_v46, %v3522_v14  ;;  %v3353_v0 = vpop.f32.mrb[129].mxu1  ;;  %v3771_v13 = vpop.f32.mrb[129].mxu0  ;;  %v3529_v46 = vld [vmem:[#allocation2 + $0x88] sm:$0xff] }
 0x1f4   : > { %v3936_v3 = vld [vmem:[#allocation2 + $0x30] sm:$0xff]  ;;  %v3568_v37 = vadd.f32 %v3520_v35, %v3353_v0  ;;  %v7099_v33 = vpop.f32.mrb[130].mxu1  ;;  %v7155_v50 = vpop.f32.mrb[130].mxu0 }
 0x1f5   : > { %3618 = vst.msk [vmem:[#allocation2 + $0x50] sm:$0xff] %vm462_vm0, %v3570_v1  ;;  %v3984_v9 = vadd.f32 %v7150_v26, %v3936_v3  ;;  %v3934_v61 = vld [vmem:[#allocation2 + $0x20] sm:$0xff]  ;;  %v3571_v53 = vadd.f32 %v7099_v33, %v3523_v31  ;;  %v3356_v10 = vpop.f32.mrb[131].mxu1  ;;  %v3774_v59 = vpop.f32.mrb[131].mxu0  ;;  %v3534_v33 = vld [vmem:[#allocation2 + $0xb0] sm:$0xff] }
 0x1f6   : > { %3616 = vst.msk [vmem:[#allocation2 + $0x40] sm:$0xff] %vm462_vm0, %v3568_v37  ;;  %v3982_v51 = vadd.f32 %v3934_v61, %v3755_v25  ;;  %v3937_v32 = vld [vmem:[#allocation2 + $0x38] sm:$0xff]  ;;  %v3569_v40 = vadd.f32 %v3521_v45, %v3356_v10  ;;  %v3532_v61 = vld [vmem:[#allocation2 + $0xa0] sm:$0xff] }
 0x1f7   : > { %4032 = vst.msk [vmem:[#allocation2 + $0x30] sm:$0xff] %vm462_vm0, %v3984_v9  ;;  %3619 = vst.msk [vmem:[#allocation2 + $0x58] sm:$0xff] %vm462_vm0, %v3571_v53  ;;  %v3985_v30 = vadd.f32 %v7151_v58, %v3937_v32  ;;  %v3935_v28 = vld [vmem:[#allocation2 + $0x28] sm:$0xff] }
 0x1f8   : > { %4030 = vst.msk [vmem:[#allocation2 + $0x20] sm:$0xff] %vm462_vm0, %v3982_v51  ;;  %3617 = vst.msk [vmem:[#allocation2 + $0x48] sm:$0xff] %vm462_vm0, %v3569_v40  ;;  %v3983_v63 = vadd.f32 %v3935_v28, %v3758_v42  ;;  %v3535_v51 = vld [vmem:[#allocation2 + $0xb8] sm:$0xff] }
 0x1f9   : > { %4033 = vst.msk [vmem:[#allocation2 + $0x38] sm:$0xff] %vm462_vm0, %v3985_v30 }
 0x1fa   : > { %4031 = vst.msk [vmem:[#allocation2 + $0x28] sm:$0xff] %vm462_vm0, %v3983_v63  ;;  %v7102_v49 = vpop.f32.mrb[132].mxu1  ;;  %v7158_v60 = vpop.f32.mrb[132].mxu0 }
 0x1fb   : > { %v3574_v56 = vadd.f32 %v7102_v49, %v3526_v21  ;;  %v3369_v2 = vpop.f32.mrb[133].mxu1  ;;  %v3787_v24 = vpop.f32.mrb[133].mxu0  ;;  %v3533_v49 = vld [vmem:[#allocation2 + $0xa8] sm:$0xff] }
 0x1fc   : > { %v3940_v17 = vld [vmem:[#allocation2 + $0x50] sm:$0xff]  ;;  %v3572_v38 = vadd.f32 %v3524_v34, %v3369_v2  ;;  %v7103_v52 = vpop.f32.mrb[134].mxu1  ;;  %v7159_v41 = vpop.f32.mrb[134].mxu0 }
 0x1fd   : > { %3622 = vst.msk [vmem:[#allocation2 + $0x70] sm:$0xff] %vm462_vm0, %v3574_v56  ;;  %v3988_v4 = vadd.f32 %v7154_v7, %v3940_v17  ;;  %v3938_v18 = vld [vmem:[#allocation2 + $0x40] sm:$0xff]  ;;  %v3575_v44 = vadd.f32 %v7103_v52, %v3527_v12  ;;  %v3372_v8 = vpop.f32.mrb[135].mxu1  ;;  %v3790_v22 = vpop.f32.mrb[135].mxu0  ;;  %v3538_v52 = vld [vmem:[#allocation2 + $0xd0] sm:$0xff] }
 0x1fe   : > { %3620 = vst.msk [vmem:[#allocation2 + $0x60] sm:$0xff] %vm462_vm0, %v3572_v38  ;;  %v3986_v26 = vadd.f32 %v3938_v18, %v3771_v13  ;;  %v3941_v5 = vld [vmem:[#allocation2 + $0x58] sm:$0xff]  ;;  %v3573_v39 = vadd.f32 %v3525_v15, %v3372_v8  ;;  %v3536_v18 = vld [vmem:[#allocation2 + $0xc0] sm:$0xff] }
 0x1ff   : > { %4036 = vst.msk [vmem:[#allocation2 + $0x50] sm:$0xff] %vm462_vm0, %v3988_v4  ;;  %3623 = vst.msk [vmem:[#allocation2 + $0x78] sm:$0xff] %vm462_vm0, %v3575_v44  ;;  %v3989_v43 = vadd.f32 %v7155_v50, %v3941_v5  ;;  %v3939_v25 = vld [vmem:[#allocation2 + $0x48] sm:$0xff] }
 0x200   : > { %4034 = vst.msk [vmem:[#allocation2 + $0x40] sm:$0xff] %vm462_vm0, %v3986_v26  ;;  %3621 = vst.msk [vmem:[#allocation2 + $0x68] sm:$0xff] %vm462_vm0, %v3573_v39  ;;  %v3987_v20 = vadd.f32 %v3939_v25, %v3774_v59  ;;  %v3539_v26 = vld [vmem:[#allocation2 + $0xd8] sm:$0xff] }
 0x201   : > { %4037 = vst.msk [vmem:[#allocation2 + $0x58] sm:$0xff] %vm462_vm0, %v3989_v43 }
 0x202   : > { %4035 = vst.msk [vmem:[#allocation2 + $0x48] sm:$0xff] %vm462_vm0, %v3987_v20  ;;  %v7106_v62 = vpop.f32.mrb[136].mxu1  ;;  %v7162_v27 = vpop.f32.mrb[136].mxu0 }
 0x203   : > { %v3578_v58 = vadd.f32 %v7106_v62, %v3530_v16  ;;  %v3385_v23 = vpop.f32.mrb[137].mxu1  ;;  %v3803_v6 = vpop.f32.mrb[137].mxu0  ;;  %v3537_v62 = vld [vmem:[#allocation2 + $0xc8] sm:$0xff] }
 0x204   : > { %v3944_v57 = vld [vmem:[#allocation2 + $0x70] sm:$0xff]  ;;  %v3576_v29 = vadd.f32 %v3528_v54, %v3385_v23  ;;  %v7107_v42 = vpop.f32.mrb[138].mxu1  ;;  %v7163_v47 = vpop.f32.mrb[138].mxu0 }
 0x205   : > { %3626 = vst.msk [vmem:[#allocation2 + $0x90] sm:$0xff] %vm462_vm0, %v3578_v58  ;;  %v3992_v36 = vadd.f32 %v7158_v60, %v3944_v57  ;;  %v3942_v11 = vld [vmem:[#allocation2 + $0x60] sm:$0xff]  ;;  %v3579_v48 = vadd.f32 %v7107_v42, %v3531_v19  ;;  %v3388_v55 = vpop.f32.mrb[139].mxu1  ;;  %v3806_v14 = vpop.f32.mrb[139].mxu0  ;;  %v3542_v42 = vld [vmem:[#allocation2 + $0xf0] sm:$0xff] }
 0x206   : > { %3624 = vst.msk [vmem:[#allocation2 + $0x80] sm:$0xff] %vm462_vm0, %v3576_v29  ;;  %v3990_v7 = vadd.f32 %v3942_v11, %v3787_v24  ;;  %v3945_v1 = vld [vmem:[#allocation2 + $0x78] sm:$0xff]  ;;  %v3577_v0 = vadd.f32 %v3529_v46, %v3388_v55  ;;  %v3540_v11 = vld [vmem:[#allocation2 + $0xe0] sm:$0xff] }
 0x207   : > { %4040 = vst.msk [vmem:[#allocation2 + $0x70] sm:$0xff] %vm462_vm0, %v3992_v36  ;;  %3627 = vst.msk [vmem:[#allocation2 + $0x98] sm:$0xff] %vm462_vm0, %v3579_v48  ;;  %v3993_v35 = vadd.f32 %v7159_v41, %v3945_v1  ;;  %v3943_v13 = vld [vmem:[#allocation2 + $0x68] sm:$0xff] }
 0x208   : > { %4038 = vst.msk [vmem:[#allocation2 + $0x60] sm:$0xff] %vm462_vm0, %v3990_v7  ;;  %3625 = vst.msk [vmem:[#allocation2 + $0x88] sm:$0xff] %vm462_vm0, %v3577_v0  ;;  %v3991_v3 = vadd.f32 %v3943_v13, %v3790_v22  ;;  %v3543_v7 = vld [vmem:[#allocation2 + $0xf8] sm:$0xff] }
 0x209   : > { %4041 = vst.msk [vmem:[#allocation2 + $0x78] sm:$0xff] %vm462_vm0, %v3993_v35 }
 0x20a   : > { %4039 = vst.msk [vmem:[#allocation2 + $0x68] sm:$0xff] %vm462_vm0, %v3991_v3  ;;  %v7110_v37 = vpop.f32.mrb[140].mxu1  ;;  %v7166_v31 = vpop.f32.mrb[140].mxu0 }
 0x20b   : > { %v3582_v50 = vadd.f32 %v7110_v37, %v3534_v33  ;;  %v3401_v9 = vpop.f32.mrb[141].mxu1  ;;  %v3819_v53 = vpop.f32.mrb[141].mxu0  ;;  %v3541_v37 = vld [vmem:[#allocation2 + $0xe8] sm:$0xff] }
 0x20c   : > { %v3948_v10 = vld [vmem:[#allocation2 + $0x90] sm:$0xff]  ;;  %v3580_v45 = vadd.f32 %v3532_v61, %v3401_v9  ;;  %v7111_v59 = vpop.f32.mrb[142].mxu1  ;;  %v7167_v32 = vpop.f32.mrb[142].mxu0 }
 0x20d   : > { %3630 = vst.msk [vmem:[#allocation2 + $0xb0] sm:$0xff] %vm462_vm0, %v3582_v50  ;;  %v3996_v40 = vadd.f32 %v7162_v27, %v3948_v10  ;;  %v3946_v30 = vld [vmem:[#allocation2 + $0x80] sm:$0xff]  ;;  %v3583_v28 = vadd.f32 %v7111_v59, %v3535_v51  ;;  %v3404_v63 = vpop.f32.mrb[143].mxu1  ;;  %v3822_v21 = vpop.f32.mrb[143].mxu0  ;;  %v3546_v59 = vld [vmem:[#allocation2 + $0x110] sm:$0xff] }
 0x20e   : > { %3628 = vst.msk [vmem:[#allocation2 + $0xa0] sm:$0xff] %vm462_vm0, %v3580_v45  ;;  %v3994_v60 = vadd.f32 %v3946_v30, %v3803_v6  ;;  %v3949_v56 = vld [vmem:[#allocation2 + $0x98] sm:$0xff]  ;;  %v3581_v2 = vadd.f32 %v3533_v49, %v3404_v63  ;;  %v3544_v30 = vld [vmem:[#allocation2 + $0x100] sm:$0xff] }
 0x20f   : > { %4044 = vst.msk [vmem:[#allocation2 + $0x90] sm:$0xff] %vm462_vm0, %v3996_v40  ;;  %3631 = vst.msk [vmem:[#allocation2 + $0xb8] sm:$0xff] %vm462_vm0, %v3583_v28  ;;  %v3997_v34 = vadd.f32 %v7163_v47, %v3949_v56  ;;  %v3947_v24 = vld [vmem:[#allocation2 + $0x88] sm:$0xff] }
 0x210   : > { %4042 = vst.msk [vmem:[#allocation2 + $0x80] sm:$0xff] %vm462_vm0, %v3994_v60  ;;  %3629 = vst.msk [vmem:[#allocation2 + $0xa8] sm:$0xff] %vm462_vm0, %v3581_v2  ;;  %v3995_v17 = vadd.f32 %v3947_v24, %v3806_v14  ;;  %v3547_v60 = vld [vmem:[#allocation2 + $0x118] sm:$0xff] }
 0x211   : > { %4045 = vst.msk [vmem:[#allocation2 + $0x98] sm:$0xff] %vm462_vm0, %v3997_v34 }
 0x212   : > { %4043 = vst.msk [vmem:[#allocation2 + $0x88] sm:$0xff] %vm462_vm0, %v3995_v17  ;;  %v7114_v38 = vpop.f32.mrb[144].mxu1  ;;  %v7170_v12 = vpop.f32.mrb[144].mxu0 }
 0x213   : > { %v3586_v41 = vadd.f32 %v7114_v38, %v3538_v52  ;;  %v3417_v4 = vpop.f32.mrb[145].mxu1  ;;  %v3835_v44 = vpop.f32.mrb[145].mxu0  ;;  %v3545_v38 = vld [vmem:[#allocation2 + $0x108] sm:$0xff] }
 0x214   : > { %v3952_v8 = vld [vmem:[#allocation2 + $0xb0] sm:$0xff]  ;;  %v3584_v15 = vadd.f32 %v3536_v18, %v3417_v4  ;;  %v7115_v22 = vpop.f32.mrb[146].mxu1  ;;  %v7171_v5 = vpop.f32.mrb[146].mxu0 }
 0x215   : > { %3634 = vst.msk [vmem:[#allocation2 + $0xd0] sm:$0xff] %vm462_vm0, %v3586_v41  ;;  %v4000_v39 = vadd.f32 %v7166_v31, %v3952_v8  ;;  %v3950_v43 = vld [vmem:[#allocation2 + $0xa0] sm:$0xff]  ;;  %v3587_v25 = vadd.f32 %v7115_v22, %v3539_v26  ;;  %v3420_v20 = vpop.f32.mrb[147].mxu1  ;;  %v3838_v16 = vpop.f32.mrb[147].mxu0  ;;  %v3550_v22 = vld [vmem:[#allocation2 + $0x130] sm:$0xff] }
 0x216   : > { %3632 = vst.msk [vmem:[#allocation2 + $0xc0] sm:$0xff] %vm462_vm0, %v3584_v15  ;;  %v3998_v27 = vadd.f32 %v3950_v43, %v3819_v53  ;;  %v3953_v58 = vld [vmem:[#allocation2 + $0xb8] sm:$0xff]  ;;  %v3585_v23 = vadd.f32 %v3537_v62, %v3420_v20  ;;  %v3548_v43 = vld [vmem:[#allocation2 + $0x120] sm:$0xff] }
 0x217   : > { %4048 = vst.msk [vmem:[#allocation2 + $0xb0] sm:$0xff] %vm462_vm0, %v4000_v39  ;;  %3635 = vst.msk [vmem:[#allocation2 + $0xd8] sm:$0xff] %vm462_vm0, %v3587_v25  ;;  %v4001_v54 = vadd.f32 %v7167_v32, %v3953_v58  ;;  %v3951_v6 = vld [vmem:[#allocation2 + $0xa8] sm:$0xff] }
 0x218   : > { %4046 = vst.msk [vmem:[#allocation2 + $0xa0] sm:$0xff] %vm462_vm0, %v3998_v27  ;;  %3633 = vst.msk [vmem:[#allocation2 + $0xc8] sm:$0xff] %vm462_vm0, %v3585_v23  ;;  %v3999_v57 = vadd.f32 %v3951_v6, %v3822_v21  ;;  %v3551_v27 = vld [vmem:[#allocation2 + $0x138] sm:$0xff] }
 0x219   : > { %4049 = vst.msk [vmem:[#allocation2 + $0xb8] sm:$0xff] %vm462_vm0, %v4001_v54 }
 0x21a   : > { %4047 = vst.msk [vmem:[#allocation2 + $0xa8] sm:$0xff] %vm462_vm0, %v3999_v57  ;;  %v7118_v29 = vpop.f32.mrb[148].mxu1  ;;  %v7174_v19 = vpop.f32.mrb[148].mxu0 }
 0x21b   : > { %v3590_v47 = vadd.f32 %v7118_v29, %v3542_v42  ;;  %v3433_v36 = vpop.f32.mrb[149].mxu1  ;;  %v3851_v48 = vpop.f32.mrb[149].mxu0  ;;  %v3549_v29 = vld [vmem:[#allocation2 + $0x128] sm:$0xff] }
 0x21c   : > { %v3956_v55 = vld [vmem:[#allocation2 + $0xd0] sm:$0xff]  ;;  %v3588_v46 = vadd.f32 %v3540_v11, %v3433_v36  ;;  %v7119_v14 = vpop.f32.mrb[150].mxu1  ;;  %v7175_v1 = vpop.f32.mrb[150].mxu0 }
 0x21d   : > { %3638 = vst.msk [vmem:[#allocation2 + $0xf0] sm:$0xff] %vm462_vm0, %v3590_v47  ;;  %v4004_v0 = vadd.f32 %v7170_v12, %v3956_v55  ;;  %v3954_v35 = vld [vmem:[#allocation2 + $0xc0] sm:$0xff]  ;;  %v3591_v13 = vadd.f32 %v7119_v14, %v3543_v7  ;;  %v3436_v3 = vpop.f32.mrb[151].mxu1  ;;  %v3854_v33 = vpop.f32.mrb[151].mxu0  ;;  %v3554_v14 = vld [vmem:[#allocation2 + $0x150] sm:$0xff] }
 0x21e   : > { %3636 = vst.msk [vmem:[#allocation2 + $0xe0] sm:$0xff] %vm462_vm0, %v3588_v46  ;;  %v4002_v31 = vadd.f32 %v3954_v35, %v3835_v44  ;;  %v3957_v50 = vld [vmem:[#allocation2 + $0xd8] sm:$0xff]  ;;  %v3589_v9 = vadd.f32 %v3541_v37, %v3436_v3  ;;  %v3552_v35 = vld [vmem:[#allocation2 + $0x140] sm:$0xff] }
 0x21f   : > { %4052 = vst.msk [vmem:[#allocation2 + $0xd0] sm:$0xff] %vm462_vm0, %v4004_v0  ;;  %3639 = vst.msk [vmem:[#allocation2 + $0xf8] sm:$0xff] %vm462_vm0, %v3591_v13  ;;  %v4005_v61 = vadd.f32 %v7171_v5, %v3957_v50  ;;  %v3955_v53 = vld [vmem:[#allocation2 + $0xc8] sm:$0xff] }
 0x220   : > { %4050 = vst.msk [vmem:[#allocation2 + $0xc0] sm:$0xff] %vm462_vm0, %v4002_v31  ;;  %3637 = vst.msk [vmem:[#allocation2 + $0xe8] sm:$0xff] %vm462_vm0, %v3589_v9  ;;  %v4003_v10 = vadd.f32 %v3955_v53, %v3838_v16  ;;  %v3555_v31 = vld [vmem:[#allocation2 + $0x158] sm:$0xff] }
 0x221   : > { %4053 = vst.msk [vmem:[#allocation2 + $0xd8] sm:$0xff] %vm462_vm0, %v4005_v61 }
 0x222   : > { %4051 = vst.msk [vmem:[#allocation2 + $0xc8] sm:$0xff] %vm462_vm0, %v4003_v10  ;;  %v7122_v45 = vpop.f32.mrb[152].mxu1  ;;  %v7178_v51 = vpop.f32.mrb[152].mxu0 }
 0x223   : > { %v3594_v32 = vadd.f32 %v7122_v45, %v3546_v59  ;;  %v3449_v40 = vpop.f32.mrb[153].mxu1  ;;  %v3867_v28 = vpop.f32.mrb[153].mxu0  ;;  %v3553_v45 = vld [vmem:[#allocation2 + $0x148] sm:$0xff] }
 0x224   : > { %v3960_v63 = vld [vmem:[#allocation2 + $0xf0] sm:$0xff]  ;;  %v3592_v49 = vadd.f32 %v3544_v30, %v3449_v40  ;;  %v7123_v21 = vpop.f32.mrb[154].mxu1  ;;  %v7179_v56 = vpop.f32.mrb[154].mxu0 }
 0x225   : > { %3642 = vst.msk [vmem:[#allocation2 + $0x110] sm:$0xff] %vm462_vm0, %v3594_v32  ;;  %v4008_v2 = vadd.f32 %v7174_v19, %v3960_v63  ;;  %v3958_v34 = vld [vmem:[#allocation2 + $0xe0] sm:$0xff]  ;;  %v3595_v24 = vadd.f32 %v7123_v21, %v3547_v60  ;;  %v3452_v17 = vpop.f32.mrb[155].mxu1  ;;  %v3870_v52 = vpop.f32.mrb[155].mxu0  ;;  %v3558_v21 = vld [vmem:[#allocation2 + $0x170] sm:$0xff] }
 0x226   : > { %3640 = vst.msk [vmem:[#allocation2 + $0x100] sm:$0xff] %vm462_vm0, %v3592_v49  ;;  %v4006_v12 = vadd.f32 %v3958_v34, %v3851_v48  ;;  %v3961_v41 = vld [vmem:[#allocation2 + $0xf8] sm:$0xff]  ;;  %v3593_v4 = vadd.f32 %v3545_v38, %v3452_v17  ;;  %v3556_v34 = vld [vmem:[#allocation2 + $0x160] sm:$0xff] }
 0x227   : > { %4056 = vst.msk [vmem:[#allocation2 + $0xf0] sm:$0xff] %vm462_vm0, %v4008_v2  ;;  %3643 = vst.msk [vmem:[#allocation2 + $0x118] sm:$0xff] %vm462_vm0, %v3595_v24  ;;  %v4009_v18 = vadd.f32 %v7175_v1, %v3961_v41  ;;  %v3959_v44 = vld [vmem:[#allocation2 + $0xe8] sm:$0xff] }
 0x228   : > { %4054 = vst.msk [vmem:[#allocation2 + $0xe0] sm:$0xff] %vm462_vm0, %v4006_v12  ;;  %3641 = vst.msk [vmem:[#allocation2 + $0x108] sm:$0xff] %vm462_vm0, %v3593_v4  ;;  %v4007_v8 = vadd.f32 %v3959_v44, %v3854_v33  ;;  %v3559_v12 = vld [vmem:[#allocation2 + $0x178] sm:$0xff] }
 0x229   : > { %4057 = vst.msk [vmem:[#allocation2 + $0xf8] sm:$0xff] %vm462_vm0, %v4009_v18 }
 0x22a   : > { %4055 = vst.msk [vmem:[#allocation2 + $0xe8] sm:$0xff] %vm462_vm0, %v4007_v8  ;;  %v7126_v15 = vpop.f32.mrb[156].mxu1  ;;  %v7182_v26 = vpop.f32.mrb[156].mxu0 }
 0x22b   : > { %v3598_v5 = vadd.f32 %v7126_v15, %v3550_v22  ;;  %v3465_v39 = vpop.f32.mrb[157].mxu1  ;;  %v3883_v25 = vpop.f32.mrb[157].mxu0  ;;  %v3557_v15 = vld [vmem:[#allocation2 + $0x168] sm:$0xff] }
 0x22c   : > { %v3964_v20 = vld [vmem:[#allocation2 + $0x110] sm:$0xff]  ;;  %v3596_v62 = vadd.f32 %v3548_v43, %v3465_v39  ;;  %v7127_v16 = vpop.f32.mrb[158].mxu1  ;;  %v7183_v58 = vpop.f32.mrb[158].mxu0 }
 0x22d   : > { %3646 = vst.msk [vmem:[#allocation2 + $0x130] sm:$0xff] %vm462_vm0, %v3598_v5  ;;  %v4012_v23 = vadd.f32 %v7178_v51, %v3964_v20  ;;  %v3962_v54 = vld [vmem:[#allocation2 + $0x100] sm:$0xff]  ;;  %v3599_v6 = vadd.f32 %v7127_v16, %v3551_v27  ;;  %v3468_v57 = vpop.f32.mrb[159].mxu1  ;;  %v3886_v42 = vpop.f32.mrb[159].mxu0  ;;  %v4375_v16 = vld [vmem:[#allocation2 + $0x10] sm:$0xff] }
 0x22e   : > { %3644 = vst.msk [vmem:[#allocation2 + $0x120] sm:$0xff] %vm462_vm0, %v3596_v62  ;;  %v4010_v19 = vadd.f32 %v3962_v54, %v3867_v28  ;;  %v3965_v47 = vld [vmem:[#allocation2 + $0x118] sm:$0xff]  ;;  %v3597_v36 = vadd.f32 %v3549_v29, %v3468_v57  ;;  %v4373_v54 = vld [vmem:[#allocation2] sm:$0xff] }
 0x22f   : > { %4060 = vst.msk [vmem:[#allocation2 + $0x110] sm:$0xff] %vm462_vm0, %v4012_v23  ;;  %3647 = vst.msk [vmem:[#allocation2 + $0x138] sm:$0xff] %vm462_vm0, %v3599_v6  ;;  %v4013_v11 = vadd.f32 %v7179_v56, %v3965_v47  ;;  %v3963_v48 = vld [vmem:[#allocation2 + $0x108] sm:$0xff] }
 0x230   : > { %4058 = vst.msk [vmem:[#allocation2 + $0x100] sm:$0xff] %vm462_vm0, %v4010_v19  ;;  %3645 = vst.msk [vmem:[#allocation2 + $0x128] sm:$0xff] %vm462_vm0, %v3597_v36  ;;  %v4011_v55 = vadd.f32 %v3963_v48, %v3870_v52  ;;  %v4376_v19 = vld [vmem:[#allocation2 + $0x18] sm:$0xff] }
 0x231   : > { %4061 = vst.msk [vmem:[#allocation2 + $0x118] sm:$0xff] %vm462_vm0, %v4013_v11 }
 0x232   : > { %4059 = vst.msk [vmem:[#allocation2 + $0x108] sm:$0xff] %vm462_vm0, %v4011_v55  ;;  %v7130_v46 = vpop.f32.mrb[160].mxu1  ;;  %v7186_v7 = vpop.f32.mrb[160].mxu0 }
 0x233   : > { %v3602_v1 = vadd.f32 %v7130_v46, %v3554_v14  ;;  %v3481_v0 = vpop.f32.mrb[161].mxu1  ;;  %v3899_v13 = vpop.f32.mrb[161].mxu0  ;;  %v4374_v46 = vld [vmem:[#allocation2 + $0x8] sm:$0xff] }
 0x234   : > { %v3968_v3 = vld [vmem:[#allocation2 + $0x130] sm:$0xff]  ;;  %v3600_v37 = vadd.f32 %v3552_v35, %v3481_v0  ;;  %v7131_v33 = vpop.f32.mrb[162].mxu1  ;;  %v7187_v50 = vpop.f32.mrb[162].mxu0 }
 0x235   : > { %3650 = vst.msk [vmem:[#allocation2 + $0x150] sm:$0xff] %vm462_vm0, %v3602_v1  ;;  %v4016_v9 = vadd.f32 %v7182_v26, %v3968_v3  ;;  %v3966_v61 = vld [vmem:[#allocation2 + $0x120] sm:$0xff]  ;;  %v3603_v53 = vadd.f32 %v7131_v33, %v3555_v31  ;;  %v3484_v10 = vpop.f32.mrb[163].mxu1  ;;  %v3902_v59 = vpop.f32.mrb[163].mxu0  ;;  %v4379_v33 = vld [vmem:[#allocation2 + $0x30] sm:$0xff] }
 0x236   : > { %3648 = vst.msk [vmem:[#allocation2 + $0x140] sm:$0xff] %vm462_vm0, %v3600_v37  ;;  %v4014_v51 = vadd.f32 %v3966_v61, %v3883_v25  ;;  %v3969_v32 = vld [vmem:[#allocation2 + $0x138] sm:$0xff]  ;;  %v3601_v40 = vadd.f32 %v3553_v45, %v3484_v10  ;;  %v4377_v61 = vld [vmem:[#allocation2 + $0x20] sm:$0xff] }
 0x237   : > { %4064 = vst.msk [vmem:[#allocation2 + $0x130] sm:$0xff] %vm462_vm0, %v4016_v9  ;;  %3651 = vst.msk [vmem:[#allocation2 + $0x158] sm:$0xff] %vm462_vm0, %v3603_v53  ;;  %v4017_v30 = vadd.f32 %v7183_v58, %v3969_v32  ;;  %v3967_v28 = vld [vmem:[#allocation2 + $0x128] sm:$0xff] }
 0x238   : > { %4062 = vst.msk [vmem:[#allocation2 + $0x120] sm:$0xff] %vm462_vm0, %v4014_v51  ;;  %3649 = vst.msk [vmem:[#allocation2 + $0x148] sm:$0xff] %vm462_vm0, %v3601_v40  ;;  %v4015_v63 = vadd.f32 %v3967_v28, %v3886_v42  ;;  %v4380_v51 = vld [vmem:[#allocation2 + $0x38] sm:$0xff] }
 0x239   : > { %4065 = vst.msk [vmem:[#allocation2 + $0x138] sm:$0xff] %vm462_vm0, %v4017_v30 }
 0x23a   : > { %4063 = vst.msk [vmem:[#allocation2 + $0x128] sm:$0xff] %vm462_vm0, %v4015_v63  ;;  %v7134_v49 = vpop.f32.mrb[164].mxu1  ;;  %v7190_v60 = vpop.f32.mrb[164].mxu0 }
 0x23b   : > { %v3606_v56 = vadd.f32 %v7134_v49, %v3558_v21  ;;  %v3497_v2 = vpop.f32.mrb[165].mxu1  ;;  %v3915_v24 = vpop.f32.mrb[165].mxu0  ;;  %v4378_v49 = vld [vmem:[#allocation2 + $0x28] sm:$0xff] }
 0x23c   : > { %v3972_v17 = vld [vmem:[#allocation2 + $0x150] sm:$0xff]  ;;  %v3604_v38 = vadd.f32 %v3556_v34, %v3497_v2  ;;  %v7135_v52 = vpop.f32.mrb[166].mxu1  ;;  %v7191_v41 = vpop.f32.mrb[166].mxu0 }
 0x23d   : > { %3654 = vst.msk [vmem:[#allocation2 + $0x170] sm:$0xff] %vm462_vm0, %v3606_v56  ;;  %v4020_v4 = vadd.f32 %v7186_v7, %v3972_v17  ;;  %v3970_v18 = vld [vmem:[#allocation2 + $0x140] sm:$0xff]  ;;  %v3607_v44 = vadd.f32 %v7135_v52, %v3559_v12  ;;  %v3500_v8 = vpop.f32.mrb[167].mxu1  ;;  %v3918_v22 = vpop.f32.mrb[167].mxu0  ;;  %v4383_v52 = vld [vmem:[#allocation2 + $0x50] sm:$0xff] }
 0x23e   : > { %3652 = vst.msk [vmem:[#allocation2 + $0x160] sm:$0xff] %vm462_vm0, %v3604_v38  ;;  %v4018_v26 = vadd.f32 %v3970_v18, %v3899_v13  ;;  %v3973_v5 = vld [vmem:[#allocation2 + $0x158] sm:$0xff]  ;;  %v3605_v39 = vadd.f32 %v3557_v15, %v3500_v8  ;;  %v4381_v18 = vld [vmem:[#allocation2 + $0x40] sm:$0xff]  ;;  %v7456_v8 = vmov 1983009808  }
 0x23f   : > { %4068 = vst.msk [vmem:[#allocation2 + $0x150] sm:$0xff] %vm462_vm0, %v4020_v4  ;;  %3655 = vst.msk [vmem:[#allocation2 + $0x178] sm:$0xff] %vm462_vm0, %v3607_v44  ;;  %v4021_v43 = vadd.f32 %v7187_v50, %v3973_v5  ;;  %v3971_v25 = vld [vmem:[#allocation2 + $0x148] sm:$0xff]  ;;  %v5108_v15 = vunpack.c.l.s4 %v7456_v8 }
 0x240   : > { %4066 = vst.msk [vmem:[#allocation2 + $0x140] sm:$0xff] %vm462_vm0, %v4018_v26  ;;  %3653 = vst.msk [vmem:[#allocation2 + $0x168] sm:$0xff] %vm462_vm0, %v3605_v39  ;;  %v4019_v20 = vadd.f32 %v3971_v25, %v3902_v59 }
 0x241   : > { %4069 = vst.msk [vmem:[#allocation2 + $0x158] sm:$0xff] %vm462_vm0, %v4021_v43  ;;  %v4384_v43 = vld [vmem:[#allocation2 + $0x58] sm:$0xff] }
 0x242   : > { %4067 = vst.msk [vmem:[#allocation2 + $0x148] sm:$0xff] %vm462_vm0, %v4019_v20  ;;  %v7202_v62 = vpop.f32.mrb[168].mxu1  ;;  %v7258_v27 = vpop.f32.mrb[168].mxu0  ;;  %v9076_v20 = vld [vmem:[%s9706_s2] ss:$0 sm:$0xff] }
 0x243   : > { %v4423_v58 = vadd.f32 %v7202_v62, %v4375_v16  ;;  %v4182_v23 = vpop.f32.mrb[169].mxu1  ;;  %v4604_v6 = vpop.f32.mrb[169].mxu0 }
 0x244   : > { %v3976_v57 = vld [vmem:[#allocation2 + $0x170] sm:$0xff]  ;;  %v4421_v29 = vadd.f32 %v4373_v54, %v4182_v23  ;;  %v7203_v42 = vpop.f32.mrb[170].mxu1  ;;  %v7259_v47 = vpop.f32.mrb[170].mxu0  ;;  %v4382_v23 = vld [vmem:[#allocation2 + $0x48] sm:$0xff] }
 0x245   : > { %v4024_v36 = vadd.f32 %v7190_v60, %v3976_v57  ;;  %4471 = vst.msk [vmem:[#allocation2 + $0x10] sm:$0xff] %vm462_vm0, %v4423_v58  ;;  %v3974_v11 = vld [vmem:[#allocation2 + $0x160] sm:$0xff]  ;;  %v4424_v48 = vadd.f32 %v7203_v42, %v4376_v19  ;;  %v4185_v55 = vpop.f32.mrb[171].mxu1  ;;  %v4607_v14 = vpop.f32.mrb[171].mxu0 }
 0x246   : > { %v4022_v7 = vadd.f32 %v3974_v11, %v3915_v24  ;;  %4469 = vst.msk [vmem:[#allocation2] sm:$0xff] %vm462_vm0, %v4421_v29  ;;  %v3977_v1 = vld [vmem:[#allocation2 + $0x178] sm:$0xff]  ;;  %v4422_v0 = vadd.f32 %v4374_v46, %v4185_v55 }
 0x247   : > { %4072 = vst.msk [vmem:[#allocation2 + $0x170] sm:$0xff] %vm462_vm0, %v4024_v36  ;;  %v4025_v35 = vadd.f32 %v7191_v41, %v3977_v1  ;;  %4472 = vst.msk [vmem:[#allocation2 + $0x18] sm:$0xff] %vm462_vm0, %v4424_v48  ;;  %v3975_v13 = vld [vmem:[#allocation2 + $0x168] sm:$0xff]  ;;  %v5109_v48 = vunpack.c.0.s8 %v5108_v15 }
 0x248   : > { %4070 = vst.msk [vmem:[#allocation2 + $0x160] sm:$0xff] %vm462_vm0, %v4022_v7  ;;  %v4023_v3 = vadd.f32 %v3975_v13, %v3918_v22  ;;  %4470 = vst.msk [vmem:[#allocation2 + $0x8] sm:$0xff] %vm462_vm0, %v4422_v0  ;;  %v5110_v22 = vlaneseq  ;;  %v4387_v13 = vld [vmem:[#allocation2 + $0x70] sm:$0xff] }
 0x249   : > { %4073 = vst.msk [vmem:[#allocation2 + $0x178] sm:$0xff] %vm462_vm0, %v4025_v35 }
 0x24a   : > { %4071 = vst.msk [vmem:[#allocation2 + $0x168] sm:$0xff] %vm462_vm0, %v4023_v3  ;;  %v7206_v37 = vpop.f32.mrb[172].mxu1  ;;  %v7262_v31 = vpop.f32.mrb[172].mxu0  ;;  %v5111_v55 = vshrl.u32 %v5110_v22, 7 }
 0x24b   : > { %v4427_v50 = vadd.f32 %v7206_v37, %v4379_v33  ;;  %v4198_v9 = vpop.f32.mrb[173].mxu1  ;;  %v4620_v53 = vpop.f32.mrb[173].mxu0 }
 0x24c   : > { %v4797_v10 = vld [vmem:[#allocation2 + $0x10] sm:$0xff]  ;;  %v4425_v45 = vadd.f32 %v4377_v61, %v4198_v9  ;;  %v7207_v59 = vpop.f32.mrb[174].mxu1  ;;  %v7263_v32 = vpop.f32.mrb[174].mxu0 }
 0x24d   : > { %4475 = vst.msk [vmem:[#allocation2 + $0x30] sm:$0xff] %vm462_vm0, %v4427_v50  ;;  %v4845_v40 = vadd.f32 %v7258_v27, %v4797_v10  ;;  %v4795_v30 = vld [vmem:[#allocation2] sm:$0xff]  ;;  %v4428_v28 = vadd.f32 %v7207_v59, %v4380_v51  ;;  %v4201_v63 = vpop.f32.mrb[175].mxu1  ;;  %v4623_v21 = vpop.f32.mrb[175].mxu0  ;;  %v4388_v51 = vld [vmem:[#allocation2 + $0x78] sm:$0xff] }
 0x24e   : > { %4473 = vst.msk [vmem:[#allocation2 + $0x20] sm:$0xff] %vm462_vm0, %v4425_v45  ;;  %v4843_v60 = vadd.f32 %v4795_v30, %v4604_v6  ;;  %v4798_v56 = vld [vmem:[#allocation2 + $0x18] sm:$0xff]  ;;  %v4426_v2 = vadd.f32 %v4378_v49, %v4201_v63  ;;  %v4385_v50 = vld [vmem:[#allocation2 + $0x60] sm:$0xff] }
 0x24f   : > { %4893 = vst.msk [vmem:[#allocation2 + $0x10] sm:$0xff] %vm462_vm0, %v4845_v40  ;;  %4476 = vst.msk [vmem:[#allocation2 + $0x38] sm:$0xff] %vm462_vm0, %v4428_v28  ;;  %v4846_v34 = vadd.f32 %v7259_v47, %v4798_v56  ;;  %v4796_v24 = vld [vmem:[#allocation2 + $0x8] sm:$0xff] }
 0x250   : > { %4891 = vst.msk [vmem:[#allocation2] sm:$0xff] %vm462_vm0, %v4843_v60  ;;  %4474 = vst.msk [vmem:[#allocation2 + $0x28] sm:$0xff] %vm462_vm0, %v4426_v2  ;;  %v4844_v17 = vadd.f32 %v4796_v24, %v4607_v14  ;;  %v4386_v60 = vld [vmem:[#allocation2 + $0x68] sm:$0xff] }
 0x251   : > { %4894 = vst.msk [vmem:[#allocation2 + $0x18] sm:$0xff] %vm462_vm0, %v4846_v34 }
 0x252   : > { %4892 = vst.msk [vmem:[#allocation2 + $0x8] sm:$0xff] %vm462_vm0, %v4844_v17  ;;  %v7210_v38 = vpop.f32.mrb[176].mxu1  ;;  %v7266_v12 = vpop.f32.mrb[176].mxu0 }
 0x253   : > { %v4431_v41 = vadd.f32 %v7210_v38, %v4383_v52  ;;  %v4214_v4 = vpop.f32.mrb[177].mxu1  ;;  %v9069_v44 = vpop.f32.mrb[177].mxu0 }
 0x254   : > { %v4801_v26 = vld [vmem:[#allocation2 + $0x30] sm:$0xff]  ;;  %v4429_v5 = vadd.f32 %v4381_v18, %v4214_v4  ;;  %v7211_v39 = vpop.f32.mrb[178].mxu1  ;;  %v9071_v25 = vpop.f32.mrb[178].mxu0 }
 0x255   : > { %4479 = vst.msk [vmem:[#allocation2 + $0x50] sm:$0xff] %vm462_vm0, %v4431_v41  ;;  %v4849_v62 = vadd.f32 %v7262_v31, %v4801_v26  ;;  %v4799_v16 = vld [vmem:[#allocation2 + $0x20] sm:$0xff]  ;;  %v4432_v27 = vadd.f32 %v7211_v39, %v4384_v43  ;;  %v4217_v58 = vpop.f32.mrb[179].mxu1  ;;  %v9079_v54 = vpop.f32.mrb[179].mxu0 }
 0x256   : > { %4477 = vst.msk [vmem:[#allocation2 + $0x40] sm:$0xff] %vm462_vm0, %v4429_v5  ;;  %v4847_v6 = vadd.f32 %v4799_v16, %v4620_v53  ;;  %v4802_v57 = vld [vmem:[#allocation2 + $0x38] sm:$0xff]  ;;  %v4430_v29 = vadd.f32 %v4382_v23, %v4217_v58  ;;  %v9096_v53 = vsub.s32 %v5109_v48, %v5111_v55  ;;  %v4391_v58 = vld [vmem:[#allocation2 + $0x90] sm:$0xff] }
 0x257   : > { %v4939_v42 = vld [vmem:[#allocation2] sm:$0xff]  ;;  %4897 = vst.msk [vmem:[#allocation2 + $0x30] sm:$0xff] %vm462_vm0, %v4849_v62  ;;  %4480 = vst.msk [vmem:[#allocation2 + $0x58] sm:$0xff] %vm462_vm0, %v4432_v27  ;;  %v4850_v19 = vadd.f32 %v7263_v32, %v4802_v57  ;;  %v4800_v47 = vld [vmem:[#allocation2 + $0x28] sm:$0xff] }
 0x258   : > { %v4978_v36 = vadd.f32 %v9076_v20, %v4939_v42  ;;  %v4941_v11 = vld [vmem:[#allocation2 + $0x18] sm:$0xff]  ;;  %4895 = vst.msk [vmem:[#allocation2 + $0x20] sm:$0xff] %vm462_vm0, %v4847_v6  ;;  %4478 = vst.msk [vmem:[#allocation2 + $0x48] sm:$0xff] %vm462_vm0, %v4430_v29  ;;  %v4848_v46 = vadd.f32 %v4800_v47, %v4623_v21 }
 0x259   : > { %v4980_v14 = vadd.f32 %v9076_v20, %v4941_v11  ;;  %v4940_v7 = vld [vmem:[#allocation2 + $0x8] sm:$0xff]  ;;  %4898 = vst.msk [vmem:[#allocation2 + $0x38] sm:$0xff] %vm462_vm0, %v4850_v19 }
 0x25a   : > { %v5010_v1 = vmax.f32 %v4978_v36, 0.0  ;;  %v4979_v0 = vadd.f32 %v9076_v20, %v4940_v7  ;;  %4896 = vst.msk [vmem:[#allocation2 + $0x28] sm:$0xff] %vm462_vm0, %v4848_v46  ;;  %v7214_v35 = vpop.f32.mrb[180].mxu1  ;;  %v9091_v3 = vpop.f32.mrb[180].mxu0 }
 0x25b   : > { %v5012_v37 = vmax.f32 %v4980_v14, 0.0  ;;  %v4435_v33 = vadd.f32 %v7214_v35, %v4387_v13  ;;  %v4230_v31 = vpop.f32.mrb[181].mxu1  ;;  %v9093_v9 = vpop.f32.mrb[181].mxu0  ;;  %v4389_v13 = vld [vmem:[#allocation2 + $0x80] sm:$0xff] }
 0x25c   : > { %v5042_v61 = vsel %vm462_vm0, %v5010_v1, -inf  ;;  %v4805_v10 = vld [vmem:[#allocation2 + $0x50] sm:$0xff]  ;;  %v4433_v45 = vadd.f32 %v4385_v50, %v4230_v31  ;;  %v7215_v59 = vpop.f32.mrb[182].mxu1  ;;  %v9098_v32 = vpop.f32.mrb[182].mxu0  ;;  %v5011_v30 = vmax.f32 %v4979_v0, 0.0 }
 0x25d   : > { %v5043_v40 = vsel %vm462_vm0, %v5012_v37, -inf  ;;  %4483 = vst.msk [vmem:[#allocation2 + $0x70] sm:$0xff] %vm462_vm0, %v4435_v33  ;;  %v4853_v28 = vadd.f32 %v7266_v12, %v4805_v10  ;;  %v4803_v63 = vld [vmem:[#allocation2 + $0x40] sm:$0xff]  ;;  %v4436_v49 = vadd.f32 %v7215_v59, %v4388_v51  ;;  %v4233_v21 = vpop.f32.mrb[183].mxu1  ;;  %v9102_v56 = vpop.f32.mrb[183].mxu0 }
 0x25e   : > { %v5044_v2 = vmax.f32 %v5042_v61, %v5043_v40  ;;  %v4943_v34 = vld [vmem:[#allocation2 + $0x30] sm:$0xff]  ;;  %4481 = vst.msk [vmem:[#allocation2 + $0x60] sm:$0xff] %vm462_vm0, %v4433_v45  ;;  %v4851_v24 = vadd.f32 %v4803_v63, %v9069_v44  ;;  %v4806_v17 = vld [vmem:[#allocation2 + $0x58] sm:$0xff]  ;;  %v4434_v38 = vadd.f32 %v4386_v60, %v4233_v21  ;;  %v5045_v26 = vsel %vm462_vm0, %v5011_v30, -inf }
 0x25f   : > { %v4982_v52 = vadd.f32 %v9076_v20, %v4943_v34  ;;  %v4942_v41 = vld [vmem:[#allocation2 + $0x20] sm:$0xff]  ;;  %4901 = vst.msk [vmem:[#allocation2 + $0x50] sm:$0xff] %vm462_vm0, %v4853_v28  ;;  %4484 = vst.msk [vmem:[#allocation2 + $0x78] sm:$0xff] %vm462_vm0, %v4436_v49  ;;  %v4854_v12 = vadd.f32 %v9071_v25, %v4806_v17  ;;  %v4804_v4 = vld [vmem:[#allocation2 + $0x48] sm:$0xff] }
 0x260   : > { %v5106_v18 = vcombine.high %v5044_v2, %v5044_v2  ;;  %v5113_v8 = vrot.slane %v5044_v2, %v9096_v53  ;;  %v4981_v15 = vadd.f32 %v9076_v20, %v4942_v41  ;;  %v4944_v22 = vld [vmem:[#allocation2 + $0x38] sm:$0xff]  ;;  %4899 = vst.msk [vmem:[#allocation2 + $0x40] sm:$0xff] %vm462_vm0, %v4851_v24  ;;  %4482 = vst.msk [vmem:[#allocation2 + $0x68] sm:$0xff] %vm462_vm0, %v4434_v38 }
 0x261   : > { %v4852_v44 = vadd.f32 %v4804_v4, %v9079_v54  ;;  %v5014_v5 = vmax.f32 %v4982_v52, 0.0  ;;  %v4983_v39 = vadd.f32 %v9076_v20, %v4944_v22  ;;  %4902 = vst.msk [vmem:[#allocation2 + $0x58] sm:$0xff] %vm462_vm0, %v4854_v12 }
 0x262   : > { %v5120_v43 = vrot.slane %v5106_v18, %v9096_v53  ;;  %v5121_v25 = vcombine.high %v5113_v8, %v5113_v8  ;;  %v5443_v62 = vsel %vm5442_vm3, %v5113_v8, -inf  ;;  %v5013_v16 = vmax.f32 %v4981_v15, 0.0  ;;  %v7218_v27 = vpop.f32.mrb[184].mxu1  ;;  %v9121_v23 = vpop.f32.mrb[184].mxu0 }
 0x263   : > { %4900 = vst.msk [vmem:[#allocation2 + $0x48] sm:$0xff] %vm462_vm0, %v4852_v44  ;;  %v5444_v54 = vrot.slane %v5443_v62, 4  ;;  %v9124_v6 = vsel %vm462_vm0, %v5014_v5, -inf  ;;  %v5015_v57 = vmax.f32 %v4983_v39, 0.0  ;;  %v4439_v29 = vadd.f32 %v7218_v27, %v4391_v58  ;;  %v4246_v42 = vpop.f32.mrb[185].mxu1  ;;  %v9126_v19 = vpop.f32.mrb[185].mxu0 }
 0x264   : > { %v5122_v47 = vcombine.high %v5120_v43, %v5120_v43  ;;  %v5450_v36 = vsel %vm5442_vm3, %v5121_v25, -inf  ;;  %v5457_v11 = vsel %vm5442_vm3, %v5120_v43, -inf  ;;  %v5046_v48 = vsel %vm462_vm0, %v5013_v16, -inf  ;;  %v4809_v55 = vld [vmem:[#allocation2 + $0x70] sm:$0xff]  ;;  %v9131_v46 = vpop.f32.mrb[186].mxu1  ;;  %v9133_v14 = vpop.f32.mrb[186].mxu0 }
 0x265   : > { %v5445_v7 = vmax.f32 %v5443_v62, %v5444_v54  ;;  %v5451_v1 = vrot.slane %v5450_v36, 4  ;;  %v5458_v0 = vrot.slane %v5457_v11, 4  ;;  %v5047_v35 = vmax.f32 %v5045_v26, %v5046_v48  ;;  %4487 = vst.msk [vmem:[#allocation2 + $0x90] sm:$0xff] %vm462_vm0, %v4439_v29  ;;  %v4807_v37 = vld [vmem:[#allocation2 + $0x60] sm:$0xff]  ;;  %v9136_v33 = vpop.f32.mrb[187].mxu1  ;;  %v9138_v31 = vpop.f32.mrb[187].mxu0 }
 0x266   : > { %v5464_v50 = vsel %vm5442_vm3, %v5122_v47, -inf  ;;  %v9142_v61 = vsel %vm462_vm0, %v5015_v57, -inf  ;;  %v4946_v10 = vld [vmem:[#allocation2 + $0x50] sm:$0xff]  ;;  %v4857_v45 = vadd.f32 %v9091_v3, %v4809_v55  ;;  %v4437_v59 = vadd.f32 %v4389_v13, %v4246_v42 }
 0x267   : > { %v5446_v51 = vrot.slane %v5445_v7, 2  ;;  %v5452_v40 = vmax.f32 %v5450_v36, %v5451_v1  ;;  %v5459_v30 = vmax.f32 %v5457_v11, %v5458_v0  ;;  %v5465_v28 = vrot.slane %v5464_v50, 4 }
 0x268   : > { %v5123_v63 = vcombine.high %v5047_v35, %v5047_v35  ;;  %v5130_v49 = vrot.slane %v5047_v35, %v9096_v53  ;;  %v4985_v21 = vadd.f32 %v9076_v20, %v4946_v10  ;;  %4905 = vst.msk [vmem:[#allocation2 + $0x70] sm:$0xff] %vm462_vm0, %v4857_v45  ;;  %4485 = vst.msk [vmem:[#allocation2 + $0x80] sm:$0xff] %vm462_vm0, %v4437_v59 }
 0x269   : > { %v4855_v60 = vadd.f32 %v4807_v37, %v9093_v9  ;;  %v5447_v2 = vmax.f32 %v5445_v7, %v5446_v51  ;;  %v5453_v3 = vrot.slane %v5452_v40, 2  ;;  %v5460_v34 = vrot.slane %v5459_v30, 2 }
 0x26a   : > { %v5466_v24 = vmax.f32 %v5464_v50, %v5465_v28  ;;  %v5137_v17 = vrot.slane %v5123_v63, %v9096_v53  ;;  %v5138_v38 = vcombine.high %v5130_v49, %v5130_v49  ;;  %v5471_v52 = vsel %vm5442_vm3, %v5130_v49, -inf  ;;  %v9153_v12 = vpop.f32.mrb[188].mxu1  ;;  %v9155_v4 = vpop.f32.mrb[188].mxu0  ;;  %v4945_v51 = vld [vmem:[#allocation2 + $0x48] sm:$0xff] }
 0x26b   : > { %v5017_v41 = vmax.f32 %v4985_v21, 0.0  ;;  %4903 = vst.msk [vmem:[#allocation2 + $0x60] sm:$0xff] %vm462_vm0, %v4855_v60  ;;  %v5448_v18 = vrot.slane %v5447_v2, 1  ;;  %v5454_v8 = vmax.f32 %v5452_v40, %v5453_v3  ;;  %v5461_v15 = vmax.f32 %v5459_v30, %v5460_v34  ;;  %v9157_v22 = vpop.f32.mrb[189].mxu1  ;;  %v9159_v44 = vpop.f32.mrb[189].mxu0 }
 0x26c   : > { %v5467_v9 = vrot.slane %v5466_v24, 2  ;;  %v5139_v26 = vcombine.high %v5137_v17, %v5137_v17  ;;  %v5472_v5 = vrot.slane %v5471_v52, 4  ;;  %v5478_v39 = vsel %vm5442_vm3, %v5138_v38, -inf  ;;  %v9163_v25 = vpop.f32.mrb[190].mxu1  ;;  %v9165_v62 = vpop.f32.mrb[190].mxu0 }
 0x26d   : > { %v5485_v43 = vsel %vm5442_vm3, %v5137_v17, -inf  ;;  %v5449_v16 = vmax.f32 %v5447_v2, %v5448_v18  ;;  %v5455_v27 = vrot.slane %v5454_v8, 1  ;;  %v5462_v58 = vrot.slane %v5461_v15, 1  ;;  %v9167_v57 = vpop.f32.mrb[191].mxu1  ;;  %v9169_v29 = vpop.f32.mrb[191].mxu0 }
 0x26e   : > { %v5468_v54 = vmax.f32 %v5466_v24, %v5467_v9  ;;  %v5473_v42 = vmax.f32 %v5471_v52, %v5472_v5  ;;  %v5479_v47 = vrot.slane %v5478_v39, 4  ;;  %v5486_v36 = vrot.slane %v5485_v43, 4 }
 0x26f   : > { %v5492_v11 = vsel %vm5442_vm3, %v5139_v26, -inf  ;;  %v5456_v48 = vmax.f32 %v5454_v8, %v5455_v27  ;;  %v5463_v55 = vmax.f32 %v5461_v15, %v5462_v58  ;;  %v5052_v37 = vsel %vm462_vm0, %v5017_v41, -inf }
 0x270   : > { %v5469_v7 = vrot.slane %v5468_v54, 1  ;;  %v5493_v1 = vrot.slane %v5492_v11, 4  ;;  %v5474_v0 = vrot.slane %v5473_v42, 2  ;;  %v5480_v35 = vmax.f32 %v5478_v39, %v5479_v47 }
 0x271   : > { %v5487_v13 = vmax.f32 %v5485_v43, %v5486_v36  ;;  %v5956_v10 = vsel %vm5955_vm4, %v5456_v48, %v5449_v16  ;;  %v5053_v59 = vmax.f32 %v9142_v61, %v5052_v37  ;;  %v4984_v41 = vadd.f32 %v9076_v20, %v4945_v51 }
 0x272   : > { %v5470_v50 = vmax.f32 %v5468_v54, %v5469_v7  ;;  %v5494_v45 = vmax.f32 %v5492_v11, %v5493_v1  ;;  %v5958_v40 = vsel %vm5957_vm5, %v5463_v55, %v5956_v10  ;;  %v5475_v30 = vmax.f32 %v5473_v42, %v5474_v0  ;;  %v9176_v49 = vpop.f32.mrb[192].mxu1  ;;  %v9178_v21 = vpop.f32.mrb[192].mxu0  ;;  %v4947_v0 = vld [vmem:[#allocation2 + $0x60] sm:$0xff] }
 0x273   : > { %v5481_v28 = vrot.slane %v5480_v35, 2  ;;  %v5488_v63 = vrot.slane %v5487_v13, 2  ;;  %v5157_v3 = vcombine.high %v5053_v59, %v5053_v59  ;;  %v5164_v34 = vrot.slane %v5053_v59, %v9096_v53  ;;  %v9182_v24 = vpop.f32.mrb[193].mxu1  ;;  %v9184_v17 = vpop.f32.mrb[193].mxu0 }
 0x274   : > { %v5495_v60 = vrot.slane %v5494_v45, 2  ;;  %v5960_v2 = vsel %vm5959_vm6, %v5470_v50, %v5958_v40  ;;  %v5476_v61 = vrot.slane %v5475_v30, 1  ;;  %v9187_v18 = vpop.f32.mrb[194].mxu1  ;;  %v9189_v8 = vpop.f32.mrb[194].mxu0  ;;  %v5016_v51 = vmax.f32 %v4984_v41, 0.0 }
 0x275   : > { %v5482_v38 = vmax.f32 %v5480_v35, %v5481_v28  ;;  %v5489_v52 = vmax.f32 %v5487_v13, %v5488_v63  ;;  %v5171_v9 = vrot.slane %v5157_v3, %v9096_v53  ;;  %v5172_v26 = vcombine.high %v5164_v34, %v5164_v34  ;;  %v9193_v39 = vpop.f32.mrb[195].mxu1  ;;  %v9195_v43 = vpop.f32.mrb[195].mxu0  ;;  %v4810_v3 = vld [vmem:[#allocation2 + $0x78] sm:$0xff] }
 0x276   : > { %v5496_v15 = vmax.f32 %v5494_v45, %v5495_v60  ;;  %v5527_v5 = vsel %vm5442_vm3, %v5164_v34, -inf  ;;  %v5477_v16 = vmax.f32 %v5475_v30, %v5476_v61 }
 0x277   : > { %v5483_v27 = vrot.slane %v5482_v38, 1  ;;  %v5490_v58 = vrot.slane %v5489_v52, 1  ;;  %v5528_v54 = vrot.slane %v5527_v5, 4  ;;  %v5173_v47 = vcombine.high %v5171_v9, %v5171_v9 }
 0x278   : > { %v5497_v42 = vrot.slane %v5496_v15, 1  ;;  %v5534_v36 = vsel %vm5442_vm3, %v5172_v26, -inf  ;;  %v5541_v11 = vsel %vm5442_vm3, %v5171_v9, -inf  ;;  %v5962_v7 = vsel %vm5961_vm7, %v5477_v16, %v5960_v2 }
 0x279   : > { %v5484_v48 = vmax.f32 %v5482_v38, %v5483_v27  ;;  %v5491_v55 = vmax.f32 %v5489_v52, %v5490_v58  ;;  %v5529_v1 = vmax.f32 %v5527_v5, %v5528_v54  ;;  %v5535_v13 = vrot.slane %v5534_v36, 4  ;;  %v4392_v54 = vld [vmem:[#allocation2 + $0x98] sm:$0xff] }
 0x27a   : > { %v5498_v35 = vmax.f32 %v5496_v15, %v5497_v42  ;;  %v5542_v37 = vrot.slane %v5541_v11, 4  ;;  %v5548_v50 = vsel %vm5442_vm3, %v5173_v47, -inf  ;;  %v9208_v40 = vpop.f32.mrb[196].mxu1  ;;  %v9210_v30 = vpop.f32.mrb[196].mxu0  ;;  %v4986_v2 = vadd.f32 %v9076_v20, %v4947_v0 }
 0x27b   : > { %v5964_v10 = vsel %vm5963_vm8, %v5484_v48, %v5962_v7  ;;  %v5530_v45 = vrot.slane %v5529_v1, 2  ;;  %v5549_v59 = vrot.slane %v5548_v50, 4  ;;  %v5536_v63 = vmax.f32 %v5534_v36, %v5535_v13  ;;  %v9214_v34 = vpop.f32.mrb[197].mxu1  ;;  %v9216_v61 = vpop.f32.mrb[197].mxu0  ;;  %v4808_v13 = vld [vmem:[#allocation2 + $0x68] sm:$0xff] }
 0x27c   : > { %v5966_v28 = vsel %vm5965_vm9, %v5491_v55, %v5964_v10  ;;  %v5543_v60 = vmax.f32 %v5541_v11, %v5542_v37  ;;  %v5049_v15 = vsel %vm462_vm0, %v5016_v51, -inf  ;;  %v9220_v9 = vpop.f32.mrb[198].mxu1  ;;  %v9222_v26 = vpop.f32.mrb[198].mxu0  ;;  %v5018_v58 = vmax.f32 %v4986_v2, 0.0 }
 0x27d   : > { %v5968_v38 = vsel %vm5967_vm10, %v5498_v35, %v5966_v28  ;;  %v5531_v52 = vmax.f32 %v5529_v1, %v5530_v45  ;;  %v5550_v41 = vmax.f32 %v5548_v50, %v5549_v59  ;;  %v5537_v5 = vrot.slane %v5536_v63, 2  ;;  %v9227_v42 = vpop.f32.mrb[199].mxu1  ;;  %v9229_v47 = vpop.f32.mrb[199].mxu0  ;;  %v4395_v45 = vld [vmem:[#allocation2 + $0xb0] sm:$0xff] }
 0x27e   : > { %6026 = vst.msk [vmem:[%s9205_s12] sm:$0xff] %vm462_vm0, %v5968_v38  ;;  %v5544_v16 = vrot.slane %v5543_v60, 2  ;;  %v5050_v27 = vmax.f32 %v9124_v6, %v5049_v15  ;;  %v4440_v48 = vadd.f32 %v9131_v46, %v4392_v54  ;;  %v4858_v55 = vadd.f32 %v9098_v32, %v4810_v3  ;;  %v4390_v6 = vld [vmem:[#allocation2 + $0x88] sm:$0xff]  ;;  %v4813_v59 = vld [vmem:[#allocation2 + $0x90] sm:$0xff]  ;;  %v4811_v15 = vld [vmem:[#allocation2 + $0x80] sm:$0xff] }
 0x27f   : > { %v5532_v36 = vrot.slane %v5531_v52, 1  ;;  %v5551_v11 = vrot.slane %v5550_v41, 2  ;;  %v9233_v7 = vmax.f32 %v5536_v63, %v5537_v5  ;;  %v4438_v50 = vadd.f32 %v4390_v6, %v9136_v33  ;;  %v4393_v54 = vld [vmem:[#allocation2 + $0xa0] sm:$0xff]  ;;  %v4396_v6 = vld [vmem:[#allocation2 + $0xb8] sm:$0xff]  ;;  %v4399_v38 = vld [vmem:[#allocation2 + $0xd0] sm:$0xff] }
 0x280   : > { %v9235_v1 = vmax.f32 %v5543_v60, %v5544_v16  ;;  %v5140_v0 = vcombine.high %v5050_v27, %v5050_v27  ;;  %v5147_v35 = vrot.slane %v5050_v27, %v9096_v53  ;;  %4488 = vst.msk [vmem:[#allocation2 + $0x98] sm:$0xff] %vm462_vm0, %v4440_v48  ;;  %4906 = vst.msk [vmem:[#allocation2 + $0x78] sm:$0xff] %vm462_vm0, %v4858_v55  ;;  %v9248_v28 = vsel %vm462_vm0, %v5018_v58, -inf }
 0x281   : > { %v9238_v37 = vmax.f32 %v5550_v41, %v5551_v11  ;;  %v9243_v46 = vmax.f32 %v5531_v52, %v5532_v36  ;;  %4486 = vst.msk [vmem:[#allocation2 + $0x88] sm:$0xff] %vm462_vm0, %v4438_v50  ;;  %v4856_v63 = vadd.f32 %v4808_v13, %v9102_v56  ;;  %v4443_v60 = vadd.f32 %v9153_v12, %v4395_v45 }
 0x282   : > { %v5154_v32 = vrot.slane %v5140_v0, %v9096_v53  ;;  %v5155_v10 = vcombine.high %v5147_v35, %v5147_v35  ;;  %v5499_v51 = vsel %vm5442_vm3, %v5147_v35, -inf  ;;  %v9253_v2 = vpop.f32.mrb[200].mxu1  ;;  %v9255_v33 = vpop.f32.mrb[200].mxu0  ;;  %v4861_v58 = vadd.f32 %v9121_v23, %v4813_v59  ;;  %v4394_v59 = vld [vmem:[#allocation2 + $0xa8] sm:$0xff] }
 0x283   : > { %v5500_v41 = vrot.slane %v5499_v51, 4  ;;  %v9259_v5 = vpop.f32.mrb[201].mxu1  ;;  %v9261_v16 = vpop.f32.mrb[201].mxu0  ;;  %4904 = vst.msk [vmem:[#allocation2 + $0x68] sm:$0xff] %vm462_vm0, %v4856_v63  ;;  %4491 = vst.msk [vmem:[#allocation2 + $0xb0] sm:$0xff] %vm462_vm0, %v4443_v60  ;;  %v4441_v23 = vadd.f32 %v4393_v54, %v9157_v22  ;;  %v4444_v45 = vadd.f32 %v9163_v25, %v4396_v6  ;;  %v4442_v27 = vadd.f32 %v4394_v59, %v9167_v57  ;;  %v4397_v25 = vld [vmem:[#allocation2 + $0xc0] sm:$0xff] }
 0x284   : > { %v5156_v52 = vcombine.high %v5154_v32, %v5154_v32  ;;  %v5506_v56 = vsel %vm5442_vm3, %v5155_v10, -inf  ;;  %v5513_v12 = vsel %vm5442_vm3, %v5154_v32, -inf  ;;  %v9269_v36 = vpop.f32.mrb[202].mxu1  ;;  %v9271_v11 = vpop.f32.mrb[202].mxu0  ;;  %4909 = vst.msk [vmem:[#allocation2 + $0x90] sm:$0xff] %vm462_vm0, %v4861_v58  ;;  %v4859_v10 = vadd.f32 %v4811_v15, %v9126_v19  ;;  %v4400_v54 = vld [vmem:[#allocation2 + $0xd8] sm:$0xff] }
 0x285   : > { %9876 = vst [vmem:[#allocation3_spill] sm:$0xff] %v9271_v11  ;;  %v5501_v48 = vmax.f32 %v5499_v51, %v5500_v41  ;;  %v5507_v55 = vrot.slane %v5506_v56, 4  ;;  %v5514_v0 = vrot.slane %v5513_v12, 4  ;;  %v9274_v13 = vpop.f32.mrb[203].mxu1  ;;  %v9276_v50 = vpop.f32.mrb[203].mxu0  ;;  %4489 = vst.msk [vmem:[#allocation2 + $0xa0] sm:$0xff] %vm462_vm0, %v4441_v23  ;;  %v4447_v22 = vadd.f32 %v9176_v49, %v4399_v38 }
 0x286   : > { %v5520_v35 = vsel %vm5442_vm3, %v5156_v52, -inf  ;;  %9877 = vst [vmem:[#allocation5_spill] sm:$0xff] %v9276_v50  ;;  %4907 = vst.msk [vmem:[#allocation2 + $0x80] sm:$0xff] %vm462_vm0, %v4859_v10  ;;  %v4445_v58 = vadd.f32 %v4397_v25, %v9182_v24  ;;  %v4398_v49 = vld [vmem:[#allocation2 + $0xc8] sm:$0xff] }
 0x287   : > { %v5521_v32 = vrot.slane %v5520_v35, 4  ;;  %v5502_v51 = vrot.slane %v5501_v48, 2  ;;  %v5508_v63 = vmax.f32 %v5506_v56, %v5507_v55  ;;  %v5515_v60 = vmax.f32 %v5513_v12, %v5514_v0  ;;  %v4949_v41 = vld [vmem:[#allocation2 + $0x78] sm:$0xff]  ;;  %4492 = vst.msk [vmem:[#allocation2 + $0xb8] sm:$0xff] %vm462_vm0, %v4444_v45  ;;  %4490 = vst.msk [vmem:[#allocation2 + $0xa8] sm:$0xff] %vm462_vm0, %v4442_v27 }
 0x288   : > { %v4814_v52 = vld [vmem:[#allocation2 + $0x98] sm:$0xff]  ;;  %v4988_v50 = vadd.f32 %v9076_v20, %v4949_v41  ;;  %v4812_v57 = vld [vmem:[#allocation2 + $0x88] sm:$0xff]  ;;  %4495 = vst.msk [vmem:[#allocation2 + $0xd0] sm:$0xff] %vm462_vm0, %v4447_v22  ;;  %4493 = vst.msk [vmem:[#allocation2 + $0xc0] sm:$0xff] %vm462_vm0, %v4445_v58 }
 0x289   : > { %v5522_v3 = vmax.f32 %v5520_v35, %v5521_v32  ;;  %v4862_v19 = vadd.f32 %v9133_v14, %v4814_v52  ;;  %v5503_v15 = vmax.f32 %v5501_v48, %v5502_v51  ;;  %v5509_v56 = vrot.slane %v5508_v63, 2  ;;  %v4403_v22 = vld [vmem:[#allocation2 + $0xf0] sm:$0xff] }
 0x28a   : > { %v5516_v12 = vrot.slane %v5515_v60, 2  ;;  %v5020_v0 = vmax.f32 %v4988_v50, 0.0  ;;  %v4860_v35 = vadd.f32 %v4812_v57, %v9138_v31  ;;  %v4448_v14 = vadd.f32 %v9187_v18, %v4400_v54  ;;  %v9295_v38 = vpop.f32.mrb[204].mxu1  ;;  %v9297_v48 = vpop.f32.mrb[204].mxu0  ;;  %v4948_v24 = vld [vmem:[#allocation2 + $0x68] sm:$0xff]  ;;  %v4817_v23 = vld [vmem:[#allocation2 + $0xb0] sm:$0xff] }
 0x28b   : > { %v5523_v55 = vrot.slane %v5522_v3, 2  ;;  %4910 = vst.msk [vmem:[#allocation2 + $0x98] sm:$0xff] %vm462_vm0, %v4862_v19  ;;  %9878 = vst [vmem:[#allocation4_spill] sm:$0xff] %v9297_v48  ;;  %v5504_v27 = vrot.slane %v5503_v15, 1  ;;  %v5510_v6 = vmax.f32 %v5508_v63, %v5509_v56  ;;  %v4446_v50 = vadd.f32 %v4398_v49, %v9193_v39  ;;  %v9301_v10 = vpop.f32.mrb[205].mxu1  ;;  %v9303_v31 = vpop.f32.mrb[205].mxu0 }
 0x28c   : > { %v5517_v32 = vmax.f32 %v5515_v60, %v5516_v12  ;;  %9879 = vst [vmem:[#allocation7_spill] sm:$0xff] %v9303_v31  ;;  %v5055_v18 = vsel %vm462_vm0, %v5020_v0, -inf  ;;  %v4987_v59 = vadd.f32 %v9076_v20, %v4948_v24  ;;  %4908 = vst.msk [vmem:[#allocation2 + $0x88] sm:$0xff] %vm462_vm0, %v4860_v35  ;;  %v4865_v51 = vadd.f32 %v9155_v4, %v4817_v23  ;;  %v9310_v63 = vpop.f32.mrb[206].mxu1  ;;  %v9312_v60 = vpop.f32.mrb[206].mxu0 }
 0x28d   : > { %v5524_v45 = vmax.f32 %v5522_v3, %v5523_v55  ;;  %4496 = vst.msk [vmem:[#allocation2 + $0xd8] sm:$0xff] %vm462_vm0, %v4448_v14  ;;  %9880 = vst [vmem:[#allocation6_spill] sm:$0xff] %v9312_v60  ;;  %v9881_v39 = vrot.slane %v9233_v7, 1  ;;  %v5511_v52 = vrot.slane %v5510_v6, 1  ;;  %v5056_v19 = vmax.f32 %v9248_v28, %v5055_v18  ;;  %v9319_v25 = vpop.f32.mrb[207].mxu1  ;;  %v9321_v4 = vpop.f32.mrb[207].mxu0 }
 0x28e   : > { %v5518_v3 = vrot.slane %v5517_v32, 1  ;;  %4494 = vst.msk [vmem:[#allocation2 + $0xc8] sm:$0xff] %vm462_vm0, %v4446_v50  ;;  %9882 = vst [vmem:[#allocation9_spill] sm:$0xff] %v9321_v4  ;;  %v5505_v56 = vmax.f32 %v5503_v15, %v5504_v27  ;;  %v5019_v57 = vmax.f32 %v4987_v59, 0.0  ;;  %v4451_v58 = vadd.f32 %v9208_v40, %v4403_v22  ;;  %v4950_v28 = vld [vmem:[#allocation2 + $0x80] sm:$0xff] }
 0x28f   : > { %v5540_v41 = vmax.f32 %v9233_v7, %v9881_v39  ;;  %v5525_v12 = vrot.slane %v5524_v45, 1  ;;  %4913 = vst.msk [vmem:[#allocation2 + $0xb0] sm:$0xff] %vm462_vm0, %v4865_v51  ;;  %v5512_v54 = vmax.f32 %v5510_v6, %v5511_v52  ;;  %v5174_v55 = vcombine.high %v5056_v19, %v5056_v19 }
 0x290   : > { %v5519_v7 = vmax.f32 %v5517_v32, %v5518_v3  ;;  %v5181_v0 = vrot.slane %v5056_v19, %v9096_v53  ;;  %v9883_v35 = vrot.slane %v9235_v1, 1  ;;  %v9884_v49 = vrot.slane %v9238_v37, 1  ;;  %4499 = vst.msk [vmem:[#allocation2 + $0xf0] sm:$0xff] %vm462_vm0, %v4451_v58 }
 0x291   : > { %v5526_v27 = vmax.f32 %v5524_v45, %v5525_v12  ;;  %v4989_v24 = vadd.f32 %v9076_v20, %v4950_v28  ;;  %v5969_v40 = vsel %vm5955_vm4, %v5512_v54, %v5505_v56  ;;  %v5188_v6 = vrot.slane %v5174_v55, %v9096_v53 }
 0x292   : > { %v5547_v14 = vmax.f32 %v9235_v1, %v9883_v35  ;;  %v5554_v15 = vmax.f32 %v9238_v37, %v9884_v49  ;;  %v5189_v32 = vcombine.high %v5181_v0, %v5181_v0  ;;  %v5555_v23 = vsel %vm5442_vm3, %v5181_v0, -inf  ;;  %v4952_v51 = vld [vmem:[#allocation2 + $0x98] sm:$0xff]  ;;  %v9339_v37 = vpop.f32.mrb[208].mxu1  ;;  %v9341_v45 = vpop.f32.mrb[208].mxu0 }
 0x293   : > { %v5970_v50 = vsel %vm5957_vm5, %v5519_v7, %v5969_v40  ;;  %v5556_v18 = vrot.slane %v5555_v23, 4  ;;  %v5057_v1 = vsel %vm462_vm0, %v5019_v57, -inf  ;;  %v5021_v59 = vmax.f32 %v4989_v24, 0.0  ;;  %9885 = vst [vmem:[#allocation8_spill] sm:$0xff] %v9341_v45  ;;  %v9346_v22 = vpop.f32.mrb[209].mxu1  ;;  %v9348_v56 = vpop.f32.mrb[209].mxu0 }
 0x294   : > { %v5971_v39 = vsel %vm5959_vm6, %v5526_v27, %v5970_v50  ;;  %v5190_v52 = vcombine.high %v5188_v6, %v5188_v6  ;;  %v5562_v3 = vsel %vm5442_vm3, %v5189_v32, -inf  ;;  %v5569_v19 = vsel %vm5442_vm3, %v5188_v6, -inf  ;;  %9886 = vst [vmem:[#allocation11_spill] sm:$0xff] %v9348_v56  ;;  %v9352_v7 = vpop.f32.mrb[210].mxu1  ;;  %v9354_v55 = vpop.f32.mrb[210].mxu0 }
 0x295   : > { %v5972_v12 = vsel %vm5961_vm7, %v9243_v46, %v5971_v39  ;;  %v5557_v57 = vmax.f32 %v5555_v23, %v5556_v18  ;;  %v5563_v58 = vrot.slane %v5562_v3, 4  ;;  %v5570_v54 = vrot.slane %v5569_v19, 4  ;;  %9887 = vst [vmem:[#allocation10_spill] sm:$0xff] %v9354_v55  ;;  %v9360_v24 = vpop.f32.mrb[211].mxu1  ;;  %v9362_v46 = vpop.f32.mrb[211].mxu0 }
 0x296   : > { %v5973_v0 = vsel %vm5963_vm8, %v5540_v41, %v5972_v12  ;;  %v5576_v28 = vsel %vm5442_vm3, %v5190_v52, -inf  ;;  %v5058_v35 = vsel %vm462_vm0, %v5021_v59, -inf  ;;  %v4991_v49 = vadd.f32 %v9076_v20, %v4952_v51  ;;  %v4954_v27 = vld [vmem:[#allocation2 + $0xb0] sm:$0xff]  ;;  %9888 = vst [vmem:[#allocation14_spill] sm:$0xff] %v9362_v46 }
 0x297   : > { %v5974_v40 = vsel %vm5965_vm9, %v5547_v14, %v5973_v0  ;;  %v5558_v6 = vrot.slane %v5557_v57, 2  ;;  %v5564_v32 = vmax.f32 %v5562_v3, %v5563_v58  ;;  %v5571_v23 = vmax.f32 %v5569_v19, %v5570_v54 }
 0x298   : > { %v5975_v50 = vsel %vm5967_vm10, %v5554_v15, %v5974_v40  ;;  %v5577_v18 = vrot.slane %v5576_v28, 4  ;;  %v5059_v41 = vmax.f32 %v5057_v1, %v5058_v35  ;;  %v5023_v39 = vmax.f32 %v4991_v49, 0.0 }
 0x299   : > { %6027 = vst.msk [vmem:[%s9205_s12 + $0x8] sm:$0xff] %vm462_vm0, %v5975_v50  ;;  %v5559_v59 = vmax.f32 %v5557_v57, %v5558_v6  ;;  %v5565_v52 = vrot.slane %v5564_v32, 2  ;;  %v5572_v51 = vrot.slane %v5571_v23, 2  ;;  %v4993_v12 = vadd.f32 %v9076_v20, %v4954_v27 }
 0x29a   : > { %v5578_v55 = vmax.f32 %v5576_v28, %v5577_v18  ;;  %v5191_v56 = vcombine.high %v5059_v41, %v5059_v41  ;;  %v5198_v46 = vrot.slane %v5059_v41, %v9096_v53  ;;  %v5063_v14 = vsel %vm462_vm0, %v5023_v39, -inf  ;;  %v9371_v54 = vpop.f32.mrb[212].mxu1  ;;  %v9373_v1 = vpop.f32.mrb[212].mxu0 }
 0x29b   : > { %v5560_v3 = vrot.slane %v5559_v59, 1  ;;  %v5566_v19 = vmax.f32 %v5564_v32, %v5565_v52  ;;  %v5573_v58 = vmax.f32 %v5571_v23, %v5572_v51  ;;  %v5025_v15 = vmax.f32 %v4993_v12, 0.0  ;;  %9889 = vst [vmem:[#allocation12_spill] sm:$0xff] %v9373_v1  ;;  %v9377_v28 = vpop.f32.mrb[213].mxu1  ;;  %v9379_v27 = vpop.f32.mrb[213].mxu0 }
 0x29c   : > { %v5579_v0 = vrot.slane %v5578_v55, 2  ;;  %v5205_v57 = vrot.slane %v5191_v56, %v9096_v53  ;;  %v5206_v35 = vcombine.high %v5198_v46, %v5198_v46  ;;  %v5583_v49 = vsel %vm5442_vm3, %v5198_v46, -inf  ;;  %9890 = vst [vmem:[#allocation15_spill] sm:$0xff] %v9379_v27  ;;  %v9381_v23 = vpop.f32.mrb[214].mxu1  ;;  %v9383_v18 = vpop.f32.mrb[214].mxu0 }
 0x29d   : > { %v5561_v40 = vmax.f32 %v5559_v59, %v5560_v3  ;;  %v5567_v6 = vrot.slane %v5566_v19, 1  ;;  %v5574_v50 = vrot.slane %v5573_v58, 1  ;;  %v5584_v32 = vrot.slane %v5583_v49, 4  ;;  %9891 = vst [vmem:[#allocation13_spill] sm:$0xff] %v9383_v18  ;;  %v9387_v51 = vpop.f32.mrb[215].mxu1  ;;  %v9389_v46 = vpop.f32.mrb[215].mxu0 }
 0x29e   : > { %v5580_v41 = vmax.f32 %v5578_v55, %v5579_v0  ;;  %v5207_v39 = vcombine.high %v5205_v57, %v5205_v57  ;;  %v5590_v52 = vsel %vm5442_vm3, %v5206_v35, -inf  ;;  %v5597_v56 = vsel %vm5442_vm3, %v5205_v57, -inf  ;;  %9892 = vst [vmem:[#allocation16_spill] sm:$0xff] %v9389_v46  ;;  %v4815_v55 = vld [vmem:[#allocation2 + $0xa0] sm:$0xff] }
 0x29f   : > { %v5568_v12 = vmax.f32 %v5566_v19, %v5567_v6  ;;  %v5575_v27 = vmax.f32 %v5573_v58, %v5574_v50  ;;  %v5585_v59 = vmax.f32 %v5583_v49, %v5584_v32  ;;  %v5591_v3 = vrot.slane %v5590_v52, 4  ;;  %v4818_v58 = vld [vmem:[#allocation2 + $0xb8] sm:$0xff] }
 0x2a0   : > { %v5581_v1 = vrot.slane %v5580_v41, 1  ;;  %v5598_v45 = vrot.slane %v5597_v56, 4  ;;  %v5604_v4 = vsel %vm5442_vm3, %v5207_v39, -inf  ;;  %v5064_v18 = vsel %vm462_vm0, %v5025_v15, -inf }
 0x2a1   : > { %v5976_v0 = vsel %vm5955_vm4, %v5568_v12, %v5561_v40  ;;  %v5586_v35 = vrot.slane %v5585_v59, 2  ;;  %v5592_v60 = vmax.f32 %v5590_v52, %v5591_v3  ;;  %v5605_v57 = vrot.slane %v5604_v4, 4 }
 0x2a2   : > { %v5582_v31 = vmax.f32 %v5580_v41, %v5581_v1  ;;  %v5977_v48 = vsel %vm5957_vm5, %v5575_v27, %v5976_v0  ;;  %v5599_v46 = vmax.f32 %v5597_v56, %v5598_v45  ;;  %v5065_v19 = vmax.f32 %v5063_v14, %v5064_v18  ;;  %v4816_v0 = vld [vmem:[#allocation2 + $0xa8] sm:$0xff] }
 0x2a3   : > { %v5587_v49 = vmax.f32 %v5585_v59, %v5586_v35  ;;  %v5593_v6 = vrot.slane %v5592_v60, 2  ;;  %v5606_v50 = vmax.f32 %v5604_v4, %v5605_v57  ;;  %v4863_v32 = vadd.f32 %v4815_v55, %v9159_v44  ;;  %v4951_v35 = vld [vmem:[#allocation2 + $0x90] sm:$0xff] }
 0x2a4   : > { %v5600_v39 = vrot.slane %v5599_v46, 2  ;;  %v5978_v15 = vsel %vm5959_vm6, %v5582_v31, %v5977_v48  ;;  %v5225_v11 = vcombine.high %v5065_v19, %v5065_v19  ;;  %v5232_v40 = vrot.slane %v5065_v19, %v9096_v53 }
 0x2a5   : > { %v5588_v12 = vrot.slane %v5587_v49, 1  ;;  %v5594_v52 = vmax.f32 %v5592_v60, %v5593_v6  ;;  %v5607_v3 = vrot.slane %v5606_v50, 2  ;;  %4911 = vst.msk [vmem:[#allocation2 + $0xa0] sm:$0xff] %vm462_vm0, %v4863_v32  ;;  %v4866_v45 = vadd.f32 %v9165_v62, %v4818_v58  ;;  %v4821_v6 = vld [vmem:[#allocation2 + $0xd0] sm:$0xff] }
 0x2a6   : > { %v5601_v14 = vmax.f32 %v5599_v46, %v5600_v39  ;;  %v5239_v1 = vrot.slane %v5225_v11, %v9096_v53  ;;  %v5240_v27 = vcombine.high %v5232_v40, %v5232_v40  ;;  %v5639_v4 = vsel %vm5442_vm3, %v5232_v40, -inf }
 0x2a7   : > { %v5589_v44 = vmax.f32 %v5587_v49, %v5588_v12  ;;  %v5595_v18 = vrot.slane %v5594_v52, 1  ;;  %v5608_v41 = vmax.f32 %v5606_v50, %v5607_v3  ;;  %v5640_v48 = vrot.slane %v5639_v4, 4  ;;  %4914 = vst.msk [vmem:[#allocation2 + $0xb8] sm:$0xff] %vm462_vm0, %v4866_v45  ;;  %v4819_v12 = vld [vmem:[#allocation2 + $0xc0] sm:$0xff] }
 0x2a8   : > { %v5602_v31 = vrot.slane %v5601_v14, 1  ;;  %v5241_v56 = vcombine.high %v5239_v1, %v5239_v1  ;;  %v5646_v60 = vsel %vm5442_vm3, %v5240_v27, -inf  ;;  %v5653_v59 = vsel %vm5442_vm3, %v5239_v1, -inf  ;;  %v4822_v1 = vld [vmem:[#allocation2 + $0xd8] sm:$0xff] }
 0x2a9   : > { %v5596_v55 = vmax.f32 %v5594_v52, %v5595_v18  ;;  %v5609_v62 = vrot.slane %v5608_v41, 1  ;;  %v5979_v46 = vsel %vm5961_vm7, %v5589_v44, %v5978_v15  ;;  %v5641_v11 = vmax.f32 %v5639_v4, %v5640_v48  ;;  %v4401_v18 = vld [vmem:[#allocation2 + $0xe0] sm:$0xff] }
 0x2aa   : > { %v5603_v57 = vmax.f32 %v5601_v14, %v5602_v31  ;;  %v5647_v19 = vrot.slane %v5646_v60, 4  ;;  %v5654_v58 = vrot.slane %v5653_v59, 4  ;;  %v5660_v49 = vsel %vm5442_vm3, %v5241_v56, -inf }
 0x2ab   : > { %v5610_v50 = vmax.f32 %v5608_v41, %v5609_v62  ;;  %v5980_v32 = vsel %vm5963_vm8, %v5596_v55, %v5979_v46  ;;  %v5642_v39 = vrot.slane %v5641_v11, 2  ;;  %v5661_v40 = vrot.slane %v5660_v49, 4  ;;  %v4820_v41 = vld [vmem:[#allocation2 + $0xc8] sm:$0xff] }
 0x2ac   : > { %v5981_v52 = vsel %vm5965_vm9, %v5603_v57, %v5980_v32  ;;  %v5648_v3 = vmax.f32 %v5646_v60, %v5647_v19  ;;  %v5655_v15 = vmax.f32 %v5653_v59, %v5654_v58  ;;  %v4864_v45 = vadd.f32 %v4816_v0, %v9169_v29  ;;  %v4404_v60 = vld [vmem:[#allocation2 + $0xf8] sm:$0xff]  ;;  %v4402_v62 = vld [vmem:[#allocation2 + $0xe8] sm:$0xff]  ;;  %v4405_v57 = vld [vmem:[#allocation2 + $0x100] sm:$0xff] }
 0x2ad   : > { %v9411_v14 = vadd.f32 %v9076_v20, %v4951_v35  ;;  %v5982_v27 = vsel %vm5967_vm10, %v5610_v50, %v5981_v52  ;;  %v5662_v4 = vmax.f32 %v5660_v49, %v5661_v40  ;;  %v4869_v44 = vadd.f32 %v9178_v21, %v4821_v6  ;;  %v4825_v20 = vld [vmem:[#allocation2 + $0xf0] sm:$0xff]  ;;  %v4408_v19 = vld [vmem:[#allocation2 + $0x118] sm:$0xff]  ;;  %v4406_v49 = vld [vmem:[#allocation2 + $0x108] sm:$0xff] }
 0x2ae   : > { %6028 = vst.msk [vmem:[%s9205_s12 + $0x10] sm:$0xff] %vm462_vm0, %v5982_v27  ;;  %v5649_v48 = vrot.slane %v5648_v3, 2  ;;  %v5656_v31 = vrot.slane %v5655_v15, 2  ;;  %4912 = vst.msk [vmem:[#allocation2 + $0xa8] sm:$0xff] %vm462_vm0, %v4864_v45  ;;  %v4449_v56 = vadd.f32 %v4401_v18, %v9214_v34  ;;  %v4867_v29 = vadd.f32 %v4819_v12, %v9184_v17  ;;  %v4411_v6 = vld [vmem:[#allocation2 + $0x130] sm:$0xff]  ;;  %v4409_v50 = vld [vmem:[#allocation2 + $0x120] sm:$0xff] }
 0x2af   : > { %v9420_v59 = vmax.f32 %v5641_v11, %v5642_v39  ;;  %4917 = vst.msk [vmem:[#allocation2 + $0xd0] sm:$0xff] %vm462_vm0, %v4869_v44  ;;  %v4452_v21 = vadd.f32 %v9220_v9, %v4404_v60  ;;  %v4870_v55 = vadd.f32 %v9189_v8, %v4822_v1  ;;  %v5663_v0 = vrot.slane %v5662_v4, 2  ;;  %v4407_v11 = vld [vmem:[#allocation2 + $0x110] sm:$0xff]  ;;  %v4412_v40 = vld [vmem:[#allocation2 + $0x138] sm:$0xff]  ;;  %v4410_v12 = vld [vmem:[#allocation2 + $0x128] sm:$0xff] }
 0x2b0   : > { %v9425_v46 = vmax.f32 %v5648_v3, %v5649_v48  ;;  %4497 = vst.msk [vmem:[#allocation2 + $0xe0] sm:$0xff] %vm462_vm0, %v4449_v56  ;;  %4915 = vst.msk [vmem:[#allocation2 + $0xc0] sm:$0xff] %vm462_vm0, %v4867_v29  ;;  %v4450_v17 = vadd.f32 %v4402_v62, %v9227_v42  ;;  %v4868_v34 = vadd.f32 %v4820_v41, %v9195_v43  ;;  %v5022_v58 = vmax.f32 %v9411_v14, 0.0  ;;  %v4416_v45 = vld [vmem:[#allocation2 + $0x158] sm:$0xff]  ;;  %v9465_v44 = vld [vmem:[%s9706_s2] ss:$0 sm:$0xff] }
 0x2b1   : > { %v9431_v35 = vmax.f32 %v5655_v15, %v5656_v31  ;;  %4500 = vst.msk [vmem:[#allocation2 + $0xf8] sm:$0xff] %vm462_vm0, %v4452_v21  ;;  %4918 = vst.msk [vmem:[#allocation2 + $0xd8] sm:$0xff] %vm462_vm0, %v4870_v55  ;;  %v4455_v8 = vadd.f32 %v9253_v2, %v4407_v11  ;;  %v4873_v9 = vadd.f32 %v9210_v30, %v4825_v20  ;;  %v5644_v32 = vrot.slane %v9420_v59, 1  ;;  %v4418_v48 = vld [vmem:[#allocation2 + $0x168] sm:$0xff] }
 0x2b2   : > { %4498 = vst.msk [vmem:[#allocation2 + $0xe8] sm:$0xff] %vm462_vm0, %v4450_v17  ;;  %4916 = vst.msk [vmem:[#allocation2 + $0xc8] sm:$0xff] %vm462_vm0, %v4868_v34  ;;  %v4453_v43 = vadd.f32 %v4405_v57, %v9259_v5  ;;  %v4456_v42 = vadd.f32 %v9269_v36, %v4408_v19  ;;  %v4454_v30 = vadd.f32 %v4406_v49, %v9274_v13  ;;  %v4415_v5 = vld [vmem:[#allocation2 + $0x150] sm:$0xff]  ;;  %v5651_v36 = vrot.slane %v9425_v46, 1  ;;  %v4413_v13 = vld [vmem:[#allocation2 + $0x140] sm:$0xff] }
 0x2b3   : > { %4503 = vst.msk [vmem:[#allocation2 + $0x110] sm:$0xff] %vm462_vm0, %v4455_v8  ;;  %4921 = vst.msk [vmem:[#allocation2 + $0xf0] sm:$0xff] %vm462_vm0, %v4873_v9  ;;  %v4459_v2 = vadd.f32 %v9295_v38, %v4411_v6  ;;  %v4457_v39 = vadd.f32 %v4409_v50, %v9301_v10  ;;  %v9449_v52 = vmax.f32 %v5662_v4, %v5663_v0  ;;  %v4414_v38 = vld [vmem:[#allocation2 + $0x148] sm:$0xff]  ;;  %v5658_v10 = vrot.slane %v9431_v35, 1  ;;  %v4419_v4 = vld [vmem:[#allocation2 + $0x170] sm:$0xff] }
 0x2b4   : > { %4501 = vst.msk [vmem:[#allocation2 + $0x100] sm:$0xff] %vm462_vm0, %v4453_v43  ;;  %4504 = vst.msk [vmem:[#allocation2 + $0x118] sm:$0xff] %vm462_vm0, %v4456_v42  ;;  %v4460_v3 = vadd.f32 %v9310_v63, %v4412_v40  ;;  %v4458_v15 = vadd.f32 %v4410_v12, %v9319_v25  ;;  %v4463_v14 = vadd.f32 %v9339_v37, %v4415_v5  ;;  %v4417_v25 = vld [vmem:[#allocation2 + $0x160] sm:$0xff]  ;;  %v5060_v31 = vsel %vm462_vm0, %v5022_v58, -inf }
 0x2b5   : > { %v4953_v1 = vld [vmem:[#allocation2 + $0xa8] sm:$0xff]  ;;  %4502 = vst.msk [vmem:[#allocation2 + $0x108] sm:$0xff] %vm462_vm0, %v4454_v30  ;;  %4507 = vst.msk [vmem:[#allocation2 + $0x130] sm:$0xff] %vm462_vm0, %v4459_v2  ;;  %v4461_v27 = vadd.f32 %v4413_v13, %v9346_v22  ;;  %v4464_v63 = vadd.f32 %v9352_v7, %v4416_v45  ;;  %v4462_v41 = vadd.f32 %v4414_v38, %v9360_v24  ;;  %v4420_v7 = vld [vmem:[#allocation2 + $0x178] sm:$0xff] }
 0x2b6   : > { %4505 = vst.msk [vmem:[#allocation2 + $0x120] sm:$0xff] %vm462_vm0, %v4457_v39  ;;  %v4992_v18 = vadd.f32 %v9465_v44, %v4953_v1  ;;  %4508 = vst.msk [vmem:[#allocation2 + $0x138] sm:$0xff] %vm462_vm0, %v4460_v3  ;;  %v4467_v37 = vadd.f32 %v9371_v54, %v4419_v4  ;;  %v4465_v22 = vadd.f32 %v4417_v25, %v9377_v28  ;;  %v5665_v28 = vrot.slane %v9449_v52, 1  ;;  %v9895_v45 = vld [vmem:[#allocation4_spill] sm:$0xff] }
 0x2b7   : > { %4506 = vst.msk [vmem:[#allocation2 + $0x128] sm:$0xff] %vm462_vm0, %v4458_v15  ;;  %v9475_v56 = vmax.f32 %v9420_v59, %v5644_v32  ;;  %v4955_v29 = vld [vmem:[#allocation2 + $0xc0] sm:$0xff]  ;;  %4511 = vst.msk [vmem:[#allocation2 + $0x150] sm:$0xff] %vm462_vm0, %v4463_v14  ;;  %v4468_v24 = vadd.f32 %v9381_v23, %v4420_v7  ;;  %v4466_v54 = vadd.f32 %v4418_v48, %v9387_v51 }
 0x2b8   : > { %v4823_v60 = vld [vmem:[#allocation2 + $0xe0] sm:$0xff]  ;;  %4509 = vst.msk [vmem:[#allocation2 + $0x140] sm:$0xff] %vm462_vm0, %v4461_v27  ;;  %4512 = vst.msk [vmem:[#allocation2 + $0x158] sm:$0xff] %vm462_vm0, %v4464_v63  ;;  %v5024_v20 = vmax.f32 %v4992_v18, 0.0  ;;  %v4994_v21 = vadd.f32 %v9465_v44, %v4955_v29  ;;  %v4957_v55 = vld [vmem:[#allocation2 + $0xd8] sm:$0xff]  ;;  %v9489_v0 = vmax.f32 %v9425_v46, %v5651_v36  ;;  %v9492_v23 = vmax.f32 %v9431_v35, %v5658_v10 }
 0x2b9   : > { %v4871_v59 = vadd.f32 %v4823_v60, %v9216_v61  ;;  %v4826_v62 = vld [vmem:[#allocation2 + $0xf8] sm:$0xff]  ;;  %4510 = vst.msk [vmem:[#allocation2 + $0x148] sm:$0xff] %vm462_vm0, %v4462_v41  ;;  %4515 = vst.msk [vmem:[#allocation2 + $0x170] sm:$0xff] %vm462_vm0, %v4467_v37  ;;  %v4996_v51 = vadd.f32 %v9465_v44, %v4957_v55  ;;  %v4956_v17 = vld [vmem:[#allocation2 + $0xc8] sm:$0xff]  ;;  %v9512_v40 = vmax.f32 %v9449_v52, %v5665_v28 }
 0x2ba   : > { %4513 = vst.msk [vmem:[#allocation2 + $0x160] sm:$0xff] %vm462_vm0, %v4465_v22  ;;  %v4874_v34 = vadd.f32 %v9222_v26, %v4826_v62  ;;  %v4824_v11 = vld [vmem:[#allocation2 + $0xe8] sm:$0xff]  ;;  %4516 = vst.msk [vmem:[#allocation2 + $0x178] sm:$0xff] %vm462_vm0, %v4468_v24  ;;  %v5061_v61 = vsel %vm462_vm0, %v5024_v20, -inf  ;;  %v5026_v8 = vmax.f32 %v4994_v21, 0.0  ;;  %v4995_v9 = vadd.f32 %v9465_v44, %v4956_v17  ;;  %v4959_v46 = vld [vmem:[#allocation2 + $0xf0] sm:$0xff] }
 0x2bb   : > { %4514 = vst.msk [vmem:[#allocation2 + $0x168] sm:$0xff] %vm462_vm0, %v4466_v54  ;;  %4919 = vst.msk [vmem:[#allocation2 + $0xe0] sm:$0xff] %vm462_vm0, %v4871_v59  ;;  %v4872_v35 = vadd.f32 %v4824_v11, %v9229_v47  ;;  %v4829_v57 = vld [vmem:[#allocation2 + $0x110] sm:$0xff]  ;;  %v5062_v19 = vmax.f32 %v5060_v31, %v5061_v61  ;;  %v5028_v58 = vmax.f32 %v4996_v51, 0.0  ;;  %v9503_v26 = vadd.f32 %v9465_v44, %v4959_v46  ;;  %v4827_v42 = vld [vmem:[#allocation2 + $0x100] sm:$0xff] }
 0x2bc   : > { %4922 = vst.msk [vmem:[#allocation2 + $0xf8] sm:$0xff] %vm462_vm0, %v4874_v34  ;;  %v4877_v43 = vadd.f32 %v9255_v33, %v4829_v57  ;;  %v4830_v49 = vld [vmem:[#allocation2 + $0x118] sm:$0xff]  ;;  %v5066_v6 = vsel %vm462_vm0, %v5026_v8, -inf  ;;  %v5027_v50 = vmax.f32 %v4995_v9, 0.0  ;;  %v4875_v32 = vadd.f32 %v4827_v42, %v9261_v16  ;;  %v9893_v47 = vld [vmem:[#allocation3_spill] sm:$0xff]  ;;  %v4828_v2 = vld [vmem:[#allocation2 + $0x108] sm:$0xff] }
 0x2bd   : > { %4920 = vst.msk [vmem:[#allocation2 + $0xe8] sm:$0xff] %vm462_vm0, %v4872_v35  ;;  %v4878_v30 = vadd.f32 %v9893_v47, %v4830_v49  ;;  %v4833_v39 = vld [vmem:[#allocation2 + $0x130] sm:$0xff]  ;;  %v5208_v12 = vcombine.high %v5062_v19, %v5062_v19  ;;  %v5215_v5 = vrot.slane %v5062_v19, %v9096_v53  ;;  %v5067_v33 = vsel %vm462_vm0, %v5028_v58, -inf  ;;  %v4831_v36 = vld [vmem:[#allocation2 + $0x120] sm:$0xff]  ;;  %v4834_v38 = vld [vmem:[#allocation2 + $0x138] sm:$0xff] }
 0x2be   : > { %4925 = vst.msk [vmem:[#allocation2 + $0x110] sm:$0xff] %vm462_vm0, %v4877_v43  ;;  %v5068_v3 = vmax.f32 %v5066_v6, %v5067_v33  ;;  %v5030_v15 = vmax.f32 %v9503_v26, 0.0  ;;  %4923 = vst.msk [vmem:[#allocation2 + $0x100] sm:$0xff] %vm462_vm0, %v4875_v32  ;;  %v9894_v16 = vld [vmem:[#allocation5_spill] sm:$0xff]  ;;  %v4881_v52 = vadd.f32 %v9895_v45, %v4833_v39  ;;  %v9525_v27 = vsel %vm462_vm0, %v5027_v50, -inf  ;;  %v9896_v18 = vld [vmem:[#allocation7_spill] sm:$0xff] }
 0x2bf   : > { %4926 = vst.msk [vmem:[#allocation2 + $0x118] sm:$0xff] %vm462_vm0, %v4878_v30  ;;  %v4876_v13 = vadd.f32 %v4828_v2, %v9894_v16  ;;  %v5222_v10 = vrot.slane %v5208_v12, %v9096_v53  ;;  %v5223_v1 = vcombine.high %v5215_v5, %v5215_v5  ;;  %v5611_v14 = vsel %vm5442_vm3, %v5215_v5, -inf  ;;  %v9897_v31 = vld [vmem:[#allocation6_spill] sm:$0xff] }
 0x2c0   : > { %v5612_v63 = vrot.slane %v5611_v14, 4  ;;  %v5242_v4 = vcombine.high %v5068_v3, %v5068_v3  ;;  %v5249_v25 = vrot.slane %v5068_v3, %v9096_v53  ;;  %4929 = vst.msk [vmem:[#allocation2 + $0x130] sm:$0xff] %vm462_vm0, %v4881_v52  ;;  %v4879_v41 = vadd.f32 %v4831_v36, %v9896_v18 }
 0x2c1   : > { %4924 = vst.msk [vmem:[#allocation2 + $0x108] sm:$0xff] %vm462_vm0, %v4876_v13  ;;  %v5224_v37 = vcombine.high %v5222_v10, %v5222_v10  ;;  %v5618_v22 = vsel %vm5442_vm3, %v5223_v1, -inf  ;;  %v5625_v7 = vsel %vm5442_vm3, %v5222_v10, -inf  ;;  %v4882_v29 = vadd.f32 %v9897_v31, %v4834_v38 }
 0x2c2   : > { %v4958_v48 = vld [vmem:[#allocation2 + $0xe0] sm:$0xff]  ;;  %v5613_v60 = vmax.f32 %v5611_v14, %v5612_v63  ;;  %v5619_v24 = vrot.slane %v5618_v22, 4  ;;  %v5626_v54 = vrot.slane %v5625_v7, 4  ;;  %v5256_v28 = vrot.slane %v5242_v4, %v9096_v53  ;;  %4927 = vst.msk [vmem:[#allocation2 + $0x120] sm:$0xff] %vm462_vm0, %v4879_v41 }
 0x2c3   : > { %v5632_v20 = vsel %vm5442_vm3, %v5224_v37, -inf  ;;  %v5257_v21 = vcombine.high %v5249_v25, %v5249_v25  ;;  %v5667_v55 = vsel %vm5442_vm3, %v5249_v25, -inf  ;;  %v4997_v59 = vadd.f32 %v9465_v44, %v4958_v48  ;;  %4930 = vst.msk [vmem:[#allocation2 + $0x138] sm:$0xff] %vm462_vm0, %v4882_v29  ;;  %v4960_v38 = vld [vmem:[#allocation2 + $0xf8] sm:$0xff] }
 0x2c4   : > { %v5614_v62 = vrot.slane %v5613_v60, 2  ;;  %v5620_v51 = vmax.f32 %v5618_v22, %v5619_v24  ;;  %v5627_v17 = vmax.f32 %v5625_v7, %v5626_v54  ;;  %v5633_v34 = vrot.slane %v5632_v20, 4 }
 0x2c5   : > { %v5258_v11 = vcombine.high %v5256_v28, %v5256_v28  ;;  %v5668_v61 = vrot.slane %v5667_v55, 4  ;;  %v5674_v8 = vsel %vm5442_vm3, %v5257_v21, -inf  ;;  %v5681_v9 = vsel %vm5442_vm3, %v5256_v28, -inf  ;;  %v4962_v31 = vld [vmem:[#allocation2 + $0x110] sm:$0xff] }
 0x2c6   : > { %v5615_v46 = vmax.f32 %v5613_v60, %v5614_v62  ;;  %v5621_v35 = vrot.slane %v5620_v51, 2  ;;  %v5628_v57 = vrot.slane %v5627_v17, 2  ;;  %v5634_v19 = vmax.f32 %v5632_v20, %v5633_v34 }
 0x2c7   : > { %v5669_v58 = vmax.f32 %v5667_v55, %v5668_v61  ;;  %v5675_v43 = vrot.slane %v5674_v8, 4  ;;  %v5682_v42 = vrot.slane %v5681_v9, 4  ;;  %v5688_v49 = vsel %vm5442_vm3, %v5258_v11, -inf }
 0x2c8   : > { %v5616_v6 = vrot.slane %v5615_v46, 1  ;;  %v5622_v50 = vmax.f32 %v5620_v51, %v5621_v35  ;;  %v5629_v32 = vmax.f32 %v5627_v17, %v5628_v57  ;;  %v5635_v47 = vrot.slane %v5634_v19, 2 }
 0x2c9   : > { %v5670_v30 = vrot.slane %v5669_v58, 2  ;;  %v5676_v2 = vmax.f32 %v5674_v8, %v5675_v43  ;;  %v5683_v39 = vmax.f32 %v5681_v9, %v5682_v42  ;;  %v5689_v12 = vrot.slane %v5688_v49, 4  ;;  %v4961_v9 = vld [vmem:[#allocation2 + $0x108] sm:$0xff] }
 0x2ca   : > { %v5617_v5 = vmax.f32 %v5615_v46, %v5616_v6  ;;  %v5623_v33 = vrot.slane %v5622_v50, 1  ;;  %v5630_v36 = vrot.slane %v5629_v32, 1  ;;  %v5636_v3 = vmax.f32 %v5634_v19, %v5635_v47 }
 0x2cb   : > { %v5671_v16 = vmax.f32 %v5669_v58, %v5670_v30  ;;  %v5677_v13 = vrot.slane %v5676_v2, 2  ;;  %v5684_v45 = vrot.slane %v5683_v39, 2  ;;  %v5690_v52 = vmax.f32 %v5688_v49, %v5689_v12 }
 0x2cc   : > { %v5624_v10 = vmax.f32 %v5622_v50, %v5623_v33  ;;  %v5631_v1 = vmax.f32 %v5629_v32, %v5630_v36  ;;  %v5637_v14 = vrot.slane %v5636_v3, 1  ;;  %v5029_v63 = vmax.f32 %v4997_v59, 0.0 }
 0x2cd   : > { %v5672_v4 = vrot.slane %v5671_v16, 1  ;;  %v5678_v25 = vmax.f32 %v5676_v2, %v5677_v13  ;;  %v5685_v18 = vmax.f32 %v5683_v39, %v5684_v45  ;;  %v5691_v41 = vrot.slane %v5690_v52, 2  ;;  %v4963_v2 = vld [vmem:[#allocation2 + $0x120] sm:$0xff] }
 0x2ce   : > { %v5638_v37 = vmax.f32 %v5636_v3, %v5637_v14  ;;  %v5983_v22 = vsel %vm5955_vm4, %v5624_v10, %v5617_v5  ;;  %v5070_v7 = vsel %vm462_vm0, %v5029_v63, -inf  ;;  %v4999_v48 = vadd.f32 %v9465_v44, %v4960_v38 }
 0x2cf   : > { %v5984_v29 = vsel %vm5957_vm5, %v5631_v1, %v5983_v22  ;;  %v5673_v60 = vmax.f32 %v5671_v16, %v5672_v4  ;;  %v5679_v24 = vrot.slane %v5678_v25, 1  ;;  %v5686_v54 = vrot.slane %v5685_v18, 1 }
 0x2d0   : > { %v5985_v28 = vsel %vm5959_vm6, %v5638_v37, %v5984_v29  ;;  %v5692_v20 = vmax.f32 %v5690_v52, %v5691_v41  ;;  %v5071_v21 = vmax.f32 %v9525_v27, %v5070_v7  ;;  %v5031_v55 = vmax.f32 %v4999_v48, 0.0 }
 0x2d1   : > { %v5986_v59 = vsel %vm5961_vm7, %v9475_v56, %v5985_v28  ;;  %v5680_v62 = vmax.f32 %v5678_v25, %v5679_v24  ;;  %v5687_v51 = vmax.f32 %v5685_v18, %v5686_v54  ;;  %v5001_v17 = vadd.f32 %v9465_v44, %v4962_v31 }
 0x2d2   : > { %v5987_v34 = vsel %vm5963_vm8, %v9489_v0, %v5986_v59  ;;  %v5693_v11 = vrot.slane %v5692_v20, 1  ;;  %v5259_v61 = vcombine.high %v5071_v21, %v5071_v21  ;;  %v5266_v8 = vrot.slane %v5071_v21, %v9096_v53 }
 0x2d3   : > { %v5988_v27 = vsel %vm5965_vm9, %v9492_v23, %v5987_v34  ;;  %v5990_v46 = vsel %vm5955_vm4, %v5680_v62, %v5673_v60  ;;  %v5072_v56 = vsel %vm462_vm0, %v5030_v15, -inf  ;;  %v5033_v35 = vmax.f32 %v5001_v17, 0.0 }
 0x2d4   : > { %v5989_v57 = vsel %vm5967_vm10, %v9512_v40, %v5988_v27  ;;  %v5694_v19 = vmax.f32 %v5692_v20, %v5693_v11  ;;  %v5991_v0 = vsel %vm5957_vm5, %v5687_v51, %v5990_v46  ;;  %v5273_v58 = vrot.slane %v5259_v61, %v9096_v53 }
 0x2d5   : > { %6029 = vst.msk [vmem:[%s9205_s12 + $0x18] sm:$0xff] %vm462_vm0, %v5989_v57  ;;  %v5274_v43 = vcombine.high %v5266_v8, %v5266_v8  ;;  %v5695_v23 = vsel %vm5442_vm3, %v5266_v8, -inf  ;;  %v5076_v42 = vsel %vm462_vm0, %v5033_v35, -inf  ;;  %v5000_v26 = vadd.f32 %v9465_v44, %v4961_v9 }
 0x2d6   : > { %v5275_v49 = vcombine.high %v5273_v58, %v5273_v58  ;;  %v5696_v15 = vrot.slane %v5695_v23, 4  ;;  %v5709_v6 = vsel %vm5442_vm3, %v5273_v58, -inf  ;;  %v5075_v40 = vsel %vm462_vm0, %v5031_v55, -inf }
 0x2d7   : > { %v5702_v50 = vsel %vm5442_vm3, %v5274_v43, -inf  ;;  %v5710_v32 = vrot.slane %v5709_v6, 4  ;;  %v5077_v47 = vmax.f32 %v5075_v40, %v5076_v42  ;;  %v5032_v30 = vmax.f32 %v5000_v26, 0.0 }
 0x2d8   : > { %v5697_v39 = vmax.f32 %v5695_v23, %v5696_v15  ;;  %v5703_v12 = vrot.slane %v5702_v50, 4  ;;  %v5716_v5 = vsel %vm5442_vm3, %v5275_v49, -inf  ;;  %v5992_v33 = vsel %vm5959_vm6, %v5694_v19, %v5991_v0 }
 0x2d9   : > { %v5711_v36 = vmax.f32 %v5709_v6, %v5710_v32  ;;  %v5717_v3 = vrot.slane %v5716_v5, 4  ;;  %v5293_v16 = vcombine.high %v5077_v47, %v5077_v47  ;;  %v5300_v13 = vrot.slane %v5077_v47, %v9096_v53 }
 0x2da   : > { %v5698_v45 = vrot.slane %v5697_v39, 2  ;;  %v5704_v52 = vmax.f32 %v5702_v50, %v5703_v12  ;;  %v5073_v38 = vsel %vm462_vm0, %v5032_v30, -inf  ;;  %v9578_v10 = vadd.f32 %v9465_v44, %v4963_v2 }
 0x2db   : > { %v5712_v1 = vrot.slane %v5711_v36, 2  ;;  %v5718_v14 = vmax.f32 %v5716_v5, %v5717_v3  ;;  %v5307_v63 = vrot.slane %v5293_v16, %v9096_v53  ;;  %v5308_v4 = vcombine.high %v5300_v13, %v5300_v13 }
 0x2dc   : > { %v5699_v25 = vmax.f32 %v5697_v39, %v5698_v45  ;;  %v5705_v18 = vrot.slane %v5704_v52, 2  ;;  %v5751_v41 = vsel %vm5442_vm3, %v5300_v13, -inf  ;;  %v5074_v37 = vmax.f32 %v5072_v56, %v5073_v38  ;;  %v4832_v45 = vld [vmem:[#allocation2 + $0x128] sm:$0xff] }
 0x2dd   : > { %v5713_v22 = vmax.f32 %v5711_v36, %v5712_v1  ;;  %v5719_v7 = vrot.slane %v5718_v14, 2  ;;  %v5309_v48 = vcombine.high %v5307_v63, %v5307_v63  ;;  %v5752_v31 = vrot.slane %v5751_v41, 4 }
 0x2de   : > { %v5700_v29 = vrot.slane %v5699_v25, 1  ;;  %v5706_v60 = vmax.f32 %v5704_v52, %v5705_v18  ;;  %v5758_v24 = vsel %vm5442_vm3, %v5308_v4, -inf  ;;  %v5765_v54 = vsel %vm5442_vm3, %v5307_v63, -inf  ;;  %v4837_v63 = vld [vmem:[#allocation2 + $0x150] sm:$0xff] }
 0x2df   : > { %v5714_v28 = vrot.slane %v5713_v22, 1  ;;  %v5720_v20 = vmax.f32 %v5718_v14, %v5719_v7  ;;  %v5753_v21 = vmax.f32 %v5751_v41, %v5752_v31  ;;  %v5759_v55 = vrot.slane %v5758_v24, 4  ;;  %v4835_v41 = vld [vmem:[#allocation2 + $0x140] sm:$0xff]  ;;  %v9898_v31 = vld [vmem:[#allocation9_spill] sm:$0xff] }
 0x2e0   : > { %v5701_v59 = vmax.f32 %v5699_v25, %v5700_v29  ;;  %v5707_v62 = vrot.slane %v5706_v60, 1  ;;  %v5766_v51 = vrot.slane %v5765_v54, 4  ;;  %v5772_v17 = vsel %vm5442_vm3, %v5309_v48, -inf }
 0x2e1   : > { %v5715_v34 = vmax.f32 %v5713_v22, %v5714_v28  ;;  %v5721_v11 = vrot.slane %v5720_v20, 1  ;;  %v5754_v61 = vrot.slane %v5753_v21, 2  ;;  %v5760_v8 = vmax.f32 %v5758_v24, %v5759_v55  ;;  %v4841_v55 = vld [vmem:[#allocation2 + $0x170] sm:$0xff] }
 0x2e2   : > { %v5708_v9 = vmax.f32 %v5706_v60, %v5707_v62  ;;  %v5993_v27 = vsel %vm5961_vm7, %v5701_v59, %v5992_v33  ;;  %v5767_v46 = vmax.f32 %v5765_v54, %v5766_v51  ;;  %v5773_v56 = vrot.slane %v5772_v17, 4  ;;  %v4965_v33 = vld [vmem:[#allocation2 + $0x138] sm:$0xff]  ;;  %v4836_v60 = vld [vmem:[#allocation2 + $0x148] sm:$0xff]  ;;  %v9900_v51 = vld [vmem:[#allocation11_spill] sm:$0xff] }
 0x2e3   : > { %v5722_v35 = vmax.f32 %v5720_v20, %v5721_v11  ;;  %v5755_v57 = vmax.f32 %v5753_v21, %v5754_v61  ;;  %v5761_v19 = vrot.slane %v5760_v8, 2  ;;  %v5276_v0 = vcombine.high %v5074_v37, %v5074_v37  ;;  %v9899_v20 = vld [vmem:[#allocation8_spill] sm:$0xff]  ;;  %v4839_v61 = vld [vmem:[#allocation2 + $0x160] sm:$0xff] }
 0x2e4   : > { %v5994_v58 = vsel %vm5963_vm8, %v5708_v9, %v5993_v27  ;;  %v5768_v43 = vrot.slane %v5767_v46, 2  ;;  %v5774_v23 = vmax.f32 %v5772_v17, %v5773_v56  ;;  %v5283_v42 = vrot.slane %v5074_v37, %v9096_v53  ;;  %v4838_v37 = vld [vmem:[#allocation2 + $0x158] sm:$0xff] }
 0x2e5   : > { %v5995_v26 = vsel %vm5965_vm9, %v5715_v34, %v5994_v58  ;;  %v5756_v49 = vrot.slane %v5755_v57, 1  ;;  %v5290_v15 = vrot.slane %v5276_v0, %v9096_v53  ;;  %v5762_v40 = vmax.f32 %v5760_v8, %v5761_v19  ;;  %v9901_v34 = vld [vmem:[#allocation10_spill] sm:$0xff]  ;;  %v9903_v58 = vld [vmem:[#allocation12_spill] sm:$0xff] }
 0x2e6   : > { %v5996_v6 = vsel %vm5967_vm10, %v5722_v35, %v5995_v26  ;;  %v9591_v50 = vmax.f32 %v5767_v46, %v5768_v43  ;;  %v5291_v32 = vcombine.high %v5283_v42, %v5283_v42  ;;  %v5775_v47 = vrot.slane %v5774_v23, 2  ;;  %v4842_v8 = vld [vmem:[#allocation2 + $0x178] sm:$0xff] }
 0x2e7   : > { %6030 = vst.msk [vmem:[%s9205_s12 + $0x20] sm:$0xff] %vm462_vm0, %v5996_v6  ;;  %v5292_v30 = vcombine.high %v5290_v15, %v5290_v15  ;;  %v5723_v2 = vsel %vm5442_vm3, %v5283_v42, -inf  ;;  %v5034_v5 = vmax.f32 %v9578_v10, 0.0  ;;  %v9598_v36 = vmax.f32 %v5755_v57, %v5756_v49  ;;  %v9902_v56 = vld [vmem:[#allocation14_spill] sm:$0xff]  ;;  %v9904_v49 = vld [vmem:[#allocation15_spill] sm:$0xff]  ;;  %v9905_v6 = vld [vmem:[#allocation13_spill] sm:$0xff] }
 0x2e8   : > { %v5724_v39 = vrot.slane %v5723_v2, 4  ;;  %v5730_v12 = vsel %vm5442_vm3, %v5291_v32, -inf  ;;  %v5737_v16 = vsel %vm5442_vm3, %v5290_v15, -inf  ;;  %v5763_v52 = vrot.slane %v5762_v40, 1 }
 0x2e9   : > { %v5731_v3 = vrot.slane %v5730_v12, 4  ;;  %v5744_v13 = vsel %vm5442_vm3, %v5292_v30, -inf  ;;  %v5770_v38 = vrot.slane %v9591_v50, 1  ;;  %v5738_v14 = vrot.slane %v5737_v16, 4 }
 0x2ea   : > { %v5725_v1 = vmax.f32 %v5723_v2, %v5724_v39  ;;  %v9603_v4 = vmax.f32 %v5774_v23, %v5775_v47  ;;  %v5745_v18 = vrot.slane %v5744_v13, 4  ;;  %v5004_v10 = vadd.f32 %v9465_v44, %v4965_v33  ;;  %v4840_v23 = vld [vmem:[#allocation2 + $0x168] sm:$0xff] }
 0x2eb   : > { %v5732_v25 = vmax.f32 %v5730_v12, %v5731_v3  ;;  %v5739_v7 = vmax.f32 %v5737_v16, %v5738_v14  ;;  %v5078_v48 = vsel %vm462_vm0, %v5034_v5, -inf  ;;  %v4880_v29 = vadd.f32 %v4832_v45, %v9898_v31  ;;  %v9906_v3 = vld [vmem:[#allocation16_spill] sm:$0xff] }
 0x2ec   : > { %v5726_v22 = vrot.slane %v5725_v1, 2  ;;  %v5746_v54 = vmax.f32 %v5744_v13, %v5745_v18  ;;  %v5036_v28 = vmax.f32 %v5004_v10, 0.0  ;;  %v4885_v21 = vadd.f32 %v9899_v20, %v4837_v63 }
 0x2ed   : > { %v5733_v24 = vrot.slane %v5732_v25, 2  ;;  %v5740_v62 = vrot.slane %v5739_v7, 2  ;;  %4928 = vst.msk [vmem:[#allocation2 + $0x128] sm:$0xff] %vm462_vm0, %v4880_v29  ;;  %v4883_v17 = vadd.f32 %v4835_v41, %v9900_v51  ;;  %v4886_v11 = vadd.f32 %v9901_v34, %v4838_v37 }
 0x2ee   : > { %v5727_v59 = vmax.f32 %v5725_v1, %v5726_v22  ;;  %v5747_v27 = vrot.slane %v5746_v54, 2  ;;  %v5079_v46 = vsel %vm462_vm0, %v5036_v28, -inf  ;;  %4933 = vst.msk [vmem:[#allocation2 + $0x150] sm:$0xff] %vm462_vm0, %v4885_v21  ;;  %v4884_v35 = vadd.f32 %v4836_v60, %v9902_v56 }
 0x2ef   : > { %v5734_v9 = vmax.f32 %v5732_v25, %v5733_v24  ;;  %v5741_v19 = vmax.f32 %v5739_v7, %v5740_v62  ;;  %v5080_v0 = vmax.f32 %v5078_v48, %v5079_v46  ;;  %4931 = vst.msk [vmem:[#allocation2 + $0x140] sm:$0xff] %vm462_vm0, %v4883_v17  ;;  %4934 = vst.msk [vmem:[#allocation2 + $0x158] sm:$0xff] %vm462_vm0, %v4886_v11 }
 0x2f0   : > { %v5728_v57 = vrot.slane %v5727_v59, 1  ;;  %v4889_v43 = vadd.f32 %v9903_v58, %v4841_v55  ;;  %v5748_v26 = vmax.f32 %v5746_v54, %v5747_v27  ;;  %4932 = vst.msk [vmem:[#allocation2 + $0x148] sm:$0xff] %vm462_vm0, %v4884_v35  ;;  %v4887_v15 = vadd.f32 %v4839_v61, %v9904_v49 }
 0x2f1   : > { %v5735_v42 = vrot.slane %v5734_v9, 1  ;;  %v4890_v32 = vadd.f32 %v9905_v6, %v4842_v8  ;;  %v5764_v47 = vmax.f32 %v5762_v40, %v5763_v52  ;;  %v5742_v30 = vrot.slane %v5741_v19, 1 }
 0x2f2   : > { %v5310_v2 = vcombine.high %v5080_v0, %v5080_v0  ;;  %v5317_v39 = vrot.slane %v5080_v0, %v9096_v53  ;;  %4937 = vst.msk [vmem:[#allocation2 + $0x170] sm:$0xff] %vm462_vm0, %v4889_v43  ;;  %v5729_v12 = vmax.f32 %v5727_v59, %v5728_v57  ;;  %v5749_v33 = vrot.slane %v5748_v26, 1  ;;  %4935 = vst.msk [vmem:[#allocation2 + $0x160] sm:$0xff] %vm462_vm0, %v4887_v15 }
 0x2f3   : > { %v5736_v5 = vmax.f32 %v5734_v9, %v5735_v42  ;;  %4938 = vst.msk [vmem:[#allocation2 + $0x178] sm:$0xff] %vm462_vm0, %v4890_v32  ;;  %v4888_v16 = vadd.f32 %v4840_v23, %v9906_v3  ;;  %v5743_v13 = vmax.f32 %v5741_v19, %v5742_v30  ;;  %v5777_v52 = vrot.slane %v9603_v4, 1 }
 0x2f4   : > { %v5324_v45 = vrot.slane %v5310_v2, %v9096_v53  ;;  %v5325_v1 = vcombine.high %v5317_v39, %v5317_v39  ;;  %v5779_v40 = vsel %vm5442_vm3, %v5317_v39, -inf  ;;  %v5750_v14 = vmax.f32 %v5748_v26, %v5749_v33  ;;  %v4964_v18 = vld [vmem:[#allocation2 + $0x128] sm:$0xff] }
 0x2f5   : > { %v5997_v63 = vsel %vm5955_vm4, %v5736_v5, %v5729_v12  ;;  %v5780_v25 = vrot.slane %v5779_v40, 4  ;;  %4936 = vst.msk [vmem:[#allocation2 + $0x168] sm:$0xff] %vm462_vm0, %v4888_v16  ;;  %v5771_v60 = vmax.f32 %v9591_v50, %v5770_v38  ;;  %v5003_v28 = vadd.f32 %v9465_v44, %v4964_v18  ;;  %v4967_v50 = vld [vmem:[#allocation2 + $0x150] sm:$0xff] }
 0x2f6   : > { %v5998_v10 = vsel %vm5957_vm5, %v5743_v13, %v5997_v63  ;;  %v5326_v41 = vcombine.high %v5324_v45, %v5324_v45  ;;  %v5786_v37 = vsel %vm5442_vm3, %v5325_v1, -inf  ;;  %v5793_v22 = vsel %vm5442_vm3, %v5324_v45, -inf  ;;  %v4966_v62 = vld [vmem:[#allocation2 + $0x140] sm:$0xff]  ;;  %v4968_v38 = vld [vmem:[#allocation2 + $0x158] sm:$0xff] }
 0x2f7   : > { %v5999_v7 = vsel %vm5959_vm6, %v5750_v14, %v5998_v10  ;;  %v5781_v48 = vmax.f32 %v5779_v40, %v5780_v25  ;;  %v5787_v31 = vrot.slane %v5786_v37, 4  ;;  %v5794_v29 = vrot.slane %v5793_v22, 4 }
 0x2f8   : > { %v6000_v24 = vsel %vm5961_vm7, %v9598_v36, %v5999_v7  ;;  %v5800_v54 = vsel %vm5442_vm3, %v5326_v41, -inf  ;;  %v5778_v20 = vmax.f32 %v9603_v4, %v5777_v52  ;;  %v5035_v8 = vmax.f32 %v5003_v28, 0.0 }
 0x2f9   : > { %v6001_v21 = vsel %vm5963_vm8, %v5764_v47, %v6000_v24  ;;  %v5788_v55 = vmax.f32 %v5786_v37, %v5787_v31  ;;  %v5795_v59 = vmax.f32 %v5793_v22, %v5794_v29  ;;  %v5782_v17 = vrot.slane %v5781_v48, 2  ;;  %v4970_v9 = vld [vmem:[#allocation2 + $0x170] sm:$0xff] }
 0x2fa   : > { %v6002_v51 = vsel %vm5965_vm9, %v5771_v60, %v6001_v21  ;;  %v5801_v34 = vrot.slane %v5800_v54, 4  ;;  %v5005_v27 = vadd.f32 %v9465_v44, %v4966_v62  ;;  %v5006_v56 = vadd.f32 %v9465_v44, %v4967_v50 }
 0x2fb   : > { %v6003_v36 = vsel %vm5967_vm10, %v5778_v20, %v6002_v51  ;;  %v5789_v11 = vrot.slane %v5788_v55, 2  ;;  %v5796_v61 = vrot.slane %v5795_v59, 2  ;;  %v5007_v35 = vadd.f32 %v9465_v44, %v4968_v38 }
 0x2fc   : > { %6031 = vst.msk [vmem:[%s9205_s12 + $0x28] sm:$0xff] %vm462_vm0, %v6003_v36  ;;  %v5802_v4 = vmax.f32 %v5800_v54, %v5801_v34  ;;  %v4969_v57 = vld [vmem:[#allocation2 + $0x168] sm:$0xff]  ;;  %v5783_v19 = vmax.f32 %v5781_v48, %v5782_v17  ;;  %v5037_v58 = vmax.f32 %v5005_v27, 0.0  ;;  %v5009_v43 = vadd.f32 %v9465_v44, %v4970_v9 }
 0x2fd   : > { %v5790_v46 = vmax.f32 %v5788_v55, %v5789_v11  ;;  %v5797_v0 = vmax.f32 %v5795_v59, %v5796_v61  ;;  %v5081_v42 = vsel %vm462_vm0, %v5035_v8, -inf  ;;  %v5039_v26 = vmax.f32 %v5007_v35, 0.0 }
 0x2fe   : > { %v5803_v23 = vrot.slane %v5802_v4, 2  ;;  %v5082_v15 = vsel %vm462_vm0, %v5037_v58, -inf  ;;  %v5041_v6 = vmax.f32 %v5009_v43, 0.0  ;;  %v5008_v32 = vadd.f32 %v9465_v44, %v4969_v57 }
 0x2ff   : > { %v5791_v49 = vrot.slane %v5790_v46, 1  ;;  %v5038_v47 = vmax.f32 %v5006_v56, 0.0  ;;  %v5083_v30 = vmax.f32 %v5081_v42, %v5082_v15  ;;  %v5784_v2 = vrot.slane %v5783_v19, 1 }
 0x300   : > { %v5798_v39 = vrot.slane %v5797_v0, 1  ;;  %v5087_v12 = vsel %vm462_vm0, %v5039_v26, -inf  ;;  %v5088_v5 = vsel %vm462_vm0, %v5041_v6, -inf  ;;  %v5804_v45 = vmax.f32 %v5802_v4, %v5803_v23 }
 0x301   : > { %v5327_v33 = vcombine.high %v5083_v30, %v5083_v30  ;;  %v5334_v3 = vrot.slane %v5083_v30, %v9096_v53  ;;  %v5089_v16 = vmax.f32 %v5087_v12, %v5088_v5  ;;  %v5792_v13 = vmax.f32 %v5790_v46, %v5791_v49 }
 0x302   : > { %v5040_v1 = vmax.f32 %v5008_v32, 0.0  ;;  %v5785_v63 = vmax.f32 %v5783_v19, %v5784_v2  ;;  %v5799_v25 = vmax.f32 %v5797_v0, %v5798_v39  ;;  %v5084_v18 = vsel %vm462_vm0, %v5038_v47, -inf }
 0x303   : > { %v5341_v40 = vrot.slane %v5327_v33, %v9096_v53  ;;  %v5342_v52 = vcombine.high %v5334_v3, %v5334_v3  ;;  %v5807_v44 = vsel %vm5442_vm3, %v5334_v3, -inf  ;;  %v5361_v14 = vcombine.high %v5089_v16, %v5089_v16 }
 0x304   : > { %v5808_v10 = vrot.slane %v5807_v44, 4  ;;  %v5368_v7 = vrot.slane %v5089_v16, %v9096_v53  ;;  %v5085_v60 = vsel %vm462_vm0, %v5040_v1, -inf  ;;  %v5805_v24 = vrot.slane %v5804_v45, 1 }
 0x305   : > { %v5343_v41 = vcombine.high %v5341_v40, %v5341_v40  ;;  %v5814_v37 = vsel %vm5442_vm3, %v5342_v52, -inf  ;;  %v5821_v22 = vsel %vm5442_vm3, %v5341_v40, -inf  ;;  %v6004_v54 = vsel %vm5955_vm4, %v5792_v13, %v5785_v63 }
 0x306   : > { %v5809_v48 = vmax.f32 %v5807_v44, %v5808_v10  ;;  %v5815_v31 = vrot.slane %v5814_v37, 4  ;;  %v5822_v29 = vrot.slane %v5821_v22, 4  ;;  %v5375_v20 = vrot.slane %v5361_v14, %v9096_v53 }
 0x307   : > { %v5828_v28 = vsel %vm5442_vm3, %v5343_v41, -inf  ;;  %v5376_v51 = vcombine.high %v5368_v7, %v5368_v7  ;;  %v5086_v17 = vmax.f32 %v5084_v18, %v5085_v60  ;;  %v5806_v11 = vmax.f32 %v5804_v45, %v5805_v24 }
 0x308   : > { %v5810_v21 = vrot.slane %v5809_v48, 2  ;;  %v5816_v55 = vmax.f32 %v5814_v37, %v5815_v31  ;;  %v5823_v59 = vmax.f32 %v5821_v22, %v5822_v29  ;;  %v5829_v62 = vrot.slane %v5828_v28, 4 }
 0x309   : > { %v6005_v61 = vsel %vm5957_vm5, %v5799_v25, %v6004_v54  ;;  %v5377_v8 = vcombine.high %v5375_v20, %v5375_v20  ;;  %v5863_v9 = vsel %vm5442_vm3, %v5368_v7, -inf  ;;  %v5870_v35 = vsel %vm5442_vm3, %v5376_v51, -inf }
 0x30a   : > { %v5811_v34 = vmax.f32 %v5809_v48, %v5810_v21  ;;  %v5817_v50 = vrot.slane %v5816_v55, 2  ;;  %v5824_v38 = vrot.slane %v5823_v59, 2  ;;  %v5830_v36 = vmax.f32 %v5828_v28, %v5829_v62 }
 0x30b   : > { %v5877_v57 = vsel %vm5442_vm3, %v5375_v20, -inf  ;;  %v5344_v19 = vcombine.high %v5086_v17, %v5086_v17  ;;  %v6006_v42 = vsel %vm5959_vm6, %v5806_v11, %v6005_v61  ;;  %v5864_v26 = vrot.slane %v5863_v9, 4 }
 0x30c   : > { %v5812_v4 = vrot.slane %v5811_v34, 1  ;;  %v5818_v27 = vmax.f32 %v5816_v55, %v5817_v50  ;;  %v5825_v46 = vmax.f32 %v5823_v59, %v5824_v38  ;;  %v5831_v56 = vrot.slane %v5830_v36, 2 }
 0x30d   : > { %v5884_v49 = vsel %vm5442_vm3, %v5377_v8, -inf  ;;  %v5871_v30 = vrot.slane %v5870_v35, 4  ;;  %v5878_v2 = vrot.slane %v5877_v57, 4  ;;  %v5351_v5 = vrot.slane %v5086_v17, %v9096_v53 }
 0x30e   : > { %v5813_v0 = vmax.f32 %v5811_v34, %v5812_v4  ;;  %v5819_v58 = vrot.slane %v5818_v27, 1  ;;  %v5826_v43 = vrot.slane %v5825_v46, 1  ;;  %v5832_v23 = vmax.f32 %v5830_v36, %v5831_v56 }
 0x30f   : > { %v5358_v33 = vrot.slane %v5344_v19, %v9096_v53  ;;  %v5885_v16 = vrot.slane %v5884_v49, 4  ;;  %v5865_v45 = vmax.f32 %v5863_v9, %v5864_v26  ;;  %v5359_v1 = vcombine.high %v5351_v5, %v5351_v5 }
 0x310   : > { %v5820_v15 = vmax.f32 %v5818_v27, %v5819_v58  ;;  %v5827_v6 = vmax.f32 %v5825_v46, %v5826_v43  ;;  %v5833_v32 = vrot.slane %v5832_v23, 1  ;;  %v6007_v47 = vsel %vm5961_vm7, %v5813_v0, %v6006_v42 }
 0x311   : > { %v5360_v40 = vcombine.high %v5358_v33, %v5358_v33  ;;  %v5872_v52 = vmax.f32 %v5870_v35, %v5871_v30  ;;  %v5835_v44 = vsel %vm5442_vm3, %v5351_v5, -inf  ;;  %v5849_v14 = vsel %vm5442_vm3, %v5358_v33, -inf }
 0x312   : > { %v5834_v39 = vmax.f32 %v5832_v23, %v5833_v32  ;;  %v6008_v12 = vsel %vm5963_vm8, %v5820_v15, %v6007_v47  ;;  %v5879_v63 = vmax.f32 %v5877_v57, %v5878_v2  ;;  %v5836_v25 = vrot.slane %v5835_v44, 4 }
 0x313   : > { %v6009_v3 = vsel %vm5965_vm9, %v5827_v6, %v6008_v12  ;;  %v5842_v18 = vsel %vm5442_vm3, %v5359_v1, -inf  ;;  %v5850_v53 = vrot.slane %v5849_v14, 4  ;;  %v5886_v10 = vmax.f32 %v5884_v49, %v5885_v16 }
 0x314   : > { %v6010_v13 = vsel %vm5967_vm10, %v5834_v39, %v6009_v3  ;;  %v5843_v41 = vrot.slane %v5842_v18, 4  ;;  %v5856_v37 = vsel %vm5442_vm3, %v5360_v40, -inf  ;;  %v5866_v22 = vrot.slane %v5865_v45, 2 }
 0x315   : > { %6032 = vst.msk [vmem:[%s9205_s12 + $0x30] sm:$0xff] %vm462_vm0, %v6010_v13  ;;  %v5837_v7 = vmax.f32 %v5835_v44, %v5836_v25  ;;  %v5851_v48 = vmax.f32 %v5849_v14, %v5850_v53  ;;  %v5857_v31 = vrot.slane %v5856_v37, 4  ;;  %v5873_v29 = vrot.slane %v5872_v52, 2 }
 0x316   : > { %v5844_v60 = vmax.f32 %v5842_v18, %v5843_v41  ;;  %v5880_v24 = vrot.slane %v5879_v63, 2  ;;  %v5887_v21 = vrot.slane %v5886_v10, 2  ;;  %v5867_v59 = vmax.f32 %v5865_v45, %v5866_v22 }
 0x317   : > { %v5838_v54 = vrot.slane %v5837_v7, 2  ;;  %v5852_v28 = vrot.slane %v5851_v48, 2  ;;  %v5858_v20 = vmax.f32 %v5856_v37, %v5857_v31  ;;  %v5874_v34 = vmax.f32 %v5872_v52, %v5873_v29 }
 0x318   : > { %v5845_v55 = vrot.slane %v5844_v60, 2  ;;  %v5881_v38 = vmax.f32 %v5879_v63, %v5880_v24  ;;  %v5888_v8 = vmax.f32 %v5886_v10, %v5887_v21  ;;  %v5868_v4 = vrot.slane %v5867_v59, 1 }
 0x319   : > { %v5839_v62 = vmax.f32 %v5837_v7, %v5838_v54  ;;  %v5853_v51 = vmax.f32 %v5851_v48, %v5852_v28  ;;  %v5859_v17 = vrot.slane %v5858_v20, 2  ;;  %v5875_v56 = vrot.slane %v5874_v34, 1 }
 0x31a   : > { %v5846_v50 = vmax.f32 %v5844_v60, %v5845_v55  ;;  %v5882_v19 = vrot.slane %v5881_v38, 1  ;;  %v5889_v58 = vrot.slane %v5888_v8, 1  ;;  %v5869_v23 = vmax.f32 %v5867_v59, %v5868_v4 }
 0x31b   : > { %v5840_v36 = vrot.slane %v5839_v62, 1  ;;  %v5854_v11 = vrot.slane %v5853_v51, 1  ;;  %v5860_v61 = vmax.f32 %v5858_v20, %v5859_v17  ;;  %v5876_v26 = vmax.f32 %v5874_v34, %v5875_v56 }
 0x31c   : > { %v5847_v9 = vrot.slane %v5846_v50, 1  ;;  %v5883_v15 = vmax.f32 %v5881_v38, %v5882_v19  ;;  %v5890_v32 = vmax.f32 %v5888_v8, %v5889_v58 }
 0x31d   : > { %v5855_v27 = vmax.f32 %v5853_v51, %v5854_v11  ;;  %v5861_v46 = vrot.slane %v5860_v61, 1  ;;  %v5841_v35 = vmax.f32 %v5839_v62, %v5840_v36 }
 0x31e   : > { %v5848_v57 = vmax.f32 %v5846_v50, %v5847_v9 }
 0x31f   : > { %v5862_v0 = vmax.f32 %v5860_v61, %v5861_v46 }
 0x320   : > { %v6011_v43 = vsel %vm5955_vm4, %v5848_v57, %v5841_v35 }
 0x321   : > { %v6012_v42 = vsel %vm5957_vm5, %v5855_v27, %v6011_v43 }
 0x322   : > { %v6013_v49 = vsel %vm5959_vm6, %v5862_v0, %v6012_v42 }
 0x323   : > { %v6014_v6 = vsel %vm5961_vm7, %v5869_v23, %v6013_v49 }
 0x324   : > { %v6015_v47 = vsel %vm5963_vm8, %v5876_v26, %v6014_v6 }
 0x325   : > { %v6016_v30 = vsel %vm5965_vm9, %v5883_v15, %v6015_v47 }
 0x326   : > { %v6017_v2 = vsel %vm5967_vm10, %v5890_v32, %v6016_v30 }
 0x327   : > { %6033 = vst.msk [vmem:[%s9205_s12 + $0x38] sm:$0xff] %vm462_vm0, %v6017_v2 }
 0x328 PF: > { %s13_s14 = sadd.s32 1, %s7454_s14   ;;  %s9907_s12 = smov %s7450_s13 }
 0x329   : > { %p10_p5 = scmp.ge.s32.totalorder %s13_s14, 4   ;;  %s9908_s13 = smov %s9910_s15 }
 0x32b   :  { %12 = sbr.rel (!%p10_p5) target bundleno = 2 (0x2), region = 76 }

</bundles_post_ra>
